<compile_context>
chip_gen: v7x
topology: tpu7x:2x2x1
jax: 0.10.0
libtpu: 0.0.40
codegen_flags: <defaults>
</compile_context>

<pallas_src>
import functools

import jax
import jax.numpy as jnp
from jax import lax
from jax.experimental import pallas as pl
from jax.experimental.pallas import tpu as pltpu


_NBUF = 32   # embedding-row DMAs kept in flight (power of two)
_CHUNK = 8   # rows per fused LayerNorm chunk (sublane granularity)


def _bge_embed_kernel(ids_ref, word_hbm, pos_type_ref, gamma_ref, beta_ref,
                      out_ref, gathered, sem, *, eps, vocab, seq_len, seq_tile):
    """One grid step = one (sequence tile, batch row).

    ids_ref      : (B*S_pad,) int32 in SMEM (scalar-prefetched, flattened)
    word_hbm     : (V, D) word-embedding table, left in HBM (pl.ANY)
    pos_type_ref : (TS, D) f32 precombined position+token_type embeddings
    gamma_ref    : (1, D)  f32 LayerNorm weight
    beta_ref     : (1, D)  f32 LayerNorm bias
    out_ref      : (TS, D) output slab for this tile
    gathered     : (TS, D) VMEM scratch (word-table dtype) for gathered rows
    sem          : (_NBUF,) DMA semaphores (rolling slots)
    """
    st = pl.program_id(0)
    b = pl.program_id(1)
    base_id = b * seq_len + st * seq_tile

    nprime = min(_NBUF, seq_tile)       # rows primed before any compute
    n_chunks = seq_tile // _CHUNK
    ahead = nprime // _CHUNK            # prefetch distance, in chunks
    n_steady = max(n_chunks - ahead, 0)

    def read_tok(row):
        # SMEM scalar read; clamp so a bad id can never trigger an OOB HBM DMA
        # (PyTorch's nn.Embedding would raise instead of remapping).
        return jnp.clip(ids_ref[base_id + row], 0, vocab - 1)

    def row_copy(tok, row):
        return pltpu.make_async_copy(
            word_hbm.at[pl.ds(tok, 1), :],
            gathered.at[pl.ds(row, 1), :],
            sem.at[row & (_NBUF - 1)])

    # ---- prime: fill the DMA pipeline (straight-line, fully unrolled) ------
    for r in range(nprime):
        row_copy(read_tok(r), r).start()

    inv_d = jnp.float32(1.0 / out_ref.shape[-1])
    gamma = gamma_ref[...]
    beta = beta_ref[...]

    def compute_chunk(base):
        # base is a multiple of _CHUNK -> aligned, unmasked loads/stores.
        sl = pl.ds(base, _CHUNK)
        e = gathered[sl, :].astype(jnp.float32) + pos_type_ref[sl, :]
        mean = jnp.sum(e, axis=-1, keepdims=True) * inv_d
        d = e - mean
        var = jnp.sum(d * d, axis=-1, keepdims=True) * inv_d
        y = d * lax.rsqrt(var + eps)
        out_ref[sl, :] = (y * gamma + beta).astype(out_ref.dtype)

    def steady_chunk(c, carry):
        base = pl.multiple_of(c * _CHUNK, _CHUNK)
        # Hoist all SMEM scalar reads above the waits (.wait() breaks SMEM
        # sst->sld forwarding), then retire chunk c and immediately refill each
        # freed semaphore slot with its replacement row `nprime` rows ahead.
        wait_toks = [read_tok(base + j) for j in range(_CHUNK)]
        next_toks = [read_tok(base + nprime + j) for j in range(_CHUNK)]
        for j in range(_CHUNK):
            row_copy(wait_toks[j], base + j).wait()
            row_copy(next_toks[j], base + nprime + j).start()
        compute_chunk(base)   # LN overlapped with the in-flight DMAs
        return carry

    def drain_chunk(c, carry):
        base = pl.multiple_of(c * _CHUNK, _CHUNK)
        toks = [read_tok(base + j) for j in range(_CHUNK)]
        for j in range(_CHUNK):
            row_copy(toks[j], base + j).wait()
        compute_chunk(base)
        return carry

    if n_steady > 0:
        lax.fori_loop(0, n_steady, steady_chunk, 0,
                      unroll=min(4, n_steady))
    lax.fori_loop(n_steady, n_chunks, drain_chunk, 0,
                  unroll=min(4, n_chunks - n_steady))


def _round_up(x, m):
    return ((x + m - 1) // m) * m


def _pick_seq_tile(s_pad, batch, cap=512):
    """Largest multiple-of-8 divisor of s_pad not exceeding `cap`."""
    best = 8
    t = 8
    top = min(cap, s_pad)
    while t <= top:
        if s_pad % t == 0:
            best = t
        t += 8
    # v7x has 2 TensorCores: keep at least 2 grid steps when possible.
    if batch * (s_pad // best) < 2:
        for t in range(best - 8, 7, -8):
            if s_pad % t == 0 and batch * (s_pad // t) >= 2:
                best = t
                break
    return best


def bge_m3_embedding(input_ids, word_emb, pos_emb, type_emb, gamma, beta,
                     *, eps=1e-12, seq_tile=None, out_dtype=jnp.float32):
    B, S = input_ids.shape
    V, D = word_emb.shape
    P = pos_emb.shape[0]
    assert S <= P, "sequence length must not exceed position table size"

    # Pad the sequence so tiles satisfy the (8,128) constraint; padded rows are
    # computed on garbage (token 0, zero pos/type) and sliced off below.
    if seq_tile is None:
        S_pad = _round_up(S, _CHUNK)
        seq_tile = _pick_seq_tile(S_pad, B)
    else:
        assert seq_tile > 0 and seq_tile % _CHUNK == 0, \
            "seq_tile must be a positive multiple of 8"
        S_pad = _round_up(S, seq_tile)
    pad = S_pad - S

    ids = input_ids.astype(jnp.int32)
    if pad:
        ids = jnp.pad(ids, ((0, 0), (0, pad)))
    ids_flat = ids.reshape(-1)

    # Fold position + token-type-0 embeddings (token_type_ids default to zeros,
    # position_ids = arange(S), as in the PyTorch module) into one table.
    pos_type = (pos_emb[:S].astype(jnp.float32)
                + type_emb[0][None, :].astype(jnp.float32))
    if pad:
        pos_type = jnp.pad(pos_type, ((0, pad), (0, 0)))
    gamma2 = gamma.reshape(1, D).astype(jnp.float32)
    beta2 = beta.reshape(1, D).astype(jnp.float32)

    kernel = functools.partial(_bge_embed_kernel, eps=eps, vocab=V,
                               seq_len=S_pad, seq_tile=seq_tile)

    grid_spec = pltpu.PrefetchScalarGridSpec(
        num_scalar_prefetch=1,                       # flattened ids -> SMEM
        grid=(S_pad // seq_tile, B),                 # batch innermost: pos_type
        in_specs=[                                   # block reused across b.
            pl.BlockSpec(memory_space=pl.ANY),       # word table stays in HBM
            pl.BlockSpec((seq_tile, D), lambda st, b, ids: (st, 0)),
            pl.BlockSpec((1, D), lambda st, b, ids: (0, 0)),   # LN gamma
            pl.BlockSpec((1, D), lambda st, b, ids: (0, 0)),   # LN beta
        ],
        out_specs=pl.BlockSpec((None, seq_tile, D),
                               lambda st, b, ids: (b, st, 0)),
        scratch_shapes=[
            pltpu.VMEM((seq_tile, D), word_emb.dtype),   # gathered rows
            pltpu.SemaphoreType.DMA((_NBUF,)),
        ],
    )

    # Explicit VMEM budget: pos_type (2 bufs, f32) + out (2 bufs) + gathered
    # scratch, with ~2x headroom; clamp to v7x's 64 MiB physical VMEM.
    w_item = jnp.dtype(word_emb.dtype).itemsize
    o_item = jnp.dtype(out_dtype).itemsize
    tile_bytes = seq_tile * D * (2 * 4 + 2 * o_item + w_item)
    vmem_limit = int(min(64 * 1024 * 1024,
                         max(16 * 1024 * 1024, 2 * tile_bytes + (2 << 20))))

    out = pl.pallas_call(
        kernel,
        out_shape=jax.ShapeDtypeStruct((B, S_pad, D), out_dtype),
        grid_spec=grid_spec,
        compiler_params=pltpu.CompilerParams(
            dimension_semantics=("parallel", "parallel"),
            vmem_limit_bytes=vmem_limit),
    )(ids_flat, word_emb, pos_type, gamma2, beta2)

    if pad:
        out = out[:, :S, :]
    return out


def _reference(input_ids, word_emb, pos_emb, type_emb, gamma, beta, eps):
    B, S = input_ids.shape
    w = jnp.take(word_emb, input_ids, axis=0)                     # (B, S, D)
    p = pos_emb[None, :S, :]                                      # (1, S, D)
    t = jnp.broadcast_to(type_emb[0][None, None, :], w.shape)     # token_type_ids = 0
    e = (w + p + t).astype(jnp.float32)
    mean = jnp.mean(e, axis=-1, keepdims=True)
    var = jnp.mean((e - mean) ** 2, axis=-1, keepdims=True)
    return (e - mean) * lax.rsqrt(var + eps) * gamma + beta


if __name__ == "__main__":
    # Small deterministic config: word_size=64, embed_dim=128, position_size=96,
    # layer_norm_eps=1e-12; batch=2, seq=64.
    V, D, P = 64, 128, 96
    B, S = 2, 64
    eps = 1e-12

    key = jax.random.PRNGKey(0)
    k_ids, k_word, k_pos, k_type = jax.random.split(key, 4)

    input_ids = jax.random.randint(k_ids, (B, S), 0, V, dtype=jnp.int32)
    word_emb = jax.random.normal(k_word, (V, D), dtype=jnp.float32) * 0.02
    pos_emb = jax.random.normal(k_pos, (P, D), dtype=jnp.float32) * 0.02
    type_emb = jax.random.normal(k_type, (1, D), dtype=jnp.float32) * 0.02
    gamma = jnp.ones((D,), dtype=jnp.float32)    # nn.LayerNorm default init
    beta = jnp.zeros((D,), dtype=jnp.float32)

    ref = _reference(input_ids, word_emb, pos_emb, type_emb, gamma, beta, eps)

    # Default tiling (64-row tile): exercises the 32-deep steady-state pipeline
    # and the fused per-chunk LayerNorm.
    out = bge_m3_embedding(input_ids, word_emb, pos_emb, type_emb, gamma, beta,
                           eps=eps)
    out = jax.block_until_ready(out)
    assert out.shape == (B, S, D)
    assert jnp.allclose(out, ref, atol=1e-5, rtol=1e-5)

    # Explicit small tile: multi-seq-tile grid, pos_type block reuse across the
    # inner batch axis, drain-only path.
    out2 = bge_m3_embedding(input_ids, word_emb, pos_emb, type_emb, gamma, beta,
                            eps=eps, seq_tile=16)
    out2 = jax.block_until_ready(out2)
    assert jnp.allclose(out2, ref, atol=1e-5, rtol=1e-5)

    print("KERNEL_OK")
</pallas_src>

<mosaic_0001>
module attributes {stable_mosaic.version = 11 : i64} {
  func.func @_bge_embed_kernel(%arg0: i32, %arg1: i32, %arg2: memref<128xi32, #tpu.memory_space<smem>>, %arg3: memref<64x128xf32, #tpu.memory_space<any>>, %arg4: memref<64x128xf32, #tpu.memory_space<vmem>>, %arg5: memref<1x128xf32, #tpu.memory_space<vmem>>, %arg6: memref<1x128xf32, #tpu.memory_space<vmem>>, %arg7: memref<1x64x128xf32, #tpu.memory_space<vmem>>, %arg8: memref<64x128xf32, #tpu.memory_space<vmem>>, %arg9: memref<32x!tpu.dma_semaphore, #tpu.memory_space<semaphore_mem>>) attributes {dimension_semantics = [#tpu.dimension_semantics<parallel>, #tpu.dimension_semantics<parallel>], iteration_bounds = array<i64: 1, 2>, scalar_prefetch = 1 : i64, scratch_operands = 2 : i64, tpu.core_type = #tpu.core_type<tc>, window_params = [{}, {transform_indices = @transform_1, window_bounds = array<i64: 64, 128>}, {pipeline_mode = #tpu.pipeline_mode<synchronous>, transform_indices = @transform_2, window_bounds = array<i64: 1, 128>}, {pipeline_mode = #tpu.pipeline_mode<synchronous>, transform_indices = @transform_3, window_bounds = array<i64: 1, 128>}, {transform_indices = @transform_4, window_bounds = array<i64: 1, 64, 128>}]} {
    %c64_i32 = arith.constant 64 : i32
    %0 = arith.muli %arg1, %c64_i32 : i32
    %c64_i32_0 = arith.constant 64 : i32
    %1 = arith.muli %arg0, %c64_i32_0 : i32
    %2 = arith.addi %0, %1 : i32
    %c0_i32 = arith.constant 0 : i32
    %3 = arith.addi %2, %c0_i32 : i32
    %4 = arith.index_cast %3 : i32 to index
    %5 = memref.load %arg2[%4] : memref<128xi32, #tpu.memory_space<smem>>
    %c0_i32_1 = arith.constant 0 : i32
    %c63_i32 = arith.constant 63 : i32
    %6 = arith.maxsi %c0_i32_1, %5 : i32
    %7 = arith.minsi %c63_i32, %6 : i32
    %c0_i32_2 = arith.constant 0 : i32
    %c0_i32_3 = arith.constant 0 : i32
    %8 = tpu.memref_slice %arg3[%7, %c0_i32_3] : memref<64x128xf32, #tpu.memory_space<any>> -> memref<1x128xf32, #tpu.memory_space<any>>
    %c0_i32_4 = arith.constant 0 : i32
    %c0_i32_5 = arith.constant 0 : i32
    %9 = tpu.memref_slice %arg8[%c0_i32_4, %c0_i32_5] : memref<64x128xf32, #tpu.memory_space<vmem>> -> memref<1x128xf32, #tpu.memory_space<vmem>>
    %10 = tpu.memref_slice %arg9[%c0_i32_2] : memref<32x!tpu.dma_semaphore, #tpu.memory_space<semaphore_mem>> -> memref<1x!tpu.dma_semaphore, #tpu.memory_space<semaphore_mem>>
    %11 = tpu.memref_squeeze %10 : memref<1x!tpu.dma_semaphore, #tpu.memory_space<semaphore_mem>> -> memref<!tpu.dma_semaphore, #tpu.memory_space<semaphore_mem>>
    tpu.enqueue_dma source(%8 : memref<1x128xf32, #tpu.memory_space<any>>) target(%9 : memref<1x128xf32, #tpu.memory_space<vmem>>) target_semaphore(%11 : memref<!tpu.dma_semaphore, #tpu.memory_space<semaphore_mem>>)
    %c1_i32 = arith.constant 1 : i32
    %12 = arith.addi %2, %c1_i32 : i32
    %13 = arith.index_cast %12 : i32 to index
    %14 = memref.load %arg2[%13] : memref<128xi32, #tpu.memory_space<smem>>
    %c0_i32_6 = arith.constant 0 : i32
    %c63_i32_7 = arith.constant 63 : i32
    %15 = arith.maxsi %c0_i32_6, %14 : i32
    %16 = arith.minsi %c63_i32_7, %15 : i32
    %c1_i32_8 = arith.constant 1 : i32
    %c0_i32_9 = arith.constant 0 : i32
    %17 = tpu.memref_slice %arg3[%16, %c0_i32_9] : memref<64x128xf32, #tpu.memory_space<any>> -> memref<1x128xf32, #tpu.memory_space<any>>
    %c1_i32_10 = arith.constant 1 : i32
    %c0_i32_11 = arith.constant 0 : i32
    %18 = tpu.memref_slice %arg8[%c1_i32_10, %c0_i32_11] : memref<64x128xf32, #tpu.memory_space<vmem>> -> memref<1x128xf32, #tpu.memory_space<vmem>>
    %19 = tpu.memref_slice %arg9[%c1_i32_8] : memref<32x!tpu.dma_semaphore, #tpu.memory_space<semaphore_mem>> -> memref<1x!tpu.dma_semaphore, #tpu.memory_space<semaphore_mem>>
    %20 = tpu.memref_squeeze %19 : memref<1x!tpu.dma_semaphore, #tpu.memory_space<semaphore_mem>> -> memref<!tpu.dma_semaphore, #tpu.memory_space<semaphore_mem>>
    tpu.enqueue_dma source(%17 : memref<1x128xf32, #tpu.memory_space<any>>) target(%18 : memref<1x128xf32, #tpu.memory_space<vmem>>) target_semaphore(%20 : memref<!tpu.dma_semaphore, #tpu.memory_space<semaphore_mem>>)
    %c2_i32 = arith.constant 2 : i32
    %21 = arith.addi %2, %c2_i32 : i32
    %22 = arith.index_cast %21 : i32 to index
    %23 = memref.load %arg2[%22] : memref<128xi32, #tpu.memory_space<smem>>
    %c0_i32_12 = arith.constant 0 : i32
    %c63_i32_13 = arith.constant 63 : i32
    %24 = arith.maxsi %c0_i32_12, %23 : i32
    %25 = arith.minsi %c63_i32_13, %24 : i32
    %c2_i32_14 = arith.constant 2 : i32
    %c0_i32_15 = arith.constant 0 : i32
    %26 = tpu.memref_slice %arg3[%25, %c0_i32_15] : memref<64x128xf32, #tpu.memory_space<any>> -> memref<1x128xf32, #tpu.memory_space<any>>
    %c2_i32_16 = arith.constant 2 : i32
    %c0_i32_17 = arith.constant 0 : i32
    %27 = tpu.memref_slice %arg8[%c2_i32_16, %c0_i32_17] : memref<64x128xf32, #tpu.memory_space<vmem>> -> memref<1x128xf32, #tpu.memory_space<vmem>>
    %28 = tpu.memref_slice %arg9[%c2_i32_14] : memref<32x!tpu.dma_semaphore, #tpu.memory_space<semaphore_mem>> -> memref<1x!tpu.dma_semaphore, #tpu.memory_space<semaphore_mem>>
    %29 = tpu.memref_squeeze %28 : memref<1x!tpu.dma_semaphore, #tpu.memory_space<semaphore_mem>> -> memref<!tpu.dma_semaphore, #tpu.memory_space<semaphore_mem>>
    tpu.enqueue_dma source(%26 : memref<1x128xf32, #tpu.memory_space<any>>) target(%27 : memref<1x128xf32, #tpu.memory_space<vmem>>) target_semaphore(%29 : memref<!tpu.dma_semaphore, #tpu.memory_space<semaphore_mem>>)
    %c3_i32 = arith.constant 3 : i32
    %30 = arith.addi %2, %c3_i32 : i32
    %31 = arith.index_cast %30 : i32 to index
    %32 = memref.load %arg2[%31] : memref<128xi32, #tpu.memory_space<smem>>
    %c0_i32_18 = arith.constant 0 : i32
    %c63_i32_19 = arith.constant 63 : i32
    %33 = arith.maxsi %c0_i32_18, %32 : i32
    %34 = arith.minsi %c63_i32_19, %33 : i32
    %c3_i32_20 = arith.constant 3 : i32
    %c0_i32_21 = arith.constant 0 : i32
    %35 = tpu.memref_slice %arg3[%34, %c0_i32_21] : memref<64x128xf32, #tpu.memory_space<any>> -> memref<1x128xf32, #tpu.memory_space<any>>
    %c3_i32_22 = arith.constant 3 : i32
    %c0_i32_23 = arith.constant 0 : i32
    %36 = tpu.memref_slice %arg8[%c3_i32_22, %c0_i32_23] : memref<64x128xf32, #tpu.memory_space<vmem>> -> memref<1x128xf32, #tpu.memory_space<vmem>>
    %37 = tpu.memref_slice %arg9[%c3_i32_20] : memref<32x!tpu.dma_semaphore, #tpu.memory_space<semaphore_mem>> -> memref<1x!tpu.dma_semaphore, #tpu.memory_space<semaphore_mem>>
    %38 = tpu.memref_squeeze %37 : memref<1x!tpu.dma_semaphore, #tpu.memory_space<semaphore_mem>> -> memref<!tpu.dma_semaphore, #tpu.memory_space<semaphore_mem>>
    tpu.enqueue_dma source(%35 : memref<1x128xf32, #tpu.memory_space<any>>) target(%36 : memref<1x128xf32, #tpu.memory_space<vmem>>) target_semaphore(%38 : memref<!tpu.dma_semaphore, #tpu.memory_space<semaphore_mem>>)
    %c4_i32 = arith.constant 4 : i32
    %39 = arith.addi %2, %c4_i32 : i32
    %40 = arith.index_cast %39 : i32 to index
    %41 = memref.load %arg2[%40] : memref<128xi32, #tpu.memory_space<smem>>
    %c0_i32_24 = arith.constant 0 : i32
    %c63_i32_25 = arith.constant 63 : i32
    %42 = arith.maxsi %c0_i32_24, %41 : i32
    %43 = arith.minsi %c63_i32_25, %42 : i32
    %c4_i32_26 = arith.constant 4 : i32
    %c0_i32_27 = arith.constant 0 : i32
    %44 = tpu.memref_slice %arg3[%43, %c0_i32_27] : memref<64x128xf32, #tpu.memory_space<any>> -> memref<1x128xf32, #tpu.memory_space<any>>
    %c4_i32_28 = arith.constant 4 : i32
    %c0_i32_29 = arith.constant 0 : i32
    %45 = tpu.memref_slice %arg8[%c4_i32_28, %c0_i32_29] : memref<64x128xf32, #tpu.memory_space<vmem>> -> memref<1x128xf32, #tpu.memory_space<vmem>>
    %46 = tpu.memref_slice %arg9[%c4_i32_26] : memref<32x!tpu.dma_semaphore, #tpu.memory_space<semaphore_mem>> -> memref<1x!tpu.dma_semaphore, #tpu.memory_space<semaphore_mem>>
    %47 = tpu.memref_squeeze %46 : memref<1x!tpu.dma_semaphore, #tpu.memory_space<semaphore_mem>> -> memref<!tpu.dma_semaphore, #tpu.memory_space<semaphore_mem>>
    tpu.enqueue_dma source(%44 : memref<1x128xf32, #tpu.memory_space<any>>) target(%45 : memref<1x128xf32, #tpu.memory_space<vmem>>) target_semaphore(%47 : memref<!tpu.dma_semaphore, #tpu.memory_space<semaphore_mem>>)
    %c5_i32 = arith.constant 5 : i32
    %48 = arith.addi %2, %c5_i32 : i32
    %49 = arith.index_cast %48 : i32 to index
    %50 = memref.load %arg2[%49] : memref<128xi32, #tpu.memory_space<smem>>
    %c0_i32_30 = arith.constant 0 : i32
    %c63_i32_31 = arith.constant 63 : i32
    %51 = arith.maxsi %c0_i32_30, %50 : i32
    %52 = arith.minsi %c63_i32_31, %51 : i32
    %c5_i32_32 = arith.constant 5 : i32
    %c0_i32_33 = arith.constant 0 : i32
    %53 = tpu.memref_slice %arg3[%52, %c0_i32_33] : memref<64x128xf32, #tpu.memory_space<any>> -> memref<1x128xf32, #tpu.memory_space<any>>
    %c5_i32_34 = arith.constant 5 : i32
    %c0_i32_35 = arith.constant 0 : i32
    %54 = tpu.memref_slice %arg8[%c5_i32_34, %c0_i32_35] : memref<64x128xf32, #tpu.memory_space<vmem>> -> memref<1x128xf32, #tpu.memory_space<vmem>>
    %55 = tpu.memref_slice %arg9[%c5_i32_32] : memref<32x!tpu.dma_semaphore, #tpu.memory_space<semaphore_mem>> -> memref<1x!tpu.dma_semaphore, #tpu.memory_space<semaphore_mem>>
    %56 = tpu.memref_squeeze %55 : memref<1x!tpu.dma_semaphore, #tpu.memory_space<semaphore_mem>> -> memref<!tpu.dma_semaphore, #tpu.memory_space<semaphore_mem>>
    tpu.enqueue_dma source(%53 : memref<1x128xf32, #tpu.memory_space<any>>) target(%54 : memref<1x128xf32, #tpu.memory_space<vmem>>) target_semaphore(%56 : memref<!tpu.dma_semaphore, #tpu.memory_space<semaphore_mem>>)
    %c6_i32 = arith.constant 6 : i32
    %57 = arith.addi %2, %c6_i32 : i32
    %58 = arith.index_cast %57 : i32 to index
    %59 = memref.load %arg2[%58] : memref<128xi32, #tpu.memory_space<smem>>
    %c0_i32_36 = arith.constant 0 : i32
    %c63_i32_37 = arith.constant 63 : i32
    %60 = arith.maxsi %c0_i32_36, %59 : i32
    %61 = arith.minsi %c63_i32_37, %60 : i32
    %c6_i32_38 = arith.constant 6 : i32
    %c0_i32_39 = arith.constant 0 : i32
    %62 = tpu.memref_slice %arg3[%61, %c0_i32_39] : memref<64x128xf32, #tpu.memory_space<any>> -> memref<1x128xf32, #tpu.memory_space<any>>
    %c6_i32_40 = arith.constant 6 : i32
    %c0_i32_41 = arith.constant 0 : i32
    %63 = tpu.memref_slice %arg8[%c6_i32_40, %c0_i32_41] : memref<64x128xf32, #tpu.memory_space<vmem>> -> memref<1x128xf32, #tpu.memory_space<vmem>>
    %64 = tpu.memref_slice %arg9[%c6_i32_38] : memref<32x!tpu.dma_semaphore, #tpu.memory_space<semaphore_mem>> -> memref<1x!tpu.dma_semaphore, #tpu.memory_space<semaphore_mem>>
    %65 = tpu.memref_squeeze %64 : memref<1x!tpu.dma_semaphore, #tpu.memory_space<semaphore_mem>> -> memref<!tpu.dma_semaphore, #tpu.memory_space<semaphore_mem>>
    tpu.enqueue_dma source(%62 : memref<1x128xf32, #tpu.memory_space<any>>) target(%63 : memref<1x128xf32, #tpu.memory_space<vmem>>) target_semaphore(%65 : memref<!tpu.dma_semaphore, #tpu.memory_space<semaphore_mem>>)
    %c7_i32 = arith.constant 7 : i32
    %66 = arith.addi %2, %c7_i32 : i32
    %67 = arith.index_cast %66 : i32 to index
    %68 = memref.load %arg2[%67] : memref<128xi32, #tpu.memory_space<smem>>
    %c0_i32_42 = arith.constant 0 : i32
    %c63_i32_43 = arith.constant 63 : i32
    %69 = arith.maxsi %c0_i32_42, %68 : i32
    %70 = arith.minsi %c63_i32_43, %69 : i32
    %c7_i32_44 = arith.constant 7 : i32
    %c0_i32_45 = arith.constant 0 : i32
    %71 = tpu.memref_slice %arg3[%70, %c0_i32_45] : memref<64x128xf32, #tpu.memory_space<any>> -> memref<1x128xf32, #tpu.memory_space<any>>
    %c7_i32_46 = arith.constant 7 : i32
    %c0_i32_47 = arith.constant 0 : i32
    %72 = tpu.memref_slice %arg8[%c7_i32_46, %c0_i32_47] : memref<64x128xf32, #tpu.memory_space<vmem>> -> memref<1x128xf32, #tpu.memory_space<vmem>>
    %73 = tpu.memref_slice %arg9[%c7_i32_44] : memref<32x!tpu.dma_semaphore, #tpu.memory_space<semaphore_mem>> -> memref<1x!tpu.dma_semaphore, #tpu.memory_space<semaphore_mem>>
    %74 = tpu.memref_squeeze %73 : memref<1x!tpu.dma_semaphore, #tpu.memory_space<semaphore_mem>> -> memref<!tpu.dma_semaphore, #tpu.memory_space<semaphore_mem>>
    tpu.enqueue_dma source(%71 : memref<1x128xf32, #tpu.memory_space<any>>) target(%72 : memref<1x128xf32, #tpu.memory_space<vmem>>) target_semaphore(%74 : memref<!tpu.dma_semaphore, #tpu.memory_space<semaphore_mem>>)
    %c8_i32 = arith.constant 8 : i32
    %75 = arith.addi %2, %c8_i32 : i32
    %76 = arith.index_cast %75 : i32 to index
    %77 = memref.load %arg2[%76] : memref<128xi32, #tpu.memory_space<smem>>
    %c0_i32_48 = arith.constant 0 : i32
    %c63_i32_49 = arith.constant 63 : i32
    %78 = arith.maxsi %c0_i32_48, %77 : i32
    %79 = arith.minsi %c63_i32_49, %78 : i32
    %c8_i32_50 = arith.constant 8 : i32
    %c0_i32_51 = arith.constant 0 : i32
    %80 = tpu.memref_slice %arg3[%79, %c0_i32_51] : memref<64x128xf32, #tpu.memory_space<any>> -> memref<1x128xf32, #tpu.memory_space<any>>
    %c8_i32_52 = arith.constant 8 : i32
    %c0_i32_53 = arith.constant 0 : i32
    %81 = tpu.memref_slice %arg8[%c8_i32_52, %c0_i32_53] : memref<64x128xf32, #tpu.memory_space<vmem>> -> memref<1x128xf32, #tpu.memory_space<vmem>>
    %82 = tpu.memref_slice %arg9[%c8_i32_50] : memref<32x!tpu.dma_semaphore, #tpu.memory_space<semaphore_mem>> -> memref<1x!tpu.dma_semaphore, #tpu.memory_space<semaphore_mem>>
    %83 = tpu.memref_squeeze %82 : memref<1x!tpu.dma_semaphore, #tpu.memory_space<semaphore_mem>> -> memref<!tpu.dma_semaphore, #tpu.memory_space<semaphore_mem>>
    tpu.enqueue_dma source(%80 : memref<1x128xf32, #tpu.memory_space<any>>) target(%81 : memref<1x128xf32, #tpu.memory_space<vmem>>) target_semaphore(%83 : memref<!tpu.dma_semaphore, #tpu.memory_space<semaphore_mem>>)
    %c9_i32 = arith.constant 9 : i32
    %84 = arith.addi %2, %c9_i32 : i32
    %85 = arith.index_cast %84 : i32 to index
    %86 = memref.load %arg2[%85] : memref<128xi32, #tpu.memory_space<smem>>
    %c0_i32_54 = arith.constant 0 : i32
    %c63_i32_55 = arith.constant 63 : i32
    %87 = arith.maxsi %c0_i32_54, %86 : i32
    %88 = arith.minsi %c63_i32_55, %87 : i32
    %c9_i32_56 = arith.constant 9 : i32
    %c0_i32_57 = arith.constant 0 : i32
    %89 = tpu.memref_slice %arg3[%88, %c0_i32_57] : memref<64x128xf32, #tpu.memory_space<any>> -> memref<1x128xf32, #tpu.memory_space<any>>
    %c9_i32_58 = arith.constant 9 : i32
    %c0_i32_59 = arith.constant 0 : i32
    %90 = tpu.memref_slice %arg8[%c9_i32_58, %c0_i32_59] : memref<64x128xf32, #tpu.memory_space<vmem>> -> memref<1x128xf32, #tpu.memory_space<vmem>>
    %91 = tpu.memref_slice %arg9[%c9_i32_56] : memref<32x!tpu.dma_semaphore, #tpu.memory_space<semaphore_mem>> -> memref<1x!tpu.dma_semaphore, #tpu.memory_space<semaphore_mem>>
    %92 = tpu.memref_squeeze %91 : memref<1x!tpu.dma_semaphore, #tpu.memory_space<semaphore_mem>> -> memref<!tpu.dma_semaphore, #tpu.memory_space<semaphore_mem>>
    tpu.enqueue_dma source(%89 : memref<1x128xf32, #tpu.memory_space<any>>) target(%90 : memref<1x128xf32, #tpu.memory_space<vmem>>) target_semaphore(%92 : memref<!tpu.dma_semaphore, #tpu.memory_space<semaphore_mem>>)
    %c10_i32 = arith.constant 10 : i32
    %93 = arith.addi %2, %c10_i32 : i32
    %94 = arith.index_cast %93 : i32 to index
    %95 = memref.load %arg2[%94] : memref<128xi32, #tpu.memory_space<smem>>
    %c0_i32_60 = arith.constant 0 : i32
    %c63_i32_61 = arith.constant 63 : i32
    %96 = arith.maxsi %c0_i32_60, %95 : i32
    %97 = arith.minsi %c63_i32_61, %96 : i32
    %c10_i32_62 = arith.constant 10 : i32
    %c0_i32_63 = arith.constant 0 : i32
    %98 = tpu.memref_slice %arg3[%97, %c0_i32_63] : memref<64x128xf32, #tpu.memory_space<any>> -> memref<1x128xf32, #tpu.memory_space<any>>
    %c10_i32_64 = arith.constant 10 : i32
    %c0_i32_65 = arith.constant 0 : i32
    %99 = tpu.memref_slice %arg8[%c10_i32_64, %c0_i32_65] : memref<64x128xf32, #tpu.memory_space<vmem>> -> memref<1x128xf32, #tpu.memory_space<vmem>>
    %100 = tpu.memref_slice %arg9[%c10_i32_62] : memref<32x!tpu.dma_semaphore, #tpu.memory_space<semaphore_mem>> -> memref<1x!tpu.dma_semaphore, #tpu.memory_space<semaphore_mem>>
    %101 = tpu.memref_squeeze %100 : memref<1x!tpu.dma_semaphore, #tpu.memory_space<semaphore_mem>> -> memref<!tpu.dma_semaphore, #tpu.memory_space<semaphore_mem>>
    tpu.enqueue_dma source(%98 : memref<1x128xf32, #tpu.memory_space<any>>) target(%99 : memref<1x128xf32, #tpu.memory_space<vmem>>) target_semaphore(%101 : memref<!tpu.dma_semaphore, #tpu.memory_space<semaphore_mem>>)
    %c11_i32 = arith.constant 11 : i32
    %102 = arith.addi %2, %c11_i32 : i32
    %103 = arith.index_cast %102 : i32 to index
    %104 = memref.load %arg2[%103] : memref<128xi32, #tpu.memory_space<smem>>
    %c0_i32_66 = arith.constant 0 : i32
    %c63_i32_67 = arith.constant 63 : i32
    %105 = arith.maxsi %c0_i32_66, %104 : i32
    %106 = arith.minsi %c63_i32_67, %105 : i32
    %c11_i32_68 = arith.constant 11 : i32
    %c0_i32_69 = arith.constant 0 : i32
    %107 = tpu.memref_slice %arg3[%106, %c0_i32_69] : memref<64x128xf32, #tpu.memory_space<any>> -> memref<1x128xf32, #tpu.memory_space<any>>
    %c11_i32_70 = arith.constant 11 : i32
    %c0_i32_71 = arith.constant 0 : i32
    %108 = tpu.memref_slice %arg8[%c11_i32_70, %c0_i32_71] : memref<64x128xf32, #tpu.memory_space<vmem>> -> memref<1x128xf32, #tpu.memory_space<vmem>>
    %109 = tpu.memref_slice %arg9[%c11_i32_68] : memref<32x!tpu.dma_semaphore, #tpu.memory_space<semaphore_mem>> -> memref<1x!tpu.dma_semaphore, #tpu.memory_space<semaphore_mem>>
    %110 = tpu.memref_squeeze %109 : memref<1x!tpu.dma_semaphore, #tpu.memory_space<semaphore_mem>> -> memref<!tpu.dma_semaphore, #tpu.memory_space<semaphore_mem>>
    tpu.enqueue_dma source(%107 : memref<1x128xf32, #tpu.memory_space<any>>) target(%108 : memref<1x128xf32, #tpu.memory_space<vmem>>) target_semaphore(%110 : memref<!tpu.dma_semaphore, #tpu.memory_space<semaphore_mem>>)
    %c12_i32 = arith.constant 12 : i32
    %111 = arith.addi %2, %c12_i32 : i32
    %112 = arith.index_cast %111 : i32 to index
    %113 = memref.load %arg2[%112] : memref<128xi32, #tpu.memory_space<smem>>
    %c0_i32_72 = arith.constant 0 : i32
    %c63_i32_73 = arith.constant 63 : i32
    %114 = arith.maxsi %c0_i32_72, %113 : i32
    %115 = arith.minsi %c63_i32_73, %114 : i32
    %c12_i32_74 = arith.constant 12 : i32
    %c0_i32_75 = arith.constant 0 : i32
    %116 = tpu.memref_slice %arg3[%115, %c0_i32_75] : memref<64x128xf32, #tpu.memory_space<any>> -> memref<1x128xf32, #tpu.memory_space<any>>
    %c12_i32_76 = arith.constant 12 : i32
    %c0_i32_77 = arith.constant 0 : i32
    %117 = tpu.memref_slice %arg8[%c12_i32_76, %c0_i32_77] : memref<64x128xf32, #tpu.memory_space<vmem>> -> memref<1x128xf32, #tpu.memory_space<vmem>>
    %118 = tpu.memref_slice %arg9[%c12_i32_74] : memref<32x!tpu.dma_semaphore, #tpu.memory_space<semaphore_mem>> -> memref<1x!tpu.dma_semaphore, #tpu.memory_space<semaphore_mem>>
    %119 = tpu.memref_squeeze %118 : memref<1x!tpu.dma_semaphore, #tpu.memory_space<semaphore_mem>> -> memref<!tpu.dma_semaphore, #tpu.memory_space<semaphore_mem>>
    tpu.enqueue_dma source(%116 : memref<1x128xf32, #tpu.memory_space<any>>) target(%117 : memref<1x128xf32, #tpu.memory_space<vmem>>) target_semaphore(%119 : memref<!tpu.dma_semaphore, #tpu.memory_space<semaphore_mem>>)
    %c13_i32 = arith.constant 13 : i32
    %120 = arith.addi %2, %c13_i32 : i32
    %121 = arith.index_cast %120 : i32 to index
    %122 = memref.load %arg2[%121] : memref<128xi32, #tpu.memory_space<smem>>
    %c0_i32_78 = arith.constant 0 : i32
    %c63_i32_79 = arith.constant 63 : i32
    %123 = arith.maxsi %c0_i32_78, %122 : i32
    %124 = arith.minsi %c63_i32_79, %123 : i32
    %c13_i32_80 = arith.constant 13 : i32
    %c0_i32_81 = arith.constant 0 : i32
    %125 = tpu.memref_slice %arg3[%124, %c0_i32_81] : memref<64x128xf32, #tpu.memory_space<any>> -> memref<1x128xf32, #tpu.memory_space<any>>
    %c13_i32_82 = arith.constant 13 : i32
    %c0_i32_83 = arith.constant 0 : i32
    %126 = tpu.memref_slice %arg8[%c13_i32_82, %c0_i32_83] : memref<64x128xf32, #tpu.memory_space<vmem>> -> memref<1x128xf32, #tpu.memory_space<vmem>>
    %127 = tpu.memref_slice %arg9[%c13_i32_80] : memref<32x!tpu.dma_semaphore, #tpu.memory_space<semaphore_mem>> -> memref<1x!tpu.dma_semaphore, #tpu.memory_space<semaphore_mem>>
    %128 = tpu.memref_squeeze %127 : memref<1x!tpu.dma_semaphore, #tpu.memory_space<semaphore_mem>> -> memref<!tpu.dma_semaphore, #tpu.memory_space<semaphore_mem>>
    tpu.enqueue_dma source(%125 : memref<1x128xf32, #tpu.memory_space<any>>) target(%126 : memref<1x128xf32, #tpu.memory_space<vmem>>) target_semaphore(%128 : memref<!tpu.dma_semaphore, #tpu.memory_space<semaphore_mem>>)
    %c14_i32 = arith.constant 14 : i32
    %129 = arith.addi %2, %c14_i32 : i32
    %130 = arith.index_cast %129 : i32 to index
    %131 = memref.load %arg2[%130] : memref<128xi32, #tpu.memory_space<smem>>
    %c0_i32_84 = arith.constant 0 : i32
    %c63_i32_85 = arith.constant 63 : i32
    %132 = arith.maxsi %c0_i32_84, %131 : i32
    %133 = arith.minsi %c63_i32_85, %132 : i32
    %c14_i32_86 = arith.constant 14 : i32
    %c0_i32_87 = arith.constant 0 : i32
    %134 = tpu.memref_slice %arg3[%133, %c0_i32_87] : memref<64x128xf32, #tpu.memory_space<any>> -> memref<1x128xf32, #tpu.memory_space<any>>
    %c14_i32_88 = arith.constant 14 : i32
    %c0_i32_89 = arith.constant 0 : i32
    %135 = tpu.memref_slice %arg8[%c14_i32_88, %c0_i32_89] : memref<64x128xf32, #tpu.memory_space<vmem>> -> memref<1x128xf32, #tpu.memory_space<vmem>>
    %136 = tpu.memref_slice %arg9[%c14_i32_86] : memref<32x!tpu.dma_semaphore, #tpu.memory_space<semaphore_mem>> -> memref<1x!tpu.dma_semaphore, #tpu.memory_space<semaphore_mem>>
    %137 = tpu.memref_squeeze %136 : memref<1x!tpu.dma_semaphore, #tpu.memory_space<semaphore_mem>> -> memref<!tpu.dma_semaphore, #tpu.memory_space<semaphore_mem>>
    tpu.enqueue_dma source(%134 : memref<1x128xf32, #tpu.memory_space<any>>) target(%135 : memref<1x128xf32, #tpu.memory_space<vmem>>) target_semaphore(%137 : memref<!tpu.dma_semaphore, #tpu.memory_space<semaphore_mem>>)
    %c15_i32 = arith.constant 15 : i32
    %138 = arith.addi %2, %c15_i32 : i32
    %139 = arith.index_cast %138 : i32 to index
    %140 = memref.load %arg2[%139] : memref<128xi32, #tpu.memory_space<smem>>
    %c0_i32_90 = arith.constant 0 : i32
    %c63_i32_91 = arith.constant 63 : i32
    %141 = arith.maxsi %c0_i32_90, %140 : i32
    %142 = arith.minsi %c63_i32_91, %141 : i32
    %c15_i32_92 = arith.constant 15 : i32
    %c0_i32_93 = arith.constant 0 : i32
    %143 = tpu.memref_slice %arg3[%142, %c0_i32_93] : memref<64x128xf32, #tpu.memory_space<any>> -> memref<1x128xf32, #tpu.memory_space<any>>
    %c15_i32_94 = arith.constant 15 : i32
    %c0_i32_95 = arith.constant 0 : i32
    %144 = tpu.memref_slice %arg8[%c15_i32_94, %c0_i32_95] : memref<64x128xf32, #tpu.memory_space<vmem>> -> memref<1x128xf32, #tpu.memory_space<vmem>>
    %145 = tpu.memref_slice %arg9[%c15_i32_92] : memref<32x!tpu.dma_semaphore, #tpu.memory_space<semaphore_mem>> -> memref<1x!tpu.dma_semaphore, #tpu.memory_space<semaphore_mem>>
    %146 = tpu.memref_squeeze %145 : memref<1x!tpu.dma_semaphore, #tpu.memory_space<semaphore_mem>> -> memref<!tpu.dma_semaphore, #tpu.memory_space<semaphore_mem>>
    tpu.enqueue_dma source(%143 : memref<1x128xf32, #tpu.memory_space<any>>) target(%144 : memref<1x128xf32, #tpu.memory_space<vmem>>) target_semaphore(%146 : memref<!tpu.dma_semaphore, #tpu.memory_space<semaphore_mem>>)
    %c16_i32 = arith.constant 16 : i32
    %147 = arith.addi %2, %c16_i32 : i32
    %148 = arith.index_cast %147 : i32 to index
    %149 = memref.load %arg2[%148] : memref<128xi32, #tpu.memory_space<smem>>
    %c0_i32_96 = arith.constant 0 : i32
    %c63_i32_97 = arith.constant 63 : i32
    %150 = arith.maxsi %c0_i32_96, %149 : i32
    %151 = arith.minsi %c63_i32_97, %150 : i32
    %c16_i32_98 = arith.constant 16 : i32
    %c0_i32_99 = arith.constant 0 : i32
    %152 = tpu.memref_slice %arg3[%151, %c0_i32_99] : memref<64x128xf32, #tpu.memory_space<any>> -> memref<1x128xf32, #tpu.memory_space<any>>
    %c16_i32_100 = arith.constant 16 : i32
    %c0_i32_101 = arith.constant 0 : i32
    %153 = tpu.memref_slice %arg8[%c16_i32_100, %c0_i32_101] : memref<64x128xf32, #tpu.memory_space<vmem>> -> memref<1x128xf32, #tpu.memory_space<vmem>>
    %154 = tpu.memref_slice %arg9[%c16_i32_98] : memref<32x!tpu.dma_semaphore, #tpu.memory_space<semaphore_mem>> -> memref<1x!tpu.dma_semaphore, #tpu.memory_space<semaphore_mem>>
    %155 = tpu.memref_squeeze %154 : memref<1x!tpu.dma_semaphore, #tpu.memory_space<semaphore_mem>> -> memref<!tpu.dma_semaphore, #tpu.memory_space<semaphore_mem>>
    tpu.enqueue_dma source(%152 : memref<1x128xf32, #tpu.memory_space<any>>) target(%153 : memref<1x128xf32, #tpu.memory_space<vmem>>) target_semaphore(%155 : memref<!tpu.dma_semaphore, #tpu.memory_space<semaphore_mem>>)
    %c17_i32 = arith.constant 17 : i32
    %156 = arith.addi %2, %c17_i32 : i32
    %157 = arith.index_cast %156 : i32 to index
    %158 = memref.load %arg2[%157] : memref<128xi32, #tpu.memory_space<smem>>
    %c0_i32_102 = arith.constant 0 : i32
    %c63_i32_103 = arith.constant 63 : i32
    %159 = arith.maxsi %c0_i32_102, %158 : i32
    %160 = arith.minsi %c63_i32_103, %159 : i32
    %c17_i32_104 = arith.constant 17 : i32
    %c0_i32_105 = arith.constant 0 : i32
    %161 = tpu.memref_slice %arg3[%160, %c0_i32_105] : memref<64x128xf32, #tpu.memory_space<any>> -> memref<1x128xf32, #tpu.memory_space<any>>
    %c17_i32_106 = arith.constant 17 : i32
    %c0_i32_107 = arith.constant 0 : i32
    %162 = tpu.memref_slice %arg8[%c17_i32_106, %c0_i32_107] : memref<64x128xf32, #tpu.memory_space<vmem>> -> memref<1x128xf32, #tpu.memory_space<vmem>>
    %163 = tpu.memref_slice %arg9[%c17_i32_104] : memref<32x!tpu.dma_semaphore, #tpu.memory_space<semaphore_mem>> -> memref<1x!tpu.dma_semaphore, #tpu.memory_space<semaphore_mem>>
    %164 = tpu.memref_squeeze %163 : memref<1x!tpu.dma_semaphore, #tpu.memory_space<semaphore_mem>> -> memref<!tpu.dma_semaphore, #tpu.memory_space<semaphore_mem>>
    tpu.enqueue_dma source(%161 : memref<1x128xf32, #tpu.memory_space<any>>) target(%162 : memref<1x128xf32, #tpu.memory_space<vmem>>) target_semaphore(%164 : memref<!tpu.dma_semaphore, #tpu.memory_space<semaphore_mem>>)
    %c18_i32 = arith.constant 18 : i32
    %165 = arith.addi %2, %c18_i32 : i32
    %166 = arith.index_cast %165 : i32 to index
    %167 = memref.load %arg2[%166] : memref<128xi32, #tpu.memory_space<smem>>
    %c0_i32_108 = arith.constant 0 : i32
    %c63_i32_109 = arith.constant 63 : i32
    %168 = arith.maxsi %c0_i32_108, %167 : i32
    %169 = arith.minsi %c63_i32_109, %168 : i32
    %c18_i32_110 = arith.constant 18 : i32
    %c0_i32_111 = arith.constant 0 : i32
    %170 = tpu.memref_slice %arg3[%169, %c0_i32_111] : memref<64x128xf32, #tpu.memory_space<any>> -> memref<1x128xf32, #tpu.memory_space<any>>
    %c18_i32_112 = arith.constant 18 : i32
    %c0_i32_113 = arith.constant 0 : i32
    %171 = tpu.memref_slice %arg8[%c18_i32_112, %c0_i32_113] : memref<64x128xf32, #tpu.memory_space<vmem>> -> memref<1x128xf32, #tpu.memory_space<vmem>>
    %172 = tpu.memref_slice %arg9[%c18_i32_110] : memref<32x!tpu.dma_semaphore, #tpu.memory_space<semaphore_mem>> -> memref<1x!tpu.dma_semaphore, #tpu.memory_space<semaphore_mem>>
    %173 = tpu.memref_squeeze %172 : memref<1x!tpu.dma_semaphore, #tpu.memory_space<semaphore_mem>> -> memref<!tpu.dma_semaphore, #tpu.memory_space<semaphore_mem>>
    tpu.enqueue_dma source(%170 : memref<1x128xf32, #tpu.memory_space<any>>) target(%171 : memref<1x128xf32, #tpu.memory_space<vmem>>) target_semaphore(%173 : memref<!tpu.dma_semaphore, #tpu.memory_space<semaphore_mem>>)
    %c19_i32 = arith.constant 19 : i32
    %174 = arith.addi %2, %c19_i32 : i32
    %175 = arith.index_cast %174 : i32 to index
    %176 = memref.load %arg2[%175] : memref<128xi32, #tpu.memory_space<smem>>
    %c0_i32_114 = arith.constant 0 : i32
    %c63_i32_115 = arith.constant 63 : i32
    %177 = arith.maxsi %c0_i32_114, %176 : i32
    %178 = arith.minsi %c63_i32_115, %177 : i32
    %c19_i32_116 = arith.constant 19 : i32
    %c0_i32_117 = arith.constant 0 : i32
    %179 = tpu.memref_slice %arg3[%178, %c0_i32_117] : memref<64x128xf32, #tpu.memory_space<any>> -> memref<1x128xf32, #tpu.memory_space<any>>
    %c19_i32_118 = arith.constant 19 : i32
    %c0_i32_119 = arith.constant 0 : i32
    %180 = tpu.memref_slice %arg8[%c19_i32_118, %c0_i32_119] : memref<64x128xf32, #tpu.memory_space<vmem>> -> memref<1x128xf32, #tpu.memory_space<vmem>>
    %181 = tpu.memref_slice %arg9[%c19_i32_116] : memref<32x!tpu.dma_semaphore, #tpu.memory_space<semaphore_mem>> -> memref<1x!tpu.dma_semaphore, #tpu.memory_space<semaphore_mem>>
    %182 = tpu.memref_squeeze %181 : memref<1x!tpu.dma_semaphore, #tpu.memory_space<semaphore_mem>> -> memref<!tpu.dma_semaphore, #tpu.memory_space<semaphore_mem>>
    tpu.enqueue_dma source(%179 : memref<1x128xf32, #tpu.memory_space<any>>) target(%180 : memref<1x128xf32, #tpu.memory_space<vmem>>) target_semaphore(%182 : memref<!tpu.dma_semaphore, #tpu.memory_space<semaphore_mem>>)
    %c20_i32 = arith.constant 20 : i32
    %183 = arith.addi %2, %c20_i32 : i32
    %184 = arith.index_cast %183 : i32 to index
    %185 = memref.load %arg2[%184] : memref<128xi32, #tpu.memory_space<smem>>
    %c0_i32_120 = arith.constant 0 : i32
    %c63_i32_121 = arith.constant 63 : i32
    %186 = arith.maxsi %c0_i32_120, %185 : i32
    %187 = arith.minsi %c63_i32_121, %186 : i32
    %c20_i32_122 = arith.constant 20 : i32
    %c0_i32_123 = arith.constant 0 : i32
    %188 = tpu.memref_slice %arg3[%187, %c0_i32_123] : memref<64x128xf32, #tpu.memory_space<any>> -> memref<1x128xf32, #tpu.memory_space<any>>
    %c20_i32_124 = arith.constant 20 : i32
    %c0_i32_125 = arith.constant 0 : i32
    %189 = tpu.memref_slice %arg8[%c20_i32_124, %c0_i32_125] : memref<64x128xf32, #tpu.memory_space<vmem>> -> memref<1x128xf32, #tpu.memory_space<vmem>>
    %190 = tpu.memref_slice %arg9[%c20_i32_122] : memref<32x!tpu.dma_semaphore, #tpu.memory_space<semaphore_mem>> -> memref<1x!tpu.dma_semaphore, #tpu.memory_space<semaphore_mem>>
    %191 = tpu.memref_squeeze %190 : memref<1x!tpu.dma_semaphore, #tpu.memory_space<semaphore_mem>> -> memref<!tpu.dma_semaphore, #tpu.memory_space<semaphore_mem>>
    tpu.enqueue_dma source(%188 : memref<1x128xf32, #tpu.memory_space<any>>) target(%189 : memref<1x128xf32, #tpu.memory_space<vmem>>) target_semaphore(%191 : memref<!tpu.dma_semaphore, #tpu.memory_space<semaphore_mem>>)
    %c21_i32 = arith.constant 21 : i32
    %192 = arith.addi %2, %c21_i32 : i32
    %193 = arith.index_cast %192 : i32 to index
    %194 = memref.load %arg2[%193] : memref<128xi32, #tpu.memory_space<smem>>
    %c0_i32_126 = arith.constant 0 : i32
    %c63_i32_127 = arith.constant 63 : i32
    %195 = arith.maxsi %c0_i32_126, %194 : i32
    %196 = arith.minsi %c63_i32_127, %195 : i32
    %c21_i32_128 = arith.constant 21 : i32
    %c0_i32_129 = arith.constant 0 : i32
    %197 = tpu.memref_slice %arg3[%196, %c0_i32_129] : memref<64x128xf32, #tpu.memory_space<any>> -> memref<1x128xf32, #tpu.memory_space<any>>
    %c21_i32_130 = arith.constant 21 : i32
    %c0_i32_131 = arith.constant 0 : i32
    %198 = tpu.memref_slice %arg8[%c21_i32_130, %c0_i32_131] : memref<64x128xf32, #tpu.memory_space<vmem>> -> memref<1x128xf32, #tpu.memory_space<vmem>>
    %199 = tpu.memref_slice %arg9[%c21_i32_128] : memref<32x!tpu.dma_semaphore, #tpu.memory_space<semaphore_mem>> -> memref<1x!tpu.dma_semaphore, #tpu.memory_space<semaphore_mem>>
    %200 = tpu.memref_squeeze %199 : memref<1x!tpu.dma_semaphore, #tpu.memory_space<semaphore_mem>> -> memref<!tpu.dma_semaphore, #tpu.memory_space<semaphore_mem>>
    tpu.enqueue_dma source(%197 : memref<1x128xf32, #tpu.memory_space<any>>) target(%198 : memref<1x128xf32, #tpu.memory_space<vmem>>) target_semaphore(%200 : memref<!tpu.dma_semaphore, #tpu.memory_space<semaphore_mem>>)
    %c22_i32 = arith.constant 22 : i32
    %201 = arith.addi %2, %c22_i32 : i32
    %202 = arith.index_cast %201 : i32 to index
    %203 = memref.load %arg2[%202] : memref<128xi32, #tpu.memory_space<smem>>
    %c0_i32_132 = arith.constant 0 : i32
    %c63_i32_133 = arith.constant 63 : i32
    %204 = arith.maxsi %c0_i32_132, %203 : i32
    %205 = arith.minsi %c63_i32_133, %204 : i32
    %c22_i32_134 = arith.constant 22 : i32
    %c0_i32_135 = arith.constant 0 : i32
    %206 = tpu.memref_slice %arg3[%205, %c0_i32_135] : memref<64x128xf32, #tpu.memory_space<any>> -> memref<1x128xf32, #tpu.memory_space<any>>
    %c22_i32_136 = arith.constant 22 : i32
    %c0_i32_137 = arith.constant 0 : i32
    %207 = tpu.memref_slice %arg8[%c22_i32_136, %c0_i32_137] : memref<64x128xf32, #tpu.memory_space<vmem>> -> memref<1x128xf32, #tpu.memory_space<vmem>>
    %208 = tpu.memref_slice %arg9[%c22_i32_134] : memref<32x!tpu.dma_semaphore, #tpu.memory_space<semaphore_mem>> -> memref<1x!tpu.dma_semaphore, #tpu.memory_space<semaphore_mem>>
    %209 = tpu.memref_squeeze %208 : memref<1x!tpu.dma_semaphore, #tpu.memory_space<semaphore_mem>> -> memref<!tpu.dma_semaphore, #tpu.memory_space<semaphore_mem>>
    tpu.enqueue_dma source(%206 : memref<1x128xf32, #tpu.memory_space<any>>) target(%207 : memref<1x128xf32, #tpu.memory_space<vmem>>) target_semaphore(%209 : memref<!tpu.dma_semaphore, #tpu.memory_space<semaphore_mem>>)
    %c23_i32 = arith.constant 23 : i32
    %210 = arith.addi %2, %c23_i32 : i32
    %211 = arith.index_cast %210 : i32 to index
    %212 = memref.load %arg2[%211] : memref<128xi32, #tpu.memory_space<smem>>
    %c0_i32_138 = arith.constant 0 : i32
    %c63_i32_139 = arith.constant 63 : i32
    %213 = arith.maxsi %c0_i32_138, %212 : i32
    %214 = arith.minsi %c63_i32_139, %213 : i32
    %c23_i32_140 = arith.constant 23 : i32
    %c0_i32_141 = arith.constant 0 : i32
    %215 = tpu.memref_slice %arg3[%214, %c0_i32_141] : memref<64x128xf32, #tpu.memory_space<any>> -> memref<1x128xf32, #tpu.memory_space<any>>
    %c23_i32_142 = arith.constant 23 : i32
    %c0_i32_143 = arith.constant 0 : i32
    %216 = tpu.memref_slice %arg8[%c23_i32_142, %c0_i32_143] : memref<64x128xf32, #tpu.memory_space<vmem>> -> memref<1x128xf32, #tpu.memory_space<vmem>>
    %217 = tpu.memref_slice %arg9[%c23_i32_140] : memref<32x!tpu.dma_semaphore, #tpu.memory_space<semaphore_mem>> -> memref<1x!tpu.dma_semaphore, #tpu.memory_space<semaphore_mem>>
    %218 = tpu.memref_squeeze %217 : memref<1x!tpu.dma_semaphore, #tpu.memory_space<semaphore_mem>> -> memref<!tpu.dma_semaphore, #tpu.memory_space<semaphore_mem>>
    tpu.enqueue_dma source(%215 : memref<1x128xf32, #tpu.memory_space<any>>) target(%216 : memref<1x128xf32, #tpu.memory_space<vmem>>) target_semaphore(%218 : memref<!tpu.dma_semaphore, #tpu.memory_space<semaphore_mem>>)
    %c24_i32 = arith.constant 24 : i32
    %219 = arith.addi %2, %c24_i32 : i32
    %220 = arith.index_cast %219 : i32 to index
    %221 = memref.load %arg2[%220] : memref<128xi32, #tpu.memory_space<smem>>
    %c0_i32_144 = arith.constant 0 : i32
    %c63_i32_145 = arith.constant 63 : i32
    %222 = arith.maxsi %c0_i32_144, %221 : i32
    %223 = arith.minsi %c63_i32_145, %222 : i32
    %c24_i32_146 = arith.constant 24 : i32
    %c0_i32_147 = arith.constant 0 : i32
    %224 = tpu.memref_slice %arg3[%223, %c0_i32_147] : memref<64x128xf32, #tpu.memory_space<any>> -> memref<1x128xf32, #tpu.memory_space<any>>
    %c24_i32_148 = arith.constant 24 : i32
    %c0_i32_149 = arith.constant 0 : i32
    %225 = tpu.memref_slice %arg8[%c24_i32_148, %c0_i32_149] : memref<64x128xf32, #tpu.memory_space<vmem>> -> memref<1x128xf32, #tpu.memory_space<vmem>>
    %226 = tpu.memref_slice %arg9[%c24_i32_146] : memref<32x!tpu.dma_semaphore, #tpu.memory_space<semaphore_mem>> -> memref<1x!tpu.dma_semaphore, #tpu.memory_space<semaphore_mem>>
    %227 = tpu.memref_squeeze %226 : memref<1x!tpu.dma_semaphore, #tpu.memory_space<semaphore_mem>> -> memref<!tpu.dma_semaphore, #tpu.memory_space<semaphore_mem>>
    tpu.enqueue_dma source(%224 : memref<1x128xf32, #tpu.memory_space<any>>) target(%225 : memref<1x128xf32, #tpu.memory_space<vmem>>) target_semaphore(%227 : memref<!tpu.dma_semaphore, #tpu.memory_space<semaphore_mem>>)
    %c25_i32 = arith.constant 25 : i32
    %228 = arith.addi %2, %c25_i32 : i32
    %229 = arith.index_cast %228 : i32 to index
    %230 = memref.load %arg2[%229] : memref<128xi32, #tpu.memory_space<smem>>
    %c0_i32_150 = arith.constant 0 : i32
    %c63_i32_151 = arith.constant 63 : i32
    %231 = arith.maxsi %c0_i32_150, %230 : i32
    %232 = arith.minsi %c63_i32_151, %231 : i32
    %c25_i32_152 = arith.constant 25 : i32
    %c0_i32_153 = arith.constant 0 : i32
    %233 = tpu.memref_slice %arg3[%232, %c0_i32_153] : memref<64x128xf32, #tpu.memory_space<any>> -> memref<1x128xf32, #tpu.memory_space<any>>
    %c25_i32_154 = arith.constant 25 : i32
    %c0_i32_155 = arith.constant 0 : i32
    %234 = tpu.memref_slice %arg8[%c25_i32_154, %c0_i32_155] : memref<64x128xf32, #tpu.memory_space<vmem>> -> memref<1x128xf32, #tpu.memory_space<vmem>>
    %235 = tpu.memref_slice %arg9[%c25_i32_152] : memref<32x!tpu.dma_semaphore, #tpu.memory_space<semaphore_mem>> -> memref<1x!tpu.dma_semaphore, #tpu.memory_space<semaphore_mem>>
    %236 = tpu.memref_squeeze %235 : memref<1x!tpu.dma_semaphore, #tpu.memory_space<semaphore_mem>> -> memref<!tpu.dma_semaphore, #tpu.memory_space<semaphore_mem>>
    tpu.enqueue_dma source(%233 : memref<1x128xf32, #tpu.memory_space<any>>) target(%234 : memref<1x128xf32, #tpu.memory_space<vmem>>) target_semaphore(%236 : memref<!tpu.dma_semaphore, #tpu.memory_space<semaphore_mem>>)
    %c26_i32 = arith.constant 26 : i32
    %237 = arith.addi %2, %c26_i32 : i32
    %238 = arith.index_cast %237 : i32 to index
    %239 = memref.load %arg2[%238] : memref<128xi32, #tpu.memory_space<smem>>
    %c0_i32_156 = arith.constant 0 : i32
    %c63_i32_157 = arith.constant 63 : i32
    %240 = arith.maxsi %c0_i32_156, %239 : i32
    %241 = arith.minsi %c63_i32_157, %240 : i32
    %c26_i32_158 = arith.constant 26 : i32
    %c0_i32_159 = arith.constant 0 : i32
    %242 = tpu.memref_slice %arg3[%241, %c0_i32_159] : memref<64x128xf32, #tpu.memory_space<any>> -> memref<1x128xf32, #tpu.memory_space<any>>
    %c26_i32_160 = arith.constant 26 : i32
    %c0_i32_161 = arith.constant 0 : i32
    %243 = tpu.memref_slice %arg8[%c26_i32_160, %c0_i32_161] : memref<64x128xf32, #tpu.memory_space<vmem>> -> memref<1x128xf32, #tpu.memory_space<vmem>>
    %244 = tpu.memref_slice %arg9[%c26_i32_158] : memref<32x!tpu.dma_semaphore, #tpu.memory_space<semaphore_mem>> -> memref<1x!tpu.dma_semaphore, #tpu.memory_space<semaphore_mem>>
    %245 = tpu.memref_squeeze %244 : memref<1x!tpu.dma_semaphore, #tpu.memory_space<semaphore_mem>> -> memref<!tpu.dma_semaphore, #tpu.memory_space<semaphore_mem>>
    tpu.enqueue_dma source(%242 : memref<1x128xf32, #tpu.memory_space<any>>) target(%243 : memref<1x128xf32, #tpu.memory_space<vmem>>) target_semaphore(%245 : memref<!tpu.dma_semaphore, #tpu.memory_space<semaphore_mem>>)
    %c27_i32 = arith.constant 27 : i32
    %246 = arith.addi %2, %c27_i32 : i32
    %247 = arith.index_cast %246 : i32 to index
    %248 = memref.load %arg2[%247] : memref<128xi32, #tpu.memory_space<smem>>
    %c0_i32_162 = arith.constant 0 : i32
    %c63_i32_163 = arith.constant 63 : i32
    %249 = arith.maxsi %c0_i32_162, %248 : i32
    %250 = arith.minsi %c63_i32_163, %249 : i32
    %c27_i32_164 = arith.constant 27 : i32
    %c0_i32_165 = arith.constant 0 : i32
    %251 = tpu.memref_slice %arg3[%250, %c0_i32_165] : memref<64x128xf32, #tpu.memory_space<any>> -> memref<1x128xf32, #tpu.memory_space<any>>
    %c27_i32_166 = arith.constant 27 : i32
    %c0_i32_167 = arith.constant 0 : i32
    %252 = tpu.memref_slice %arg8[%c27_i32_166, %c0_i32_167] : memref<64x128xf32, #tpu.memory_space<vmem>> -> memref<1x128xf32, #tpu.memory_space<vmem>>
    %253 = tpu.memref_slice %arg9[%c27_i32_164] : memref<32x!tpu.dma_semaphore, #tpu.memory_space<semaphore_mem>> -> memref<1x!tpu.dma_semaphore, #tpu.memory_space<semaphore_mem>>
    %254 = tpu.memref_squeeze %253 : memref<1x!tpu.dma_semaphore, #tpu.memory_space<semaphore_mem>> -> memref<!tpu.dma_semaphore, #tpu.memory_space<semaphore_mem>>
    tpu.enqueue_dma source(%251 : memref<1x128xf32, #tpu.memory_space<any>>) target(%252 : memref<1x128xf32, #tpu.memory_space<vmem>>) target_semaphore(%254 : memref<!tpu.dma_semaphore, #tpu.memory_space<semaphore_mem>>)
    %c28_i32 = arith.constant 28 : i32
    %255 = arith.addi %2, %c28_i32 : i32
    %256 = arith.index_cast %255 : i32 to index
    %257 = memref.load %arg2[%256] : memref<128xi32, #tpu.memory_space<smem>>
    %c0_i32_168 = arith.constant 0 : i32
    %c63_i32_169 = arith.constant 63 : i32
    %258 = arith.maxsi %c0_i32_168, %257 : i32
    %259 = arith.minsi %c63_i32_169, %258 : i32
    %c28_i32_170 = arith.constant 28 : i32
    %c0_i32_171 = arith.constant 0 : i32
    %260 = tpu.memref_slice %arg3[%259, %c0_i32_171] : memref<64x128xf32, #tpu.memory_space<any>> -> memref<1x128xf32, #tpu.memory_space<any>>
    %c28_i32_172 = arith.constant 28 : i32
    %c0_i32_173 = arith.constant 0 : i32
    %261 = tpu.memref_slice %arg8[%c28_i32_172, %c0_i32_173] : memref<64x128xf32, #tpu.memory_space<vmem>> -> memref<1x128xf32, #tpu.memory_space<vmem>>
    %262 = tpu.memref_slice %arg9[%c28_i32_170] : memref<32x!tpu.dma_semaphore, #tpu.memory_space<semaphore_mem>> -> memref<1x!tpu.dma_semaphore, #tpu.memory_space<semaphore_mem>>
    %263 = tpu.memref_squeeze %262 : memref<1x!tpu.dma_semaphore, #tpu.memory_space<semaphore_mem>> -> memref<!tpu.dma_semaphore, #tpu.memory_space<semaphore_mem>>
    tpu.enqueue_dma source(%260 : memref<1x128xf32, #tpu.memory_space<any>>) target(%261 : memref<1x128xf32, #tpu.memory_space<vmem>>) target_semaphore(%263 : memref<!tpu.dma_semaphore, #tpu.memory_space<semaphore_mem>>)
    %c29_i32 = arith.constant 29 : i32
    %264 = arith.addi %2, %c29_i32 : i32
    %265 = arith.index_cast %264 : i32 to index
    %266 = memref.load %arg2[%265] : memref<128xi32, #tpu.memory_space<smem>>
    %c0_i32_174 = arith.constant 0 : i32
    %c63_i32_175 = arith.constant 63 : i32
    %267 = arith.maxsi %c0_i32_174, %266 : i32
    %268 = arith.minsi %c63_i32_175, %267 : i32
    %c29_i32_176 = arith.constant 29 : i32
    %c0_i32_177 = arith.constant 0 : i32
    %269 = tpu.memref_slice %arg3[%268, %c0_i32_177] : memref<64x128xf32, #tpu.memory_space<any>> -> memref<1x128xf32, #tpu.memory_space<any>>
    %c29_i32_178 = arith.constant 29 : i32
    %c0_i32_179 = arith.constant 0 : i32
    %270 = tpu.memref_slice %arg8[%c29_i32_178, %c0_i32_179] : memref<64x128xf32, #tpu.memory_space<vmem>> -> memref<1x128xf32, #tpu.memory_space<vmem>>
    %271 = tpu.memref_slice %arg9[%c29_i32_176] : memref<32x!tpu.dma_semaphore, #tpu.memory_space<semaphore_mem>> -> memref<1x!tpu.dma_semaphore, #tpu.memory_space<semaphore_mem>>
    %272 = tpu.memref_squeeze %271 : memref<1x!tpu.dma_semaphore, #tpu.memory_space<semaphore_mem>> -> memref<!tpu.dma_semaphore, #tpu.memory_space<semaphore_mem>>
    tpu.enqueue_dma source(%269 : memref<1x128xf32, #tpu.memory_space<any>>) target(%270 : memref<1x128xf32, #tpu.memory_space<vmem>>) target_semaphore(%272 : memref<!tpu.dma_semaphore, #tpu.memory_space<semaphore_mem>>)
    %c30_i32 = arith.constant 30 : i32
    %273 = arith.addi %2, %c30_i32 : i32
    %274 = arith.index_cast %273 : i32 to index
    %275 = memref.load %arg2[%274] : memref<128xi32, #tpu.memory_space<smem>>
    %c0_i32_180 = arith.constant 0 : i32
    %c63_i32_181 = arith.constant 63 : i32
    %276 = arith.maxsi %c0_i32_180, %275 : i32
    %277 = arith.minsi %c63_i32_181, %276 : i32
    %c30_i32_182 = arith.constant 30 : i32
    %c0_i32_183 = arith.constant 0 : i32
    %278 = tpu.memref_slice %arg3[%277, %c0_i32_183] : memref<64x128xf32, #tpu.memory_space<any>> -> memref<1x128xf32, #tpu.memory_space<any>>
    %c30_i32_184 = arith.constant 30 : i32
    %c0_i32_185 = arith.constant 0 : i32
    %279 = tpu.memref_slice %arg8[%c30_i32_184, %c0_i32_185] : memref<64x128xf32, #tpu.memory_space<vmem>> -> memref<1x128xf32, #tpu.memory_space<vmem>>
    %280 = tpu.memref_slice %arg9[%c30_i32_182] : memref<32x!tpu.dma_semaphore, #tpu.memory_space<semaphore_mem>> -> memref<1x!tpu.dma_semaphore, #tpu.memory_space<semaphore_mem>>
    %281 = tpu.memref_squeeze %280 : memref<1x!tpu.dma_semaphore, #tpu.memory_space<semaphore_mem>> -> memref<!tpu.dma_semaphore, #tpu.memory_space<semaphore_mem>>
    tpu.enqueue_dma source(%278 : memref<1x128xf32, #tpu.memory_space<any>>) target(%279 : memref<1x128xf32, #tpu.memory_space<vmem>>) target_semaphore(%281 : memref<!tpu.dma_semaphore, #tpu.memory_space<semaphore_mem>>)
    %c31_i32 = arith.constant 31 : i32
    %282 = arith.addi %2, %c31_i32 : i32
    %283 = arith.index_cast %282 : i32 to index
    %284 = memref.load %arg2[%283] : memref<128xi32, #tpu.memory_space<smem>>
    %c0_i32_186 = arith.constant 0 : i32
    %c63_i32_187 = arith.constant 63 : i32
    %285 = arith.maxsi %c0_i32_186, %284 : i32
    %286 = arith.minsi %c63_i32_187, %285 : i32
    %c31_i32_188 = arith.constant 31 : i32
    %c0_i32_189 = arith.constant 0 : i32
    %287 = tpu.memref_slice %arg3[%286, %c0_i32_189] : memref<64x128xf32, #tpu.memory_space<any>> -> memref<1x128xf32, #tpu.memory_space<any>>
    %c31_i32_190 = arith.constant 31 : i32
    %c0_i32_191 = arith.constant 0 : i32
    %288 = tpu.memref_slice %arg8[%c31_i32_190, %c0_i32_191] : memref<64x128xf32, #tpu.memory_space<vmem>> -> memref<1x128xf32, #tpu.memory_space<vmem>>
    %289 = tpu.memref_slice %arg9[%c31_i32_188] : memref<32x!tpu.dma_semaphore, #tpu.memory_space<semaphore_mem>> -> memref<1x!tpu.dma_semaphore, #tpu.memory_space<semaphore_mem>>
    %290 = tpu.memref_squeeze %289 : memref<1x!tpu.dma_semaphore, #tpu.memory_space<semaphore_mem>> -> memref<!tpu.dma_semaphore, #tpu.memory_space<semaphore_mem>>
    tpu.enqueue_dma source(%287 : memref<1x128xf32, #tpu.memory_space<any>>) target(%288 : memref<1x128xf32, #tpu.memory_space<vmem>>) target_semaphore(%290 : memref<!tpu.dma_semaphore, #tpu.memory_space<semaphore_mem>>)
    %c0 = arith.constant 0 : index
    %c0_192 = arith.constant 0 : index
    %291 = vector.load %arg5[%c0, %c0_192] : memref<1x128xf32, #tpu.memory_space<vmem>>, vector<1x128xf32>
    %c0_193 = arith.constant 0 : index
    %c0_194 = arith.constant 0 : index
    %292 = vector.load %arg6[%c0_193, %c0_194] : memref<1x128xf32, #tpu.memory_space<vmem>>, vector<1x128xf32>
    %cst = arith.constant 7.812500e-03 : f32
    %c0_i32_195 = arith.constant 0 : i32
    %c8_i32_196 = arith.constant 8 : i32
    %293 = arith.muli %c0_i32_195, %c8_i32_196 : i32
    %294 = tpu.assume_multiple %293, 8 : i32
    %c0_i32_197 = arith.constant 0 : i32
    %295 = arith.addi %294, %c0_i32_197 : i32
    %296 = arith.addi %2, %295 : i32
    %297 = arith.index_cast %296 : i32 to index
    %298 = memref.load %arg2[%297] : memref<128xi32, #tpu.memory_space<smem>>
    %c0_i32_198 = arith.constant 0 : i32
    %c63_i32_199 = arith.constant 63 : i32
    %299 = arith.maxsi %c0_i32_198, %298 : i32
    %300 = arith.minsi %c63_i32_199, %299 : i32
    %c1_i32_200 = arith.constant 1 : i32
    %301 = arith.addi %294, %c1_i32_200 : i32
    %302 = arith.addi %2, %301 : i32
    %303 = arith.index_cast %302 : i32 to index
    %304 = memref.load %arg2[%303] : memref<128xi32, #tpu.memory_space<smem>>
    %c0_i32_201 = arith.constant 0 : i32
    %c63_i32_202 = arith.constant 63 : i32
    %305 = arith.maxsi %c0_i32_201, %304 : i32
    %306 = arith.minsi %c63_i32_202, %305 : i32
    %c2_i32_203 = arith.constant 2 : i32
    %307 = arith.addi %294, %c2_i32_203 : i32
    %308 = arith.addi %2, %307 : i32
    %309 = arith.index_cast %308 : i32 to index
    %310 = memref.load %arg2[%309] : memref<128xi32, #tpu.memory_space<smem>>
    %c0_i32_204 = arith.constant 0 : i32
    %c63_i32_205 = arith.constant 63 : i32
    %311 = arith.maxsi %c0_i32_204, %310 : i32
    %312 = arith.minsi %c63_i32_205, %311 : i32
    %c3_i32_206 = arith.constant 3 : i32
    %313 = arith.addi %294, %c3_i32_206 : i32
    %314 = arith.addi %2, %313 : i32
    %315 = arith.index_cast %314 : i32 to index
    %316 = memref.load %arg2[%315] : memref<128xi32, #tpu.memory_space<smem>>
    %c0_i32_207 = arith.constant 0 : i32
    %c63_i32_208 = arith.constant 63 : i32
    %317 = arith.maxsi %c0_i32_207, %316 : i32
    %318 = arith.minsi %c63_i32_208, %317 : i32
    %c4_i32_209 = arith.constant 4 : i32
    %319 = arith.addi %294, %c4_i32_209 : i32
    %320 = arith.addi %2, %319 : i32
    %321 = arith.index_cast %320 : i32 to index
    %322 = memref.load %arg2[%321] : memref<128xi32, #tpu.memory_space<smem>>
    %c0_i32_210 = arith.constant 0 : i32
    %c63_i32_211 = arith.constant 63 : i32
    %323 = arith.maxsi %c0_i32_210, %322 : i32
    %324 = arith.minsi %c63_i32_211, %323 : i32
    %c5_i32_212 = arith.constant 5 : i32
    %325 = arith.addi %294, %c5_i32_212 : i32
    %326 = arith.addi %2, %325 : i32
    %327 = arith.index_cast %326 : i32 to index
    %328 = memref.load %arg2[%327] : memref<128xi32, #tpu.memory_space<smem>>
    %c0_i32_213 = arith.constant 0 : i32
    %c63_i32_214 = arith.constant 63 : i32
    %329 = arith.maxsi %c0_i32_213, %328 : i32
    %330 = arith.minsi %c63_i32_214, %329 : i32
    %c6_i32_215 = arith.constant 6 : i32
    %331 = arith.addi %294, %c6_i32_215 : i32
    %332 = arith.addi %2, %331 : i32
    %333 = arith.index_cast %332 : i32 to index
    %334 = memref.load %arg2[%333] : memref<128xi32, #tpu.memory_space<smem>>
    %c0_i32_216 = arith.constant 0 : i32
    %c63_i32_217 = arith.constant 63 : i32
    %335 = arith.maxsi %c0_i32_216, %334 : i32
    %336 = arith.minsi %c63_i32_217, %335 : i32
    %c7_i32_218 = arith.constant 7 : i32
    %337 = arith.addi %294, %c7_i32_218 : i32
    %338 = arith.addi %2, %337 : i32
    %339 = arith.index_cast %338 : i32 to index
    %340 = memref.load %arg2[%339] : memref<128xi32, #tpu.memory_space<smem>>
    %c0_i32_219 = arith.constant 0 : i32
    %c63_i32_220 = arith.constant 63 : i32
    %341 = arith.maxsi %c0_i32_219, %340 : i32
    %342 = arith.minsi %c63_i32_220, %341 : i32
    %c32_i32 = arith.constant 32 : i32
    %343 = arith.addi %294, %c32_i32 : i32
    %c0_i32_221 = arith.constant 0 : i32
    %344 = arith.addi %343, %c0_i32_221 : i32
    %345 = arith.addi %2, %344 : i32
    %346 = arith.index_cast %345 : i32 to index
    %347 = memref.load %arg2[%346] : memref<128xi32, #tpu.memory_space<smem>>
    %c0_i32_222 = arith.constant 0 : i32
    %c63_i32_223 = arith.constant 63 : i32
    %348 = arith.maxsi %c0_i32_222, %347 : i32
    %349 = arith.minsi %c63_i32_223, %348 : i32
    %c32_i32_224 = arith.constant 32 : i32
    %350 = arith.addi %294, %c32_i32_224 : i32
    %c1_i32_225 = arith.constant 1 : i32
    %351 = arith.addi %350, %c1_i32_225 : i32
    %352 = arith.addi %2, %351 : i32
    %353 = arith.index_cast %352 : i32 to index
    %354 = memref.load %arg2[%353] : memref<128xi32, #tpu.memory_space<smem>>
    %c0_i32_226 = arith.constant 0 : i32
    %c63_i32_227 = arith.constant 63 : i32
    %355 = arith.maxsi %c0_i32_226, %354 : i32
    %356 = arith.minsi %c63_i32_227, %355 : i32
    %c32_i32_228 = arith.constant 32 : i32
    %357 = arith.addi %294, %c32_i32_228 : i32
    %c2_i32_229 = arith.constant 2 : i32
    %358 = arith.addi %357, %c2_i32_229 : i32
    %359 = arith.addi %2, %358 : i32
    %360 = arith.index_cast %359 : i32 to index
    %361 = memref.load %arg2[%360] : memref<128xi32, #tpu.memory_space<smem>>
    %c0_i32_230 = arith.constant 0 : i32
    %c63_i32_231 = arith.constant 63 : i32
    %362 = arith.maxsi %c0_i32_230, %361 : i32
    %363 = arith.minsi %c63_i32_231, %362 : i32
    %c32_i32_232 = arith.constant 32 : i32
    %364 = arith.addi %294, %c32_i32_232 : i32
    %c3_i32_233 = arith.constant 3 : i32
    %365 = arith.addi %364, %c3_i32_233 : i32
    %366 = arith.addi %2, %365 : i32
    %367 = arith.index_cast %366 : i32 to index
    %368 = memref.load %arg2[%367] : memref<128xi32, #tpu.memory_space<smem>>
    %c0_i32_234 = arith.constant 0 : i32
    %c63_i32_235 = arith.constant 63 : i32
    %369 = arith.maxsi %c0_i32_234, %368 : i32
    %370 = arith.minsi %c63_i32_235, %369 : i32
    %c32_i32_236 = arith.constant 32 : i32
    %371 = arith.addi %294, %c32_i32_236 : i32
    %c4_i32_237 = arith.constant 4 : i32
    %372 = arith.addi %371, %c4_i32_237 : i32
    %373 = arith.addi %2, %372 : i32
    %374 = arith.index_cast %373 : i32 to index
    %375 = memref.load %arg2[%374] : memref<128xi32, #tpu.memory_space<smem>>
    %c0_i32_238 = arith.constant 0 : i32
    %c63_i32_239 = arith.constant 63 : i32
    %376 = arith.maxsi %c0_i32_238, %375 : i32
    %377 = arith.minsi %c63_i32_239, %376 : i32
    %c32_i32_240 = arith.constant 32 : i32
    %378 = arith.addi %294, %c32_i32_240 : i32
    %c5_i32_241 = arith.constant 5 : i32
    %379 = arith.addi %378, %c5_i32_241 : i32
    %380 = arith.addi %2, %379 : i32
    %381 = arith.index_cast %380 : i32 to index
    %382 = memref.load %arg2[%381] : memref<128xi32, #tpu.memory_space<smem>>
    %c0_i32_242 = arith.constant 0 : i32
    %c63_i32_243 = arith.constant 63 : i32
    %383 = arith.maxsi %c0_i32_242, %382 : i32
    %384 = arith.minsi %c63_i32_243, %383 : i32
    %c32_i32_244 = arith.constant 32 : i32
    %385 = arith.addi %294, %c32_i32_244 : i32
    %c6_i32_245 = arith.constant 6 : i32
    %386 = arith.addi %385, %c6_i32_245 : i32
    %387 = arith.addi %2, %386 : i32
    %388 = arith.index_cast %387 : i32 to index
    %389 = memref.load %arg2[%388] : memref<128xi32, #tpu.memory_space<smem>>
    %c0_i32_246 = arith.constant 0 : i32
    %c63_i32_247 = arith.constant 63 : i32
    %390 = arith.maxsi %c0_i32_246, %389 : i32
    %391 = arith.minsi %c63_i32_247, %390 : i32
    %c32_i32_248 = arith.constant 32 : i32
    %392 = arith.addi %294, %c32_i32_248 : i32
    %c7_i32_249 = arith.constant 7 : i32
    %393 = arith.addi %392, %c7_i32_249 : i32
    %394 = arith.addi %2, %393 : i32
    %395 = arith.index_cast %394 : i32 to index
    %396 = memref.load %arg2[%395] : memref<128xi32, #tpu.memory_space<smem>>
    %c0_i32_250 = arith.constant 0 : i32
    %c63_i32_251 = arith.constant 63 : i32
    %397 = arith.maxsi %c0_i32_250, %396 : i32
    %398 = arith.minsi %c63_i32_251, %397 : i32
    %c0_i32_252 = arith.constant 0 : i32
    %399 = arith.addi %294, %c0_i32_252 : i32
    %c31_i32_253 = arith.constant 31 : i32
    %400 = arith.andi %399, %c31_i32_253 : i32
    %c0_i32_254 = arith.constant 0 : i32
    %401 = tpu.memref_slice %arg3[%300, %c0_i32_254] : memref<64x128xf32, #tpu.memory_space<any>> -> memref<1x128xf32, #tpu.memory_space<any>>
    %c0_i32_255 = arith.constant 0 : i32
    %402 = tpu.memref_slice %arg8[%399, %c0_i32_255] : memref<64x128xf32, #tpu.memory_space<vmem>> -> memref<1x128xf32, #tpu.memory_space<vmem>>
    %403 = tpu.memref_slice %arg9[%400] : memref<32x!tpu.dma_semaphore, #tpu.memory_space<semaphore_mem>> -> memref<1x!tpu.dma_semaphore, #tpu.memory_space<semaphore_mem>>
    %404 = tpu.memref_squeeze %403 : memref<1x!tpu.dma_semaphore, #tpu.memory_space<semaphore_mem>> -> memref<!tpu.dma_semaphore, #tpu.memory_space<semaphore_mem>>
    tpu.wait_dma2 semaphore(%404 : memref<!tpu.dma_semaphore, #tpu.memory_space<semaphore_mem>>) src(%401 : memref<1x128xf32, #tpu.memory_space<any>>) dst(%402 : memref<1x128xf32, #tpu.memory_space<vmem>>)
    %c32_i32_256 = arith.constant 32 : i32
    %405 = arith.addi %294, %c32_i32_256 : i32
    %c0_i32_257 = arith.constant 0 : i32
    %406 = arith.addi %405, %c0_i32_257 : i32
    %c31_i32_258 = arith.constant 31 : i32
    %407 = arith.andi %406, %c31_i32_258 : i32
    %c0_i32_259 = arith.constant 0 : i32
    %408 = tpu.memref_slice %arg3[%349, %c0_i32_259] : memref<64x128xf32, #tpu.memory_space<any>> -> memref<1x128xf32, #tpu.memory_space<any>>
    %c0_i32_260 = arith.constant 0 : i32
    %409 = tpu.memref_slice %arg8[%406, %c0_i32_260] : memref<64x128xf32, #tpu.memory_space<vmem>> -> memref<1x128xf32, #tpu.memory_space<vmem>>
    %410 = tpu.memref_slice %arg9[%407] : memref<32x!tpu.dma_semaphore, #tpu.memory_space<semaphore_mem>> -> memref<1x!tpu.dma_semaphore, #tpu.memory_space<semaphore_mem>>
    %411 = tpu.memref_squeeze %410 : memref<1x!tpu.dma_semaphore, #tpu.memory_space<semaphore_mem>> -> memref<!tpu.dma_semaphore, #tpu.memory_space<semaphore_mem>>
    tpu.enqueue_dma source(%408 : memref<1x128xf32, #tpu.memory_space<any>>) target(%409 : memref<1x128xf32, #tpu.memory_space<vmem>>) target_semaphore(%411 : memref<!tpu.dma_semaphore, #tpu.memory_space<semaphore_mem>>)
    %c1_i32_261 = arith.constant 1 : i32
    %412 = arith.addi %294, %c1_i32_261 : i32
    %c31_i32_262 = arith.constant 31 : i32
    %413 = arith.andi %412, %c31_i32_262 : i32
    %c0_i32_263 = arith.constant 0 : i32
    %414 = tpu.memref_slice %arg3[%306, %c0_i32_263] : memref<64x128xf32, #tpu.memory_space<any>> -> memref<1x128xf32, #tpu.memory_space<any>>
    %c0_i32_264 = arith.constant 0 : i32
    %415 = tpu.memref_slice %arg8[%412, %c0_i32_264] : memref<64x128xf32, #tpu.memory_space<vmem>> -> memref<1x128xf32, #tpu.memory_space<vmem>>
    %416 = tpu.memref_slice %arg9[%413] : memref<32x!tpu.dma_semaphore, #tpu.memory_space<semaphore_mem>> -> memref<1x!tpu.dma_semaphore, #tpu.memory_space<semaphore_mem>>
    %417 = tpu.memref_squeeze %416 : memref<1x!tpu.dma_semaphore, #tpu.memory_space<semaphore_mem>> -> memref<!tpu.dma_semaphore, #tpu.memory_space<semaphore_mem>>
    tpu.wait_dma2 semaphore(%417 : memref<!tpu.dma_semaphore, #tpu.memory_space<semaphore_mem>>) src(%414 : memref<1x128xf32, #tpu.memory_space<any>>) dst(%415 : memref<1x128xf32, #tpu.memory_space<vmem>>)
    %c32_i32_265 = arith.constant 32 : i32
    %418 = arith.addi %294, %c32_i32_265 : i32
    %c1_i32_266 = arith.constant 1 : i32
    %419 = arith.addi %418, %c1_i32_266 : i32
    %c31_i32_267 = arith.constant 31 : i32
    %420 = arith.andi %419, %c31_i32_267 : i32
    %c0_i32_268 = arith.constant 0 : i32
    %421 = tpu.memref_slice %arg3[%356, %c0_i32_268] : memref<64x128xf32, #tpu.memory_space<any>> -> memref<1x128xf32, #tpu.memory_space<any>>
    %c0_i32_269 = arith.constant 0 : i32
    %422 = tpu.memref_slice %arg8[%419, %c0_i32_269] : memref<64x128xf32, #tpu.memory_space<vmem>> -> memref<1x128xf32, #tpu.memory_space<vmem>>
    %423 = tpu.memref_slice %arg9[%420] : memref<32x!tpu.dma_semaphore, #tpu.memory_space<semaphore_mem>> -> memref<1x!tpu.dma_semaphore, #tpu.memory_space<semaphore_mem>>
    %424 = tpu.memref_squeeze %423 : memref<1x!tpu.dma_semaphore, #tpu.memory_space<semaphore_mem>> -> memref<!tpu.dma_semaphore, #tpu.memory_space<semaphore_mem>>
    tpu.enqueue_dma source(%421 : memref<1x128xf32, #tpu.memory_space<any>>) target(%422 : memref<1x128xf32, #tpu.memory_space<vmem>>) target_semaphore(%424 : memref<!tpu.dma_semaphore, #tpu.memory_space<semaphore_mem>>)
    %c2_i32_270 = arith.constant 2 : i32
    %425 = arith.addi %294, %c2_i32_270 : i32
    %c31_i32_271 = arith.constant 31 : i32
    %426 = arith.andi %425, %c31_i32_271 : i32
    %c0_i32_272 = arith.constant 0 : i32
    %427 = tpu.memref_slice %arg3[%312, %c0_i32_272] : memref<64x128xf32, #tpu.memory_space<any>> -> memref<1x128xf32, #tpu.memory_space<any>>
    %c0_i32_273 = arith.constant 0 : i32
    %428 = tpu.memref_slice %arg8[%425, %c0_i32_273] : memref<64x128xf32, #tpu.memory_space<vmem>> -> memref<1x128xf32, #tpu.memory_space<vmem>>
    %429 = tpu.memref_slice %arg9[%426] : memref<32x!tpu.dma_semaphore, #tpu.memory_space<semaphore_mem>> -> memref<1x!tpu.dma_semaphore, #tpu.memory_space<semaphore_mem>>
    %430 = tpu.memref_squeeze %429 : memref<1x!tpu.dma_semaphore, #tpu.memory_space<semaphore_mem>> -> memref<!tpu.dma_semaphore, #tpu.memory_space<semaphore_mem>>
    tpu.wait_dma2 semaphore(%430 : memref<!tpu.dma_semaphore, #tpu.memory_space<semaphore_mem>>) src(%427 : memref<1x128xf32, #tpu.memory_space<any>>) dst(%428 : memref<1x128xf32, #tpu.memory_space<vmem>>)
    %c32_i32_274 = arith.constant 32 : i32
    %431 = arith.addi %294, %c32_i32_274 : i32
    %c2_i32_275 = arith.constant 2 : i32
    %432 = arith.addi %431, %c2_i32_275 : i32
    %c31_i32_276 = arith.constant 31 : i32
    %433 = arith.andi %432, %c31_i32_276 : i32
    %c0_i32_277 = arith.constant 0 : i32
    %434 = tpu.memref_slice %arg3[%363, %c0_i32_277] : memref<64x128xf32, #tpu.memory_space<any>> -> memref<1x128xf32, #tpu.memory_space<any>>
    %c0_i32_278 = arith.constant 0 : i32
    %435 = tpu.memref_slice %arg8[%432, %c0_i32_278] : memref<64x128xf32, #tpu.memory_space<vmem>> -> memref<1x128xf32, #tpu.memory_space<vmem>>
    %436 = tpu.memref_slice %arg9[%433] : memref<32x!tpu.dma_semaphore, #tpu.memory_space<semaphore_mem>> -> memref<1x!tpu.dma_semaphore, #tpu.memory_space<semaphore_mem>>
    %437 = tpu.memref_squeeze %436 : memref<1x!tpu.dma_semaphore, #tpu.memory_space<semaphore_mem>> -> memref<!tpu.dma_semaphore, #tpu.memory_space<semaphore_mem>>
    tpu.enqueue_dma source(%434 : memref<1x128xf32, #tpu.memory_space<any>>) target(%435 : memref<1x128xf32, #tpu.memory_space<vmem>>) target_semaphore(%437 : memref<!tpu.dma_semaphore, #tpu.memory_space<semaphore_mem>>)
    %c3_i32_279 = arith.constant 3 : i32
    %438 = arith.addi %294, %c3_i32_279 : i32
    %c31_i32_280 = arith.constant 31 : i32
    %439 = arith.andi %438, %c31_i32_280 : i32
    %c0_i32_281 = arith.constant 0 : i32
    %440 = tpu.memref_slice %arg3[%318, %c0_i32_281] : memref<64x128xf32, #tpu.memory_space<any>> -> memref<1x128xf32, #tpu.memory_space<any>>
    %c0_i32_282 = arith.constant 0 : i32
    %441 = tpu.memref_slice %arg8[%438, %c0_i32_282] : memref<64x128xf32, #tpu.memory_space<vmem>> -> memref<1x128xf32, #tpu.memory_space<vmem>>
    %442 = tpu.memref_slice %arg9[%439] : memref<32x!tpu.dma_semaphore, #tpu.memory_space<semaphore_mem>> -> memref<1x!tpu.dma_semaphore, #tpu.memory_space<semaphore_mem>>
    %443 = tpu.memref_squeeze %442 : memref<1x!tpu.dma_semaphore, #tpu.memory_space<semaphore_mem>> -> memref<!tpu.dma_semaphore, #tpu.memory_space<semaphore_mem>>
    tpu.wait_dma2 semaphore(%443 : memref<!tpu.dma_semaphore, #tpu.memory_space<semaphore_mem>>) src(%440 : memref<1x128xf32, #tpu.memory_space<any>>) dst(%441 : memref<1x128xf32, #tpu.memory_space<vmem>>)
    %c32_i32_283 = arith.constant 32 : i32
    %444 = arith.addi %294, %c32_i32_283 : i32
    %c3_i32_284 = arith.constant 3 : i32
    %445 = arith.addi %444, %c3_i32_284 : i32
    %c31_i32_285 = arith.constant 31 : i32
    %446 = arith.andi %445, %c31_i32_285 : i32
    %c0_i32_286 = arith.constant 0 : i32
    %447 = tpu.memref_slice %arg3[%370, %c0_i32_286] : memref<64x128xf32, #tpu.memory_space<any>> -> memref<1x128xf32, #tpu.memory_space<any>>
    %c0_i32_287 = arith.constant 0 : i32
    %448 = tpu.memref_slice %arg8[%445, %c0_i32_287] : memref<64x128xf32, #tpu.memory_space<vmem>> -> memref<1x128xf32, #tpu.memory_space<vmem>>
    %449 = tpu.memref_slice %arg9[%446] : memref<32x!tpu.dma_semaphore, #tpu.memory_space<semaphore_mem>> -> memref<1x!tpu.dma_semaphore, #tpu.memory_space<semaphore_mem>>
    %450 = tpu.memref_squeeze %449 : memref<1x!tpu.dma_semaphore, #tpu.memory_space<semaphore_mem>> -> memref<!tpu.dma_semaphore, #tpu.memory_space<semaphore_mem>>
    tpu.enqueue_dma source(%447 : memref<1x128xf32, #tpu.memory_space<any>>) target(%448 : memref<1x128xf32, #tpu.memory_space<vmem>>) target_semaphore(%450 : memref<!tpu.dma_semaphore, #tpu.memory_space<semaphore_mem>>)
    %c4_i32_288 = arith.constant 4 : i32
    %451 = arith.addi %294, %c4_i32_288 : i32
    %c31_i32_289 = arith.constant 31 : i32
    %452 = arith.andi %451, %c31_i32_289 : i32
    %c0_i32_290 = arith.constant 0 : i32
    %453 = tpu.memref_slice %arg3[%324, %c0_i32_290] : memref<64x128xf32, #tpu.memory_space<any>> -> memref<1x128xf32, #tpu.memory_space<any>>
    %c0_i32_291 = arith.constant 0 : i32
    %454 = tpu.memref_slice %arg8[%451, %c0_i32_291] : memref<64x128xf32, #tpu.memory_space<vmem>> -> memref<1x128xf32, #tpu.memory_space<vmem>>
    %455 = tpu.memref_slice %arg9[%452] : memref<32x!tpu.dma_semaphore, #tpu.memory_space<semaphore_mem>> -> memref<1x!tpu.dma_semaphore, #tpu.memory_space<semaphore_mem>>
    %456 = tpu.memref_squeeze %455 : memref<1x!tpu.dma_semaphore, #tpu.memory_space<semaphore_mem>> -> memref<!tpu.dma_semaphore, #tpu.memory_space<semaphore_mem>>
    tpu.wait_dma2 semaphore(%456 : memref<!tpu.dma_semaphore, #tpu.memory_space<semaphore_mem>>) src(%453 : memref<1x128xf32, #tpu.memory_space<any>>) dst(%454 : memref<1x128xf32, #tpu.memory_space<vmem>>)
    %c32_i32_292 = arith.constant 32 : i32
    %457 = arith.addi %294, %c32_i32_292 : i32
    %c4_i32_293 = arith.constant 4 : i32
    %458 = arith.addi %457, %c4_i32_293 : i32
    %c31_i32_294 = arith.constant 31 : i32
    %459 = arith.andi %458, %c31_i32_294 : i32
    %c0_i32_295 = arith.constant 0 : i32
    %460 = tpu.memref_slice %arg3[%377, %c0_i32_295] : memref<64x128xf32, #tpu.memory_space<any>> -> memref<1x128xf32, #tpu.memory_space<any>>
    %c0_i32_296 = arith.constant 0 : i32
    %461 = tpu.memref_slice %arg8[%458, %c0_i32_296] : memref<64x128xf32, #tpu.memory_space<vmem>> -> memref<1x128xf32, #tpu.memory_space<vmem>>
    %462 = tpu.memref_slice %arg9[%459] : memref<32x!tpu.dma_semaphore, #tpu.memory_space<semaphore_mem>> -> memref<1x!tpu.dma_semaphore, #tpu.memory_space<semaphore_mem>>
    %463 = tpu.memref_squeeze %462 : memref<1x!tpu.dma_semaphore, #tpu.memory_space<semaphore_mem>> -> memref<!tpu.dma_semaphore, #tpu.memory_space<semaphore_mem>>
    tpu.enqueue_dma source(%460 : memref<1x128xf32, #tpu.memory_space<any>>) target(%461 : memref<1x128xf32, #tpu.memory_space<vmem>>) target_semaphore(%463 : memref<!tpu.dma_semaphore, #tpu.memory_space<semaphore_mem>>)
    %c5_i32_297 = arith.constant 5 : i32
    %464 = arith.addi %294, %c5_i32_297 : i32
    %c31_i32_298 = arith.constant 31 : i32
    %465 = arith.andi %464, %c31_i32_298 : i32
    %c0_i32_299 = arith.constant 0 : i32
    %466 = tpu.memref_slice %arg3[%330, %c0_i32_299] : memref<64x128xf32, #tpu.memory_space<any>> -> memref<1x128xf32, #tpu.memory_space<any>>
    %c0_i32_300 = arith.constant 0 : i32
    %467 = tpu.memref_slice %arg8[%464, %c0_i32_300] : memref<64x128xf32, #tpu.memory_space<vmem>> -> memref<1x128xf32, #tpu.memory_space<vmem>>
    %468 = tpu.memref_slice %arg9[%465] : memref<32x!tpu.dma_semaphore, #tpu.memory_space<semaphore_mem>> -> memref<1x!tpu.dma_semaphore, #tpu.memory_space<semaphore_mem>>
    %469 = tpu.memref_squeeze %468 : memref<1x!tpu.dma_semaphore, #tpu.memory_space<semaphore_mem>> -> memref<!tpu.dma_semaphore, #tpu.memory_space<semaphore_mem>>
    tpu.wait_dma2 semaphore(%469 : memref<!tpu.dma_semaphore, #tpu.memory_space<semaphore_mem>>) src(%466 : memref<1x128xf32, #tpu.memory_space<any>>) dst(%467 : memref<1x128xf32, #tpu.memory_space<vmem>>)
    %c32_i32_301 = arith.constant 32 : i32
    %470 = arith.addi %294, %c32_i32_301 : i32
    %c5_i32_302 = arith.constant 5 : i32
    %471 = arith.addi %470, %c5_i32_302 : i32
    %c31_i32_303 = arith.constant 31 : i32
    %472 = arith.andi %471, %c31_i32_303 : i32
    %c0_i32_304 = arith.constant 0 : i32
    %473 = tpu.memref_slice %arg3[%384, %c0_i32_304] : memref<64x128xf32, #tpu.memory_space<any>> -> memref<1x128xf32, #tpu.memory_space<any>>
    %c0_i32_305 = arith.constant 0 : i32
    %474 = tpu.memref_slice %arg8[%471, %c0_i32_305] : memref<64x128xf32, #tpu.memory_space<vmem>> -> memref<1x128xf32, #tpu.memory_space<vmem>>
    %475 = tpu.memref_slice %arg9[%472] : memref<32x!tpu.dma_semaphore, #tpu.memory_space<semaphore_mem>> -> memref<1x!tpu.dma_semaphore, #tpu.memory_space<semaphore_mem>>
    %476 = tpu.memref_squeeze %475 : memref<1x!tpu.dma_semaphore, #tpu.memory_space<semaphore_mem>> -> memref<!tpu.dma_semaphore, #tpu.memory_space<semaphore_mem>>
    tpu.enqueue_dma source(%473 : memref<1x128xf32, #tpu.memory_space<any>>) target(%474 : memref<1x128xf32, #tpu.memory_space<vmem>>) target_semaphore(%476 : memref<!tpu.dma_semaphore, #tpu.memory_space<semaphore_mem>>)
    %c6_i32_306 = arith.constant 6 : i32
    %477 = arith.addi %294, %c6_i32_306 : i32
    %c31_i32_307 = arith.constant 31 : i32
    %478 = arith.andi %477, %c31_i32_307 : i32
    %c0_i32_308 = arith.constant 0 : i32
    %479 = tpu.memref_slice %arg3[%336, %c0_i32_308] : memref<64x128xf32, #tpu.memory_space<any>> -> memref<1x128xf32, #tpu.memory_space<any>>
    %c0_i32_309 = arith.constant 0 : i32
    %480 = tpu.memref_slice %arg8[%477, %c0_i32_309] : memref<64x128xf32, #tpu.memory_space<vmem>> -> memref<1x128xf32, #tpu.memory_space<vmem>>
    %481 = tpu.memref_slice %arg9[%478] : memref<32x!tpu.dma_semaphore, #tpu.memory_space<semaphore_mem>> -> memref<1x!tpu.dma_semaphore, #tpu.memory_space<semaphore_mem>>
    %482 = tpu.memref_squeeze %481 : memref<1x!tpu.dma_semaphore, #tpu.memory_space<semaphore_mem>> -> memref<!tpu.dma_semaphore, #tpu.memory_space<semaphore_mem>>
    tpu.wait_dma2 semaphore(%482 : memref<!tpu.dma_semaphore, #tpu.memory_space<semaphore_mem>>) src(%479 : memref<1x128xf32, #tpu.memory_space<any>>) dst(%480 : memref<1x128xf32, #tpu.memory_space<vmem>>)
    %c32_i32_310 = arith.constant 32 : i32
    %483 = arith.addi %294, %c32_i32_310 : i32
    %c6_i32_311 = arith.constant 6 : i32
    %484 = arith.addi %483, %c6_i32_311 : i32
    %c31_i32_312 = arith.constant 31 : i32
    %485 = arith.andi %484, %c31_i32_312 : i32
    %c0_i32_313 = arith.constant 0 : i32
    %486 = tpu.memref_slice %arg3[%391, %c0_i32_313] : memref<64x128xf32, #tpu.memory_space<any>> -> memref<1x128xf32, #tpu.memory_space<any>>
    %c0_i32_314 = arith.constant 0 : i32
    %487 = tpu.memref_slice %arg8[%484, %c0_i32_314] : memref<64x128xf32, #tpu.memory_space<vmem>> -> memref<1x128xf32, #tpu.memory_space<vmem>>
    %488 = tpu.memref_slice %arg9[%485] : memref<32x!tpu.dma_semaphore, #tpu.memory_space<semaphore_mem>> -> memref<1x!tpu.dma_semaphore, #tpu.memory_space<semaphore_mem>>
    %489 = tpu.memref_squeeze %488 : memref<1x!tpu.dma_semaphore, #tpu.memory_space<semaphore_mem>> -> memref<!tpu.dma_semaphore, #tpu.memory_space<semaphore_mem>>
    tpu.enqueue_dma source(%486 : memref<1x128xf32, #tpu.memory_space<any>>) target(%487 : memref<1x128xf32, #tpu.memory_space<vmem>>) target_semaphore(%489 : memref<!tpu.dma_semaphore, #tpu.memory_space<semaphore_mem>>)
    %c7_i32_315 = arith.constant 7 : i32
    %490 = arith.addi %294, %c7_i32_315 : i32
    %c31_i32_316 = arith.constant 31 : i32
    %491 = arith.andi %490, %c31_i32_316 : i32
    %c0_i32_317 = arith.constant 0 : i32
    %492 = tpu.memref_slice %arg3[%342, %c0_i32_317] : memref<64x128xf32, #tpu.memory_space<any>> -> memref<1x128xf32, #tpu.memory_space<any>>
    %c0_i32_318 = arith.constant 0 : i32
    %493 = tpu.memref_slice %arg8[%490, %c0_i32_318] : memref<64x128xf32, #tpu.memory_space<vmem>> -> memref<1x128xf32, #tpu.memory_space<vmem>>
    %494 = tpu.memref_slice %arg9[%491] : memref<32x!tpu.dma_semaphore, #tpu.memory_space<semaphore_mem>> -> memref<1x!tpu.dma_semaphore, #tpu.memory_space<semaphore_mem>>
    %495 = tpu.memref_squeeze %494 : memref<1x!tpu.dma_semaphore, #tpu.memory_space<semaphore_mem>> -> memref<!tpu.dma_semaphore, #tpu.memory_space<semaphore_mem>>
    tpu.wait_dma2 semaphore(%495 : memref<!tpu.dma_semaphore, #tpu.memory_space<semaphore_mem>>) src(%492 : memref<1x128xf32, #tpu.memory_space<any>>) dst(%493 : memref<1x128xf32, #tpu.memory_space<vmem>>)
    %c32_i32_319 = arith.constant 32 : i32
    %496 = arith.addi %294, %c32_i32_319 : i32
    %c7_i32_320 = arith.constant 7 : i32
    %497 = arith.addi %496, %c7_i32_320 : i32
    %c31_i32_321 = arith.constant 31 : i32
    %498 = arith.andi %497, %c31_i32_321 : i32
    %c0_i32_322 = arith.constant 0 : i32
    %499 = tpu.memref_slice %arg3[%398, %c0_i32_322] : memref<64x128xf32, #tpu.memory_space<any>> -> memref<1x128xf32, #tpu.memory_space<any>>
    %c0_i32_323 = arith.constant 0 : i32
    %500 = tpu.memref_slice %arg8[%497, %c0_i32_323] : memref<64x128xf32, #tpu.memory_space<vmem>> -> memref<1x128xf32, #tpu.memory_space<vmem>>
    %501 = tpu.memref_slice %arg9[%498] : memref<32x!tpu.dma_semaphore, #tpu.memory_space<semaphore_mem>> -> memref<1x!tpu.dma_semaphore, #tpu.memory_space<semaphore_mem>>
    %502 = tpu.memref_squeeze %501 : memref<1x!tpu.dma_semaphore, #tpu.memory_space<semaphore_mem>> -> memref<!tpu.dma_semaphore, #tpu.memory_space<semaphore_mem>>
    tpu.enqueue_dma source(%499 : memref<1x128xf32, #tpu.memory_space<any>>) target(%500 : memref<1x128xf32, #tpu.memory_space<vmem>>) target_semaphore(%502 : memref<!tpu.dma_semaphore, #tpu.memory_space<semaphore_mem>>)
    %503 = arith.index_cast %294 : i32 to index
    %c0_324 = arith.constant 0 : index
    %504 = vector.load %arg8[%503, %c0_324] : memref<64x128xf32, #tpu.memory_space<vmem>>, vector<8x128xf32>
    %505 = arith.index_cast %294 : i32 to index
    %c0_325 = arith.constant 0 : index
    %506 = vector.load %arg4[%505, %c0_325] : memref<64x128xf32, #tpu.memory_space<vmem>>, vector<8x128xf32>
    %507 = arith.addf %504, %506 : vector<8x128xf32>
    %cst_326 = arith.constant dense<0.000000e+00> : vector<8xf32>
    %508 = vector.multi_reduction <add>, %507, %cst_326 [1] : vector<8x128xf32> to vector<8xf32>
    %509 = vector.shape_cast %508 : vector<8xf32> to vector<8x1xf32>
    %510 = vector.broadcast %cst : f32 to vector<8x1xf32>
    %511 = arith.mulf %509, %510 : vector<8x1xf32>
    %512 = vector.broadcast %511 : vector<8x1xf32> to vector<8x128xf32>
    %513 = arith.subf %507, %512 : vector<8x128xf32>
    %514 = arith.mulf %513, %513 : vector<8x128xf32>
    %cst_327 = arith.constant dense<0.000000e+00> : vector<8xf32>
    %515 = vector.multi_reduction <add>, %514, %cst_327 [1] : vector<8x128xf32> to vector<8xf32>
    %516 = vector.shape_cast %515 : vector<8xf32> to vector<8x1xf32>
    %517 = vector.broadcast %cst : f32 to vector<8x1xf32>
    %518 = arith.mulf %516, %517 : vector<8x1xf32>
    %cst_328 = arith.constant 9.99999996E-13 : f32
    %519 = vector.broadcast %cst_328 : f32 to vector<8x1xf32>
    %520 = arith.addf %518, %519 : vector<8x1xf32>
    %521 = math.rsqrt %520 : vector<8x1xf32>
    %522 = vector.broadcast %521 : vector<8x1xf32> to vector<8x128xf32>
    %523 = arith.mulf %513, %522 : vector<8x128xf32>
    %524 = vector.broadcast %291 : vector<1x128xf32> to vector<8x128xf32>
    %525 = arith.mulf %523, %524 : vector<8x128xf32>
    %526 = vector.broadcast %292 : vector<1x128xf32> to vector<8x128xf32>
    %527 = arith.addf %525, %526 : vector<8x128xf32>
    %c0_329 = arith.constant 0 : index
    %528 = arith.index_cast %294 : i32 to index
    %c0_330 = arith.constant 0 : index
    %529 = vector.load %arg7[%c0_329, %528, %c0_330] : memref<1x64x128xf32, #tpu.memory_space<vmem>>, vector<1x8x128xf32>
    %530 = vector.shape_cast %529 : vector<1x8x128xf32> to vector<8x128xf32>
    %531 = vector.shape_cast %527 : vector<8x128xf32> to vector<1x8x128xf32>
    tpu.vector_store %arg7[%c0_329, %528, %c0_330], %531 {strides = array<i32>} : memref<1x64x128xf32, #tpu.memory_space<vmem>>, vector<1x8x128xf32>,
    %c1_i32_331 = arith.constant 1 : i32
    %c8_i32_332 = arith.constant 8 : i32
    %532 = arith.muli %c1_i32_331, %c8_i32_332 : i32
    %533 = tpu.assume_multiple %532, 8 : i32
    %c0_i32_333 = arith.constant 0 : i32
    %534 = arith.addi %533, %c0_i32_333 : i32
    %535 = arith.addi %2, %534 : i32
    %536 = arith.index_cast %535 : i32 to index
    %537 = memref.load %arg2[%536] : memref<128xi32, #tpu.memory_space<smem>>
    %c0_i32_334 = arith.constant 0 : i32
    %c63_i32_335 = arith.constant 63 : i32
    %538 = arith.maxsi %c0_i32_334, %537 : i32
    %539 = arith.minsi %c63_i32_335, %538 : i32
    %c1_i32_336 = arith.constant 1 : i32
    %540 = arith.addi %533, %c1_i32_336 : i32
    %541 = arith.addi %2, %540 : i32
    %542 = arith.index_cast %541 : i32 to index
    %543 = memref.load %arg2[%542] : memref<128xi32, #tpu.memory_space<smem>>
    %c0_i32_337 = arith.constant 0 : i32
    %c63_i32_338 = arith.constant 63 : i32
    %544 = arith.maxsi %c0_i32_337, %543 : i32
    %545 = arith.minsi %c63_i32_338, %544 : i32
    %c2_i32_339 = arith.constant 2 : i32
    %546 = arith.addi %533, %c2_i32_339 : i32
    %547 = arith.addi %2, %546 : i32
    %548 = arith.index_cast %547 : i32 to index
    %549 = memref.load %arg2[%548] : memref<128xi32, #tpu.memory_space<smem>>
    %c0_i32_340 = arith.constant 0 : i32
    %c63_i32_341 = arith.constant 63 : i32
    %550 = arith.maxsi %c0_i32_340, %549 : i32
    %551 = arith.minsi %c63_i32_341, %550 : i32
    %c3_i32_342 = arith.constant 3 : i32
    %552 = arith.addi %533, %c3_i32_342 : i32
    %553 = arith.addi %2, %552 : i32
    %554 = arith.index_cast %553 : i32 to index
    %555 = memref.load %arg2[%554] : memref<128xi32, #tpu.memory_space<smem>>
    %c0_i32_343 = arith.constant 0 : i32
    %c63_i32_344 = arith.constant 63 : i32
    %556 = arith.maxsi %c0_i32_343, %555 : i32
    %557 = arith.minsi %c63_i32_344, %556 : i32
    %c4_i32_345 = arith.constant 4 : i32
    %558 = arith.addi %533, %c4_i32_345 : i32
    %559 = arith.addi %2, %558 : i32
    %560 = arith.index_cast %559 : i32 to index
    %561 = memref.load %arg2[%560] : memref<128xi32, #tpu.memory_space<smem>>
    %c0_i32_346 = arith.constant 0 : i32
    %c63_i32_347 = arith.constant 63 : i32
    %562 = arith.maxsi %c0_i32_346, %561 : i32
    %563 = arith.minsi %c63_i32_347, %562 : i32
    %c5_i32_348 = arith.constant 5 : i32
    %564 = arith.addi %533, %c5_i32_348 : i32
    %565 = arith.addi %2, %564 : i32
    %566 = arith.index_cast %565 : i32 to index
    %567 = memref.load %arg2[%566] : memref<128xi32, #tpu.memory_space<smem>>
    %c0_i32_349 = arith.constant 0 : i32
    %c63_i32_350 = arith.constant 63 : i32
    %568 = arith.maxsi %c0_i32_349, %567 : i32
    %569 = arith.minsi %c63_i32_350, %568 : i32
    %c6_i32_351 = arith.constant 6 : i32
    %570 = arith.addi %533, %c6_i32_351 : i32
    %571 = arith.addi %2, %570 : i32
    %572 = arith.index_cast %571 : i32 to index
    %573 = memref.load %arg2[%572] : memref<128xi32, #tpu.memory_space<smem>>
    %c0_i32_352 = arith.constant 0 : i32
    %c63_i32_353 = arith.constant 63 : i32
    %574 = arith.maxsi %c0_i32_352, %573 : i32
    %575 = arith.minsi %c63_i32_353, %574 : i32
    %c7_i32_354 = arith.constant 7 : i32
    %576 = arith.addi %533, %c7_i32_354 : i32
    %577 = arith.addi %2, %576 : i32
    %578 = arith.index_cast %577 : i32 to index
    %579 = memref.load %arg2[%578] : memref<128xi32, #tpu.memory_space<smem>>
    %c0_i32_355 = arith.constant 0 : i32
    %c63_i32_356 = arith.constant 63 : i32
    %580 = arith.maxsi %c0_i32_355, %579 : i32
    %581 = arith.minsi %c63_i32_356, %580 : i32
    %c32_i32_357 = arith.constant 32 : i32
    %582 = arith.addi %533, %c32_i32_357 : i32
    %c0_i32_358 = arith.constant 0 : i32
    %583 = arith.addi %582, %c0_i32_358 : i32
    %584 = arith.addi %2, %583 : i32
    %585 = arith.index_cast %584 : i32 to index
    %586 = memref.load %arg2[%585] : memref<128xi32, #tpu.memory_space<smem>>
    %c0_i32_359 = arith.constant 0 : i32
    %c63_i32_360 = arith.constant 63 : i32
    %587 = arith.maxsi %c0_i32_359, %586 : i32
    %588 = arith.minsi %c63_i32_360, %587 : i32
    %c32_i32_361 = arith.constant 32 : i32
    %589 = arith.addi %533, %c32_i32_361 : i32
    %c1_i32_362 = arith.constant 1 : i32
    %590 = arith.addi %589, %c1_i32_362 : i32
    %591 = arith.addi %2, %590 : i32
    %592 = arith.index_cast %591 : i32 to index
    %593 = memref.load %arg2[%592] : memref<128xi32, #tpu.memory_space<smem>>
    %c0_i32_363 = arith.constant 0 : i32
    %c63_i32_364 = arith.constant 63 : i32
    %594 = arith.maxsi %c0_i32_363, %593 : i32
    %595 = arith.minsi %c63_i32_364, %594 : i32
    %c32_i32_365 = arith.constant 32 : i32
    %596 = arith.addi %533, %c32_i32_365 : i32
    %c2_i32_366 = arith.constant 2 : i32
    %597 = arith.addi %596, %c2_i32_366 : i32
    %598 = arith.addi %2, %597 : i32
    %599 = arith.index_cast %598 : i32 to index
    %600 = memref.load %arg2[%599] : memref<128xi32, #tpu.memory_space<smem>>
    %c0_i32_367 = arith.constant 0 : i32
    %c63_i32_368 = arith.constant 63 : i32
    %601 = arith.maxsi %c0_i32_367, %600 : i32
    %602 = arith.minsi %c63_i32_368, %601 : i32
    %c32_i32_369 = arith.constant 32 : i32
    %603 = arith.addi %533, %c32_i32_369 : i32
    %c3_i32_370 = arith.constant 3 : i32
    %604 = arith.addi %603, %c3_i32_370 : i32
    %605 = arith.addi %2, %604 : i32
    %606 = arith.index_cast %605 : i32 to index
    %607 = memref.load %arg2[%606] : memref<128xi32, #tpu.memory_space<smem>>
    %c0_i32_371 = arith.constant 0 : i32
    %c63_i32_372 = arith.constant 63 : i32
    %608 = arith.maxsi %c0_i32_371, %607 : i32
    %609 = arith.minsi %c63_i32_372, %608 : i32
    %c32_i32_373 = arith.constant 32 : i32
    %610 = arith.addi %533, %c32_i32_373 : i32
    %c4_i32_374 = arith.constant 4 : i32
    %611 = arith.addi %610, %c4_i32_374 : i32
    %612 = arith.addi %2, %611 : i32
    %613 = arith.index_cast %612 : i32 to index
    %614 = memref.load %arg2[%613] : memref<128xi32, #tpu.memory_space<smem>>
    %c0_i32_375 = arith.constant 0 : i32
    %c63_i32_376 = arith.constant 63 : i32
    %615 = arith.maxsi %c0_i32_375, %614 : i32
    %616 = arith.minsi %c63_i32_376, %615 : i32
    %c32_i32_377 = arith.constant 32 : i32
    %617 = arith.addi %533, %c32_i32_377 : i32
    %c5_i32_378 = arith.constant 5 : i32
    %618 = arith.addi %617, %c5_i32_378 : i32
    %619 = arith.addi %2, %618 : i32
    %620 = arith.index_cast %619 : i32 to index
    %621 = memref.load %arg2[%620] : memref<128xi32, #tpu.memory_space<smem>>
    %c0_i32_379 = arith.constant 0 : i32
    %c63_i32_380 = arith.constant 63 : i32
    %622 = arith.maxsi %c0_i32_379, %621 : i32
    %623 = arith.minsi %c63_i32_380, %622 : i32
    %c32_i32_381 = arith.constant 32 : i32
    %624 = arith.addi %533, %c32_i32_381 : i32
    %c6_i32_382 = arith.constant 6 : i32
    %625 = arith.addi %624, %c6_i32_382 : i32
    %626 = arith.addi %2, %625 : i32
    %627 = arith.index_cast %626 : i32 to index
    %628 = memref.load %arg2[%627] : memref<128xi32, #tpu.memory_space<smem>>
    %c0_i32_383 = arith.constant 0 : i32
    %c63_i32_384 = arith.constant 63 : i32
    %629 = arith.maxsi %c0_i32_383, %628 : i32
    %630 = arith.minsi %c63_i32_384, %629 : i32
    %c32_i32_385 = arith.constant 32 : i32
    %631 = arith.addi %533, %c32_i32_385 : i32
    %c7_i32_386 = arith.constant 7 : i32
    %632 = arith.addi %631, %c7_i32_386 : i32
    %633 = arith.addi %2, %632 : i32
    %634 = arith.index_cast %633 : i32 to index
    %635 = memref.load %arg2[%634] : memref<128xi32, #tpu.memory_space<smem>>
    %c0_i32_387 = arith.constant 0 : i32
    %c63_i32_388 = arith.constant 63 : i32
    %636 = arith.maxsi %c0_i32_387, %635 : i32
    %637 = arith.minsi %c63_i32_388, %636 : i32
    %c0_i32_389 = arith.constant 0 : i32
    %638 = arith.addi %533, %c0_i32_389 : i32
    %c31_i32_390 = arith.constant 31 : i32
    %639 = arith.andi %638, %c31_i32_390 : i32
    %c0_i32_391 = arith.constant 0 : i32
    %640 = tpu.memref_slice %arg3[%539, %c0_i32_391] : memref<64x128xf32, #tpu.memory_space<any>> -> memref<1x128xf32, #tpu.memory_space<any>>
    %c0_i32_392 = arith.constant 0 : i32
    %641 = tpu.memref_slice %arg8[%638, %c0_i32_392] : memref<64x128xf32, #tpu.memory_space<vmem>> -> memref<1x128xf32, #tpu.memory_space<vmem>>
    %642 = tpu.memref_slice %arg9[%639] : memref<32x!tpu.dma_semaphore, #tpu.memory_space<semaphore_mem>> -> memref<1x!tpu.dma_semaphore, #tpu.memory_space<semaphore_mem>>
    %643 = tpu.memref_squeeze %642 : memref<1x!tpu.dma_semaphore, #tpu.memory_space<semaphore_mem>> -> memref<!tpu.dma_semaphore, #tpu.memory_space<semaphore_mem>>
    tpu.wait_dma2 semaphore(%643 : memref<!tpu.dma_semaphore, #tpu.memory_space<semaphore_mem>>) src(%640 : memref<1x128xf32, #tpu.memory_space<any>>) dst(%641 : memref<1x128xf32, #tpu.memory_space<vmem>>)
    %c32_i32_393 = arith.constant 32 : i32
    %644 = arith.addi %533, %c32_i32_393 : i32
    %c0_i32_394 = arith.constant 0 : i32
    %645 = arith.addi %644, %c0_i32_394 : i32
    %c31_i32_395 = arith.constant 31 : i32
    %646 = arith.andi %645, %c31_i32_395 : i32
    %c0_i32_396 = arith.constant 0 : i32
    %647 = tpu.memref_slice %arg3[%588, %c0_i32_396] : memref<64x128xf32, #tpu.memory_space<any>> -> memref<1x128xf32, #tpu.memory_space<any>>
    %c0_i32_397 = arith.constant 0 : i32
    %648 = tpu.memref_slice %arg8[%645, %c0_i32_397] : memref<64x128xf32, #tpu.memory_space<vmem>> -> memref<1x128xf32, #tpu.memory_space<vmem>>
    %649 = tpu.memref_slice %arg9[%646] : memref<32x!tpu.dma_semaphore, #tpu.memory_space<semaphore_mem>> -> memref<1x!tpu.dma_semaphore, #tpu.memory_space<semaphore_mem>>
    %650 = tpu.memref_squeeze %649 : memref<1x!tpu.dma_semaphore, #tpu.memory_space<semaphore_mem>> -> memref<!tpu.dma_semaphore, #tpu.memory_space<semaphore_mem>>
    tpu.enqueue_dma source(%647 : memref<1x128xf32, #tpu.memory_space<any>>) target(%648 : memref<1x128xf32, #tpu.memory_space<vmem>>) target_semaphore(%650 : memref<!tpu.dma_semaphore, #tpu.memory_space<semaphore_mem>>)
    %c1_i32_398 = arith.constant 1 : i32
    %651 = arith.addi %533, %c1_i32_398 : i32
    %c31_i32_399 = arith.constant 31 : i32
    %652 = arith.andi %651, %c31_i32_399 : i32
    %c0_i32_400 = arith.constant 0 : i32
    %653 = tpu.memref_slice %arg3[%545, %c0_i32_400] : memref<64x128xf32, #tpu.memory_space<any>> -> memref<1x128xf32, #tpu.memory_space<any>>
    %c0_i32_401 = arith.constant 0 : i32
    %654 = tpu.memref_slice %arg8[%651, %c0_i32_401] : memref<64x128xf32, #tpu.memory_space<vmem>> -> memref<1x128xf32, #tpu.memory_space<vmem>>
    %655 = tpu.memref_slice %arg9[%652] : memref<32x!tpu.dma_semaphore, #tpu.memory_space<semaphore_mem>> -> memref<1x!tpu.dma_semaphore, #tpu.memory_space<semaphore_mem>>
    %656 = tpu.memref_squeeze %655 : memref<1x!tpu.dma_semaphore, #tpu.memory_space<semaphore_mem>> -> memref<!tpu.dma_semaphore, #tpu.memory_space<semaphore_mem>>
    tpu.wait_dma2 semaphore(%656 : memref<!tpu.dma_semaphore, #tpu.memory_space<semaphore_mem>>) src(%653 : memref<1x128xf32, #tpu.memory_space<any>>) dst(%654 : memref<1x128xf32, #tpu.memory_space<vmem>>)
    %c32_i32_402 = arith.constant 32 : i32
    %657 = arith.addi %533, %c32_i32_402 : i32
    %c1_i32_403 = arith.constant 1 : i32
    %658 = arith.addi %657, %c1_i32_403 : i32
    %c31_i32_404 = arith.constant 31 : i32
    %659 = arith.andi %658, %c31_i32_404 : i32
    %c0_i32_405 = arith.constant 0 : i32
    %660 = tpu.memref_slice %arg3[%595, %c0_i32_405] : memref<64x128xf32, #tpu.memory_space<any>> -> memref<1x128xf32, #tpu.memory_space<any>>
    %c0_i32_406 = arith.constant 0 : i32
    %661 = tpu.memref_slice %arg8[%658, %c0_i32_406] : memref<64x128xf32, #tpu.memory_space<vmem>> -> memref<1x128xf32, #tpu.memory_space<vmem>>
    %662 = tpu.memref_slice %arg9[%659] : memref<32x!tpu.dma_semaphore, #tpu.memory_space<semaphore_mem>> -> memref<1x!tpu.dma_semaphore, #tpu.memory_space<semaphore_mem>>
    %663 = tpu.memref_squeeze %662 : memref<1x!tpu.dma_semaphore, #tpu.memory_space<semaphore_mem>> -> memref<!tpu.dma_semaphore, #tpu.memory_space<semaphore_mem>>
    tpu.enqueue_dma source(%660 : memref<1x128xf32, #tpu.memory_space<any>>) target(%661 : memref<1x128xf32, #tpu.memory_space<vmem>>) target_semaphore(%663 : memref<!tpu.dma_semaphore, #tpu.memory_space<semaphore_mem>>)
    %c2_i32_407 = arith.constant 2 : i32
    %664 = arith.addi %533, %c2_i32_407 : i32
    %c31_i32_408 = arith.constant 31 : i32
    %665 = arith.andi %664, %c31_i32_408 : i32
    %c0_i32_409 = arith.constant 0 : i32
    %666 = tpu.memref_slice %arg3[%551, %c0_i32_409] : memref<64x128xf32, #tpu.memory_space<any>> -> memref<1x128xf32, #tpu.memory_space<any>>
    %c0_i32_410 = arith.constant 0 : i32
    %667 = tpu.memref_slice %arg8[%664, %c0_i32_410] : memref<64x128xf32, #tpu.memory_space<vmem>> -> memref<1x128xf32, #tpu.memory_space<vmem>>
    %668 = tpu.memref_slice %arg9[%665] : memref<32x!tpu.dma_semaphore, #tpu.memory_space<semaphore_mem>> -> memref<1x!tpu.dma_semaphore, #tpu.memory_space<semaphore_mem>>
    %669 = tpu.memref_squeeze %668 : memref<1x!tpu.dma_semaphore, #tpu.memory_space<semaphore_mem>> -> memref<!tpu.dma_semaphore, #tpu.memory_space<semaphore_mem>>
    tpu.wait_dma2 semaphore(%669 : memref<!tpu.dma_semaphore, #tpu.memory_space<semaphore_mem>>) src(%666 : memref<1x128xf32, #tpu.memory_space<any>>) dst(%667 : memref<1x128xf32, #tpu.memory_space<vmem>>)
    %c32_i32_411 = arith.constant 32 : i32
    %670 = arith.addi %533, %c32_i32_411 : i32
    %c2_i32_412 = arith.constant 2 : i32
    %671 = arith.addi %670, %c2_i32_412 : i32
    %c31_i32_413 = arith.constant 31 : i32
    %672 = arith.andi %671, %c31_i32_413 : i32
    %c0_i32_414 = arith.constant 0 : i32
    %673 = tpu.memref_slice %arg3[%602, %c0_i32_414] : memref<64x128xf32, #tpu.memory_space<any>> -> memref<1x128xf32, #tpu.memory_space<any>>
    %c0_i32_415 = arith.constant 0 : i32
    %674 = tpu.memref_slice %arg8[%671, %c0_i32_415] : memref<64x128xf32, #tpu.memory_space<vmem>> -> memref<1x128xf32, #tpu.memory_space<vmem>>
    %675 = tpu.memref_slice %arg9[%672] : memref<32x!tpu.dma_semaphore, #tpu.memory_space<semaphore_mem>> -> memref<1x!tpu.dma_semaphore, #tpu.memory_space<semaphore_mem>>
    %676 = tpu.memref_squeeze %675 : memref<1x!tpu.dma_semaphore, #tpu.memory_space<semaphore_mem>> -> memref<!tpu.dma_semaphore, #tpu.memory_space<semaphore_mem>>
    tpu.enqueue_dma source(%673 : memref<1x128xf32, #tpu.memory_space<any>>) target(%674 : memref<1x128xf32, #tpu.memory_space<vmem>>) target_semaphore(%676 : memref<!tpu.dma_semaphore, #tpu.memory_space<semaphore_mem>>)
    %c3_i32_416 = arith.constant 3 : i32
    %677 = arith.addi %533, %c3_i32_416 : i32
    %c31_i32_417 = arith.constant 31 : i32
    %678 = arith.andi %677, %c31_i32_417 : i32
    %c0_i32_418 = arith.constant 0 : i32
    %679 = tpu.memref_slice %arg3[%557, %c0_i32_418] : memref<64x128xf32, #tpu.memory_space<any>> -> memref<1x128xf32, #tpu.memory_space<any>>
    %c0_i32_419 = arith.constant 0 : i32
    %680 = tpu.memref_slice %arg8[%677, %c0_i32_419] : memref<64x128xf32, #tpu.memory_space<vmem>> -> memref<1x128xf32, #tpu.memory_space<vmem>>
    %681 = tpu.memref_slice %arg9[%678] : memref<32x!tpu.dma_semaphore, #tpu.memory_space<semaphore_mem>> -> memref<1x!tpu.dma_semaphore, #tpu.memory_space<semaphore_mem>>
    %682 = tpu.memref_squeeze %681 : memref<1x!tpu.dma_semaphore, #tpu.memory_space<semaphore_mem>> -> memref<!tpu.dma_semaphore, #tpu.memory_space<semaphore_mem>>
    tpu.wait_dma2 semaphore(%682 : memref<!tpu.dma_semaphore, #tpu.memory_space<semaphore_mem>>) src(%679 : memref<1x128xf32, #tpu.memory_space<any>>) dst(%680 : memref<1x128xf32, #tpu.memory_space<vmem>>)
    %c32_i32_420 = arith.constant 32 : i32
    %683 = arith.addi %533, %c32_i32_420 : i32
    %c3_i32_421 = arith.constant 3 : i32
    %684 = arith.addi %683, %c3_i32_421 : i32
    %c31_i32_422 = arith.constant 31 : i32
    %685 = arith.andi %684, %c31_i32_422 : i32
    %c0_i32_423 = arith.constant 0 : i32
    %686 = tpu.memref_slice %arg3[%609, %c0_i32_423] : memref<64x128xf32, #tpu.memory_space<any>> -> memref<1x128xf32, #tpu.memory_space<any>>
    %c0_i32_424 = arith.constant 0 : i32
    %687 = tpu.memref_slice %arg8[%684, %c0_i32_424] : memref<64x128xf32, #tpu.memory_space<vmem>> -> memref<1x128xf32, #tpu.memory_space<vmem>>
    %688 = tpu.memref_slice %arg9[%685] : memref<32x!tpu.dma_semaphore, #tpu.memory_space<semaphore_mem>> -> memref<1x!tpu.dma_semaphore, #tpu.memory_space<semaphore_mem>>
    %689 = tpu.memref_squeeze %688 : memref<1x!tpu.dma_semaphore, #tpu.memory_space<semaphore_mem>> -> memref<!tpu.dma_semaphore, #tpu.memory_space<semaphore_mem>>
    tpu.enqueue_dma source(%686 : memref<1x128xf32, #tpu.memory_space<any>>) target(%687 : memref<1x128xf32, #tpu.memory_space<vmem>>) target_semaphore(%689 : memref<!tpu.dma_semaphore, #tpu.memory_space<semaphore_mem>>)
    %c4_i32_425 = arith.constant 4 : i32
    %690 = arith.addi %533, %c4_i32_425 : i32
    %c31_i32_426 = arith.constant 31 : i32
    %691 = arith.andi %690, %c31_i32_426 : i32
    %c0_i32_427 = arith.constant 0 : i32
    %692 = tpu.memref_slice %arg3[%563, %c0_i32_427] : memref<64x128xf32, #tpu.memory_space<any>> -> memref<1x128xf32, #tpu.memory_space<any>>
    %c0_i32_428 = arith.constant 0 : i32
    %693 = tpu.memref_slice %arg8[%690, %c0_i32_428] : memref<64x128xf32, #tpu.memory_space<vmem>> -> memref<1x128xf32, #tpu.memory_space<vmem>>
    %694 = tpu.memref_slice %arg9[%691] : memref<32x!tpu.dma_semaphore, #tpu.memory_space<semaphore_mem>> -> memref<1x!tpu.dma_semaphore, #tpu.memory_space<semaphore_mem>>
    %695 = tpu.memref_squeeze %694 : memref<1x!tpu.dma_semaphore, #tpu.memory_space<semaphore_mem>> -> memref<!tpu.dma_semaphore, #tpu.memory_space<semaphore_mem>>
    tpu.wait_dma2 semaphore(%695 : memref<!tpu.dma_semaphore, #tpu.memory_space<semaphore_mem>>) src(%692 : memref<1x128xf32, #tpu.memory_space<any>>) dst(%693 : memref<1x128xf32, #tpu.memory_space<vmem>>)
    %c32_i32_429 = arith.constant 32 : i32
    %696 = arith.addi %533, %c32_i32_429 : i32
    %c4_i32_430 = arith.constant 4 : i32
    %697 = arith.addi %696, %c4_i32_430 : i32
    %c31_i32_431 = arith.constant 31 : i32
    %698 = arith.andi %697, %c31_i32_431 : i32
    %c0_i32_432 = arith.constant 0 : i32
    %699 = tpu.memref_slice %arg3[%616, %c0_i32_432] : memref<64x128xf32, #tpu.memory_space<any>> -> memref<1x128xf32, #tpu.memory_space<any>>
    %c0_i32_433 = arith.constant 0 : i32
    %700 = tpu.memref_slice %arg8[%697, %c0_i32_433] : memref<64x128xf32, #tpu.memory_space<vmem>> -> memref<1x128xf32, #tpu.memory_space<vmem>>
    %701 = tpu.memref_slice %arg9[%698] : memref<32x!tpu.dma_semaphore, #tpu.memory_space<semaphore_mem>> -> memref<1x!tpu.dma_semaphore, #tpu.memory_space<semaphore_mem>>
    %702 = tpu.memref_squeeze %701 : memref<1x!tpu.dma_semaphore, #tpu.memory_space<semaphore_mem>> -> memref<!tpu.dma_semaphore, #tpu.memory_space<semaphore_mem>>
    tpu.enqueue_dma source(%699 : memref<1x128xf32, #tpu.memory_space<any>>) target(%700 : memref<1x128xf32, #tpu.memory_space<vmem>>) target_semaphore(%702 : memref<!tpu.dma_semaphore, #tpu.memory_space<semaphore_mem>>)
    %c5_i32_434 = arith.constant 5 : i32
    %703 = arith.addi %533, %c5_i32_434 : i32
    %c31_i32_435 = arith.constant 31 : i32
    %704 = arith.andi %703, %c31_i32_435 : i32
    %c0_i32_436 = arith.constant 0 : i32
    %705 = tpu.memref_slice %arg3[%569, %c0_i32_436] : memref<64x128xf32, #tpu.memory_space<any>> -> memref<1x128xf32, #tpu.memory_space<any>>
    %c0_i32_437 = arith.constant 0 : i32
    %706 = tpu.memref_slice %arg8[%703, %c0_i32_437] : memref<64x128xf32, #tpu.memory_space<vmem>> -> memref<1x128xf32, #tpu.memory_space<vmem>>
    %707 = tpu.memref_slice %arg9[%704] : memref<32x!tpu.dma_semaphore, #tpu.memory_space<semaphore_mem>> -> memref<1x!tpu.dma_semaphore, #tpu.memory_space<semaphore_mem>>
    %708 = tpu.memref_squeeze %707 : memref<1x!tpu.dma_semaphore, #tpu.memory_space<semaphore_mem>> -> memref<!tpu.dma_semaphore, #tpu.memory_space<semaphore_mem>>
    tpu.wait_dma2 semaphore(%708 : memref<!tpu.dma_semaphore, #tpu.memory_space<semaphore_mem>>) src(%705 : memref<1x128xf32, #tpu.memory_space<any>>) dst(%706 : memref<1x128xf32, #tpu.memory_space<vmem>>)
    %c32_i32_438 = arith.constant 32 : i32
    %709 = arith.addi %533, %c32_i32_438 : i32
    %c5_i32_439 = arith.constant 5 : i32
    %710 = arith.addi %709, %c5_i32_439 : i32
    %c31_i32_440 = arith.constant 31 : i32
    %711 = arith.andi %710, %c31_i32_440 : i32
    %c0_i32_441 = arith.constant 0 : i32
    %712 = tpu.memref_slice %arg3[%623, %c0_i32_441] : memref<64x128xf32, #tpu.memory_space<any>> -> memref<1x128xf32, #tpu.memory_space<any>>
    %c0_i32_442 = arith.constant 0 : i32
    %713 = tpu.memref_slice %arg8[%710, %c0_i32_442] : memref<64x128xf32, #tpu.memory_space<vmem>> -> memref<1x128xf32, #tpu.memory_space<vmem>>
    %714 = tpu.memref_slice %arg9[%711] : memref<32x!tpu.dma_semaphore, #tpu.memory_space<semaphore_mem>> -> memref<1x!tpu.dma_semaphore, #tpu.memory_space<semaphore_mem>>
    %715 = tpu.memref_squeeze %714 : memref<1x!tpu.dma_semaphore, #tpu.memory_space<semaphore_mem>> -> memref<!tpu.dma_semaphore, #tpu.memory_space<semaphore_mem>>
    tpu.enqueue_dma source(%712 : memref<1x128xf32, #tpu.memory_space<any>>) target(%713 : memref<1x128xf32, #tpu.memory_space<vmem>>) target_semaphore(%715 : memref<!tpu.dma_semaphore, #tpu.memory_space<semaphore_mem>>)
    %c6_i32_443 = arith.constant 6 : i32
    %716 = arith.addi %533, %c6_i32_443 : i32
    %c31_i32_444 = arith.constant 31 : i32
    %717 = arith.andi %716, %c31_i32_444 : i32
    %c0_i32_445 = arith.constant 0 : i32
    %718 = tpu.memref_slice %arg3[%575, %c0_i32_445] : memref<64x128xf32, #tpu.memory_space<any>> -> memref<1x128xf32, #tpu.memory_space<any>>
    %c0_i32_446 = arith.constant 0 : i32
    %719 = tpu.memref_slice %arg8[%716, %c0_i32_446] : memref<64x128xf32, #tpu.memory_space<vmem>> -> memref<1x128xf32, #tpu.memory_space<vmem>>
    %720 = tpu.memref_slice %arg9[%717] : memref<32x!tpu.dma_semaphore, #tpu.memory_space<semaphore_mem>> -> memref<1x!tpu.dma_semaphore, #tpu.memory_space<semaphore_mem>>
    %721 = tpu.memref_squeeze %720 : memref<1x!tpu.dma_semaphore, #tpu.memory_space<semaphore_mem>> -> memref<!tpu.dma_semaphore, #tpu.memory_space<semaphore_mem>>
    tpu.wait_dma2 semaphore(%721 : memref<!tpu.dma_semaphore, #tpu.memory_space<semaphore_mem>>) src(%718 : memref<1x128xf32, #tpu.memory_space<any>>) dst(%719 : memref<1x128xf32, #tpu.memory_space<vmem>>)
    %c32_i32_447 = arith.constant 32 : i32
    %722 = arith.addi %533, %c32_i32_447 : i32
    %c6_i32_448 = arith.constant 6 : i32
    %723 = arith.addi %722, %c6_i32_448 : i32
    %c31_i32_449 = arith.constant 31 : i32
    %724 = arith.andi %723, %c31_i32_449 : i32
    %c0_i32_450 = arith.constant 0 : i32
    %725 = tpu.memref_slice %arg3[%630, %c0_i32_450] : memref<64x128xf32, #tpu.memory_space<any>> -> memref<1x128xf32, #tpu.memory_space<any>>
    %c0_i32_451 = arith.constant 0 : i32
    %726 = tpu.memref_slice %arg8[%723, %c0_i32_451] : memref<64x128xf32, #tpu.memory_space<vmem>> -> memref<1x128xf32, #tpu.memory_space<vmem>>
    %727 = tpu.memref_slice %arg9[%724] : memref<32x!tpu.dma_semaphore, #tpu.memory_space<semaphore_mem>> -> memref<1x!tpu.dma_semaphore, #tpu.memory_space<semaphore_mem>>
    %728 = tpu.memref_squeeze %727 : memref<1x!tpu.dma_semaphore, #tpu.memory_space<semaphore_mem>> -> memref<!tpu.dma_semaphore, #tpu.memory_space<semaphore_mem>>
    tpu.enqueue_dma source(%725 : memref<1x128xf32, #tpu.memory_space<any>>) target(%726 : memref<1x128xf32, #tpu.memory_space<vmem>>) target_semaphore(%728 : memref<!tpu.dma_semaphore, #tpu.memory_space<semaphore_mem>>)
    %c7_i32_452 = arith.constant 7 : i32
    %729 = arith.addi %533, %c7_i32_452 : i32
    %c31_i32_453 = arith.constant 31 : i32
    %730 = arith.andi %729, %c31_i32_453 : i32
    %c0_i32_454 = arith.constant 0 : i32
    %731 = tpu.memref_slice %arg3[%581, %c0_i32_454] : memref<64x128xf32, #tpu.memory_space<any>> -> memref<1x128xf32, #tpu.memory_space<any>>
    %c0_i32_455 = arith.constant 0 : i32
    %732 = tpu.memref_slice %arg8[%729, %c0_i32_455] : memref<64x128xf32, #tpu.memory_space<vmem>> -> memref<1x128xf32, #tpu.memory_space<vmem>>
    %733 = tpu.memref_slice %arg9[%730] : memref<32x!tpu.dma_semaphore, #tpu.memory_space<semaphore_mem>> -> memref<1x!tpu.dma_semaphore, #tpu.memory_space<semaphore_mem>>
    %734 = tpu.memref_squeeze %733 : memref<1x!tpu.dma_semaphore, #tpu.memory_space<semaphore_mem>> -> memref<!tpu.dma_semaphore, #tpu.memory_space<semaphore_mem>>
    tpu.wait_dma2 semaphore(%734 : memref<!tpu.dma_semaphore, #tpu.memory_space<semaphore_mem>>) src(%731 : memref<1x128xf32, #tpu.memory_space<any>>) dst(%732 : memref<1x128xf32, #tpu.memory_space<vmem>>)
    %c32_i32_456 = arith.constant 32 : i32
    %735 = arith.addi %533, %c32_i32_456 : i32
    %c7_i32_457 = arith.constant 7 : i32
    %736 = arith.addi %735, %c7_i32_457 : i32
    %c31_i32_458 = arith.constant 31 : i32
    %737 = arith.andi %736, %c31_i32_458 : i32
    %c0_i32_459 = arith.constant 0 : i32
    %738 = tpu.memref_slice %arg3[%637, %c0_i32_459] : memref<64x128xf32, #tpu.memory_space<any>> -> memref<1x128xf32, #tpu.memory_space<any>>
    %c0_i32_460 = arith.constant 0 : i32
    %739 = tpu.memref_slice %arg8[%736, %c0_i32_460] : memref<64x128xf32, #tpu.memory_space<vmem>> -> memref<1x128xf32, #tpu.memory_space<vmem>>
    %740 = tpu.memref_slice %arg9[%737] : memref<32x!tpu.dma_semaphore, #tpu.memory_space<semaphore_mem>> -> memref<1x!tpu.dma_semaphore, #tpu.memory_space<semaphore_mem>>
    %741 = tpu.memref_squeeze %740 : memref<1x!tpu.dma_semaphore, #tpu.memory_space<semaphore_mem>> -> memref<!tpu.dma_semaphore, #tpu.memory_space<semaphore_mem>>
    tpu.enqueue_dma source(%738 : memref<1x128xf32, #tpu.memory_space<any>>) target(%739 : memref<1x128xf32, #tpu.memory_space<vmem>>) target_semaphore(%741 : memref<!tpu.dma_semaphore, #tpu.memory_space<semaphore_mem>>)
    %742 = arith.index_cast %533 : i32 to index
    %c0_461 = arith.constant 0 : index
    %743 = vector.load %arg8[%742, %c0_461] : memref<64x128xf32, #tpu.memory_space<vmem>>, vector<8x128xf32>
    %744 = arith.index_cast %533 : i32 to index
    %c0_462 = arith.constant 0 : index
    %745 = vector.load %arg4[%744, %c0_462] : memref<64x128xf32, #tpu.memory_space<vmem>>, vector<8x128xf32>
    %746 = arith.addf %743, %745 : vector<8x128xf32>
    %cst_463 = arith.constant dense<0.000000e+00> : vector<8xf32>
    %747 = vector.multi_reduction <add>, %746, %cst_463 [1] : vector<8x128xf32> to vector<8xf32>
    %748 = vector.shape_cast %747 : vector<8xf32> to vector<8x1xf32>
    %749 = vector.broadcast %cst : f32 to vector<8x1xf32>
    %750 = arith.mulf %748, %749 : vector<8x1xf32>
    %751 = vector.broadcast %750 : vector<8x1xf32> to vector<8x128xf32>
    %752 = arith.subf %746, %751 : vector<8x128xf32>
    %753 = arith.mulf %752, %752 : vector<8x128xf32>
    %cst_464 = arith.constant dense<0.000000e+00> : vector<8xf32>
    %754 = vector.multi_reduction <add>, %753, %cst_464 [1] : vector<8x128xf32> to vector<8xf32>
    %755 = vector.shape_cast %754 : vector<8xf32> to vector<8x1xf32>
    %756 = vector.broadcast %cst : f32 to vector<8x1xf32>
    %757 = arith.mulf %755, %756 : vector<8x1xf32>
    %cst_465 = arith.constant 9.99999996E-13 : f32
    %758 = vector.broadcast %cst_465 : f32 to vector<8x1xf32>
    %759 = arith.addf %757, %758 : vector<8x1xf32>
    %760 = math.rsqrt %759 : vector<8x1xf32>
    %761 = vector.broadcast %760 : vector<8x1xf32> to vector<8x128xf32>
    %762 = arith.mulf %752, %761 : vector<8x128xf32>
    %763 = vector.broadcast %291 : vector<1x128xf32> to vector<8x128xf32>
    %764 = arith.mulf %762, %763 : vector<8x128xf32>
    %765 = vector.broadcast %292 : vector<1x128xf32> to vector<8x128xf32>
    %766 = arith.addf %764, %765 : vector<8x128xf32>
    %c0_466 = arith.constant 0 : index
    %767 = arith.index_cast %533 : i32 to index
    %c0_467 = arith.constant 0 : index
    %768 = vector.load %arg7[%c0_466, %767, %c0_467] : memref<1x64x128xf32, #tpu.memory_space<vmem>>, vector<1x8x128xf32>
    %769 = vector.shape_cast %768 : vector<1x8x128xf32> to vector<8x128xf32>
    %770 = vector.shape_cast %766 : vector<8x128xf32> to vector<1x8x128xf32>
    tpu.vector_store %arg7[%c0_466, %767, %c0_467], %770 {strides = array<i32>} : memref<1x64x128xf32, #tpu.memory_space<vmem>>, vector<1x8x128xf32>,
    %c2_i32_468 = arith.constant 2 : i32
    %c8_i32_469 = arith.constant 8 : i32
    %771 = arith.muli %c2_i32_468, %c8_i32_469 : i32
    %772 = tpu.assume_multiple %771, 8 : i32
    %c0_i32_470 = arith.constant 0 : i32
    %773 = arith.addi %772, %c0_i32_470 : i32
    %774 = arith.addi %2, %773 : i32
    %775 = arith.index_cast %774 : i32 to index
    %776 = memref.load %arg2[%775] : memref<128xi32, #tpu.memory_space<smem>>
    %c0_i32_471 = arith.constant 0 : i32
    %c63_i32_472 = arith.constant 63 : i32
    %777 = arith.maxsi %c0_i32_471, %776 : i32
    %778 = arith.minsi %c63_i32_472, %777 : i32
    %c1_i32_473 = arith.constant 1 : i32
    %779 = arith.addi %772, %c1_i32_473 : i32
    %780 = arith.addi %2, %779 : i32
    %781 = arith.index_cast %780 : i32 to index
    %782 = memref.load %arg2[%781] : memref<128xi32, #tpu.memory_space<smem>>
    %c0_i32_474 = arith.constant 0 : i32
    %c63_i32_475 = arith.constant 63 : i32
    %783 = arith.maxsi %c0_i32_474, %782 : i32
    %784 = arith.minsi %c63_i32_475, %783 : i32
    %c2_i32_476 = arith.constant 2 : i32
    %785 = arith.addi %772, %c2_i32_476 : i32
    %786 = arith.addi %2, %785 : i32
    %787 = arith.index_cast %786 : i32 to index
    %788 = memref.load %arg2[%787] : memref<128xi32, #tpu.memory_space<smem>>
    %c0_i32_477 = arith.constant 0 : i32
    %c63_i32_478 = arith.constant 63 : i32
    %789 = arith.maxsi %c0_i32_477, %788 : i32
    %790 = arith.minsi %c63_i32_478, %789 : i32
    %c3_i32_479 = arith.constant 3 : i32
    %791 = arith.addi %772, %c3_i32_479 : i32
    %792 = arith.addi %2, %791 : i32
    %793 = arith.index_cast %792 : i32 to index
    %794 = memref.load %arg2[%793] : memref<128xi32, #tpu.memory_space<smem>>
    %c0_i32_480 = arith.constant 0 : i32
    %c63_i32_481 = arith.constant 63 : i32
    %795 = arith.maxsi %c0_i32_480, %794 : i32
    %796 = arith.minsi %c63_i32_481, %795 : i32
    %c4_i32_482 = arith.constant 4 : i32
    %797 = arith.addi %772, %c4_i32_482 : i32
    %798 = arith.addi %2, %797 : i32
    %799 = arith.index_cast %798 : i32 to index
    %800 = memref.load %arg2[%799] : memref<128xi32, #tpu.memory_space<smem>>
    %c0_i32_483 = arith.constant 0 : i32
    %c63_i32_484 = arith.constant 63 : i32
    %801 = arith.maxsi %c0_i32_483, %800 : i32
    %802 = arith.minsi %c63_i32_484, %801 : i32
    %c5_i32_485 = arith.constant 5 : i32
    %803 = arith.addi %772, %c5_i32_485 : i32
    %804 = arith.addi %2, %803 : i32
    %805 = arith.index_cast %804 : i32 to index
    %806 = memref.load %arg2[%805] : memref<128xi32, #tpu.memory_space<smem>>
    %c0_i32_486 = arith.constant 0 : i32
    %c63_i32_487 = arith.constant 63 : i32
    %807 = arith.maxsi %c0_i32_486, %806 : i32
    %808 = arith.minsi %c63_i32_487, %807 : i32
    %c6_i32_488 = arith.constant 6 : i32
    %809 = arith.addi %772, %c6_i32_488 : i32
    %810 = arith.addi %2, %809 : i32
    %811 = arith.index_cast %810 : i32 to index
    %812 = memref.load %arg2[%811] : memref<128xi32, #tpu.memory_space<smem>>
    %c0_i32_489 = arith.constant 0 : i32
    %c63_i32_490 = arith.constant 63 : i32
    %813 = arith.maxsi %c0_i32_489, %812 : i32
    %814 = arith.minsi %c63_i32_490, %813 : i32
    %c7_i32_491 = arith.constant 7 : i32
    %815 = arith.addi %772, %c7_i32_491 : i32
    %816 = arith.addi %2, %815 : i32
    %817 = arith.index_cast %816 : i32 to index
    %818 = memref.load %arg2[%817] : memref<128xi32, #tpu.memory_space<smem>>
    %c0_i32_492 = arith.constant 0 : i32
    %c63_i32_493 = arith.constant 63 : i32
    %819 = arith.maxsi %c0_i32_492, %818 : i32
    %820 = arith.minsi %c63_i32_493, %819 : i32
    %c32_i32_494 = arith.constant 32 : i32
    %821 = arith.addi %772, %c32_i32_494 : i32
    %c0_i32_495 = arith.constant 0 : i32
    %822 = arith.addi %821, %c0_i32_495 : i32
    %823 = arith.addi %2, %822 : i32
    %824 = arith.index_cast %823 : i32 to index
    %825 = memref.load %arg2[%824] : memref<128xi32, #tpu.memory_space<smem>>
    %c0_i32_496 = arith.constant 0 : i32
    %c63_i32_497 = arith.constant 63 : i32
    %826 = arith.maxsi %c0_i32_496, %825 : i32
    %827 = arith.minsi %c63_i32_497, %826 : i32
    %c32_i32_498 = arith.constant 32 : i32
    %828 = arith.addi %772, %c32_i32_498 : i32
    %c1_i32_499 = arith.constant 1 : i32
    %829 = arith.addi %828, %c1_i32_499 : i32
    %830 = arith.addi %2, %829 : i32
    %831 = arith.index_cast %830 : i32 to index
    %832 = memref.load %arg2[%831] : memref<128xi32, #tpu.memory_space<smem>>
    %c0_i32_500 = arith.constant 0 : i32
    %c63_i32_501 = arith.constant 63 : i32
    %833 = arith.maxsi %c0_i32_500, %832 : i32
    %834 = arith.minsi %c63_i32_501, %833 : i32
    %c32_i32_502 = arith.constant 32 : i32
    %835 = arith.addi %772, %c32_i32_502 : i32
    %c2_i32_503 = arith.constant 2 : i32
    %836 = arith.addi %835, %c2_i32_503 : i32
    %837 = arith.addi %2, %836 : i32
    %838 = arith.index_cast %837 : i32 to index
    %839 = memref.load %arg2[%838] : memref<128xi32, #tpu.memory_space<smem>>
    %c0_i32_504 = arith.constant 0 : i32
    %c63_i32_505 = arith.constant 63 : i32
    %840 = arith.maxsi %c0_i32_504, %839 : i32
    %841 = arith.minsi %c63_i32_505, %840 : i32
    %c32_i32_506 = arith.constant 32 : i32
    %842 = arith.addi %772, %c32_i32_506 : i32
    %c3_i32_507 = arith.constant 3 : i32
    %843 = arith.addi %842, %c3_i32_507 : i32
    %844 = arith.addi %2, %843 : i32
    %845 = arith.index_cast %844 : i32 to index
    %846 = memref.load %arg2[%845] : memref<128xi32, #tpu.memory_space<smem>>
    %c0_i32_508 = arith.constant 0 : i32
    %c63_i32_509 = arith.constant 63 : i32
    %847 = arith.maxsi %c0_i32_508, %846 : i32
    %848 = arith.minsi %c63_i32_509, %847 : i32
    %c32_i32_510 = arith.constant 32 : i32
    %849 = arith.addi %772, %c32_i32_510 : i32
    %c4_i32_511 = arith.constant 4 : i32
    %850 = arith.addi %849, %c4_i32_511 : i32
    %851 = arith.addi %2, %850 : i32
    %852 = arith.index_cast %851 : i32 to index
    %853 = memref.load %arg2[%852] : memref<128xi32, #tpu.memory_space<smem>>
    %c0_i32_512 = arith.constant 0 : i32
    %c63_i32_513 = arith.constant 63 : i32
    %854 = arith.maxsi %c0_i32_512, %853 : i32
    %855 = arith.minsi %c63_i32_513, %854 : i32
    %c32_i32_514 = arith.constant 32 : i32
    %856 = arith.addi %772, %c32_i32_514 : i32
    %c5_i32_515 = arith.constant 5 : i32
    %857 = arith.addi %856, %c5_i32_515 : i32
    %858 = arith.addi %2, %857 : i32
    %859 = arith.index_cast %858 : i32 to index
    %860 = memref.load %arg2[%859] : memref<128xi32, #tpu.memory_space<smem>>
    %c0_i32_516 = arith.constant 0 : i32
    %c63_i32_517 = arith.constant 63 : i32
    %861 = arith.maxsi %c0_i32_516, %860 : i32
    %862 = arith.minsi %c63_i32_517, %861 : i32
    %c32_i32_518 = arith.constant 32 : i32
    %863 = arith.addi %772, %c32_i32_518 : i32
    %c6_i32_519 = arith.constant 6 : i32
    %864 = arith.addi %863, %c6_i32_519 : i32
    %865 = arith.addi %2, %864 : i32
    %866 = arith.index_cast %865 : i32 to index
    %867 = memref.load %arg2[%866] : memref<128xi32, #tpu.memory_space<smem>>
    %c0_i32_520 = arith.constant 0 : i32
    %c63_i32_521 = arith.constant 63 : i32
    %868 = arith.maxsi %c0_i32_520, %867 : i32
    %869 = arith.minsi %c63_i32_521, %868 : i32
    %c32_i32_522 = arith.constant 32 : i32
    %870 = arith.addi %772, %c32_i32_522 : i32
    %c7_i32_523 = arith.constant 7 : i32
    %871 = arith.addi %870, %c7_i32_523 : i32
    %872 = arith.addi %2, %871 : i32
    %873 = arith.index_cast %872 : i32 to index
    %874 = memref.load %arg2[%873] : memref<128xi32, #tpu.memory_space<smem>>
    %c0_i32_524 = arith.constant 0 : i32
    %c63_i32_525 = arith.constant 63 : i32
    %875 = arith.maxsi %c0_i32_524, %874 : i32
    %876 = arith.minsi %c63_i32_525, %875 : i32
    %c0_i32_526 = arith.constant 0 : i32
    %877 = arith.addi %772, %c0_i32_526 : i32
    %c31_i32_527 = arith.constant 31 : i32
    %878 = arith.andi %877, %c31_i32_527 : i32
    %c0_i32_528 = arith.constant 0 : i32
    %879 = tpu.memref_slice %arg3[%778, %c0_i32_528] : memref<64x128xf32, #tpu.memory_space<any>> -> memref<1x128xf32, #tpu.memory_space<any>>
    %c0_i32_529 = arith.constant 0 : i32
    %880 = tpu.memref_slice %arg8[%877, %c0_i32_529] : memref<64x128xf32, #tpu.memory_space<vmem>> -> memref<1x128xf32, #tpu.memory_space<vmem>>
    %881 = tpu.memref_slice %arg9[%878] : memref<32x!tpu.dma_semaphore, #tpu.memory_space<semaphore_mem>> -> memref<1x!tpu.dma_semaphore, #tpu.memory_space<semaphore_mem>>
    %882 = tpu.memref_squeeze %881 : memref<1x!tpu.dma_semaphore, #tpu.memory_space<semaphore_mem>> -> memref<!tpu.dma_semaphore, #tpu.memory_space<semaphore_mem>>
    tpu.wait_dma2 semaphore(%882 : memref<!tpu.dma_semaphore, #tpu.memory_space<semaphore_mem>>) src(%879 : memref<1x128xf32, #tpu.memory_space<any>>) dst(%880 : memref<1x128xf32, #tpu.memory_space<vmem>>)
    %c32_i32_530 = arith.constant 32 : i32
    %883 = arith.addi %772, %c32_i32_530 : i32
    %c0_i32_531 = arith.constant 0 : i32
    %884 = arith.addi %883, %c0_i32_531 : i32
    %c31_i32_532 = arith.constant 31 : i32
    %885 = arith.andi %884, %c31_i32_532 : i32
    %c0_i32_533 = arith.constant 0 : i32
    %886 = tpu.memref_slice %arg3[%827, %c0_i32_533] : memref<64x128xf32, #tpu.memory_space<any>> -> memref<1x128xf32, #tpu.memory_space<any>>
    %c0_i32_534 = arith.constant 0 : i32
    %887 = tpu.memref_slice %arg8[%884, %c0_i32_534] : memref<64x128xf32, #tpu.memory_space<vmem>> -> memref<1x128xf32, #tpu.memory_space<vmem>>
    %888 = tpu.memref_slice %arg9[%885] : memref<32x!tpu.dma_semaphore, #tpu.memory_space<semaphore_mem>> -> memref<1x!tpu.dma_semaphore, #tpu.memory_space<semaphore_mem>>
    %889 = tpu.memref_squeeze %888 : memref<1x!tpu.dma_semaphore, #tpu.memory_space<semaphore_mem>> -> memref<!tpu.dma_semaphore, #tpu.memory_space<semaphore_mem>>
    tpu.enqueue_dma source(%886 : memref<1x128xf32, #tpu.memory_space<any>>) target(%887 : memref<1x128xf32, #tpu.memory_space<vmem>>) target_semaphore(%889 : memref<!tpu.dma_semaphore, #tpu.memory_space<semaphore_mem>>)
    %c1_i32_535 = arith.constant 1 : i32
    %890 = arith.addi %772, %c1_i32_535 : i32
    %c31_i32_536 = arith.constant 31 : i32
    %891 = arith.andi %890, %c31_i32_536 : i32
    %c0_i32_537 = arith.constant 0 : i32
    %892 = tpu.memref_slice %arg3[%784, %c0_i32_537] : memref<64x128xf32, #tpu.memory_space<any>> -> memref<1x128xf32, #tpu.memory_space<any>>
    %c0_i32_538 = arith.constant 0 : i32
    %893 = tpu.memref_slice %arg8[%890, %c0_i32_538] : memref<64x128xf32, #tpu.memory_space<vmem>> -> memref<1x128xf32, #tpu.memory_space<vmem>>
    %894 = tpu.memref_slice %arg9[%891] : memref<32x!tpu.dma_semaphore, #tpu.memory_space<semaphore_mem>> -> memref<1x!tpu.dma_semaphore, #tpu.memory_space<semaphore_mem>>
    %895 = tpu.memref_squeeze %894 : memref<1x!tpu.dma_semaphore, #tpu.memory_space<semaphore_mem>> -> memref<!tpu.dma_semaphore, #tpu.memory_space<semaphore_mem>>
    tpu.wait_dma2 semaphore(%895 : memref<!tpu.dma_semaphore, #tpu.memory_space<semaphore_mem>>) src(%892 : memref<1x128xf32, #tpu.memory_space<any>>) dst(%893 : memref<1x128xf32, #tpu.memory_space<vmem>>)
    %c32_i32_539 = arith.constant 32 : i32
    %896 = arith.addi %772, %c32_i32_539 : i32
    %c1_i32_540 = arith.constant 1 : i32
    %897 = arith.addi %896, %c1_i32_540 : i32
    %c31_i32_541 = arith.constant 31 : i32
    %898 = arith.andi %897, %c31_i32_541 : i32
    %c0_i32_542 = arith.constant 0 : i32
    %899 = tpu.memref_slice %arg3[%834, %c0_i32_542] : memref<64x128xf32, #tpu.memory_space<any>> -> memref<1x128xf32, #tpu.memory_space<any>>
    %c0_i32_543 = arith.constant 0 : i32
    %900 = tpu.memref_slice %arg8[%897, %c0_i32_543] : memref<64x128xf32, #tpu.memory_space<vmem>> -> memref<1x128xf32, #tpu.memory_space<vmem>>
    %901 = tpu.memref_slice %arg9[%898] : memref<32x!tpu.dma_semaphore, #tpu.memory_space<semaphore_mem>> -> memref<1x!tpu.dma_semaphore, #tpu.memory_space<semaphore_mem>>
    %902 = tpu.memref_squeeze %901 : memref<1x!tpu.dma_semaphore, #tpu.memory_space<semaphore_mem>> -> memref<!tpu.dma_semaphore, #tpu.memory_space<semaphore_mem>>
    tpu.enqueue_dma source(%899 : memref<1x128xf32, #tpu.memory_space<any>>) target(%900 : memref<1x128xf32, #tpu.memory_space<vmem>>) target_semaphore(%902 : memref<!tpu.dma_semaphore, #tpu.memory_space<semaphore_mem>>)
    %c2_i32_544 = arith.constant 2 : i32
    %903 = arith.addi %772, %c2_i32_544 : i32
    %c31_i32_545 = arith.constant 31 : i32
    %904 = arith.andi %903, %c31_i32_545 : i32
    %c0_i32_546 = arith.constant 0 : i32
    %905 = tpu.memref_slice %arg3[%790, %c0_i32_546] : memref<64x128xf32, #tpu.memory_space<any>> -> memref<1x128xf32, #tpu.memory_space<any>>
    %c0_i32_547 = arith.constant 0 : i32
    %906 = tpu.memref_slice %arg8[%903, %c0_i32_547] : memref<64x128xf32, #tpu.memory_space<vmem>> -> memref<1x128xf32, #tpu.memory_space<vmem>>
    %907 = tpu.memref_slice %arg9[%904] : memref<32x!tpu.dma_semaphore, #tpu.memory_space<semaphore_mem>> -> memref<1x!tpu.dma_semaphore, #tpu.memory_space<semaphore_mem>>
    %908 = tpu.memref_squeeze %907 : memref<1x!tpu.dma_semaphore, #tpu.memory_space<semaphore_mem>> -> memref<!tpu.dma_semaphore, #tpu.memory_space<semaphore_mem>>
    tpu.wait_dma2 semaphore(%908 : memref<!tpu.dma_semaphore, #tpu.memory_space<semaphore_mem>>) src(%905 : memref<1x128xf32, #tpu.memory_space<any>>) dst(%906 : memref<1x128xf32, #tpu.memory_space<vmem>>)
    %c32_i32_548 = arith.constant 32 : i32
    %909 = arith.addi %772, %c32_i32_548 : i32
    %c2_i32_549 = arith.constant 2 : i32
    %910 = arith.addi %909, %c2_i32_549 : i32
    %c31_i32_550 = arith.constant 31 : i32
    %911 = arith.andi %910, %c31_i32_550 : i32
    %c0_i32_551 = arith.constant 0 : i32
    %912 = tpu.memref_slice %arg3[%841, %c0_i32_551] : memref<64x128xf32, #tpu.memory_space<any>> -> memref<1x128xf32, #tpu.memory_space<any>>
    %c0_i32_552 = arith.constant 0 : i32
    %913 = tpu.memref_slice %arg8[%910, %c0_i32_552] : memref<64x128xf32, #tpu.memory_space<vmem>> -> memref<1x128xf32, #tpu.memory_space<vmem>>
    %914 = tpu.memref_slice %arg9[%911] : memref<32x!tpu.dma_semaphore, #tpu.memory_space<semaphore_mem>> -> memref<1x!tpu.dma_semaphore, #tpu.memory_space<semaphore_mem>>
    %915 = tpu.memref_squeeze %914 : memref<1x!tpu.dma_semaphore, #tpu.memory_space<semaphore_mem>> -> memref<!tpu.dma_semaphore, #tpu.memory_space<semaphore_mem>>
    tpu.enqueue_dma source(%912 : memref<1x128xf32, #tpu.memory_space<any>>) target(%913 : memref<1x128xf32, #tpu.memory_space<vmem>>) target_semaphore(%915 : memref<!tpu.dma_semaphore, #tpu.memory_space<semaphore_mem>>)
    %c3_i32_553 = arith.constant 3 : i32
    %916 = arith.addi %772, %c3_i32_553 : i32
    %c31_i32_554 = arith.constant 31 : i32
    %917 = arith.andi %916, %c31_i32_554 : i32
    %c0_i32_555 = arith.constant 0 : i32
    %918 = tpu.memref_slice %arg3[%796, %c0_i32_555] : memref<64x128xf32, #tpu.memory_space<any>> -> memref<1x128xf32, #tpu.memory_space<any>>
    %c0_i32_556 = arith.constant 0 : i32
    %919 = tpu.memref_slice %arg8[%916, %c0_i32_556] : memref<64x128xf32, #tpu.memory_space<vmem>> -> memref<1x128xf32, #tpu.memory_space<vmem>>
    %920 = tpu.memref_slice %arg9[%917] : memref<32x!tpu.dma_semaphore, #tpu.memory_space<semaphore_mem>> -> memref<1x!tpu.dma_semaphore, #tpu.memory_space<semaphore_mem>>
    %921 = tpu.memref_squeeze %920 : memref<1x!tpu.dma_semaphore, #tpu.memory_space<semaphore_mem>> -> memref<!tpu.dma_semaphore, #tpu.memory_space<semaphore_mem>>
    tpu.wait_dma2 semaphore(%921 : memref<!tpu.dma_semaphore, #tpu.memory_space<semaphore_mem>>) src(%918 : memref<1x128xf32, #tpu.memory_space<any>>) dst(%919 : memref<1x128xf32, #tpu.memory_space<vmem>>)
    %c32_i32_557 = arith.constant 32 : i32
    %922 = arith.addi %772, %c32_i32_557 : i32
    %c3_i32_558 = arith.constant 3 : i32
    %923 = arith.addi %922, %c3_i32_558 : i32
    %c31_i32_559 = arith.constant 31 : i32
    %924 = arith.andi %923, %c31_i32_559 : i32
    %c0_i32_560 = arith.constant 0 : i32
    %925 = tpu.memref_slice %arg3[%848, %c0_i32_560] : memref<64x128xf32, #tpu.memory_space<any>> -> memref<1x128xf32, #tpu.memory_space<any>>
    %c0_i32_561 = arith.constant 0 : i32
    %926 = tpu.memref_slice %arg8[%923, %c0_i32_561] : memref<64x128xf32, #tpu.memory_space<vmem>> -> memref<1x128xf32, #tpu.memory_space<vmem>>
    %927 = tpu.memref_slice %arg9[%924] : memref<32x!tpu.dma_semaphore, #tpu.memory_space<semaphore_mem>> -> memref<1x!tpu.dma_semaphore, #tpu.memory_space<semaphore_mem>>
    %928 = tpu.memref_squeeze %927 : memref<1x!tpu.dma_semaphore, #tpu.memory_space<semaphore_mem>> -> memref<!tpu.dma_semaphore, #tpu.memory_space<semaphore_mem>>
    tpu.enqueue_dma source(%925 : memref<1x128xf32, #tpu.memory_space<any>>) target(%926 : memref<1x128xf32, #tpu.memory_space<vmem>>) target_semaphore(%928 : memref<!tpu.dma_semaphore, #tpu.memory_space<semaphore_mem>>)
    %c4_i32_562 = arith.constant 4 : i32
    %929 = arith.addi %772, %c4_i32_562 : i32
    %c31_i32_563 = arith.constant 31 : i32
    %930 = arith.andi %929, %c31_i32_563 : i32
    %c0_i32_564 = arith.constant 0 : i32
    %931 = tpu.memref_slice %arg3[%802, %c0_i32_564] : memref<64x128xf32, #tpu.memory_space<any>> -> memref<1x128xf32, #tpu.memory_space<any>>
    %c0_i32_565 = arith.constant 0 : i32
    %932 = tpu.memref_slice %arg8[%929, %c0_i32_565] : memref<64x128xf32, #tpu.memory_space<vmem>> -> memref<1x128xf32, #tpu.memory_space<vmem>>
    %933 = tpu.memref_slice %arg9[%930] : memref<32x!tpu.dma_semaphore, #tpu.memory_space<semaphore_mem>> -> memref<1x!tpu.dma_semaphore, #tpu.memory_space<semaphore_mem>>
    %934 = tpu.memref_squeeze %933 : memref<1x!tpu.dma_semaphore, #tpu.memory_space<semaphore_mem>> -> memref<!tpu.dma_semaphore, #tpu.memory_space<semaphore_mem>>
    tpu.wait_dma2 semaphore(%934 : memref<!tpu.dma_semaphore, #tpu.memory_space<semaphore_mem>>) src(%931 : memref<1x128xf32, #tpu.memory_space<any>>) dst(%932 : memref<1x128xf32, #tpu.memory_space<vmem>>)
    %c32_i32_566 = arith.constant 32 : i32
    %935 = arith.addi %772, %c32_i32_566 : i32
    %c4_i32_567 = arith.constant 4 : i32
    %936 = arith.addi %935, %c4_i32_567 : i32
    %c31_i32_568 = arith.constant 31 : i32
    %937 = arith.andi %936, %c31_i32_568 : i32
    %c0_i32_569 = arith.constant 0 : i32
    %938 = tpu.memref_slice %arg3[%855, %c0_i32_569] : memref<64x128xf32, #tpu.memory_space<any>> -> memref<1x128xf32, #tpu.memory_space<any>>
    %c0_i32_570 = arith.constant 0 : i32
    %939 = tpu.memref_slice %arg8[%936, %c0_i32_570] : memref<64x128xf32, #tpu.memory_space<vmem>> -> memref<1x128xf32, #tpu.memory_space<vmem>>
    %940 = tpu.memref_slice %arg9[%937] : memref<32x!tpu.dma_semaphore, #tpu.memory_space<semaphore_mem>> -> memref<1x!tpu.dma_semaphore, #tpu.memory_space<semaphore_mem>>
    %941 = tpu.memref_squeeze %940 : memref<1x!tpu.dma_semaphore, #tpu.memory_space<semaphore_mem>> -> memref<!tpu.dma_semaphore, #tpu.memory_space<semaphore_mem>>
    tpu.enqueue_dma source(%938 : memref<1x128xf32, #tpu.memory_space<any>>) target(%939 : memref<1x128xf32, #tpu.memory_space<vmem>>) target_semaphore(%941 : memref<!tpu.dma_semaphore, #tpu.memory_space<semaphore_mem>>)
    %c5_i32_571 = arith.constant 5 : i32
    %942 = arith.addi %772, %c5_i32_571 : i32
    %c31_i32_572 = arith.constant 31 : i32
    %943 = arith.andi %942, %c31_i32_572 : i32
    %c0_i32_573 = arith.constant 0 : i32
    %944 = tpu.memref_slice %arg3[%808, %c0_i32_573] : memref<64x128xf32, #tpu.memory_space<any>> -> memref<1x128xf32, #tpu.memory_space<any>>
    %c0_i32_574 = arith.constant 0 : i32
    %945 = tpu.memref_slice %arg8[%942, %c0_i32_574] : memref<64x128xf32, #tpu.memory_space<vmem>> -> memref<1x128xf32, #tpu.memory_space<vmem>>
    %946 = tpu.memref_slice %arg9[%943] : memref<32x!tpu.dma_semaphore, #tpu.memory_space<semaphore_mem>> -> memref<1x!tpu.dma_semaphore, #tpu.memory_space<semaphore_mem>>
    %947 = tpu.memref_squeeze %946 : memref<1x!tpu.dma_semaphore, #tpu.memory_space<semaphore_mem>> -> memref<!tpu.dma_semaphore, #tpu.memory_space<semaphore_mem>>
    tpu.wait_dma2 semaphore(%947 : memref<!tpu.dma_semaphore, #tpu.memory_space<semaphore_mem>>) src(%944 : memref<1x128xf32, #tpu.memory_space<any>>) dst(%945 : memref<1x128xf32, #tpu.memory_space<vmem>>)
    %c32_i32_575 = arith.constant 32 : i32
    %948 = arith.addi %772, %c32_i32_575 : i32
    %c5_i32_576 = arith.constant 5 : i32
    %949 = arith.addi %948, %c5_i32_576 : i32
    %c31_i32_577 = arith.constant 31 : i32
    %950 = arith.andi %949, %c31_i32_577 : i32
    %c0_i32_578 = arith.constant 0 : i32
    %951 = tpu.memref_slice %arg3[%862, %c0_i32_578] : memref<64x128xf32, #tpu.memory_space<any>> -> memref<1x128xf32, #tpu.memory_space<any>>
    %c0_i32_579 = arith.constant 0 : i32
    %952 = tpu.memref_slice %arg8[%949, %c0_i32_579] : memref<64x128xf32, #tpu.memory_space<vmem>> -> memref<1x128xf32, #tpu.memory_space<vmem>>
    %953 = tpu.memref_slice %arg9[%950] : memref<32x!tpu.dma_semaphore, #tpu.memory_space<semaphore_mem>> -> memref<1x!tpu.dma_semaphore, #tpu.memory_space<semaphore_mem>>
    %954 = tpu.memref_squeeze %953 : memref<1x!tpu.dma_semaphore, #tpu.memory_space<semaphore_mem>> -> memref<!tpu.dma_semaphore, #tpu.memory_space<semaphore_mem>>
    tpu.enqueue_dma source(%951 : memref<1x128xf32, #tpu.memory_space<any>>) target(%952 : memref<1x128xf32, #tpu.memory_space<vmem>>) target_semaphore(%954 : memref<!tpu.dma_semaphore, #tpu.memory_space<semaphore_mem>>)
    %c6_i32_580 = arith.constant 6 : i32
    %955 = arith.addi %772, %c6_i32_580 : i32
    %c31_i32_581 = arith.constant 31 : i32
    %956 = arith.andi %955, %c31_i32_581 : i32
    %c0_i32_582 = arith.constant 0 : i32
    %957 = tpu.memref_slice %arg3[%814, %c0_i32_582] : memref<64x128xf32, #tpu.memory_space<any>> -> memref<1x128xf32, #tpu.memory_space<any>>
    %c0_i32_583 = arith.constant 0 : i32
    %958 = tpu.memref_slice %arg8[%955, %c0_i32_583] : memref<64x128xf32, #tpu.memory_space<vmem>> -> memref<1x128xf32, #tpu.memory_space<vmem>>
    %959 = tpu.memref_slice %arg9[%956] : memref<32x!tpu.dma_semaphore, #tpu.memory_space<semaphore_mem>> -> memref<1x!tpu.dma_semaphore, #tpu.memory_space<semaphore_mem>>
    %960 = tpu.memref_squeeze %959 : memref<1x!tpu.dma_semaphore, #tpu.memory_space<semaphore_mem>> -> memref<!tpu.dma_semaphore, #tpu.memory_space<semaphore_mem>>
    tpu.wait_dma2 semaphore(%960 : memref<!tpu.dma_semaphore, #tpu.memory_space<semaphore_mem>>) src(%957 : memref<1x128xf32, #tpu.memory_space<any>>) dst(%958 : memref<1x128xf32, #tpu.memory_space<vmem>>)
    %c32_i32_584 = arith.constant 32 : i32
    %961 = arith.addi %772, %c32_i32_584 : i32
    %c6_i32_585 = arith.constant 6 : i32
    %962 = arith.addi %961, %c6_i32_585 : i32
    %c31_i32_586 = arith.constant 31 : i32
    %963 = arith.andi %962, %c31_i32_586 : i32
    %c0_i32_587 = arith.constant 0 : i32
    %964 = tpu.memref_slice %arg3[%869, %c0_i32_587] : memref<64x128xf32, #tpu.memory_space<any>> -> memref<1x128xf32, #tpu.memory_space<any>>
    %c0_i32_588 = arith.constant 0 : i32
    %965 = tpu.memref_slice %arg8[%962, %c0_i32_588] : memref<64x128xf32, #tpu.memory_space<vmem>> -> memref<1x128xf32, #tpu.memory_space<vmem>>
    %966 = tpu.memref_slice %arg9[%963] : memref<32x!tpu.dma_semaphore, #tpu.memory_space<semaphore_mem>> -> memref<1x!tpu.dma_semaphore, #tpu.memory_space<semaphore_mem>>
    %967 = tpu.memref_squeeze %966 : memref<1x!tpu.dma_semaphore, #tpu.memory_space<semaphore_mem>> -> memref<!tpu.dma_semaphore, #tpu.memory_space<semaphore_mem>>
    tpu.enqueue_dma source(%964 : memref<1x128xf32, #tpu.memory_space<any>>) target(%965 : memref<1x128xf32, #tpu.memory_space<vmem>>) target_semaphore(%967 : memref<!tpu.dma_semaphore, #tpu.memory_space<semaphore_mem>>)
    %c7_i32_589 = arith.constant 7 : i32
    %968 = arith.addi %772, %c7_i32_589 : i32
    %c31_i32_590 = arith.constant 31 : i32
    %969 = arith.andi %968, %c31_i32_590 : i32
    %c0_i32_591 = arith.constant 0 : i32
    %970 = tpu.memref_slice %arg3[%820, %c0_i32_591] : memref<64x128xf32, #tpu.memory_space<any>> -> memref<1x128xf32, #tpu.memory_space<any>>
    %c0_i32_592 = arith.constant 0 : i32
    %971 = tpu.memref_slice %arg8[%968, %c0_i32_592] : memref<64x128xf32, #tpu.memory_space<vmem>> -> memref<1x128xf32, #tpu.memory_space<vmem>>
    %972 = tpu.memref_slice %arg9[%969] : memref<32x!tpu.dma_semaphore, #tpu.memory_space<semaphore_mem>> -> memref<1x!tpu.dma_semaphore, #tpu.memory_space<semaphore_mem>>
    %973 = tpu.memref_squeeze %972 : memref<1x!tpu.dma_semaphore, #tpu.memory_space<semaphore_mem>> -> memref<!tpu.dma_semaphore, #tpu.memory_space<semaphore_mem>>
    tpu.wait_dma2 semaphore(%973 : memref<!tpu.dma_semaphore, #tpu.memory_space<semaphore_mem>>) src(%970 : memref<1x128xf32, #tpu.memory_space<any>>) dst(%971 : memref<1x128xf32, #tpu.memory_space<vmem>>)
    %c32_i32_593 = arith.constant 32 : i32
    %974 = arith.addi %772, %c32_i32_593 : i32
    %c7_i32_594 = arith.constant 7 : i32
    %975 = arith.addi %974, %c7_i32_594 : i32
    %c31_i32_595 = arith.constant 31 : i32
    %976 = arith.andi %975, %c31_i32_595 : i32
    %c0_i32_596 = arith.constant 0 : i32
    %977 = tpu.memref_slice %arg3[%876, %c0_i32_596] : memref<64x128xf32, #tpu.memory_space<any>> -> memref<1x128xf32, #tpu.memory_space<any>>
    %c0_i32_597 = arith.constant 0 : i32
    %978 = tpu.memref_slice %arg8[%975, %c0_i32_597] : memref<64x128xf32, #tpu.memory_space<vmem>> -> memref<1x128xf32, #tpu.memory_space<vmem>>
    %979 = tpu.memref_slice %arg9[%976] : memref<32x!tpu.dma_semaphore, #tpu.memory_space<semaphore_mem>> -> memref<1x!tpu.dma_semaphore, #tpu.memory_space<semaphore_mem>>
    %980 = tpu.memref_squeeze %979 : memref<1x!tpu.dma_semaphore, #tpu.memory_space<semaphore_mem>> -> memref<!tpu.dma_semaphore, #tpu.memory_space<semaphore_mem>>
    tpu.enqueue_dma source(%977 : memref<1x128xf32, #tpu.memory_space<any>>) target(%978 : memref<1x128xf32, #tpu.memory_space<vmem>>) target_semaphore(%980 : memref<!tpu.dma_semaphore, #tpu.memory_space<semaphore_mem>>)
    %981 = arith.index_cast %772 : i32 to index
    %c0_598 = arith.constant 0 : index
    %982 = vector.load %arg8[%981, %c0_598] : memref<64x128xf32, #tpu.memory_space<vmem>>, vector<8x128xf32>
    %983 = arith.index_cast %772 : i32 to index
    %c0_599 = arith.constant 0 : index
    %984 = vector.load %arg4[%983, %c0_599] : memref<64x128xf32, #tpu.memory_space<vmem>>, vector<8x128xf32>
    %985 = arith.addf %982, %984 : vector<8x128xf32>
    %cst_600 = arith.constant dense<0.000000e+00> : vector<8xf32>
    %986 = vector.multi_reduction <add>, %985, %cst_600 [1] : vector<8x128xf32> to vector<8xf32>
    %987 = vector.shape_cast %986 : vector<8xf32> to vector<8x1xf32>
    %988 = vector.broadcast %cst : f32 to vector<8x1xf32>
    %989 = arith.mulf %987, %988 : vector<8x1xf32>
    %990 = vector.broadcast %989 : vector<8x1xf32> to vector<8x128xf32>
    %991 = arith.subf %985, %990 : vector<8x128xf32>
    %992 = arith.mulf %991, %991 : vector<8x128xf32>
    %cst_601 = arith.constant dense<0.000000e+00> : vector<8xf32>
    %993 = vector.multi_reduction <add>, %992, %cst_601 [1] : vector<8x128xf32> to vector<8xf32>
    %994 = vector.shape_cast %993 : vector<8xf32> to vector<8x1xf32>
    %995 = vector.broadcast %cst : f32 to vector<8x1xf32>
    %996 = arith.mulf %994, %995 : vector<8x1xf32>
    %cst_602 = arith.constant 9.99999996E-13 : f32
    %997 = vector.broadcast %cst_602 : f32 to vector<8x1xf32>
    %998 = arith.addf %996, %997 : vector<8x1xf32>
    %999 = math.rsqrt %998 : vector<8x1xf32>
    %1000 = vector.broadcast %999 : vector<8x1xf32> to vector<8x128xf32>
    %1001 = arith.mulf %991, %1000 : vector<8x128xf32>
    %1002 = vector.broadcast %291 : vector<1x128xf32> to vector<8x128xf32>
    %1003 = arith.mulf %1001, %1002 : vector<8x128xf32>
    %1004 = vector.broadcast %292 : vector<1x128xf32> to vector<8x128xf32>
    %1005 = arith.addf %1003, %1004 : vector<8x128xf32>
    %c0_603 = arith.constant 0 : index
    %1006 = arith.index_cast %772 : i32 to index
    %c0_604 = arith.constant 0 : index
    %1007 = vector.load %arg7[%c0_603, %1006, %c0_604] : memref<1x64x128xf32, #tpu.memory_space<vmem>>, vector<1x8x128xf32>
    %1008 = vector.shape_cast %1007 : vector<1x8x128xf32> to vector<8x128xf32>
    %1009 = vector.shape_cast %1005 : vector<8x128xf32> to vector<1x8x128xf32>
    tpu.vector_store %arg7[%c0_603, %1006, %c0_604], %1009 {strides = array<i32>} : memref<1x64x128xf32, #tpu.memory_space<vmem>>, vector<1x8x128xf32>,
    %c3_i32_605 = arith.constant 3 : i32
    %c8_i32_606 = arith.constant 8 : i32
    %1010 = arith.muli %c3_i32_605, %c8_i32_606 : i32
    %1011 = tpu.assume_multiple %1010, 8 : i32
    %c0_i32_607 = arith.constant 0 : i32
    %1012 = arith.addi %1011, %c0_i32_607 : i32
    %1013 = arith.addi %2, %1012 : i32
    %1014 = arith.index_cast %1013 : i32 to index
    %1015 = memref.load %arg2[%1014] : memref<128xi32, #tpu.memory_space<smem>>
    %c0_i32_608 = arith.constant 0 : i32
    %c63_i32_609 = arith.constant 63 : i32
    %1016 = arith.maxsi %c0_i32_608, %1015 : i32
    %1017 = arith.minsi %c63_i32_609, %1016 : i32
    %c1_i32_610 = arith.constant 1 : i32
    %1018 = arith.addi %1011, %c1_i32_610 : i32
    %1019 = arith.addi %2, %1018 : i32
    %1020 = arith.index_cast %1019 : i32 to index
    %1021 = memref.load %arg2[%1020] : memref<128xi32, #tpu.memory_space<smem>>
    %c0_i32_611 = arith.constant 0 : i32
    %c63_i32_612 = arith.constant 63 : i32
    %1022 = arith.maxsi %c0_i32_611, %1021 : i32
    %1023 = arith.minsi %c63_i32_612, %1022 : i32
    %c2_i32_613 = arith.constant 2 : i32
    %1024 = arith.addi %1011, %c2_i32_613 : i32
    %1025 = arith.addi %2, %1024 : i32
    %1026 = arith.index_cast %1025 : i32 to index
    %1027 = memref.load %arg2[%1026] : memref<128xi32, #tpu.memory_space<smem>>
    %c0_i32_614 = arith.constant 0 : i32
    %c63_i32_615 = arith.constant 63 : i32
    %1028 = arith.maxsi %c0_i32_614, %1027 : i32
    %1029 = arith.minsi %c63_i32_615, %1028 : i32
    %c3_i32_616 = arith.constant 3 : i32
    %1030 = arith.addi %1011, %c3_i32_616 : i32
    %1031 = arith.addi %2, %1030 : i32
    %1032 = arith.index_cast %1031 : i32 to index
    %1033 = memref.load %arg2[%1032] : memref<128xi32, #tpu.memory_space<smem>>
    %c0_i32_617 = arith.constant 0 : i32
    %c63_i32_618 = arith.constant 63 : i32
    %1034 = arith.maxsi %c0_i32_617, %1033 : i32
    %1035 = arith.minsi %c63_i32_618, %1034 : i32
    %c4_i32_619 = arith.constant 4 : i32
    %1036 = arith.addi %1011, %c4_i32_619 : i32
    %1037 = arith.addi %2, %1036 : i32
    %1038 = arith.index_cast %1037 : i32 to index
    %1039 = memref.load %arg2[%1038] : memref<128xi32, #tpu.memory_space<smem>>
    %c0_i32_620 = arith.constant 0 : i32
    %c63_i32_621 = arith.constant 63 : i32
    %1040 = arith.maxsi %c0_i32_620, %1039 : i32
    %1041 = arith.minsi %c63_i32_621, %1040 : i32
    %c5_i32_622 = arith.constant 5 : i32
    %1042 = arith.addi %1011, %c5_i32_622 : i32
    %1043 = arith.addi %2, %1042 : i32
    %1044 = arith.index_cast %1043 : i32 to index
    %1045 = memref.load %arg2[%1044] : memref<128xi32, #tpu.memory_space<smem>>
    %c0_i32_623 = arith.constant 0 : i32
    %c63_i32_624 = arith.constant 63 : i32
    %1046 = arith.maxsi %c0_i32_623, %1045 : i32
    %1047 = arith.minsi %c63_i32_624, %1046 : i32
    %c6_i32_625 = arith.constant 6 : i32
    %1048 = arith.addi %1011, %c6_i32_625 : i32
    %1049 = arith.addi %2, %1048 : i32
    %1050 = arith.index_cast %1049 : i32 to index
    %1051 = memref.load %arg2[%1050] : memref<128xi32, #tpu.memory_space<smem>>
    %c0_i32_626 = arith.constant 0 : i32
    %c63_i32_627 = arith.constant 63 : i32
    %1052 = arith.maxsi %c0_i32_626, %1051 : i32
    %1053 = arith.minsi %c63_i32_627, %1052 : i32
    %c7_i32_628 = arith.constant 7 : i32
    %1054 = arith.addi %1011, %c7_i32_628 : i32
    %1055 = arith.addi %2, %1054 : i32
    %1056 = arith.index_cast %1055 : i32 to index
    %1057 = memref.load %arg2[%1056] : memref<128xi32, #tpu.memory_space<smem>>
    %c0_i32_629 = arith.constant 0 : i32
    %c63_i32_630 = arith.constant 63 : i32
    %1058 = arith.maxsi %c0_i32_629, %1057 : i32
    %1059 = arith.minsi %c63_i32_630, %1058 : i32
    %c32_i32_631 = arith.constant 32 : i32
    %1060 = arith.addi %1011, %c32_i32_631 : i32
    %c0_i32_632 = arith.constant 0 : i32
    %1061 = arith.addi %1060, %c0_i32_632 : i32
    %1062 = arith.addi %2, %1061 : i32
    %1063 = arith.index_cast %1062 : i32 to index
    %1064 = memref.load %arg2[%1063] : memref<128xi32, #tpu.memory_space<smem>>
    %c0_i32_633 = arith.constant 0 : i32
    %c63_i32_634 = arith.constant 63 : i32
    %1065 = arith.maxsi %c0_i32_633, %1064 : i32
    %1066 = arith.minsi %c63_i32_634, %1065 : i32
    %c32_i32_635 = arith.constant 32 : i32
    %1067 = arith.addi %1011, %c32_i32_635 : i32
    %c1_i32_636 = arith.constant 1 : i32
    %1068 = arith.addi %1067, %c1_i32_636 : i32
    %1069 = arith.addi %2, %1068 : i32
    %1070 = arith.index_cast %1069 : i32 to index
    %1071 = memref.load %arg2[%1070] : memref<128xi32, #tpu.memory_space<smem>>
    %c0_i32_637 = arith.constant 0 : i32
    %c63_i32_638 = arith.constant 63 : i32
    %1072 = arith.maxsi %c0_i32_637, %1071 : i32
    %1073 = arith.minsi %c63_i32_638, %1072 : i32
    %c32_i32_639 = arith.constant 32 : i32
    %1074 = arith.addi %1011, %c32_i32_639 : i32
    %c2_i32_640 = arith.constant 2 : i32
    %1075 = arith.addi %1074, %c2_i32_640 : i32
    %1076 = arith.addi %2, %1075 : i32
    %1077 = arith.index_cast %1076 : i32 to index
    %1078 = memref.load %arg2[%1077] : memref<128xi32, #tpu.memory_space<smem>>
    %c0_i32_641 = arith.constant 0 : i32
    %c63_i32_642 = arith.constant 63 : i32
    %1079 = arith.maxsi %c0_i32_641, %1078 : i32
    %1080 = arith.minsi %c63_i32_642, %1079 : i32
    %c32_i32_643 = arith.constant 32 : i32
    %1081 = arith.addi %1011, %c32_i32_643 : i32
    %c3_i32_644 = arith.constant 3 : i32
    %1082 = arith.addi %1081, %c3_i32_644 : i32
    %1083 = arith.addi %2, %1082 : i32
    %1084 = arith.index_cast %1083 : i32 to index
    %1085 = memref.load %arg2[%1084] : memref<128xi32, #tpu.memory_space<smem>>
    %c0_i32_645 = arith.constant 0 : i32
    %c63_i32_646 = arith.constant 63 : i32
    %1086 = arith.maxsi %c0_i32_645, %1085 : i32
    %1087 = arith.minsi %c63_i32_646, %1086 : i32
    %c32_i32_647 = arith.constant 32 : i32
    %1088 = arith.addi %1011, %c32_i32_647 : i32
    %c4_i32_648 = arith.constant 4 : i32
    %1089 = arith.addi %1088, %c4_i32_648 : i32
    %1090 = arith.addi %2, %1089 : i32
    %1091 = arith.index_cast %1090 : i32 to index
    %1092 = memref.load %arg2[%1091] : memref<128xi32, #tpu.memory_space<smem>>
    %c0_i32_649 = arith.constant 0 : i32
    %c63_i32_650 = arith.constant 63 : i32
    %1093 = arith.maxsi %c0_i32_649, %1092 : i32
    %1094 = arith.minsi %c63_i32_650, %1093 : i32
    %c32_i32_651 = arith.constant 32 : i32
    %1095 = arith.addi %1011, %c32_i32_651 : i32
    %c5_i32_652 = arith.constant 5 : i32
    %1096 = arith.addi %1095, %c5_i32_652 : i32
    %1097 = arith.addi %2, %1096 : i32
    %1098 = arith.index_cast %1097 : i32 to index
    %1099 = memref.load %arg2[%1098] : memref<128xi32, #tpu.memory_space<smem>>
    %c0_i32_653 = arith.constant 0 : i32
    %c63_i32_654 = arith.constant 63 : i32
    %1100 = arith.maxsi %c0_i32_653, %1099 : i32
    %1101 = arith.minsi %c63_i32_654, %1100 : i32
    %c32_i32_655 = arith.constant 32 : i32
    %1102 = arith.addi %1011, %c32_i32_655 : i32
    %c6_i32_656 = arith.constant 6 : i32
    %1103 = arith.addi %1102, %c6_i32_656 : i32
    %1104 = arith.addi %2, %1103 : i32
    %1105 = arith.index_cast %1104 : i32 to index
    %1106 = memref.load %arg2[%1105] : memref<128xi32, #tpu.memory_space<smem>>
    %c0_i32_657 = arith.constant 0 : i32
    %c63_i32_658 = arith.constant 63 : i32
    %1107 = arith.maxsi %c0_i32_657, %1106 : i32
    %1108 = arith.minsi %c63_i32_658, %1107 : i32
    %c32_i32_659 = arith.constant 32 : i32
    %1109 = arith.addi %1011, %c32_i32_659 : i32
    %c7_i32_660 = arith.constant 7 : i32
    %1110 = arith.addi %1109, %c7_i32_660 : i32
    %1111 = arith.addi %2, %1110 : i32
    %1112 = arith.index_cast %1111 : i32 to index
    %1113 = memref.load %arg2[%1112] : memref<128xi32, #tpu.memory_space<smem>>
    %c0_i32_661 = arith.constant 0 : i32
    %c63_i32_662 = arith.constant 63 : i32
    %1114 = arith.maxsi %c0_i32_661, %1113 : i32
    %1115 = arith.minsi %c63_i32_662, %1114 : i32
    %c0_i32_663 = arith.constant 0 : i32
    %1116 = arith.addi %1011, %c0_i32_663 : i32
    %c31_i32_664 = arith.constant 31 : i32
    %1117 = arith.andi %1116, %c31_i32_664 : i32
    %c0_i32_665 = arith.constant 0 : i32
    %1118 = tpu.memref_slice %arg3[%1017, %c0_i32_665] : memref<64x128xf32, #tpu.memory_space<any>> -> memref<1x128xf32, #tpu.memory_space<any>>
    %c0_i32_666 = arith.constant 0 : i32
    %1119 = tpu.memref_slice %arg8[%1116, %c0_i32_666] : memref<64x128xf32, #tpu.memory_space<vmem>> -> memref<1x128xf32, #tpu.memory_space<vmem>>
    %1120 = tpu.memref_slice %arg9[%1117] : memref<32x!tpu.dma_semaphore, #tpu.memory_space<semaphore_mem>> -> memref<1x!tpu.dma_semaphore, #tpu.memory_space<semaphore_mem>>
    %1121 = tpu.memref_squeeze %1120 : memref<1x!tpu.dma_semaphore, #tpu.memory_space<semaphore_mem>> -> memref<!tpu.dma_semaphore, #tpu.memory_space<semaphore_mem>>
    tpu.wait_dma2 semaphore(%1121 : memref<!tpu.dma_semaphore, #tpu.memory_space<semaphore_mem>>) src(%1118 : memref<1x128xf32, #tpu.memory_space<any>>) dst(%1119 : memref<1x128xf32, #tpu.memory_space<vmem>>)
    %c32_i32_667 = arith.constant 32 : i32
    %1122 = arith.addi %1011, %c32_i32_667 : i32
    %c0_i32_668 = arith.constant 0 : i32
    %1123 = arith.addi %1122, %c0_i32_668 : i32
    %c31_i32_669 = arith.constant 31 : i32
    %1124 = arith.andi %1123, %c31_i32_669 : i32
    %c0_i32_670 = arith.constant 0 : i32
    %1125 = tpu.memref_slice %arg3[%1066, %c0_i32_670] : memref<64x128xf32, #tpu.memory_space<any>> -> memref<1x128xf32, #tpu.memory_space<any>>
    %c0_i32_671 = arith.constant 0 : i32
    %1126 = tpu.memref_slice %arg8[%1123, %c0_i32_671] : memref<64x128xf32, #tpu.memory_space<vmem>> -> memref<1x128xf32, #tpu.memory_space<vmem>>
    %1127 = tpu.memref_slice %arg9[%1124] : memref<32x!tpu.dma_semaphore, #tpu.memory_space<semaphore_mem>> -> memref<1x!tpu.dma_semaphore, #tpu.memory_space<semaphore_mem>>
    %1128 = tpu.memref_squeeze %1127 : memref<1x!tpu.dma_semaphore, #tpu.memory_space<semaphore_mem>> -> memref<!tpu.dma_semaphore, #tpu.memory_space<semaphore_mem>>
    tpu.enqueue_dma source(%1125 : memref<1x128xf32, #tpu.memory_space<any>>) target(%1126 : memref<1x128xf32, #tpu.memory_space<vmem>>) target_semaphore(%1128 : memref<!tpu.dma_semaphore, #tpu.memory_space<semaphore_mem>>)
    %c1_i32_672 = arith.constant 1 : i32
    %1129 = arith.addi %1011, %c1_i32_672 : i32
    %c31_i32_673 = arith.constant 31 : i32
    %1130 = arith.andi %1129, %c31_i32_673 : i32
    %c0_i32_674 = arith.constant 0 : i32
    %1131 = tpu.memref_slice %arg3[%1023, %c0_i32_674] : memref<64x128xf32, #tpu.memory_space<any>> -> memref<1x128xf32, #tpu.memory_space<any>>
    %c0_i32_675 = arith.constant 0 : i32
    %1132 = tpu.memref_slice %arg8[%1129, %c0_i32_675] : memref<64x128xf32, #tpu.memory_space<vmem>> -> memref<1x128xf32, #tpu.memory_space<vmem>>
    %1133 = tpu.memref_slice %arg9[%1130] : memref<32x!tpu.dma_semaphore, #tpu.memory_space<semaphore_mem>> -> memref<1x!tpu.dma_semaphore, #tpu.memory_space<semaphore_mem>>
    %1134 = tpu.memref_squeeze %1133 : memref<1x!tpu.dma_semaphore, #tpu.memory_space<semaphore_mem>> -> memref<!tpu.dma_semaphore, #tpu.memory_space<semaphore_mem>>
    tpu.wait_dma2 semaphore(%1134 : memref<!tpu.dma_semaphore, #tpu.memory_space<semaphore_mem>>) src(%1131 : memref<1x128xf32, #tpu.memory_space<any>>) dst(%1132 : memref<1x128xf32, #tpu.memory_space<vmem>>)
    %c32_i32_676 = arith.constant 32 : i32
    %1135 = arith.addi %1011, %c32_i32_676 : i32
    %c1_i32_677 = arith.constant 1 : i32
    %1136 = arith.addi %1135, %c1_i32_677 : i32
    %c31_i32_678 = arith.constant 31 : i32
    %1137 = arith.andi %1136, %c31_i32_678 : i32
    %c0_i32_679 = arith.constant 0 : i32
    %1138 = tpu.memref_slice %arg3[%1073, %c0_i32_679] : memref<64x128xf32, #tpu.memory_space<any>> -> memref<1x128xf32, #tpu.memory_space<any>>
    %c0_i32_680 = arith.constant 0 : i32
    %1139 = tpu.memref_slice %arg8[%1136, %c0_i32_680] : memref<64x128xf32, #tpu.memory_space<vmem>> -> memref<1x128xf32, #tpu.memory_space<vmem>>
    %1140 = tpu.memref_slice %arg9[%1137] : memref<32x!tpu.dma_semaphore, #tpu.memory_space<semaphore_mem>> -> memref<1x!tpu.dma_semaphore, #tpu.memory_space<semaphore_mem>>
    %1141 = tpu.memref_squeeze %1140 : memref<1x!tpu.dma_semaphore, #tpu.memory_space<semaphore_mem>> -> memref<!tpu.dma_semaphore, #tpu.memory_space<semaphore_mem>>
    tpu.enqueue_dma source(%1138 : memref<1x128xf32, #tpu.memory_space<any>>) target(%1139 : memref<1x128xf32, #tpu.memory_space<vmem>>) target_semaphore(%1141 : memref<!tpu.dma_semaphore, #tpu.memory_space<semaphore_mem>>)
    %c2_i32_681 = arith.constant 2 : i32
    %1142 = arith.addi %1011, %c2_i32_681 : i32
    %c31_i32_682 = arith.constant 31 : i32
    %1143 = arith.andi %1142, %c31_i32_682 : i32
    %c0_i32_683 = arith.constant 0 : i32
    %1144 = tpu.memref_slice %arg3[%1029, %c0_i32_683] : memref<64x128xf32, #tpu.memory_space<any>> -> memref<1x128xf32, #tpu.memory_space<any>>
    %c0_i32_684 = arith.constant 0 : i32
    %1145 = tpu.memref_slice %arg8[%1142, %c0_i32_684] : memref<64x128xf32, #tpu.memory_space<vmem>> -> memref<1x128xf32, #tpu.memory_space<vmem>>
    %1146 = tpu.memref_slice %arg9[%1143] : memref<32x!tpu.dma_semaphore, #tpu.memory_space<semaphore_mem>> -> memref<1x!tpu.dma_semaphore, #tpu.memory_space<semaphore_mem>>
    %1147 = tpu.memref_squeeze %1146 : memref<1x!tpu.dma_semaphore, #tpu.memory_space<semaphore_mem>> -> memref<!tpu.dma_semaphore, #tpu.memory_space<semaphore_mem>>
    tpu.wait_dma2 semaphore(%1147 : memref<!tpu.dma_semaphore, #tpu.memory_space<semaphore_mem>>) src(%1144 : memref<1x128xf32, #tpu.memory_space<any>>) dst(%1145 : memref<1x128xf32, #tpu.memory_space<vmem>>)
    %c32_i32_685 = arith.constant 32 : i32
    %1148 = arith.addi %1011, %c32_i32_685 : i32
    %c2_i32_686 = arith.constant 2 : i32
    %1149 = arith.addi %1148, %c2_i32_686 : i32
    %c31_i32_687 = arith.constant 31 : i32
    %1150 = arith.andi %1149, %c31_i32_687 : i32
    %c0_i32_688 = arith.constant 0 : i32
    %1151 = tpu.memref_slice %arg3[%1080, %c0_i32_688] : memref<64x128xf32, #tpu.memory_space<any>> -> memref<1x128xf32, #tpu.memory_space<any>>
    %c0_i32_689 = arith.constant 0 : i32
    %1152 = tpu.memref_slice %arg8[%1149, %c0_i32_689] : memref<64x128xf32, #tpu.memory_space<vmem>> -> memref<1x128xf32, #tpu.memory_space<vmem>>
    %1153 = tpu.memref_slice %arg9[%1150] : memref<32x!tpu.dma_semaphore, #tpu.memory_space<semaphore_mem>> -> memref<1x!tpu.dma_semaphore, #tpu.memory_space<semaphore_mem>>
    %1154 = tpu.memref_squeeze %1153 : memref<1x!tpu.dma_semaphore, #tpu.memory_space<semaphore_mem>> -> memref<!tpu.dma_semaphore, #tpu.memory_space<semaphore_mem>>
    tpu.enqueue_dma source(%1151 : memref<1x128xf32, #tpu.memory_space<any>>) target(%1152 : memref<1x128xf32, #tpu.memory_space<vmem>>) target_semaphore(%1154 : memref<!tpu.dma_semaphore, #tpu.memory_space<semaphore_mem>>)
    %c3_i32_690 = arith.constant 3 : i32
    %1155 = arith.addi %1011, %c3_i32_690 : i32
    %c31_i32_691 = arith.constant 31 : i32
    %1156 = arith.andi %1155, %c31_i32_691 : i32
    %c0_i32_692 = arith.constant 0 : i32
    %1157 = tpu.memref_slice %arg3[%1035, %c0_i32_692] : memref<64x128xf32, #tpu.memory_space<any>> -> memref<1x128xf32, #tpu.memory_space<any>>
    %c0_i32_693 = arith.constant 0 : i32
    %1158 = tpu.memref_slice %arg8[%1155, %c0_i32_693] : memref<64x128xf32, #tpu.memory_space<vmem>> -> memref<1x128xf32, #tpu.memory_space<vmem>>
    %1159 = tpu.memref_slice %arg9[%1156] : memref<32x!tpu.dma_semaphore, #tpu.memory_space<semaphore_mem>> -> memref<1x!tpu.dma_semaphore, #tpu.memory_space<semaphore_mem>>
    %1160 = tpu.memref_squeeze %1159 : memref<1x!tpu.dma_semaphore, #tpu.memory_space<semaphore_mem>> -> memref<!tpu.dma_semaphore, #tpu.memory_space<semaphore_mem>>
    tpu.wait_dma2 semaphore(%1160 : memref<!tpu.dma_semaphore, #tpu.memory_space<semaphore_mem>>) src(%1157 : memref<1x128xf32, #tpu.memory_space<any>>) dst(%1158 : memref<1x128xf32, #tpu.memory_space<vmem>>)
    %c32_i32_694 = arith.constant 32 : i32
    %1161 = arith.addi %1011, %c32_i32_694 : i32
    %c3_i32_695 = arith.constant 3 : i32
    %1162 = arith.addi %1161, %c3_i32_695 : i32
    %c31_i32_696 = arith.constant 31 : i32
    %1163 = arith.andi %1162, %c31_i32_696 : i32
    %c0_i32_697 = arith.constant 0 : i32
    %1164 = tpu.memref_slice %arg3[%1087, %c0_i32_697] : memref<64x128xf32, #tpu.memory_space<any>> -> memref<1x128xf32, #tpu.memory_space<any>>
    %c0_i32_698 = arith.constant 0 : i32
    %1165 = tpu.memref_slice %arg8[%1162, %c0_i32_698] : memref<64x128xf32, #tpu.memory_space<vmem>> -> memref<1x128xf32, #tpu.memory_space<vmem>>
    %1166 = tpu.memref_slice %arg9[%1163] : memref<32x!tpu.dma_semaphore, #tpu.memory_space<semaphore_mem>> -> memref<1x!tpu.dma_semaphore, #tpu.memory_space<semaphore_mem>>
    %1167 = tpu.memref_squeeze %1166 : memref<1x!tpu.dma_semaphore, #tpu.memory_space<semaphore_mem>> -> memref<!tpu.dma_semaphore, #tpu.memory_space<semaphore_mem>>
    tpu.enqueue_dma source(%1164 : memref<1x128xf32, #tpu.memory_space<any>>) target(%1165 : memref<1x128xf32, #tpu.memory_space<vmem>>) target_semaphore(%1167 : memref<!tpu.dma_semaphore, #tpu.memory_space<semaphore_mem>>)
    %c4_i32_699 = arith.constant 4 : i32
    %1168 = arith.addi %1011, %c4_i32_699 : i32
    %c31_i32_700 = arith.constant 31 : i32
    %1169 = arith.andi %1168, %c31_i32_700 : i32
    %c0_i32_701 = arith.constant 0 : i32
    %1170 = tpu.memref_slice %arg3[%1041, %c0_i32_701] : memref<64x128xf32, #tpu.memory_space<any>> -> memref<1x128xf32, #tpu.memory_space<any>>
    %c0_i32_702 = arith.constant 0 : i32
    %1171 = tpu.memref_slice %arg8[%1168, %c0_i32_702] : memref<64x128xf32, #tpu.memory_space<vmem>> -> memref<1x128xf32, #tpu.memory_space<vmem>>
    %1172 = tpu.memref_slice %arg9[%1169] : memref<32x!tpu.dma_semaphore, #tpu.memory_space<semaphore_mem>> -> memref<1x!tpu.dma_semaphore, #tpu.memory_space<semaphore_mem>>
    %1173 = tpu.memref_squeeze %1172 : memref<1x!tpu.dma_semaphore, #tpu.memory_space<semaphore_mem>> -> memref<!tpu.dma_semaphore, #tpu.memory_space<semaphore_mem>>
    tpu.wait_dma2 semaphore(%1173 : memref<!tpu.dma_semaphore, #tpu.memory_space<semaphore_mem>>) src(%1170 : memref<1x128xf32, #tpu.memory_space<any>>) dst(%1171 : memref<1x128xf32, #tpu.memory_space<vmem>>)
    %c32_i32_703 = arith.constant 32 : i32
    %1174 = arith.addi %1011, %c32_i32_703 : i32
    %c4_i32_704 = arith.constant 4 : i32
    %1175 = arith.addi %1174, %c4_i32_704 : i32
    %c31_i32_705 = arith.constant 31 : i32
    %1176 = arith.andi %1175, %c31_i32_705 : i32
    %c0_i32_706 = arith.constant 0 : i32
    %1177 = tpu.memref_slice %arg3[%1094, %c0_i32_706] : memref<64x128xf32, #tpu.memory_space<any>> -> memref<1x128xf32, #tpu.memory_space<any>>
    %c0_i32_707 = arith.constant 0 : i32
    %1178 = tpu.memref_slice %arg8[%1175, %c0_i32_707] : memref<64x128xf32, #tpu.memory_space<vmem>> -> memref<1x128xf32, #tpu.memory_space<vmem>>
    %1179 = tpu.memref_slice %arg9[%1176] : memref<32x!tpu.dma_semaphore, #tpu.memory_space<semaphore_mem>> -> memref<1x!tpu.dma_semaphore, #tpu.memory_space<semaphore_mem>>
    %1180 = tpu.memref_squeeze %1179 : memref<1x!tpu.dma_semaphore, #tpu.memory_space<semaphore_mem>> -> memref<!tpu.dma_semaphore, #tpu.memory_space<semaphore_mem>>
    tpu.enqueue_dma source(%1177 : memref<1x128xf32, #tpu.memory_space<any>>) target(%1178 : memref<1x128xf32, #tpu.memory_space<vmem>>) target_semaphore(%1180 : memref<!tpu.dma_semaphore, #tpu.memory_space<semaphore_mem>>)
    %c5_i32_708 = arith.constant 5 : i32
    %1181 = arith.addi %1011, %c5_i32_708 : i32
    %c31_i32_709 = arith.constant 31 : i32
    %1182 = arith.andi %1181, %c31_i32_709 : i32
    %c0_i32_710 = arith.constant 0 : i32
    %1183 = tpu.memref_slice %arg3[%1047, %c0_i32_710] : memref<64x128xf32, #tpu.memory_space<any>> -> memref<1x128xf32, #tpu.memory_space<any>>
    %c0_i32_711 = arith.constant 0 : i32
    %1184 = tpu.memref_slice %arg8[%1181, %c0_i32_711] : memref<64x128xf32, #tpu.memory_space<vmem>> -> memref<1x128xf32, #tpu.memory_space<vmem>>
    %1185 = tpu.memref_slice %arg9[%1182] : memref<32x!tpu.dma_semaphore, #tpu.memory_space<semaphore_mem>> -> memref<1x!tpu.dma_semaphore, #tpu.memory_space<semaphore_mem>>
    %1186 = tpu.memref_squeeze %1185 : memref<1x!tpu.dma_semaphore, #tpu.memory_space<semaphore_mem>> -> memref<!tpu.dma_semaphore, #tpu.memory_space<semaphore_mem>>
    tpu.wait_dma2 semaphore(%1186 : memref<!tpu.dma_semaphore, #tpu.memory_space<semaphore_mem>>) src(%1183 : memref<1x128xf32, #tpu.memory_space<any>>) dst(%1184 : memref<1x128xf32, #tpu.memory_space<vmem>>)
    %c32_i32_712 = arith.constant 32 : i32
    %1187 = arith.addi %1011, %c32_i32_712 : i32
    %c5_i32_713 = arith.constant 5 : i32
    %1188 = arith.addi %1187, %c5_i32_713 : i32
    %c31_i32_714 = arith.constant 31 : i32
    %1189 = arith.andi %1188, %c31_i32_714 : i32
    %c0_i32_715 = arith.constant 0 : i32
    %1190 = tpu.memref_slice %arg3[%1101, %c0_i32_715] : memref<64x128xf32, #tpu.memory_space<any>> -> memref<1x128xf32, #tpu.memory_space<any>>
    %c0_i32_716 = arith.constant 0 : i32
    %1191 = tpu.memref_slice %arg8[%1188, %c0_i32_716] : memref<64x128xf32, #tpu.memory_space<vmem>> -> memref<1x128xf32, #tpu.memory_space<vmem>>
    %1192 = tpu.memref_slice %arg9[%1189] : memref<32x!tpu.dma_semaphore, #tpu.memory_space<semaphore_mem>> -> memref<1x!tpu.dma_semaphore, #tpu.memory_space<semaphore_mem>>
    %1193 = tpu.memref_squeeze %1192 : memref<1x!tpu.dma_semaphore, #tpu.memory_space<semaphore_mem>> -> memref<!tpu.dma_semaphore, #tpu.memory_space<semaphore_mem>>
    tpu.enqueue_dma source(%1190 : memref<1x128xf32, #tpu.memory_space<any>>) target(%1191 : memref<1x128xf32, #tpu.memory_space<vmem>>) target_semaphore(%1193 : memref<!tpu.dma_semaphore, #tpu.memory_space<semaphore_mem>>)
    %c6_i32_717 = arith.constant 6 : i32
    %1194 = arith.addi %1011, %c6_i32_717 : i32
    %c31_i32_718 = arith.constant 31 : i32
    %1195 = arith.andi %1194, %c31_i32_718 : i32
    %c0_i32_719 = arith.constant 0 : i32
    %1196 = tpu.memref_slice %arg3[%1053, %c0_i32_719] : memref<64x128xf32, #tpu.memory_space<any>> -> memref<1x128xf32, #tpu.memory_space<any>>
    %c0_i32_720 = arith.constant 0 : i32
    %1197 = tpu.memref_slice %arg8[%1194, %c0_i32_720] : memref<64x128xf32, #tpu.memory_space<vmem>> -> memref<1x128xf32, #tpu.memory_space<vmem>>
    %1198 = tpu.memref_slice %arg9[%1195] : memref<32x!tpu.dma_semaphore, #tpu.memory_space<semaphore_mem>> -> memref<1x!tpu.dma_semaphore, #tpu.memory_space<semaphore_mem>>
    %1199 = tpu.memref_squeeze %1198 : memref<1x!tpu.dma_semaphore, #tpu.memory_space<semaphore_mem>> -> memref<!tpu.dma_semaphore, #tpu.memory_space<semaphore_mem>>
    tpu.wait_dma2 semaphore(%1199 : memref<!tpu.dma_semaphore, #tpu.memory_space<semaphore_mem>>) src(%1196 : memref<1x128xf32, #tpu.memory_space<any>>) dst(%1197 : memref<1x128xf32, #tpu.memory_space<vmem>>)
    %c32_i32_721 = arith.constant 32 : i32
    %1200 = arith.addi %1011, %c32_i32_721 : i32
    %c6_i32_722 = arith.constant 6 : i32
    %1201 = arith.addi %1200, %c6_i32_722 : i32
    %c31_i32_723 = arith.constant 31 : i32
    %1202 = arith.andi %1201, %c31_i32_723 : i32
    %c0_i32_724 = arith.constant 0 : i32
    %1203 = tpu.memref_slice %arg3[%1108, %c0_i32_724] : memref<64x128xf32, #tpu.memory_space<any>> -> memref<1x128xf32, #tpu.memory_space<any>>
    %c0_i32_725 = arith.constant 0 : i32
    %1204 = tpu.memref_slice %arg8[%1201, %c0_i32_725] : memref<64x128xf32, #tpu.memory_space<vmem>> -> memref<1x128xf32, #tpu.memory_space<vmem>>
    %1205 = tpu.memref_slice %arg9[%1202] : memref<32x!tpu.dma_semaphore, #tpu.memory_space<semaphore_mem>> -> memref<1x!tpu.dma_semaphore, #tpu.memory_space<semaphore_mem>>
    %1206 = tpu.memref_squeeze %1205 : memref<1x!tpu.dma_semaphore, #tpu.memory_space<semaphore_mem>> -> memref<!tpu.dma_semaphore, #tpu.memory_space<semaphore_mem>>
    tpu.enqueue_dma source(%1203 : memref<1x128xf32, #tpu.memory_space<any>>) target(%1204 : memref<1x128xf32, #tpu.memory_space<vmem>>) target_semaphore(%1206 : memref<!tpu.dma_semaphore, #tpu.memory_space<semaphore_mem>>)
    %c7_i32_726 = arith.constant 7 : i32
    %1207 = arith.addi %1011, %c7_i32_726 : i32
    %c31_i32_727 = arith.constant 31 : i32
    %1208 = arith.andi %1207, %c31_i32_727 : i32
    %c0_i32_728 = arith.constant 0 : i32
    %1209 = tpu.memref_slice %arg3[%1059, %c0_i32_728] : memref<64x128xf32, #tpu.memory_space<any>> -> memref<1x128xf32, #tpu.memory_space<any>>
    %c0_i32_729 = arith.constant 0 : i32
    %1210 = tpu.memref_slice %arg8[%1207, %c0_i32_729] : memref<64x128xf32, #tpu.memory_space<vmem>> -> memref<1x128xf32, #tpu.memory_space<vmem>>
    %1211 = tpu.memref_slice %arg9[%1208] : memref<32x!tpu.dma_semaphore, #tpu.memory_space<semaphore_mem>> -> memref<1x!tpu.dma_semaphore, #tpu.memory_space<semaphore_mem>>
    %1212 = tpu.memref_squeeze %1211 : memref<1x!tpu.dma_semaphore, #tpu.memory_space<semaphore_mem>> -> memref<!tpu.dma_semaphore, #tpu.memory_space<semaphore_mem>>
    tpu.wait_dma2 semaphore(%1212 : memref<!tpu.dma_semaphore, #tpu.memory_space<semaphore_mem>>) src(%1209 : memref<1x128xf32, #tpu.memory_space<any>>) dst(%1210 : memref<1x128xf32, #tpu.memory_space<vmem>>)
    %c32_i32_730 = arith.constant 32 : i32
    %1213 = arith.addi %1011, %c32_i32_730 : i32
    %c7_i32_731 = arith.constant 7 : i32
    %1214 = arith.addi %1213, %c7_i32_731 : i32
    %c31_i32_732 = arith.constant 31 : i32
    %1215 = arith.andi %1214, %c31_i32_732 : i32
    %c0_i32_733 = arith.constant 0 : i32
    %1216 = tpu.memref_slice %arg3[%1115, %c0_i32_733] : memref<64x128xf32, #tpu.memory_space<any>> -> memref<1x128xf32, #tpu.memory_space<any>>
    %c0_i32_734 = arith.constant 0 : i32
    %1217 = tpu.memref_slice %arg8[%1214, %c0_i32_734] : memref<64x128xf32, #tpu.memory_space<vmem>> -> memref<1x128xf32, #tpu.memory_space<vmem>>
    %1218 = tpu.memref_slice %arg9[%1215] : memref<32x!tpu.dma_semaphore, #tpu.memory_space<semaphore_mem>> -> memref<1x!tpu.dma_semaphore, #tpu.memory_space<semaphore_mem>>
    %1219 = tpu.memref_squeeze %1218 : memref<1x!tpu.dma_semaphore, #tpu.memory_space<semaphore_mem>> -> memref<!tpu.dma_semaphore, #tpu.memory_space<semaphore_mem>>
    tpu.enqueue_dma source(%1216 : memref<1x128xf32, #tpu.memory_space<any>>) target(%1217 : memref<1x128xf32, #tpu.memory_space<vmem>>) target_semaphore(%1219 : memref<!tpu.dma_semaphore, #tpu.memory_space<semaphore_mem>>)
    %1220 = arith.index_cast %1011 : i32 to index
    %c0_735 = arith.constant 0 : index
    %1221 = vector.load %arg8[%1220, %c0_735] : memref<64x128xf32, #tpu.memory_space<vmem>>, vector<8x128xf32>
    %1222 = arith.index_cast %1011 : i32 to index
    %c0_736 = arith.constant 0 : index
    %1223 = vector.load %arg4[%1222, %c0_736] : memref<64x128xf32, #tpu.memory_space<vmem>>, vector<8x128xf32>
    %1224 = arith.addf %1221, %1223 : vector<8x128xf32>
    %cst_737 = arith.constant dense<0.000000e+00> : vector<8xf32>
    %1225 = vector.multi_reduction <add>, %1224, %cst_737 [1] : vector<8x128xf32> to vector<8xf32>
    %1226 = vector.shape_cast %1225 : vector<8xf32> to vector<8x1xf32>
    %1227 = vector.broadcast %cst : f32 to vector<8x1xf32>
    %1228 = arith.mulf %1226, %1227 : vector<8x1xf32>
    %1229 = vector.broadcast %1228 : vector<8x1xf32> to vector<8x128xf32>
    %1230 = arith.subf %1224, %1229 : vector<8x128xf32>
    %1231 = arith.mulf %1230, %1230 : vector<8x128xf32>
    %cst_738 = arith.constant dense<0.000000e+00> : vector<8xf32>
    %1232 = vector.multi_reduction <add>, %1231, %cst_738 [1] : vector<8x128xf32> to vector<8xf32>
    %1233 = vector.shape_cast %1232 : vector<8xf32> to vector<8x1xf32>
    %1234 = vector.broadcast %cst : f32 to vector<8x1xf32>
    %1235 = arith.mulf %1233, %1234 : vector<8x1xf32>
    %cst_739 = arith.constant 9.99999996E-13 : f32
    %1236 = vector.broadcast %cst_739 : f32 to vector<8x1xf32>
    %1237 = arith.addf %1235, %1236 : vector<8x1xf32>
    %1238 = math.rsqrt %1237 : vector<8x1xf32>
    %1239 = vector.broadcast %1238 : vector<8x1xf32> to vector<8x128xf32>
    %1240 = arith.mulf %1230, %1239 : vector<8x128xf32>
    %1241 = vector.broadcast %291 : vector<1x128xf32> to vector<8x128xf32>
    %1242 = arith.mulf %1240, %1241 : vector<8x128xf32>
    %1243 = vector.broadcast %292 : vector<1x128xf32> to vector<8x128xf32>
    %1244 = arith.addf %1242, %1243 : vector<8x128xf32>
    %c0_740 = arith.constant 0 : index
    %1245 = arith.index_cast %1011 : i32 to index
    %c0_741 = arith.constant 0 : index
    %1246 = vector.load %arg7[%c0_740, %1245, %c0_741] : memref<1x64x128xf32, #tpu.memory_space<vmem>>, vector<1x8x128xf32>
    %1247 = vector.shape_cast %1246 : vector<1x8x128xf32> to vector<8x128xf32>
    %1248 = vector.shape_cast %1244 : vector<8x128xf32> to vector<1x8x128xf32>
    tpu.vector_store %arg7[%c0_740, %1245, %c0_741], %1248 {strides = array<i32>} : memref<1x64x128xf32, #tpu.memory_space<vmem>>, vector<1x8x128xf32>,
    %c4_i32_742 = arith.constant 4 : i32
    %cst_743 = arith.constant 7.812500e-03 : f32
    %c4_i32_744 = arith.constant 4 : i32
    %c8_i32_745 = arith.constant 8 : i32
    %1249 = arith.muli %c4_i32_744, %c8_i32_745 : i32
    %1250 = tpu.assume_multiple %1249, 8 : i32
    %c0_i32_746 = arith.constant 0 : i32
    %1251 = arith.addi %1250, %c0_i32_746 : i32
    %1252 = arith.addi %2, %1251 : i32
    %1253 = arith.index_cast %1252 : i32 to index
    %1254 = memref.load %arg2[%1253] : memref<128xi32, #tpu.memory_space<smem>>
    %c0_i32_747 = arith.constant 0 : i32
    %c63_i32_748 = arith.constant 63 : i32
    %1255 = arith.maxsi %c0_i32_747, %1254 : i32
    %1256 = arith.minsi %c63_i32_748, %1255 : i32
    %c1_i32_749 = arith.constant 1 : i32
    %1257 = arith.addi %1250, %c1_i32_749 : i32
    %1258 = arith.addi %2, %1257 : i32
    %1259 = arith.index_cast %1258 : i32 to index
    %1260 = memref.load %arg2[%1259] : memref<128xi32, #tpu.memory_space<smem>>
    %c0_i32_750 = arith.constant 0 : i32
    %c63_i32_751 = arith.constant 63 : i32
    %1261 = arith.maxsi %c0_i32_750, %1260 : i32
    %1262 = arith.minsi %c63_i32_751, %1261 : i32
    %c2_i32_752 = arith.constant 2 : i32
    %1263 = arith.addi %1250, %c2_i32_752 : i32
    %1264 = arith.addi %2, %1263 : i32
    %1265 = arith.index_cast %1264 : i32 to index
    %1266 = memref.load %arg2[%1265] : memref<128xi32, #tpu.memory_space<smem>>
    %c0_i32_753 = arith.constant 0 : i32
    %c63_i32_754 = arith.constant 63 : i32
    %1267 = arith.maxsi %c0_i32_753, %1266 : i32
    %1268 = arith.minsi %c63_i32_754, %1267 : i32
    %c3_i32_755 = arith.constant 3 : i32
    %1269 = arith.addi %1250, %c3_i32_755 : i32
    %1270 = arith.addi %2, %1269 : i32
    %1271 = arith.index_cast %1270 : i32 to index
    %1272 = memref.load %arg2[%1271] : memref<128xi32, #tpu.memory_space<smem>>
    %c0_i32_756 = arith.constant 0 : i32
    %c63_i32_757 = arith.constant 63 : i32
    %1273 = arith.maxsi %c0_i32_756, %1272 : i32
    %1274 = arith.minsi %c63_i32_757, %1273 : i32
    %c4_i32_758 = arith.constant 4 : i32
    %1275 = arith.addi %1250, %c4_i32_758 : i32
    %1276 = arith.addi %2, %1275 : i32
    %1277 = arith.index_cast %1276 : i32 to index
    %1278 = memref.load %arg2[%1277] : memref<128xi32, #tpu.memory_space<smem>>
    %c0_i32_759 = arith.constant 0 : i32
    %c63_i32_760 = arith.constant 63 : i32
    %1279 = arith.maxsi %c0_i32_759, %1278 : i32
    %1280 = arith.minsi %c63_i32_760, %1279 : i32
    %c5_i32_761 = arith.constant 5 : i32
    %1281 = arith.addi %1250, %c5_i32_761 : i32
    %1282 = arith.addi %2, %1281 : i32
    %1283 = arith.index_cast %1282 : i32 to index
    %1284 = memref.load %arg2[%1283] : memref<128xi32, #tpu.memory_space<smem>>
    %c0_i32_762 = arith.constant 0 : i32
    %c63_i32_763 = arith.constant 63 : i32
    %1285 = arith.maxsi %c0_i32_762, %1284 : i32
    %1286 = arith.minsi %c63_i32_763, %1285 : i32
    %c6_i32_764 = arith.constant 6 : i32
    %1287 = arith.addi %1250, %c6_i32_764 : i32
    %1288 = arith.addi %2, %1287 : i32
    %1289 = arith.index_cast %1288 : i32 to index
    %1290 = memref.load %arg2[%1289] : memref<128xi32, #tpu.memory_space<smem>>
    %c0_i32_765 = arith.constant 0 : i32
    %c63_i32_766 = arith.constant 63 : i32
    %1291 = arith.maxsi %c0_i32_765, %1290 : i32
    %1292 = arith.minsi %c63_i32_766, %1291 : i32
    %c7_i32_767 = arith.constant 7 : i32
    %1293 = arith.addi %1250, %c7_i32_767 : i32
    %1294 = arith.addi %2, %1293 : i32
    %1295 = arith.index_cast %1294 : i32 to index
    %1296 = memref.load %arg2[%1295] : memref<128xi32, #tpu.memory_space<smem>>
    %c0_i32_768 = arith.constant 0 : i32
    %c63_i32_769 = arith.constant 63 : i32
    %1297 = arith.maxsi %c0_i32_768, %1296 : i32
    %1298 = arith.minsi %c63_i32_769, %1297 : i32
    %c0_i32_770 = arith.constant 0 : i32
    %1299 = arith.addi %1250, %c0_i32_770 : i32
    %c31_i32_771 = arith.constant 31 : i32
    %1300 = arith.andi %1299, %c31_i32_771 : i32
    %c0_i32_772 = arith.constant 0 : i32
    %1301 = tpu.memref_slice %arg3[%1256, %c0_i32_772] : memref<64x128xf32, #tpu.memory_space<any>> -> memref<1x128xf32, #tpu.memory_space<any>>
    %c0_i32_773 = arith.constant 0 : i32
    %1302 = tpu.memref_slice %arg8[%1299, %c0_i32_773] : memref<64x128xf32, #tpu.memory_space<vmem>> -> memref<1x128xf32, #tpu.memory_space<vmem>>
    %1303 = tpu.memref_slice %arg9[%1300] : memref<32x!tpu.dma_semaphore, #tpu.memory_space<semaphore_mem>> -> memref<1x!tpu.dma_semaphore, #tpu.memory_space<semaphore_mem>>
    %1304 = tpu.memref_squeeze %1303 : memref<1x!tpu.dma_semaphore, #tpu.memory_space<semaphore_mem>> -> memref<!tpu.dma_semaphore, #tpu.memory_space<semaphore_mem>>
    tpu.wait_dma2 semaphore(%1304 : memref<!tpu.dma_semaphore, #tpu.memory_space<semaphore_mem>>) src(%1301 : memref<1x128xf32, #tpu.memory_space<any>>) dst(%1302 : memref<1x128xf32, #tpu.memory_space<vmem>>)
    %c1_i32_774 = arith.constant 1 : i32
    %1305 = arith.addi %1250, %c1_i32_774 : i32
    %c31_i32_775 = arith.constant 31 : i32
    %1306 = arith.andi %1305, %c31_i32_775 : i32
    %c0_i32_776 = arith.constant 0 : i32
    %1307 = tpu.memref_slice %arg3[%1262, %c0_i32_776] : memref<64x128xf32, #tpu.memory_space<any>> -> memref<1x128xf32, #tpu.memory_space<any>>
    %c0_i32_777 = arith.constant 0 : i32
    %1308 = tpu.memref_slice %arg8[%1305, %c0_i32_777] : memref<64x128xf32, #tpu.memory_space<vmem>> -> memref<1x128xf32, #tpu.memory_space<vmem>>
    %1309 = tpu.memref_slice %arg9[%1306] : memref<32x!tpu.dma_semaphore, #tpu.memory_space<semaphore_mem>> -> memref<1x!tpu.dma_semaphore, #tpu.memory_space<semaphore_mem>>
    %1310 = tpu.memref_squeeze %1309 : memref<1x!tpu.dma_semaphore, #tpu.memory_space<semaphore_mem>> -> memref<!tpu.dma_semaphore, #tpu.memory_space<semaphore_mem>>
    tpu.wait_dma2 semaphore(%1310 : memref<!tpu.dma_semaphore, #tpu.memory_space<semaphore_mem>>) src(%1307 : memref<1x128xf32, #tpu.memory_space<any>>) dst(%1308 : memref<1x128xf32, #tpu.memory_space<vmem>>)
    %c2_i32_778 = arith.constant 2 : i32
    %1311 = arith.addi %1250, %c2_i32_778 : i32
    %c31_i32_779 = arith.constant 31 : i32
    %1312 = arith.andi %1311, %c31_i32_779 : i32
    %c0_i32_780 = arith.constant 0 : i32
    %1313 = tpu.memref_slice %arg3[%1268, %c0_i32_780] : memref<64x128xf32, #tpu.memory_space<any>> -> memref<1x128xf32, #tpu.memory_space<any>>
    %c0_i32_781 = arith.constant 0 : i32
    %1314 = tpu.memref_slice %arg8[%1311, %c0_i32_781] : memref<64x128xf32, #tpu.memory_space<vmem>> -> memref<1x128xf32, #tpu.memory_space<vmem>>
    %1315 = tpu.memref_slice %arg9[%1312] : memref<32x!tpu.dma_semaphore, #tpu.memory_space<semaphore_mem>> -> memref<1x!tpu.dma_semaphore, #tpu.memory_space<semaphore_mem>>
    %1316 = tpu.memref_squeeze %1315 : memref<1x!tpu.dma_semaphore, #tpu.memory_space<semaphore_mem>> -> memref<!tpu.dma_semaphore, #tpu.memory_space<semaphore_mem>>
    tpu.wait_dma2 semaphore(%1316 : memref<!tpu.dma_semaphore, #tpu.memory_space<semaphore_mem>>) src(%1313 : memref<1x128xf32, #tpu.memory_space<any>>) dst(%1314 : memref<1x128xf32, #tpu.memory_space<vmem>>)
    %c3_i32_782 = arith.constant 3 : i32
    %1317 = arith.addi %1250, %c3_i32_782 : i32
    %c31_i32_783 = arith.constant 31 : i32
    %1318 = arith.andi %1317, %c31_i32_783 : i32
    %c0_i32_784 = arith.constant 0 : i32
    %1319 = tpu.memref_slice %arg3[%1274, %c0_i32_784] : memref<64x128xf32, #tpu.memory_space<any>> -> memref<1x128xf32, #tpu.memory_space<any>>
    %c0_i32_785 = arith.constant 0 : i32
    %1320 = tpu.memref_slice %arg8[%1317, %c0_i32_785] : memref<64x128xf32, #tpu.memory_space<vmem>> -> memref<1x128xf32, #tpu.memory_space<vmem>>
    %1321 = tpu.memref_slice %arg9[%1318] : memref<32x!tpu.dma_semaphore, #tpu.memory_space<semaphore_mem>> -> memref<1x!tpu.dma_semaphore, #tpu.memory_space<semaphore_mem>>
    %1322 = tpu.memref_squeeze %1321 : memref<1x!tpu.dma_semaphore, #tpu.memory_space<semaphore_mem>> -> memref<!tpu.dma_semaphore, #tpu.memory_space<semaphore_mem>>
    tpu.wait_dma2 semaphore(%1322 : memref<!tpu.dma_semaphore, #tpu.memory_space<semaphore_mem>>) src(%1319 : memref<1x128xf32, #tpu.memory_space<any>>) dst(%1320 : memref<1x128xf32, #tpu.memory_space<vmem>>)
    %c4_i32_786 = arith.constant 4 : i32
    %1323 = arith.addi %1250, %c4_i32_786 : i32
    %c31_i32_787 = arith.constant 31 : i32
    %1324 = arith.andi %1323, %c31_i32_787 : i32
    %c0_i32_788 = arith.constant 0 : i32
    %1325 = tpu.memref_slice %arg3[%1280, %c0_i32_788] : memref<64x128xf32, #tpu.memory_space<any>> -> memref<1x128xf32, #tpu.memory_space<any>>
    %c0_i32_789 = arith.constant 0 : i32
    %1326 = tpu.memref_slice %arg8[%1323, %c0_i32_789] : memref<64x128xf32, #tpu.memory_space<vmem>> -> memref<1x128xf32, #tpu.memory_space<vmem>>
    %1327 = tpu.memref_slice %arg9[%1324] : memref<32x!tpu.dma_semaphore, #tpu.memory_space<semaphore_mem>> -> memref<1x!tpu.dma_semaphore, #tpu.memory_space<semaphore_mem>>
    %1328 = tpu.memref_squeeze %1327 : memref<1x!tpu.dma_semaphore, #tpu.memory_space<semaphore_mem>> -> memref<!tpu.dma_semaphore, #tpu.memory_space<semaphore_mem>>
    tpu.wait_dma2 semaphore(%1328 : memref<!tpu.dma_semaphore, #tpu.memory_space<semaphore_mem>>) src(%1325 : memref<1x128xf32, #tpu.memory_space<any>>) dst(%1326 : memref<1x128xf32, #tpu.memory_space<vmem>>)
    %c5_i32_790 = arith.constant 5 : i32
    %1329 = arith.addi %1250, %c5_i32_790 : i32
    %c31_i32_791 = arith.constant 31 : i32
    %1330 = arith.andi %1329, %c31_i32_791 : i32
    %c0_i32_792 = arith.constant 0 : i32
    %1331 = tpu.memref_slice %arg3[%1286, %c0_i32_792] : memref<64x128xf32, #tpu.memory_space<any>> -> memref<1x128xf32, #tpu.memory_space<any>>
    %c0_i32_793 = arith.constant 0 : i32
    %1332 = tpu.memref_slice %arg8[%1329, %c0_i32_793] : memref<64x128xf32, #tpu.memory_space<vmem>> -> memref<1x128xf32, #tpu.memory_space<vmem>>
    %1333 = tpu.memref_slice %arg9[%1330] : memref<32x!tpu.dma_semaphore, #tpu.memory_space<semaphore_mem>> -> memref<1x!tpu.dma_semaphore, #tpu.memory_space<semaphore_mem>>
    %1334 = tpu.memref_squeeze %1333 : memref<1x!tpu.dma_semaphore, #tpu.memory_space<semaphore_mem>> -> memref<!tpu.dma_semaphore, #tpu.memory_space<semaphore_mem>>
    tpu.wait_dma2 semaphore(%1334 : memref<!tpu.dma_semaphore, #tpu.memory_space<semaphore_mem>>) src(%1331 : memref<1x128xf32, #tpu.memory_space<any>>) dst(%1332 : memref<1x128xf32, #tpu.memory_space<vmem>>)
    %c6_i32_794 = arith.constant 6 : i32
    %1335 = arith.addi %1250, %c6_i32_794 : i32
    %c31_i32_795 = arith.constant 31 : i32
    %1336 = arith.andi %1335, %c31_i32_795 : i32
    %c0_i32_796 = arith.constant 0 : i32
    %1337 = tpu.memref_slice %arg3[%1292, %c0_i32_796] : memref<64x128xf32, #tpu.memory_space<any>> -> memref<1x128xf32, #tpu.memory_space<any>>
    %c0_i32_797 = arith.constant 0 : i32
    %1338 = tpu.memref_slice %arg8[%1335, %c0_i32_797] : memref<64x128xf32, #tpu.memory_space<vmem>> -> memref<1x128xf32, #tpu.memory_space<vmem>>
    %1339 = tpu.memref_slice %arg9[%1336] : memref<32x!tpu.dma_semaphore, #tpu.memory_space<semaphore_mem>> -> memref<1x!tpu.dma_semaphore, #tpu.memory_space<semaphore_mem>>
    %1340 = tpu.memref_squeeze %1339 : memref<1x!tpu.dma_semaphore, #tpu.memory_space<semaphore_mem>> -> memref<!tpu.dma_semaphore, #tpu.memory_space<semaphore_mem>>
    tpu.wait_dma2 semaphore(%1340 : memref<!tpu.dma_semaphore, #tpu.memory_space<semaphore_mem>>) src(%1337 : memref<1x128xf32, #tpu.memory_space<any>>) dst(%1338 : memref<1x128xf32, #tpu.memory_space<vmem>>)
    %c7_i32_798 = arith.constant 7 : i32
    %1341 = arith.addi %1250, %c7_i32_798 : i32
    %c31_i32_799 = arith.constant 31 : i32
    %1342 = arith.andi %1341, %c31_i32_799 : i32
    %c0_i32_800 = arith.constant 0 : i32
    %1343 = tpu.memref_slice %arg3[%1298, %c0_i32_800] : memref<64x128xf32, #tpu.memory_space<any>> -> memref<1x128xf32, #tpu.memory_space<any>>
    %c0_i32_801 = arith.constant 0 : i32
    %1344 = tpu.memref_slice %arg8[%1341, %c0_i32_801] : memref<64x128xf32, #tpu.memory_space<vmem>> -> memref<1x128xf32, #tpu.memory_space<vmem>>
    %1345 = tpu.memref_slice %arg9[%1342] : memref<32x!tpu.dma_semaphore, #tpu.memory_space<semaphore_mem>> -> memref<1x!tpu.dma_semaphore, #tpu.memory_space<semaphore_mem>>
    %1346 = tpu.memref_squeeze %1345 : memref<1x!tpu.dma_semaphore, #tpu.memory_space<semaphore_mem>> -> memref<!tpu.dma_semaphore, #tpu.memory_space<semaphore_mem>>
    tpu.wait_dma2 semaphore(%1346 : memref<!tpu.dma_semaphore, #tpu.memory_space<semaphore_mem>>) src(%1343 : memref<1x128xf32, #tpu.memory_space<any>>) dst(%1344 : memref<1x128xf32, #tpu.memory_space<vmem>>)
    %1347 = arith.index_cast %1250 : i32 to index
    %c0_802 = arith.constant 0 : index
    %1348 = vector.load %arg8[%1347, %c0_802] : memref<64x128xf32, #tpu.memory_space<vmem>>, vector<8x128xf32>
    %1349 = arith.index_cast %1250 : i32 to index
    %c0_803 = arith.constant 0 : index
    %1350 = vector.load %arg4[%1349, %c0_803] : memref<64x128xf32, #tpu.memory_space<vmem>>, vector<8x128xf32>
    %1351 = arith.addf %1348, %1350 : vector<8x128xf32>
    %cst_804 = arith.constant dense<0.000000e+00> : vector<8xf32>
    %1352 = vector.multi_reduction <add>, %1351, %cst_804 [1] : vector<8x128xf32> to vector<8xf32>
    %1353 = vector.shape_cast %1352 : vector<8xf32> to vector<8x1xf32>
    %1354 = vector.broadcast %cst_743 : f32 to vector<8x1xf32>
    %1355 = arith.mulf %1353, %1354 : vector<8x1xf32>
    %1356 = vector.broadcast %1355 : vector<8x1xf32> to vector<8x128xf32>
    %1357 = arith.subf %1351, %1356 : vector<8x128xf32>
    %1358 = arith.mulf %1357, %1357 : vector<8x128xf32>
    %cst_805 = arith.constant dense<0.000000e+00> : vector<8xf32>
    %1359 = vector.multi_reduction <add>, %1358, %cst_805 [1] : vector<8x128xf32> to vector<8xf32>
    %1360 = vector.shape_cast %1359 : vector<8xf32> to vector<8x1xf32>
    %1361 = vector.broadcast %cst_743 : f32 to vector<8x1xf32>
    %1362 = arith.mulf %1360, %1361 : vector<8x1xf32>
    %cst_806 = arith.constant 9.99999996E-13 : f32
    %1363 = vector.broadcast %cst_806 : f32 to vector<8x1xf32>
    %1364 = arith.addf %1362, %1363 : vector<8x1xf32>
    %1365 = math.rsqrt %1364 : vector<8x1xf32>
    %1366 = vector.broadcast %1365 : vector<8x1xf32> to vector<8x128xf32>
    %1367 = arith.mulf %1357, %1366 : vector<8x128xf32>
    %1368 = vector.broadcast %291 : vector<1x128xf32> to vector<8x128xf32>
    %1369 = arith.mulf %1367, %1368 : vector<8x128xf32>
    %1370 = vector.broadcast %292 : vector<1x128xf32> to vector<8x128xf32>
    %1371 = arith.addf %1369, %1370 : vector<8x128xf32>
    %c0_807 = arith.constant 0 : index
    %1372 = arith.index_cast %1250 : i32 to index
    %c0_808 = arith.constant 0 : index
    %1373 = vector.load %arg7[%c0_807, %1372, %c0_808] : memref<1x64x128xf32, #tpu.memory_space<vmem>>, vector<1x8x128xf32>
    %1374 = vector.shape_cast %1373 : vector<1x8x128xf32> to vector<8x128xf32>
    %1375 = vector.shape_cast %1371 : vector<8x128xf32> to vector<1x8x128xf32>
    tpu.vector_store %arg7[%c0_807, %1372, %c0_808], %1375 {strides = array<i32>} : memref<1x64x128xf32, #tpu.memory_space<vmem>>, vector<1x8x128xf32>,
    %c5_i32_809 = arith.constant 5 : i32
    %c8_i32_810 = arith.constant 8 : i32
    %1376 = arith.muli %c5_i32_809, %c8_i32_810 : i32
    %1377 = tpu.assume_multiple %1376, 8 : i32
    %c0_i32_811 = arith.constant 0 : i32
    %1378 = arith.addi %1377, %c0_i32_811 : i32
    %1379 = arith.addi %2, %1378 : i32
    %1380 = arith.index_cast %1379 : i32 to index
    %1381 = memref.load %arg2[%1380] : memref<128xi32, #tpu.memory_space<smem>>
    %c0_i32_812 = arith.constant 0 : i32
    %c63_i32_813 = arith.constant 63 : i32
    %1382 = arith.maxsi %c0_i32_812, %1381 : i32
    %1383 = arith.minsi %c63_i32_813, %1382 : i32
    %c1_i32_814 = arith.constant 1 : i32
    %1384 = arith.addi %1377, %c1_i32_814 : i32
    %1385 = arith.addi %2, %1384 : i32
    %1386 = arith.index_cast %1385 : i32 to index
    %1387 = memref.load %arg2[%1386] : memref<128xi32, #tpu.memory_space<smem>>
    %c0_i32_815 = arith.constant 0 : i32
    %c63_i32_816 = arith.constant 63 : i32
    %1388 = arith.maxsi %c0_i32_815, %1387 : i32
    %1389 = arith.minsi %c63_i32_816, %1388 : i32
    %c2_i32_817 = arith.constant 2 : i32
    %1390 = arith.addi %1377, %c2_i32_817 : i32
    %1391 = arith.addi %2, %1390 : i32
    %1392 = arith.index_cast %1391 : i32 to index
    %1393 = memref.load %arg2[%1392] : memref<128xi32, #tpu.memory_space<smem>>
    %c0_i32_818 = arith.constant 0 : i32
    %c63_i32_819 = arith.constant 63 : i32
    %1394 = arith.maxsi %c0_i32_818, %1393 : i32
    %1395 = arith.minsi %c63_i32_819, %1394 : i32
    %c3_i32_820 = arith.constant 3 : i32
    %1396 = arith.addi %1377, %c3_i32_820 : i32
    %1397 = arith.addi %2, %1396 : i32
    %1398 = arith.index_cast %1397 : i32 to index
    %1399 = memref.load %arg2[%1398] : memref<128xi32, #tpu.memory_space<smem>>
    %c0_i32_821 = arith.constant 0 : i32
    %c63_i32_822 = arith.constant 63 : i32
    %1400 = arith.maxsi %c0_i32_821, %1399 : i32
    %1401 = arith.minsi %c63_i32_822, %1400 : i32
    %c4_i32_823 = arith.constant 4 : i32
    %1402 = arith.addi %1377, %c4_i32_823 : i32
    %1403 = arith.addi %2, %1402 : i32
    %1404 = arith.index_cast %1403 : i32 to index
    %1405 = memref.load %arg2[%1404] : memref<128xi32, #tpu.memory_space<smem>>
    %c0_i32_824 = arith.constant 0 : i32
    %c63_i32_825 = arith.constant 63 : i32
    %1406 = arith.maxsi %c0_i32_824, %1405 : i32
    %1407 = arith.minsi %c63_i32_825, %1406 : i32
    %c5_i32_826 = arith.constant 5 : i32
    %1408 = arith.addi %1377, %c5_i32_826 : i32
    %1409 = arith.addi %2, %1408 : i32
    %1410 = arith.index_cast %1409 : i32 to index
    %1411 = memref.load %arg2[%1410] : memref<128xi32, #tpu.memory_space<smem>>
    %c0_i32_827 = arith.constant 0 : i32
    %c63_i32_828 = arith.constant 63 : i32
    %1412 = arith.maxsi %c0_i32_827, %1411 : i32
    %1413 = arith.minsi %c63_i32_828, %1412 : i32
    %c6_i32_829 = arith.constant 6 : i32
    %1414 = arith.addi %1377, %c6_i32_829 : i32
    %1415 = arith.addi %2, %1414 : i32
    %1416 = arith.index_cast %1415 : i32 to index
    %1417 = memref.load %arg2[%1416] : memref<128xi32, #tpu.memory_space<smem>>
    %c0_i32_830 = arith.constant 0 : i32
    %c63_i32_831 = arith.constant 63 : i32
    %1418 = arith.maxsi %c0_i32_830, %1417 : i32
    %1419 = arith.minsi %c63_i32_831, %1418 : i32
    %c7_i32_832 = arith.constant 7 : i32
    %1420 = arith.addi %1377, %c7_i32_832 : i32
    %1421 = arith.addi %2, %1420 : i32
    %1422 = arith.index_cast %1421 : i32 to index
    %1423 = memref.load %arg2[%1422] : memref<128xi32, #tpu.memory_space<smem>>
    %c0_i32_833 = arith.constant 0 : i32
    %c63_i32_834 = arith.constant 63 : i32
    %1424 = arith.maxsi %c0_i32_833, %1423 : i32
    %1425 = arith.minsi %c63_i32_834, %1424 : i32
    %c0_i32_835 = arith.constant 0 : i32
    %1426 = arith.addi %1377, %c0_i32_835 : i32
    %c31_i32_836 = arith.constant 31 : i32
    %1427 = arith.andi %1426, %c31_i32_836 : i32
    %c0_i32_837 = arith.constant 0 : i32
    %1428 = tpu.memref_slice %arg3[%1383, %c0_i32_837] : memref<64x128xf32, #tpu.memory_space<any>> -> memref<1x128xf32, #tpu.memory_space<any>>
    %c0_i32_838 = arith.constant 0 : i32
    %1429 = tpu.memref_slice %arg8[%1426, %c0_i32_838] : memref<64x128xf32, #tpu.memory_space<vmem>> -> memref<1x128xf32, #tpu.memory_space<vmem>>
    %1430 = tpu.memref_slice %arg9[%1427] : memref<32x!tpu.dma_semaphore, #tpu.memory_space<semaphore_mem>> -> memref<1x!tpu.dma_semaphore, #tpu.memory_space<semaphore_mem>>
    %1431 = tpu.memref_squeeze %1430 : memref<1x!tpu.dma_semaphore, #tpu.memory_space<semaphore_mem>> -> memref<!tpu.dma_semaphore, #tpu.memory_space<semaphore_mem>>
    tpu.wait_dma2 semaphore(%1431 : memref<!tpu.dma_semaphore, #tpu.memory_space<semaphore_mem>>) src(%1428 : memref<1x128xf32, #tpu.memory_space<any>>) dst(%1429 : memref<1x128xf32, #tpu.memory_space<vmem>>)
    %c1_i32_839 = arith.constant 1 : i32
    %1432 = arith.addi %1377, %c1_i32_839 : i32
    %c31_i32_840 = arith.constant 31 : i32
    %1433 = arith.andi %1432, %c31_i32_840 : i32
    %c0_i32_841 = arith.constant 0 : i32
    %1434 = tpu.memref_slice %arg3[%1389, %c0_i32_841] : memref<64x128xf32, #tpu.memory_space<any>> -> memref<1x128xf32, #tpu.memory_space<any>>
    %c0_i32_842 = arith.constant 0 : i32
    %1435 = tpu.memref_slice %arg8[%1432, %c0_i32_842] : memref<64x128xf32, #tpu.memory_space<vmem>> -> memref<1x128xf32, #tpu.memory_space<vmem>>
    %1436 = tpu.memref_slice %arg9[%1433] : memref<32x!tpu.dma_semaphore, #tpu.memory_space<semaphore_mem>> -> memref<1x!tpu.dma_semaphore, #tpu.memory_space<semaphore_mem>>
    %1437 = tpu.memref_squeeze %1436 : memref<1x!tpu.dma_semaphore, #tpu.memory_space<semaphore_mem>> -> memref<!tpu.dma_semaphore, #tpu.memory_space<semaphore_mem>>
    tpu.wait_dma2 semaphore(%1437 : memref<!tpu.dma_semaphore, #tpu.memory_space<semaphore_mem>>) src(%1434 : memref<1x128xf32, #tpu.memory_space<any>>) dst(%1435 : memref<1x128xf32, #tpu.memory_space<vmem>>)
    %c2_i32_843 = arith.constant 2 : i32
    %1438 = arith.addi %1377, %c2_i32_843 : i32
    %c31_i32_844 = arith.constant 31 : i32
    %1439 = arith.andi %1438, %c31_i32_844 : i32
    %c0_i32_845 = arith.constant 0 : i32
    %1440 = tpu.memref_slice %arg3[%1395, %c0_i32_845] : memref<64x128xf32, #tpu.memory_space<any>> -> memref<1x128xf32, #tpu.memory_space<any>>
    %c0_i32_846 = arith.constant 0 : i32
    %1441 = tpu.memref_slice %arg8[%1438, %c0_i32_846] : memref<64x128xf32, #tpu.memory_space<vmem>> -> memref<1x128xf32, #tpu.memory_space<vmem>>
    %1442 = tpu.memref_slice %arg9[%1439] : memref<32x!tpu.dma_semaphore, #tpu.memory_space<semaphore_mem>> -> memref<1x!tpu.dma_semaphore, #tpu.memory_space<semaphore_mem>>
    %1443 = tpu.memref_squeeze %1442 : memref<1x!tpu.dma_semaphore, #tpu.memory_space<semaphore_mem>> -> memref<!tpu.dma_semaphore, #tpu.memory_space<semaphore_mem>>
    tpu.wait_dma2 semaphore(%1443 : memref<!tpu.dma_semaphore, #tpu.memory_space<semaphore_mem>>) src(%1440 : memref<1x128xf32, #tpu.memory_space<any>>) dst(%1441 : memref<1x128xf32, #tpu.memory_space<vmem>>)
    %c3_i32_847 = arith.constant 3 : i32
    %1444 = arith.addi %1377, %c3_i32_847 : i32
    %c31_i32_848 = arith.constant 31 : i32
    %1445 = arith.andi %1444, %c31_i32_848 : i32
    %c0_i32_849 = arith.constant 0 : i32
    %1446 = tpu.memref_slice %arg3[%1401, %c0_i32_849] : memref<64x128xf32, #tpu.memory_space<any>> -> memref<1x128xf32, #tpu.memory_space<any>>
    %c0_i32_850 = arith.constant 0 : i32
    %1447 = tpu.memref_slice %arg8[%1444, %c0_i32_850] : memref<64x128xf32, #tpu.memory_space<vmem>> -> memref<1x128xf32, #tpu.memory_space<vmem>>
    %1448 = tpu.memref_slice %arg9[%1445] : memref<32x!tpu.dma_semaphore, #tpu.memory_space<semaphore_mem>> -> memref<1x!tpu.dma_semaphore, #tpu.memory_space<semaphore_mem>>
    %1449 = tpu.memref_squeeze %1448 : memref<1x!tpu.dma_semaphore, #tpu.memory_space<semaphore_mem>> -> memref<!tpu.dma_semaphore, #tpu.memory_space<semaphore_mem>>
    tpu.wait_dma2 semaphore(%1449 : memref<!tpu.dma_semaphore, #tpu.memory_space<semaphore_mem>>) src(%1446 : memref<1x128xf32, #tpu.memory_space<any>>) dst(%1447 : memref<1x128xf32, #tpu.memory_space<vmem>>)
    %c4_i32_851 = arith.constant 4 : i32
    %1450 = arith.addi %1377, %c4_i32_851 : i32
    %c31_i32_852 = arith.constant 31 : i32
    %1451 = arith.andi %1450, %c31_i32_852 : i32
    %c0_i32_853 = arith.constant 0 : i32
    %1452 = tpu.memref_slice %arg3[%1407, %c0_i32_853] : memref<64x128xf32, #tpu.memory_space<any>> -> memref<1x128xf32, #tpu.memory_space<any>>
    %c0_i32_854 = arith.constant 0 : i32
    %1453 = tpu.memref_slice %arg8[%1450, %c0_i32_854] : memref<64x128xf32, #tpu.memory_space<vmem>> -> memref<1x128xf32, #tpu.memory_space<vmem>>
    %1454 = tpu.memref_slice %arg9[%1451] : memref<32x!tpu.dma_semaphore, #tpu.memory_space<semaphore_mem>> -> memref<1x!tpu.dma_semaphore, #tpu.memory_space<semaphore_mem>>
    %1455 = tpu.memref_squeeze %1454 : memref<1x!tpu.dma_semaphore, #tpu.memory_space<semaphore_mem>> -> memref<!tpu.dma_semaphore, #tpu.memory_space<semaphore_mem>>
    tpu.wait_dma2 semaphore(%1455 : memref<!tpu.dma_semaphore, #tpu.memory_space<semaphore_mem>>) src(%1452 : memref<1x128xf32, #tpu.memory_space<any>>) dst(%1453 : memref<1x128xf32, #tpu.memory_space<vmem>>)
    %c5_i32_855 = arith.constant 5 : i32
    %1456 = arith.addi %1377, %c5_i32_855 : i32
    %c31_i32_856 = arith.constant 31 : i32
    %1457 = arith.andi %1456, %c31_i32_856 : i32
    %c0_i32_857 = arith.constant 0 : i32
    %1458 = tpu.memref_slice %arg3[%1413, %c0_i32_857] : memref<64x128xf32, #tpu.memory_space<any>> -> memref<1x128xf32, #tpu.memory_space<any>>
    %c0_i32_858 = arith.constant 0 : i32
    %1459 = tpu.memref_slice %arg8[%1456, %c0_i32_858] : memref<64x128xf32, #tpu.memory_space<vmem>> -> memref<1x128xf32, #tpu.memory_space<vmem>>
    %1460 = tpu.memref_slice %arg9[%1457] : memref<32x!tpu.dma_semaphore, #tpu.memory_space<semaphore_mem>> -> memref<1x!tpu.dma_semaphore, #tpu.memory_space<semaphore_mem>>
    %1461 = tpu.memref_squeeze %1460 : memref<1x!tpu.dma_semaphore, #tpu.memory_space<semaphore_mem>> -> memref<!tpu.dma_semaphore, #tpu.memory_space<semaphore_mem>>
    tpu.wait_dma2 semaphore(%1461 : memref<!tpu.dma_semaphore, #tpu.memory_space<semaphore_mem>>) src(%1458 : memref<1x128xf32, #tpu.memory_space<any>>) dst(%1459 : memref<1x128xf32, #tpu.memory_space<vmem>>)
    %c6_i32_859 = arith.constant 6 : i32
    %1462 = arith.addi %1377, %c6_i32_859 : i32
    %c31_i32_860 = arith.constant 31 : i32
    %1463 = arith.andi %1462, %c31_i32_860 : i32
    %c0_i32_861 = arith.constant 0 : i32
    %1464 = tpu.memref_slice %arg3[%1419, %c0_i32_861] : memref<64x128xf32, #tpu.memory_space<any>> -> memref<1x128xf32, #tpu.memory_space<any>>
    %c0_i32_862 = arith.constant 0 : i32
    %1465 = tpu.memref_slice %arg8[%1462, %c0_i32_862] : memref<64x128xf32, #tpu.memory_space<vmem>> -> memref<1x128xf32, #tpu.memory_space<vmem>>
    %1466 = tpu.memref_slice %arg9[%1463] : memref<32x!tpu.dma_semaphore, #tpu.memory_space<semaphore_mem>> -> memref<1x!tpu.dma_semaphore, #tpu.memory_space<semaphore_mem>>
    %1467 = tpu.memref_squeeze %1466 : memref<1x!tpu.dma_semaphore, #tpu.memory_space<semaphore_mem>> -> memref<!tpu.dma_semaphore, #tpu.memory_space<semaphore_mem>>
    tpu.wait_dma2 semaphore(%1467 : memref<!tpu.dma_semaphore, #tpu.memory_space<semaphore_mem>>) src(%1464 : memref<1x128xf32, #tpu.memory_space<any>>) dst(%1465 : memref<1x128xf32, #tpu.memory_space<vmem>>)
    %c7_i32_863 = arith.constant 7 : i32
    %1468 = arith.addi %1377, %c7_i32_863 : i32
    %c31_i32_864 = arith.constant 31 : i32
    %1469 = arith.andi %1468, %c31_i32_864 : i32
    %c0_i32_865 = arith.constant 0 : i32
    %1470 = tpu.memref_slice %arg3[%1425, %c0_i32_865] : memref<64x128xf32, #tpu.memory_space<any>> -> memref<1x128xf32, #tpu.memory_space<any>>
    %c0_i32_866 = arith.constant 0 : i32
    %1471 = tpu.memref_slice %arg8[%1468, %c0_i32_866] : memref<64x128xf32, #tpu.memory_space<vmem>> -> memref<1x128xf32, #tpu.memory_space<vmem>>
    %1472 = tpu.memref_slice %arg9[%1469] : memref<32x!tpu.dma_semaphore, #tpu.memory_space<semaphore_mem>> -> memref<1x!tpu.dma_semaphore, #tpu.memory_space<semaphore_mem>>
    %1473 = tpu.memref_squeeze %1472 : memref<1x!tpu.dma_semaphore, #tpu.memory_space<semaphore_mem>> -> memref<!tpu.dma_semaphore, #tpu.memory_space<semaphore_mem>>
    tpu.wait_dma2 semaphore(%1473 : memref<!tpu.dma_semaphore, #tpu.memory_space<semaphore_mem>>) src(%1470 : memref<1x128xf32, #tpu.memory_space<any>>) dst(%1471 : memref<1x128xf32, #tpu.memory_space<vmem>>)
    %1474 = arith.index_cast %1377 : i32 to index
    %c0_867 = arith.constant 0 : index
    %1475 = vector.load %arg8[%1474, %c0_867] : memref<64x128xf32, #tpu.memory_space<vmem>>, vector<8x128xf32>
    %1476 = arith.index_cast %1377 : i32 to index
    %c0_868 = arith.constant 0 : index
    %1477 = vector.load %arg4[%1476, %c0_868] : memref<64x128xf32, #tpu.memory_space<vmem>>, vector<8x128xf32>
    %1478 = arith.addf %1475, %1477 : vector<8x128xf32>
    %cst_869 = arith.constant dense<0.000000e+00> : vector<8xf32>
    %1479 = vector.multi_reduction <add>, %1478, %cst_869 [1] : vector<8x128xf32> to vector<8xf32>
    %1480 = vector.shape_cast %1479 : vector<8xf32> to vector<8x1xf32>
    %1481 = vector.broadcast %cst_743 : f32 to vector<8x1xf32>
    %1482 = arith.mulf %1480, %1481 : vector<8x1xf32>
    %1483 = vector.broadcast %1482 : vector<8x1xf32> to vector<8x128xf32>
    %1484 = arith.subf %1478, %1483 : vector<8x128xf32>
    %1485 = arith.mulf %1484, %1484 : vector<8x128xf32>
    %cst_870 = arith.constant dense<0.000000e+00> : vector<8xf32>
    %1486 = vector.multi_reduction <add>, %1485, %cst_870 [1] : vector<8x128xf32> to vector<8xf32>
    %1487 = vector.shape_cast %1486 : vector<8xf32> to vector<8x1xf32>
    %1488 = vector.broadcast %cst_743 : f32 to vector<8x1xf32>
    %1489 = arith.mulf %1487, %1488 : vector<8x1xf32>
    %cst_871 = arith.constant 9.99999996E-13 : f32
    %1490 = vector.broadcast %cst_871 : f32 to vector<8x1xf32>
    %1491 = arith.addf %1489, %1490 : vector<8x1xf32>
    %1492 = math.rsqrt %1491 : vector<8x1xf32>
    %1493 = vector.broadcast %1492 : vector<8x1xf32> to vector<8x128xf32>
    %1494 = arith.mulf %1484, %1493 : vector<8x128xf32>
    %1495 = vector.broadcast %291 : vector<1x128xf32> to vector<8x128xf32>
    %1496 = arith.mulf %1494, %1495 : vector<8x128xf32>
    %1497 = vector.broadcast %292 : vector<1x128xf32> to vector<8x128xf32>
    %1498 = arith.addf %1496, %1497 : vector<8x128xf32>
    %c0_872 = arith.constant 0 : index
    %1499 = arith.index_cast %1377 : i32 to index
    %c0_873 = arith.constant 0 : index
    %1500 = vector.load %arg7[%c0_872, %1499, %c0_873] : memref<1x64x128xf32, #tpu.memory_space<vmem>>, vector<1x8x128xf32>
    %1501 = vector.shape_cast %1500 : vector<1x8x128xf32> to vector<8x128xf32>
    %1502 = vector.shape_cast %1498 : vector<8x128xf32> to vector<1x8x128xf32>
    tpu.vector_store %arg7[%c0_872, %1499, %c0_873], %1502 {strides = array<i32>} : memref<1x64x128xf32, #tpu.memory_space<vmem>>, vector<1x8x128xf32>,
    %c6_i32_874 = arith.constant 6 : i32
    %c8_i32_875 = arith.constant 8 : i32
    %1503 = arith.muli %c6_i32_874, %c8_i32_875 : i32
    %1504 = tpu.assume_multiple %1503, 8 : i32
    %c0_i32_876 = arith.constant 0 : i32
    %1505 = arith.addi %1504, %c0_i32_876 : i32
    %1506 = arith.addi %2, %1505 : i32
    %1507 = arith.index_cast %1506 : i32 to index
    %1508 = memref.load %arg2[%1507] : memref<128xi32, #tpu.memory_space<smem>>
    %c0_i32_877 = arith.constant 0 : i32
    %c63_i32_878 = arith.constant 63 : i32
    %1509 = arith.maxsi %c0_i32_877, %1508 : i32
    %1510 = arith.minsi %c63_i32_878, %1509 : i32
    %c1_i32_879 = arith.constant 1 : i32
    %1511 = arith.addi %1504, %c1_i32_879 : i32
    %1512 = arith.addi %2, %1511 : i32
    %1513 = arith.index_cast %1512 : i32 to index
    %1514 = memref.load %arg2[%1513] : memref<128xi32, #tpu.memory_space<smem>>
    %c0_i32_880 = arith.constant 0 : i32
    %c63_i32_881 = arith.constant 63 : i32
    %1515 = arith.maxsi %c0_i32_880, %1514 : i32
    %1516 = arith.minsi %c63_i32_881, %1515 : i32
    %c2_i32_882 = arith.constant 2 : i32
    %1517 = arith.addi %1504, %c2_i32_882 : i32
    %1518 = arith.addi %2, %1517 : i32
    %1519 = arith.index_cast %1518 : i32 to index
    %1520 = memref.load %arg2[%1519] : memref<128xi32, #tpu.memory_space<smem>>
    %c0_i32_883 = arith.constant 0 : i32
    %c63_i32_884 = arith.constant 63 : i32
    %1521 = arith.maxsi %c0_i32_883, %1520 : i32
    %1522 = arith.minsi %c63_i32_884, %1521 : i32
    %c3_i32_885 = arith.constant 3 : i32
    %1523 = arith.addi %1504, %c3_i32_885 : i32
    %1524 = arith.addi %2, %1523 : i32
    %1525 = arith.index_cast %1524 : i32 to index
    %1526 = memref.load %arg2[%1525] : memref<128xi32, #tpu.memory_space<smem>>
    %c0_i32_886 = arith.constant 0 : i32
    %c63_i32_887 = arith.constant 63 : i32
    %1527 = arith.maxsi %c0_i32_886, %1526 : i32
    %1528 = arith.minsi %c63_i32_887, %1527 : i32
    %c4_i32_888 = arith.constant 4 : i32
    %1529 = arith.addi %1504, %c4_i32_888 : i32
    %1530 = arith.addi %2, %1529 : i32
    %1531 = arith.index_cast %1530 : i32 to index
    %1532 = memref.load %arg2[%1531] : memref<128xi32, #tpu.memory_space<smem>>
    %c0_i32_889 = arith.constant 0 : i32
    %c63_i32_890 = arith.constant 63 : i32
    %1533 = arith.maxsi %c0_i32_889, %1532 : i32
    %1534 = arith.minsi %c63_i32_890, %1533 : i32
    %c5_i32_891 = arith.constant 5 : i32
    %1535 = arith.addi %1504, %c5_i32_891 : i32
    %1536 = arith.addi %2, %1535 : i32
    %1537 = arith.index_cast %1536 : i32 to index
    %1538 = memref.load %arg2[%1537] : memref<128xi32, #tpu.memory_space<smem>>
    %c0_i32_892 = arith.constant 0 : i32
    %c63_i32_893 = arith.constant 63 : i32
    %1539 = arith.maxsi %c0_i32_892, %1538 : i32
    %1540 = arith.minsi %c63_i32_893, %1539 : i32
    %c6_i32_894 = arith.constant 6 : i32
    %1541 = arith.addi %1504, %c6_i32_894 : i32
    %1542 = arith.addi %2, %1541 : i32
    %1543 = arith.index_cast %1542 : i32 to index
    %1544 = memref.load %arg2[%1543] : memref<128xi32, #tpu.memory_space<smem>>
    %c0_i32_895 = arith.constant 0 : i32
    %c63_i32_896 = arith.constant 63 : i32
    %1545 = arith.maxsi %c0_i32_895, %1544 : i32
    %1546 = arith.minsi %c63_i32_896, %1545 : i32
    %c7_i32_897 = arith.constant 7 : i32
    %1547 = arith.addi %1504, %c7_i32_897 : i32
    %1548 = arith.addi %2, %1547 : i32
    %1549 = arith.index_cast %1548 : i32 to index
    %1550 = memref.load %arg2[%1549] : memref<128xi32, #tpu.memory_space<smem>>
    %c0_i32_898 = arith.constant 0 : i32
    %c63_i32_899 = arith.constant 63 : i32
    %1551 = arith.maxsi %c0_i32_898, %1550 : i32
    %1552 = arith.minsi %c63_i32_899, %1551 : i32
    %c0_i32_900 = arith.constant 0 : i32
    %1553 = arith.addi %1504, %c0_i32_900 : i32
    %c31_i32_901 = arith.constant 31 : i32
    %1554 = arith.andi %1553, %c31_i32_901 : i32
    %c0_i32_902 = arith.constant 0 : i32
    %1555 = tpu.memref_slice %arg3[%1510, %c0_i32_902] : memref<64x128xf32, #tpu.memory_space<any>> -> memref<1x128xf32, #tpu.memory_space<any>>
    %c0_i32_903 = arith.constant 0 : i32
    %1556 = tpu.memref_slice %arg8[%1553, %c0_i32_903] : memref<64x128xf32, #tpu.memory_space<vmem>> -> memref<1x128xf32, #tpu.memory_space<vmem>>
    %1557 = tpu.memref_slice %arg9[%1554] : memref<32x!tpu.dma_semaphore, #tpu.memory_space<semaphore_mem>> -> memref<1x!tpu.dma_semaphore, #tpu.memory_space<semaphore_mem>>
    %1558 = tpu.memref_squeeze %1557 : memref<1x!tpu.dma_semaphore, #tpu.memory_space<semaphore_mem>> -> memref<!tpu.dma_semaphore, #tpu.memory_space<semaphore_mem>>
    tpu.wait_dma2 semaphore(%1558 : memref<!tpu.dma_semaphore, #tpu.memory_space<semaphore_mem>>) src(%1555 : memref<1x128xf32, #tpu.memory_space<any>>) dst(%1556 : memref<1x128xf32, #tpu.memory_space<vmem>>)
    %c1_i32_904 = arith.constant 1 : i32
    %1559 = arith.addi %1504, %c1_i32_904 : i32
    %c31_i32_905 = arith.constant 31 : i32
    %1560 = arith.andi %1559, %c31_i32_905 : i32
    %c0_i32_906 = arith.constant 0 : i32
    %1561 = tpu.memref_slice %arg3[%1516, %c0_i32_906] : memref<64x128xf32, #tpu.memory_space<any>> -> memref<1x128xf32, #tpu.memory_space<any>>
    %c0_i32_907 = arith.constant 0 : i32
    %1562 = tpu.memref_slice %arg8[%1559, %c0_i32_907] : memref<64x128xf32, #tpu.memory_space<vmem>> -> memref<1x128xf32, #tpu.memory_space<vmem>>
    %1563 = tpu.memref_slice %arg9[%1560] : memref<32x!tpu.dma_semaphore, #tpu.memory_space<semaphore_mem>> -> memref<1x!tpu.dma_semaphore, #tpu.memory_space<semaphore_mem>>
    %1564 = tpu.memref_squeeze %1563 : memref<1x!tpu.dma_semaphore, #tpu.memory_space<semaphore_mem>> -> memref<!tpu.dma_semaphore, #tpu.memory_space<semaphore_mem>>
    tpu.wait_dma2 semaphore(%1564 : memref<!tpu.dma_semaphore, #tpu.memory_space<semaphore_mem>>) src(%1561 : memref<1x128xf32, #tpu.memory_space<any>>) dst(%1562 : memref<1x128xf32, #tpu.memory_space<vmem>>)
    %c2_i32_908 = arith.constant 2 : i32
    %1565 = arith.addi %1504, %c2_i32_908 : i32
    %c31_i32_909 = arith.constant 31 : i32
    %1566 = arith.andi %1565, %c31_i32_909 : i32
    %c0_i32_910 = arith.constant 0 : i32
    %1567 = tpu.memref_slice %arg3[%1522, %c0_i32_910] : memref<64x128xf32, #tpu.memory_space<any>> -> memref<1x128xf32, #tpu.memory_space<any>>
    %c0_i32_911 = arith.constant 0 : i32
    %1568 = tpu.memref_slice %arg8[%1565, %c0_i32_911] : memref<64x128xf32, #tpu.memory_space<vmem>> -> memref<1x128xf32, #tpu.memory_space<vmem>>
    %1569 = tpu.memref_slice %arg9[%1566] : memref<32x!tpu.dma_semaphore, #tpu.memory_space<semaphore_mem>> -> memref<1x!tpu.dma_semaphore, #tpu.memory_space<semaphore_mem>>
    %1570 = tpu.memref_squeeze %1569 : memref<1x!tpu.dma_semaphore, #tpu.memory_space<semaphore_mem>> -> memref<!tpu.dma_semaphore, #tpu.memory_space<semaphore_mem>>
    tpu.wait_dma2 semaphore(%1570 : memref<!tpu.dma_semaphore, #tpu.memory_space<semaphore_mem>>) src(%1567 : memref<1x128xf32, #tpu.memory_space<any>>) dst(%1568 : memref<1x128xf32, #tpu.memory_space<vmem>>)
    %c3_i32_912 = arith.constant 3 : i32
    %1571 = arith.addi %1504, %c3_i32_912 : i32
    %c31_i32_913 = arith.constant 31 : i32
    %1572 = arith.andi %1571, %c31_i32_913 : i32
    %c0_i32_914 = arith.constant 0 : i32
    %1573 = tpu.memref_slice %arg3[%1528, %c0_i32_914] : memref<64x128xf32, #tpu.memory_space<any>> -> memref<1x128xf32, #tpu.memory_space<any>>
    %c0_i32_915 = arith.constant 0 : i32
    %1574 = tpu.memref_slice %arg8[%1571, %c0_i32_915] : memref<64x128xf32, #tpu.memory_space<vmem>> -> memref<1x128xf32, #tpu.memory_space<vmem>>
    %1575 = tpu.memref_slice %arg9[%1572] : memref<32x!tpu.dma_semaphore, #tpu.memory_space<semaphore_mem>> -> memref<1x!tpu.dma_semaphore, #tpu.memory_space<semaphore_mem>>
    %1576 = tpu.memref_squeeze %1575 : memref<1x!tpu.dma_semaphore, #tpu.memory_space<semaphore_mem>> -> memref<!tpu.dma_semaphore, #tpu.memory_space<semaphore_mem>>
    tpu.wait_dma2 semaphore(%1576 : memref<!tpu.dma_semaphore, #tpu.memory_space<semaphore_mem>>) src(%1573 : memref<1x128xf32, #tpu.memory_space<any>>) dst(%1574 : memref<1x128xf32, #tpu.memory_space<vmem>>)
    %c4_i32_916 = arith.constant 4 : i32
    %1577 = arith.addi %1504, %c4_i32_916 : i32
    %c31_i32_917 = arith.constant 31 : i32
    %1578 = arith.andi %1577, %c31_i32_917 : i32
    %c0_i32_918 = arith.constant 0 : i32
    %1579 = tpu.memref_slice %arg3[%1534, %c0_i32_918] : memref<64x128xf32, #tpu.memory_space<any>> -> memref<1x128xf32, #tpu.memory_space<any>>
    %c0_i32_919 = arith.constant 0 : i32
    %1580 = tpu.memref_slice %arg8[%1577, %c0_i32_919] : memref<64x128xf32, #tpu.memory_space<vmem>> -> memref<1x128xf32, #tpu.memory_space<vmem>>
    %1581 = tpu.memref_slice %arg9[%1578] : memref<32x!tpu.dma_semaphore, #tpu.memory_space<semaphore_mem>> -> memref<1x!tpu.dma_semaphore, #tpu.memory_space<semaphore_mem>>
    %1582 = tpu.memref_squeeze %1581 : memref<1x!tpu.dma_semaphore, #tpu.memory_space<semaphore_mem>> -> memref<!tpu.dma_semaphore, #tpu.memory_space<semaphore_mem>>
    tpu.wait_dma2 semaphore(%1582 : memref<!tpu.dma_semaphore, #tpu.memory_space<semaphore_mem>>) src(%1579 : memref<1x128xf32, #tpu.memory_space<any>>) dst(%1580 : memref<1x128xf32, #tpu.memory_space<vmem>>)
    %c5_i32_920 = arith.constant 5 : i32
    %1583 = arith.addi %1504, %c5_i32_920 : i32
    %c31_i32_921 = arith.constant 31 : i32
    %1584 = arith.andi %1583, %c31_i32_921 : i32
    %c0_i32_922 = arith.constant 0 : i32
    %1585 = tpu.memref_slice %arg3[%1540, %c0_i32_922] : memref<64x128xf32, #tpu.memory_space<any>> -> memref<1x128xf32, #tpu.memory_space<any>>
    %c0_i32_923 = arith.constant 0 : i32
    %1586 = tpu.memref_slice %arg8[%1583, %c0_i32_923] : memref<64x128xf32, #tpu.memory_space<vmem>> -> memref<1x128xf32, #tpu.memory_space<vmem>>
    %1587 = tpu.memref_slice %arg9[%1584] : memref<32x!tpu.dma_semaphore, #tpu.memory_space<semaphore_mem>> -> memref<1x!tpu.dma_semaphore, #tpu.memory_space<semaphore_mem>>
    %1588 = tpu.memref_squeeze %1587 : memref<1x!tpu.dma_semaphore, #tpu.memory_space<semaphore_mem>> -> memref<!tpu.dma_semaphore, #tpu.memory_space<semaphore_mem>>
    tpu.wait_dma2 semaphore(%1588 : memref<!tpu.dma_semaphore, #tpu.memory_space<semaphore_mem>>) src(%1585 : memref<1x128xf32, #tpu.memory_space<any>>) dst(%1586 : memref<1x128xf32, #tpu.memory_space<vmem>>)
    %c6_i32_924 = arith.constant 6 : i32
    %1589 = arith.addi %1504, %c6_i32_924 : i32
    %c31_i32_925 = arith.constant 31 : i32
    %1590 = arith.andi %1589, %c31_i32_925 : i32
    %c0_i32_926 = arith.constant 0 : i32
    %1591 = tpu.memref_slice %arg3[%1546, %c0_i32_926] : memref<64x128xf32, #tpu.memory_space<any>> -> memref<1x128xf32, #tpu.memory_space<any>>
    %c0_i32_927 = arith.constant 0 : i32
    %1592 = tpu.memref_slice %arg8[%1589, %c0_i32_927] : memref<64x128xf32, #tpu.memory_space<vmem>> -> memref<1x128xf32, #tpu.memory_space<vmem>>
    %1593 = tpu.memref_slice %arg9[%1590] : memref<32x!tpu.dma_semaphore, #tpu.memory_space<semaphore_mem>> -> memref<1x!tpu.dma_semaphore, #tpu.memory_space<semaphore_mem>>
    %1594 = tpu.memref_squeeze %1593 : memref<1x!tpu.dma_semaphore, #tpu.memory_space<semaphore_mem>> -> memref<!tpu.dma_semaphore, #tpu.memory_space<semaphore_mem>>
    tpu.wait_dma2 semaphore(%1594 : memref<!tpu.dma_semaphore, #tpu.memory_space<semaphore_mem>>) src(%1591 : memref<1x128xf32, #tpu.memory_space<any>>) dst(%1592 : memref<1x128xf32, #tpu.memory_space<vmem>>)
    %c7_i32_928 = arith.constant 7 : i32
    %1595 = arith.addi %1504, %c7_i32_928 : i32
    %c31_i32_929 = arith.constant 31 : i32
    %1596 = arith.andi %1595, %c31_i32_929 : i32
    %c0_i32_930 = arith.constant 0 : i32
    %1597 = tpu.memref_slice %arg3[%1552, %c0_i32_930] : memref<64x128xf32, #tpu.memory_space<any>> -> memref<1x128xf32, #tpu.memory_space<any>>
    %c0_i32_931 = arith.constant 0 : i32
    %1598 = tpu.memref_slice %arg8[%1595, %c0_i32_931] : memref<64x128xf32, #tpu.memory_space<vmem>> -> memref<1x128xf32, #tpu.memory_space<vmem>>
    %1599 = tpu.memref_slice %arg9[%1596] : memref<32x!tpu.dma_semaphore, #tpu.memory_space<semaphore_mem>> -> memref<1x!tpu.dma_semaphore, #tpu.memory_space<semaphore_mem>>
    %1600 = tpu.memref_squeeze %1599 : memref<1x!tpu.dma_semaphore, #tpu.memory_space<semaphore_mem>> -> memref<!tpu.dma_semaphore, #tpu.memory_space<semaphore_mem>>
    tpu.wait_dma2 semaphore(%1600 : memref<!tpu.dma_semaphore, #tpu.memory_space<semaphore_mem>>) src(%1597 : memref<1x128xf32, #tpu.memory_space<any>>) dst(%1598 : memref<1x128xf32, #tpu.memory_space<vmem>>)
    %1601 = arith.index_cast %1504 : i32 to index
    %c0_932 = arith.constant 0 : index
    %1602 = vector.load %arg8[%1601, %c0_932] : memref<64x128xf32, #tpu.memory_space<vmem>>, vector<8x128xf32>
    %1603 = arith.index_cast %1504 : i32 to index
    %c0_933 = arith.constant 0 : index
    %1604 = vector.load %arg4[%1603, %c0_933] : memref<64x128xf32, #tpu.memory_space<vmem>>, vector<8x128xf32>
    %1605 = arith.addf %1602, %1604 : vector<8x128xf32>
    %cst_934 = arith.constant dense<0.000000e+00> : vector<8xf32>
    %1606 = vector.multi_reduction <add>, %1605, %cst_934 [1] : vector<8x128xf32> to vector<8xf32>
    %1607 = vector.shape_cast %1606 : vector<8xf32> to vector<8x1xf32>
    %1608 = vector.broadcast %cst_743 : f32 to vector<8x1xf32>
    %1609 = arith.mulf %1607, %1608 : vector<8x1xf32>
    %1610 = vector.broadcast %1609 : vector<8x1xf32> to vector<8x128xf32>
    %1611 = arith.subf %1605, %1610 : vector<8x128xf32>
    %1612 = arith.mulf %1611, %1611 : vector<8x128xf32>
    %cst_935 = arith.constant dense<0.000000e+00> : vector<8xf32>
    %1613 = vector.multi_reduction <add>, %1612, %cst_935 [1] : vector<8x128xf32> to vector<8xf32>
    %1614 = vector.shape_cast %1613 : vector<8xf32> to vector<8x1xf32>
    %1615 = vector.broadcast %cst_743 : f32 to vector<8x1xf32>
    %1616 = arith.mulf %1614, %1615 : vector<8x1xf32>
    %cst_936 = arith.constant 9.99999996E-13 : f32
    %1617 = vector.broadcast %cst_936 : f32 to vector<8x1xf32>
    %1618 = arith.addf %1616, %1617 : vector<8x1xf32>
    %1619 = math.rsqrt %1618 : vector<8x1xf32>
    %1620 = vector.broadcast %1619 : vector<8x1xf32> to vector<8x128xf32>
    %1621 = arith.mulf %1611, %1620 : vector<8x128xf32>
    %1622 = vector.broadcast %291 : vector<1x128xf32> to vector<8x128xf32>
    %1623 = arith.mulf %1621, %1622 : vector<8x128xf32>
    %1624 = vector.broadcast %292 : vector<1x128xf32> to vector<8x128xf32>
    %1625 = arith.addf %1623, %1624 : vector<8x128xf32>
    %c0_937 = arith.constant 0 : index
    %1626 = arith.index_cast %1504 : i32 to index
    %c0_938 = arith.constant 0 : index
    %1627 = vector.load %arg7[%c0_937, %1626, %c0_938] : memref<1x64x128xf32, #tpu.memory_space<vmem>>, vector<1x8x128xf32>
    %1628 = vector.shape_cast %1627 : vector<1x8x128xf32> to vector<8x128xf32>
    %1629 = vector.shape_cast %1625 : vector<8x128xf32> to vector<1x8x128xf32>
    tpu.vector_store %arg7[%c0_937, %1626, %c0_938], %1629 {strides = array<i32>} : memref<1x64x128xf32, #tpu.memory_space<vmem>>, vector<1x8x128xf32>,
    %c7_i32_939 = arith.constant 7 : i32
    %c8_i32_940 = arith.constant 8 : i32
    %1630 = arith.muli %c7_i32_939, %c8_i32_940 : i32
    %1631 = tpu.assume_multiple %1630, 8 : i32
    %c0_i32_941 = arith.constant 0 : i32
    %1632 = arith.addi %1631, %c0_i32_941 : i32
    %1633 = arith.addi %2, %1632 : i32
    %1634 = arith.index_cast %1633 : i32 to index
    %1635 = memref.load %arg2[%1634] : memref<128xi32, #tpu.memory_space<smem>>
    %c0_i32_942 = arith.constant 0 : i32
    %c63_i32_943 = arith.constant 63 : i32
    %1636 = arith.maxsi %c0_i32_942, %1635 : i32
    %1637 = arith.minsi %c63_i32_943, %1636 : i32
    %c1_i32_944 = arith.constant 1 : i32
    %1638 = arith.addi %1631, %c1_i32_944 : i32
    %1639 = arith.addi %2, %1638 : i32
    %1640 = arith.index_cast %1639 : i32 to index
    %1641 = memref.load %arg2[%1640] : memref<128xi32, #tpu.memory_space<smem>>
    %c0_i32_945 = arith.constant 0 : i32
    %c63_i32_946 = arith.constant 63 : i32
    %1642 = arith.maxsi %c0_i32_945, %1641 : i32
    %1643 = arith.minsi %c63_i32_946, %1642 : i32
    %c2_i32_947 = arith.constant 2 : i32
    %1644 = arith.addi %1631, %c2_i32_947 : i32
    %1645 = arith.addi %2, %1644 : i32
    %1646 = arith.index_cast %1645 : i32 to index
    %1647 = memref.load %arg2[%1646] : memref<128xi32, #tpu.memory_space<smem>>
    %c0_i32_948 = arith.constant 0 : i32
    %c63_i32_949 = arith.constant 63 : i32
    %1648 = arith.maxsi %c0_i32_948, %1647 : i32
    %1649 = arith.minsi %c63_i32_949, %1648 : i32
    %c3_i32_950 = arith.constant 3 : i32
    %1650 = arith.addi %1631, %c3_i32_950 : i32
    %1651 = arith.addi %2, %1650 : i32
    %1652 = arith.index_cast %1651 : i32 to index
    %1653 = memref.load %arg2[%1652] : memref<128xi32, #tpu.memory_space<smem>>
    %c0_i32_951 = arith.constant 0 : i32
    %c63_i32_952 = arith.constant 63 : i32
    %1654 = arith.maxsi %c0_i32_951, %1653 : i32
    %1655 = arith.minsi %c63_i32_952, %1654 : i32
    %c4_i32_953 = arith.constant 4 : i32
    %1656 = arith.addi %1631, %c4_i32_953 : i32
    %1657 = arith.addi %2, %1656 : i32
    %1658 = arith.index_cast %1657 : i32 to index
    %1659 = memref.load %arg2[%1658] : memref<128xi32, #tpu.memory_space<smem>>
    %c0_i32_954 = arith.constant 0 : i32
    %c63_i32_955 = arith.constant 63 : i32
    %1660 = arith.maxsi %c0_i32_954, %1659 : i32
    %1661 = arith.minsi %c63_i32_955, %1660 : i32
    %c5_i32_956 = arith.constant 5 : i32
    %1662 = arith.addi %1631, %c5_i32_956 : i32
    %1663 = arith.addi %2, %1662 : i32
    %1664 = arith.index_cast %1663 : i32 to index
    %1665 = memref.load %arg2[%1664] : memref<128xi32, #tpu.memory_space<smem>>
    %c0_i32_957 = arith.constant 0 : i32
    %c63_i32_958 = arith.constant 63 : i32
    %1666 = arith.maxsi %c0_i32_957, %1665 : i32
    %1667 = arith.minsi %c63_i32_958, %1666 : i32
    %c6_i32_959 = arith.constant 6 : i32
    %1668 = arith.addi %1631, %c6_i32_959 : i32
    %1669 = arith.addi %2, %1668 : i32
    %1670 = arith.index_cast %1669 : i32 to index
    %1671 = memref.load %arg2[%1670] : memref<128xi32, #tpu.memory_space<smem>>
    %c0_i32_960 = arith.constant 0 : i32
    %c63_i32_961 = arith.constant 63 : i32
    %1672 = arith.maxsi %c0_i32_960, %1671 : i32
    %1673 = arith.minsi %c63_i32_961, %1672 : i32
    %c7_i32_962 = arith.constant 7 : i32
    %1674 = arith.addi %1631, %c7_i32_962 : i32
    %1675 = arith.addi %2, %1674 : i32
    %1676 = arith.index_cast %1675 : i32 to index
    %1677 = memref.load %arg2[%1676] : memref<128xi32, #tpu.memory_space<smem>>
    %c0_i32_963 = arith.constant 0 : i32
    %c63_i32_964 = arith.constant 63 : i32
    %1678 = arith.maxsi %c0_i32_963, %1677 : i32
    %1679 = arith.minsi %c63_i32_964, %1678 : i32
    %c0_i32_965 = arith.constant 0 : i32
    %1680 = arith.addi %1631, %c0_i32_965 : i32
    %c31_i32_966 = arith.constant 31 : i32
    %1681 = arith.andi %1680, %c31_i32_966 : i32
    %c0_i32_967 = arith.constant 0 : i32
    %1682 = tpu.memref_slice %arg3[%1637, %c0_i32_967] : memref<64x128xf32, #tpu.memory_space<any>> -> memref<1x128xf32, #tpu.memory_space<any>>
    %c0_i32_968 = arith.constant 0 : i32
    %1683 = tpu.memref_slice %arg8[%1680, %c0_i32_968] : memref<64x128xf32, #tpu.memory_space<vmem>> -> memref<1x128xf32, #tpu.memory_space<vmem>>
    %1684 = tpu.memref_slice %arg9[%1681] : memref<32x!tpu.dma_semaphore, #tpu.memory_space<semaphore_mem>> -> memref<1x!tpu.dma_semaphore, #tpu.memory_space<semaphore_mem>>
    %1685 = tpu.memref_squeeze %1684 : memref<1x!tpu.dma_semaphore, #tpu.memory_space<semaphore_mem>> -> memref<!tpu.dma_semaphore, #tpu.memory_space<semaphore_mem>>
    tpu.wait_dma2 semaphore(%1685 : memref<!tpu.dma_semaphore, #tpu.memory_space<semaphore_mem>>) src(%1682 : memref<1x128xf32, #tpu.memory_space<any>>) dst(%1683 : memref<1x128xf32, #tpu.memory_space<vmem>>)
    %c1_i32_969 = arith.constant 1 : i32
    %1686 = arith.addi %1631, %c1_i32_969 : i32
    %c31_i32_970 = arith.constant 31 : i32
    %1687 = arith.andi %1686, %c31_i32_970 : i32
    %c0_i32_971 = arith.constant 0 : i32
    %1688 = tpu.memref_slice %arg3[%1643, %c0_i32_971] : memref<64x128xf32, #tpu.memory_space<any>> -> memref<1x128xf32, #tpu.memory_space<any>>
    %c0_i32_972 = arith.constant 0 : i32
    %1689 = tpu.memref_slice %arg8[%1686, %c0_i32_972] : memref<64x128xf32, #tpu.memory_space<vmem>> -> memref<1x128xf32, #tpu.memory_space<vmem>>
    %1690 = tpu.memref_slice %arg9[%1687] : memref<32x!tpu.dma_semaphore, #tpu.memory_space<semaphore_mem>> -> memref<1x!tpu.dma_semaphore, #tpu.memory_space<semaphore_mem>>
    %1691 = tpu.memref_squeeze %1690 : memref<1x!tpu.dma_semaphore, #tpu.memory_space<semaphore_mem>> -> memref<!tpu.dma_semaphore, #tpu.memory_space<semaphore_mem>>
    tpu.wait_dma2 semaphore(%1691 : memref<!tpu.dma_semaphore, #tpu.memory_space<semaphore_mem>>) src(%1688 : memref<1x128xf32, #tpu.memory_space<any>>) dst(%1689 : memref<1x128xf32, #tpu.memory_space<vmem>>)
    %c2_i32_973 = arith.constant 2 : i32
    %1692 = arith.addi %1631, %c2_i32_973 : i32
    %c31_i32_974 = arith.constant 31 : i32
    %1693 = arith.andi %1692, %c31_i32_974 : i32
    %c0_i32_975 = arith.constant 0 : i32
    %1694 = tpu.memref_slice %arg3[%1649, %c0_i32_975] : memref<64x128xf32, #tpu.memory_space<any>> -> memref<1x128xf32, #tpu.memory_space<any>>
    %c0_i32_976 = arith.constant 0 : i32
    %1695 = tpu.memref_slice %arg8[%1692, %c0_i32_976] : memref<64x128xf32, #tpu.memory_space<vmem>> -> memref<1x128xf32, #tpu.memory_space<vmem>>
    %1696 = tpu.memref_slice %arg9[%1693] : memref<32x!tpu.dma_semaphore, #tpu.memory_space<semaphore_mem>> -> memref<1x!tpu.dma_semaphore, #tpu.memory_space<semaphore_mem>>
    %1697 = tpu.memref_squeeze %1696 : memref<1x!tpu.dma_semaphore, #tpu.memory_space<semaphore_mem>> -> memref<!tpu.dma_semaphore, #tpu.memory_space<semaphore_mem>>
    tpu.wait_dma2 semaphore(%1697 : memref<!tpu.dma_semaphore, #tpu.memory_space<semaphore_mem>>) src(%1694 : memref<1x128xf32, #tpu.memory_space<any>>) dst(%1695 : memref<1x128xf32, #tpu.memory_space<vmem>>)
    %c3_i32_977 = arith.constant 3 : i32
    %1698 = arith.addi %1631, %c3_i32_977 : i32
    %c31_i32_978 = arith.constant 31 : i32
    %1699 = arith.andi %1698, %c31_i32_978 : i32
    %c0_i32_979 = arith.constant 0 : i32
    %1700 = tpu.memref_slice %arg3[%1655, %c0_i32_979] : memref<64x128xf32, #tpu.memory_space<any>> -> memref<1x128xf32, #tpu.memory_space<any>>
    %c0_i32_980 = arith.constant 0 : i32
    %1701 = tpu.memref_slice %arg8[%1698, %c0_i32_980] : memref<64x128xf32, #tpu.memory_space<vmem>> -> memref<1x128xf32, #tpu.memory_space<vmem>>
    %1702 = tpu.memref_slice %arg9[%1699] : memref<32x!tpu.dma_semaphore, #tpu.memory_space<semaphore_mem>> -> memref<1x!tpu.dma_semaphore, #tpu.memory_space<semaphore_mem>>
    %1703 = tpu.memref_squeeze %1702 : memref<1x!tpu.dma_semaphore, #tpu.memory_space<semaphore_mem>> -> memref<!tpu.dma_semaphore, #tpu.memory_space<semaphore_mem>>
    tpu.wait_dma2 semaphore(%1703 : memref<!tpu.dma_semaphore, #tpu.memory_space<semaphore_mem>>) src(%1700 : memref<1x128xf32, #tpu.memory_space<any>>) dst(%1701 : memref<1x128xf32, #tpu.memory_space<vmem>>)
    %c4_i32_981 = arith.constant 4 : i32
    %1704 = arith.addi %1631, %c4_i32_981 : i32
    %c31_i32_982 = arith.constant 31 : i32
    %1705 = arith.andi %1704, %c31_i32_982 : i32
    %c0_i32_983 = arith.constant 0 : i32
    %1706 = tpu.memref_slice %arg3[%1661, %c0_i32_983] : memref<64x128xf32, #tpu.memory_space<any>> -> memref<1x128xf32, #tpu.memory_space<any>>
    %c0_i32_984 = arith.constant 0 : i32
    %1707 = tpu.memref_slice %arg8[%1704, %c0_i32_984] : memref<64x128xf32, #tpu.memory_space<vmem>> -> memref<1x128xf32, #tpu.memory_space<vmem>>
    %1708 = tpu.memref_slice %arg9[%1705] : memref<32x!tpu.dma_semaphore, #tpu.memory_space<semaphore_mem>> -> memref<1x!tpu.dma_semaphore, #tpu.memory_space<semaphore_mem>>
    %1709 = tpu.memref_squeeze %1708 : memref<1x!tpu.dma_semaphore, #tpu.memory_space<semaphore_mem>> -> memref<!tpu.dma_semaphore, #tpu.memory_space<semaphore_mem>>
    tpu.wait_dma2 semaphore(%1709 : memref<!tpu.dma_semaphore, #tpu.memory_space<semaphore_mem>>) src(%1706 : memref<1x128xf32, #tpu.memory_space<any>>) dst(%1707 : memref<1x128xf32, #tpu.memory_space<vmem>>)
    %c5_i32_985 = arith.constant 5 : i32
    %1710 = arith.addi %1631, %c5_i32_985 : i32
    %c31_i32_986 = arith.constant 31 : i32
    %1711 = arith.andi %1710, %c31_i32_986 : i32
    %c0_i32_987 = arith.constant 0 : i32
    %1712 = tpu.memref_slice %arg3[%1667, %c0_i32_987] : memref<64x128xf32, #tpu.memory_space<any>> -> memref<1x128xf32, #tpu.memory_space<any>>
    %c0_i32_988 = arith.constant 0 : i32
    %1713 = tpu.memref_slice %arg8[%1710, %c0_i32_988] : memref<64x128xf32, #tpu.memory_space<vmem>> -> memref<1x128xf32, #tpu.memory_space<vmem>>
    %1714 = tpu.memref_slice %arg9[%1711] : memref<32x!tpu.dma_semaphore, #tpu.memory_space<semaphore_mem>> -> memref<1x!tpu.dma_semaphore, #tpu.memory_space<semaphore_mem>>
    %1715 = tpu.memref_squeeze %1714 : memref<1x!tpu.dma_semaphore, #tpu.memory_space<semaphore_mem>> -> memref<!tpu.dma_semaphore, #tpu.memory_space<semaphore_mem>>
    tpu.wait_dma2 semaphore(%1715 : memref<!tpu.dma_semaphore, #tpu.memory_space<semaphore_mem>>) src(%1712 : memref<1x128xf32, #tpu.memory_space<any>>) dst(%1713 : memref<1x128xf32, #tpu.memory_space<vmem>>)
    %c6_i32_989 = arith.constant 6 : i32
    %1716 = arith.addi %1631, %c6_i32_989 : i32
    %c31_i32_990 = arith.constant 31 : i32
    %1717 = arith.andi %1716, %c31_i32_990 : i32
    %c0_i32_991 = arith.constant 0 : i32
    %1718 = tpu.memref_slice %arg3[%1673, %c0_i32_991] : memref<64x128xf32, #tpu.memory_space<any>> -> memref<1x128xf32, #tpu.memory_space<any>>
    %c0_i32_992 = arith.constant 0 : i32
    %1719 = tpu.memref_slice %arg8[%1716, %c0_i32_992] : memref<64x128xf32, #tpu.memory_space<vmem>> -> memref<1x128xf32, #tpu.memory_space<vmem>>
    %1720 = tpu.memref_slice %arg9[%1717] : memref<32x!tpu.dma_semaphore, #tpu.memory_space<semaphore_mem>> -> memref<1x!tpu.dma_semaphore, #tpu.memory_space<semaphore_mem>>
    %1721 = tpu.memref_squeeze %1720 : memref<1x!tpu.dma_semaphore, #tpu.memory_space<semaphore_mem>> -> memref<!tpu.dma_semaphore, #tpu.memory_space<semaphore_mem>>
    tpu.wait_dma2 semaphore(%1721 : memref<!tpu.dma_semaphore, #tpu.memory_space<semaphore_mem>>) src(%1718 : memref<1x128xf32, #tpu.memory_space<any>>) dst(%1719 : memref<1x128xf32, #tpu.memory_space<vmem>>)
    %c7_i32_993 = arith.constant 7 : i32
    %1722 = arith.addi %1631, %c7_i32_993 : i32
    %c31_i32_994 = arith.constant 31 : i32
    %1723 = arith.andi %1722, %c31_i32_994 : i32
    %c0_i32_995 = arith.constant 0 : i32
    %1724 = tpu.memref_slice %arg3[%1679, %c0_i32_995] : memref<64x128xf32, #tpu.memory_space<any>> -> memref<1x128xf32, #tpu.memory_space<any>>
    %c0_i32_996 = arith.constant 0 : i32
    %1725 = tpu.memref_slice %arg8[%1722, %c0_i32_996] : memref<64x128xf32, #tpu.memory_space<vmem>> -> memref<1x128xf32, #tpu.memory_space<vmem>>
    %1726 = tpu.memref_slice %arg9[%1723] : memref<32x!tpu.dma_semaphore, #tpu.memory_space<semaphore_mem>> -> memref<1x!tpu.dma_semaphore, #tpu.memory_space<semaphore_mem>>
    %1727 = tpu.memref_squeeze %1726 : memref<1x!tpu.dma_semaphore, #tpu.memory_space<semaphore_mem>> -> memref<!tpu.dma_semaphore, #tpu.memory_space<semaphore_mem>>
    tpu.wait_dma2 semaphore(%1727 : memref<!tpu.dma_semaphore, #tpu.memory_space<semaphore_mem>>) src(%1724 : memref<1x128xf32, #tpu.memory_space<any>>) dst(%1725 : memref<1x128xf32, #tpu.memory_space<vmem>>)
    %1728 = arith.index_cast %1631 : i32 to index
    %c0_997 = arith.constant 0 : index
    %1729 = vector.load %arg8[%1728, %c0_997] : memref<64x128xf32, #tpu.memory_space<vmem>>, vector<8x128xf32>
    %1730 = arith.index_cast %1631 : i32 to index
    %c0_998 = arith.constant 0 : index
    %1731 = vector.load %arg4[%1730, %c0_998] : memref<64x128xf32, #tpu.memory_space<vmem>>, vector<8x128xf32>
    %1732 = arith.addf %1729, %1731 : vector<8x128xf32>
    %cst_999 = arith.constant dense<0.000000e+00> : vector<8xf32>
    %1733 = vector.multi_reduction <add>, %1732, %cst_999 [1] : vector<8x128xf32> to vector<8xf32>
    %1734 = vector.shape_cast %1733 : vector<8xf32> to vector<8x1xf32>
    %1735 = vector.broadcast %cst_743 : f32 to vector<8x1xf32>
    %1736 = arith.mulf %1734, %1735 : vector<8x1xf32>
    %1737 = vector.broadcast %1736 : vector<8x1xf32> to vector<8x128xf32>
    %1738 = arith.subf %1732, %1737 : vector<8x128xf32>
    %1739 = arith.mulf %1738, %1738 : vector<8x128xf32>
    %cst_1000 = arith.constant dense<0.000000e+00> : vector<8xf32>
    %1740 = vector.multi_reduction <add>, %1739, %cst_1000 [1] : vector<8x128xf32> to vector<8xf32>
    %1741 = vector.shape_cast %1740 : vector<8xf32> to vector<8x1xf32>
    %1742 = vector.broadcast %cst_743 : f32 to vector<8x1xf32>
    %1743 = arith.mulf %1741, %1742 : vector<8x1xf32>
    %cst_1001 = arith.constant 9.99999996E-13 : f32
    %1744 = vector.broadcast %cst_1001 : f32 to vector<8x1xf32>
    %1745 = arith.addf %1743, %1744 : vector<8x1xf32>
    %1746 = math.rsqrt %1745 : vector<8x1xf32>
    %1747 = vector.broadcast %1746 : vector<8x1xf32> to vector<8x128xf32>
    %1748 = arith.mulf %1738, %1747 : vector<8x128xf32>
    %1749 = vector.broadcast %291 : vector<1x128xf32> to vector<8x128xf32>
    %1750 = arith.mulf %1748, %1749 : vector<8x128xf32>
    %1751 = vector.broadcast %292 : vector<1x128xf32> to vector<8x128xf32>
    %1752 = arith.addf %1750, %1751 : vector<8x128xf32>
    %c0_1002 = arith.constant 0 : index
    %1753 = arith.index_cast %1631 : i32 to index
    %c0_1003 = arith.constant 0 : index
    %1754 = vector.load %arg7[%c0_1002, %1753, %c0_1003] : memref<1x64x128xf32, #tpu.memory_space<vmem>>, vector<1x8x128xf32>
    %1755 = vector.shape_cast %1754 : vector<1x8x128xf32> to vector<8x128xf32>
    %1756 = vector.shape_cast %1752 : vector<8x128xf32> to vector<1x8x128xf32>
    tpu.vector_store %arg7[%c0_1002, %1753, %c0_1003], %1756 {strides = array<i32>} : memref<1x64x128xf32, #tpu.memory_space<vmem>>, vector<1x8x128xf32>,
    %c4_i32_1004 = arith.constant 4 : i32
    return
  }
  func.func @transform_1(%arg0: i32, %arg1: i32, %arg2: memref<128xi32, #tpu.memory_space<smem>>) -> (i32, i32) {
    %c0_i32 = arith.constant 0 : i32
    %c0_i32_0 = arith.constant 0 : i32
    return %arg0, %c0_i32 : i32, i32
  }
  func.func @transform_2(%arg0: i32, %arg1: i32, %arg2: memref<128xi32, #tpu.memory_space<smem>>) -> (i32, i32) {
    %c0_i32 = arith.constant 0 : i32
    %c0_i32_0 = arith.constant 0 : i32
    %c0_i32_1 = arith.constant 0 : i32
    return %c0_i32, %c0_i32_0 : i32, i32
  }
  func.func @transform_3(%arg0: i32, %arg1: i32, %arg2: memref<128xi32, #tpu.memory_space<smem>>) -> (i32, i32) {
    %c0_i32 = arith.constant 0 : i32
    %c0_i32_0 = arith.constant 0 : i32
    %c0_i32_1 = arith.constant 0 : i32
    return %c0_i32, %c0_i32_0 : i32, i32
  }
  func.func @transform_4(%arg0: i32, %arg1: i32, %arg2: memref<128xi32, #tpu.memory_space<smem>>) -> (i32, i32, i32) {
    %c0_i32 = arith.constant 0 : i32
    %c0_i32_0 = arith.constant 0 : i32
    return %arg1, %arg0, %c0_i32 : i32, i32, i32
  }
}

</mosaic_0001>

<bundles_post_ra>
// kernel: tpu_custom_call.1
= control target key start
LH: loop header
LB: loop body
LE: loop exit
PB: predicated region body
PF: predicated region fallthrough
CT: control target
= control target key end

     0   :  { %s6745_s0 = inlined_call_operand.hbm [shape: s32[128], index: 0, kind: input, shape index: {}]   ;;  %s6746_s1 = inlined_call_operand.hbm [shape: f32[64,128], index: 1, kind: input, shape index: {}]   ;;  %s6747_s2 = inlined_call_operand.hbm [shape: f32[64,128], index: 2, kind: input, shape index: {}]   ;;  %s6748_s3 = inlined_call_operand.vmem [shape: f32[1,128], index: 3, kind: input, shape index: {}]   ;;  %s6749_s4 = inlined_call_operand.vmem [shape: f32[1,128], index: 4, kind: input, shape index: {}]   ;;  %s6750_s5 = inlined_call_operand.hbm [shape: f32[2,64,128], index: 5, kind: output, shape index: {}]  }
   0x1   :  { %6767 = sst [smem:[#allocation217_spill]] %s6747_s2  ;;  %s3502_s20 = scalar_lea.hbm %s6745_s0, 16 }
   0x2   :  { %6768 = sst [smem:[#allocation218_spill]] %s6748_s3  ;;  %p3503_p0 = scmp.ne.s32.totalorder %s6745_s0, %s3502_s20 }
   0x3   :  { %6769 = sst [smem:[#allocation219_spill]] %s6749_s4  ;;  %p3506_p1 = scmp.lt.u32.totalorder %s3502_s20, %s6745_s0 }
   0x4   :  { %6770 = sst [smem:[#allocation220_spill]] %s6750_s5 }
   0x5   :  { %p3508_p2 = pnand %p3506_p1, %p3503_p0 }
   0x7   :  { %3511 = shalt.err (!%p3508_p2)  }
   0x8   :  { %s5290_s25 = smov [#allocation5]  }
   0x9   :  { %11 = dma.hbm_to_smem %s6745_s0, 16, %s5290_s25, [#allocation4] }
   0xa   :  { %5128 = dma.done.wait [#allocation4], 16 }
   0xb   :  { %5129 = vsyncadd [#allocation4], 4294967280 }
   0xc   :  { %13 = sfence }
   0xd   :  { %14 = vsyncpa [#allocation7], 0 }
   0xe   :  { %15 = vsyncpa [#allocation8], 0 }
   0xf   :  { %17 = vsyncpa [#allocation8 + $0x1], 0  ;;  %s5403_s28 = smov 0   ;;  %s5405_s29 = smov 0  }
  0x10   :  { %s5407_s30 = smov 0   ;;  %s5409_s6 = smov 0  }
  0x11   :  { %s5411_s7 = smov 0   ;;  %s5413_s8 = smov 0  }
  0x12 LB: > { %6771 = sst [smem:[#allocation207_spill]] %s5268_s28  ;;  %s2784_s0 = sadd.s32 4294967295, %s5288_s8   ;;  %s5288_s8 = sphi %s5413_s8, %s23_s8   ;;  %s5284_s7 = sphi %s5411_s7, %s6808_s7   ;;  %s5280_s6 = sphi %s5409_s6, %s6807_s6   ;;  %s5276_s30 = sphi %s5407_s30, %s6806_s30   ;;  %s5272_s29 = sphi %s5405_s29, %s6805_s29   ;;  %s5268_s28 = sphi %s5403_s28, %s6804_s28  }
  0x13   : > { %6772 = sst [smem:[#allocation208_spill]] %s5272_s29  ;;  %s2785_s9 = sadd.s32 4294967294, %s5288_s8  }
  0x14   : > { %6773 = sst [smem:[#allocation209_spill]] %s5276_s30  ;;  %s32_s10 = sadd.s32 1, %s5284_s7 }
  0x15   : > { %6774 = sst [smem:[#allocation210_spill]] %s5280_s6  ;;  %s112_s11 = sadd.s32 1, %s5276_s30 }
  0x16   : > { %6775 = sst [smem:[#allocation211_spill]] %s5284_s7  ;;  %p33_p3 = scmp.ge.s32.totalorder %s32_s10, 2 }
  0x17   : > { %6776 = sst [smem:[#allocation212_spill]] %s5288_s8  ;;  %p122_p4 = scmp.ne.s32.totalorder %s5276_s30, %s5272_s29 }
  0x18   : > { %p123_p5 = scmp.eq.s32.totalorder %s2784_s0, 1  ;;  %p128_p6 = scmp.ne.s32.totalorder %s5272_s29, %s5268_s28 }
  0x19   : > { %s6810_s10 = smov (%p33_p3, %s32_s10), 0  ;;  %p129_p8 = scmp.eq.s32.totalorder %s2785_s9, 1 }
  0x1a   : > { %6777 = sst [smem:[#allocation213_spill]] %s6810_s10  ;;  %p5443_p7 = por %p123_p5, %p122_p4 }
  0x1b   : > { %s107_s13 = ssub.s32 %s5284_s7, %s6810_s10  ;;  %p2786_p9 = scmp.ge.s32.totalorder %s5288_s8, 1 }
  0x1c   : > { %s6778_s12 = scalar_select %p5443_p7, 1, 0 }
  0x1d   : > { %p110_p10 = scmp.eq.s32.totalorder %s107_s13, 0  ;;  %p5450_p11 = por %p129_p8, %p128_p6 }
  0x1e   : > { %6779 = sst [smem:[#allocation214_spill]] %s6778_s12  ;;  %p136_p12 = scmp.lt.s32.totalorder %s5288_s8, 3 }
  0x1f   : > { %s6780_s14 = scalar_select %p5450_p11, 1, 0 }
  0x20   : > { %s5456_s15 = scalar_select %p110_p10, %s5276_s30, %s112_s11  }
  0x21   : > { %6781 = sst [smem:[#allocation215_spill]] %s6780_s14  ;;  %p5458_p13 = pnand %p2786_p9, %p136_p12 }
  0x22   : > { %6782 = sst [smem:[#allocation216_spill]] %s5456_s15  ;;  %p5462_p0 = scmp.eq.s32.totalorder %s2784_s0, 0 }
  0x23   : > { %s6783_s16 = scalar_select %p5458_p13, 1, 0 }
  0x24   : > { %s6784_s17 = scalar_select %p5462_p0, 1, 0 }
  0x25   : > { %p3357_p1 = pneg %p5458_p13  ;;  %s5291_s18 = smov [#allocation6]  }
  0x26   : > { %s151_s19 = sshll.u32 %s5291_s18, 4  ;;  %s6786_s2 = sld [smem:[#allocation217_spill]]  ;;  %s152_s19 = int_to_ptr.vmem [resolvable:$true] %s151_s19 }
  0x27   : > { %p5470_p2 = pnand %p5462_p0, %p3357_p1 }
  0x29   : > { %p3514_p4 = pneg %p5470_p2 }
  0x2c   : > { %s3512_s23 = scalar_lea.hbm %s6786_s2, 1024 }
  0x2d   : > { %p3513_p3 = scmp.ne.s32.totalorder %s6786_s2, %s3512_s23  ;;  %p3519_p8 = scmp.lt.u32.totalorder %s3512_s23, %s6786_s2 }
  0x2f   : > { %p3515_p5 = pnand %p3514_p4, %p3513_p3 }
  0x31   : > { %p3516_p6 = pneg %p3515_p5 }
  0x33   : > { %p3521_p9 = pnand %p3519_p8, %p3516_p6 }
  0x35   : > { %3524 = shalt.err (!%p3521_p9)
}
  0x36   : > { %s3525_s0 = scalar_lea.vmem %s152_s19, 1024  ;;  %p3533_p11 = scmp.lt.s32.totalorder %s152_s19, %s152_s19 }
  0x37   : > { %p3526_p10 = scmp.ne.s32.totalorder %s152_s19, %s3525_s0  ;;  %p3534_p7 = scmp.lt.s32.totalorder %s3525_s0, %s3525_s0 }
  0x39   : > { %p3528_p12 = pnand %p3526_p10, %p3514_p4  ;;  %p3535_p0 = por %p3534_p7, %p3533_p11 }
  0x3b   : > { %p3529_p1 = pneg %p3528_p12 }
  0x3d   : > { %p3536_p13 = pnand %p3535_p0, %p3529_p1 }
  0x3f   : > { %3539 = shalt.err (!%p3536_p13)
}
  0x40   : > { %s5292_s9 = smov 128   ;;  %s5293_s11 = smov 8  }
  0x41   : > { %3360 = dma.hbm_to_vmem [thread:$0]  (!%p5470_p2), %s6786_s2, 1024, %s152_s19, [#allocation7], %s5292_s9, %s5292_s9, %s5293_s11  }
  0x42   : > { %p6787_p3 = scmp.ne.s32.totalorder %s6783_s16, 0 }
  0x43   : > { %p6788_p5 = scmp.ne.s32.totalorder (!%p6787_p3), %s6784_s17, 0 }
  0x44   : > { %173 = sbr.rel (%p6787_p3) target bundleno = 4264 (0x10a8), region = 32 }
  0x4b   : > { %5131 = dma.done.wait (%p6788_p5), [#allocation7], 1024  }
  0x4c   : > { %5133 = vsyncadd (%p6788_p5), [#allocation7], 4294966272  ;;  %s5497_s21 = sshll.u32 %s5280_s6, 6  ;;  %s6789_s3 = sld [smem:[#allocation218_spill]] }
  0x4d   : > { %s892_s16 = sadd.s32 32, %s5497_s21  ;;  %s899_s20 = sadd.s32 33, %s5497_s21 }
  0x4e   : > { %s893_s22 = sld [smem:[#allocation5 + %s892_s16]]  ;;  %s906_s24 = sadd.s32 34, %s5497_s21 }
  0x4f   : > { %s900_s23 = sld [smem:[#allocation5 + %s899_s20]]  ;;  %s913_s17 = sadd.s32 35, %s5497_s21 }
  0x50   : > { %s907_s25 = sld [smem:[#allocation5 + %s906_s24]]  ;;  %s920_s27 = sadd.s32 36, %s5497_s21 }
  0x51   : > { %s914_s26 = sld [smem:[#allocation5 + %s913_s17]]  ;;  %s927_s0 = sadd.s32 37, %s5497_s21 }
  0x52   : > { %s921_s9 = sld [smem:[#allocation5 + %s920_s27]]  ;;  %v5509_v0 = vld [vmem:[%s6789_s3] ss:$0 sm:$0xff]  ;;  %s934_s16 = sadd.s32 38, %s5497_s21 }
  0x53   : > { %s928_s11 = sld [smem:[#allocation5 + %s927_s0]]  ;;  %s941_s20 = sadd.s32 39, %s5497_s21 }
  0x54   : > { %s6790_s4 = sld [smem:[#allocation219_spill]]  ;;  %p894_p7 = scmp.gt.s32.totalorder %s893_s22, 0 }
  0x55   : > { %p2984_p11 = scmp.lt.s32.totalorder %s893_s22, 63  ;;  %p901_p13 = scmp.gt.s32.totalorder %s900_s23, 0 }
  0x56   : > { %p2989_p0 = scmp.lt.s32.totalorder %s900_s23, 63  ;;  %s6812_s22 = smov (!%p894_p7, %s893_s22), 0 }
  0x57   : > { %s6814_s23 = smov (!%p901_p13, %s900_s23), 0  ;;  %s6816_s22 = smov (!%p2984_p11, %s6812_s22), 63 }
  0x58   : > { %s6818_s23 = smov (!%p2989_p0, %s6814_s23), 63  ;;  %p908_p2 = scmp.gt.s32.totalorder %s907_s25, 0 }
  0x59   : > { %p2994_p4 = scmp.lt.s32.totalorder %s907_s25, 63  ;;  %p915_p6 = scmp.gt.s32.totalorder %s914_s26, 0 }
  0x5a   : > { %v5514_v1 = vld [vmem:[%s6790_s4] ss:$0 sm:$0xff]  ;;  %p2999_p8 = scmp.lt.s32.totalorder %s914_s26, 63  ;;  %s6820_s25 = smov (!%p908_p2, %s907_s25), 0 }
  0x5b   : > { %s6822_s26 = smov (!%p915_p6, %s914_s26), 0  ;;  %s6824_s25 = smov (!%p2994_p4, %s6820_s25), 63 }
  0x5c   : > { %s6826_s26 = smov (!%p2999_p8, %s6822_s26), 63  ;;  %p922_p9 = scmp.gt.s32.totalorder %s921_s9, 0 }
  0x5d   : > { %p3004_p10 = scmp.lt.s32.totalorder %s921_s9, 63  ;;  %p929_p12 = scmp.gt.s32.totalorder %s928_s11, 0 }
  0x5e   : > { %p3009_p1 = scmp.lt.s32.totalorder %s928_s11, 63  ;;  %s6828_s9 = smov (!%p922_p9, %s921_s9), 0 }
  0x5f   : > { %s6830_s11 = smov (!%p929_p12, %s928_s11), 0  ;;  %s6832_s9 = smov (!%p3004_p10, %s6828_s9), 63 }
  0x60   : > { %s6834_s11 = smov (!%p3009_p1, %s6830_s11), 63  ;;  %s935_s2 = sld [smem:[#allocation5 + %s934_s16]] }
  0x61   : > { %s942_s19 = sld [smem:[#allocation5 + %s941_s20]]  ;;  %s6791_s24 = sand.u32 1, %s5272_s29  }
  0x62   : > { %s5532_s17 = sshll.u32 %s6791_s24, 6  ;;  %s197_s27 = sld [smem:[#allocation5 + %s5497_s21]] }
  0x63   : > { %s5294_s0 = smov [#allocation2]   ;;  %s215_s18 = sadd.s32 1, %s5497_s21 }
  0x64   : > { %s211_s13 = sshll.u32 %s5294_s0, 4  ;;  %s216_s3 = sld [smem:[#allocation5 + %s215_s18]]  ;;  %s5536_s13 = int_to_ptr.vmem [resolvable:$true] %s211_s13 }
  0x65   : > { %s5295_s20 = smov [#allocation2 + $0x1]   ;;  %s5549_s14 = scalar_lea.hbm %s6746_s1, 1024 }
  0x66   : > { %p936_p3 = scmp.gt.s32.totalorder %s935_s2, 0  ;;  %p3014_p5 = scmp.lt.s32.totalorder %s935_s2, 63 }
  0x67   : > { %p943_p7 = scmp.gt.s32.totalorder %s942_s19, 0  ;;  %p3019_p11 = scmp.lt.s32.totalorder %s942_s19, 63 }
  0x68   : > { %s6836_s2 = smov (!%p936_p3, %s935_s2), 0  ;;  %p198_p13 = scmp.gt.s32.totalorder %s197_s27, 0 }
  0x69   : > { %s6838_s19 = smov (!%p943_p7, %s942_s19), 0  ;;  %s6840_s2 = smov (!%p3014_p5, %s6836_s2), 63 }
  0x6a   : > { %s6842_s19 = smov (!%p3019_p11, %s6838_s19), 63  ;;  %p2792_p0 = scmp.lt.s32.totalorder %s197_s27, 63 }
  0x6b   : > { %p217_p2 = scmp.gt.s32.totalorder %s216_s3, 0  ;;  %p2798_p4 = scmp.lt.s32.totalorder %s216_s3, 63 }
  0x6c   : > { %s6844_s27 = smov (!%p198_p13, %s197_s27), 0  ;;  %s232_s24 = sshll.u32 %s5295_s20, 4  ;;  %s233_s24 = int_to_ptr.vmem [resolvable:$true] %s232_s24 }
  0x6d   : > { %s6846_s3 = smov (!%p217_p2, %s216_s3), 0  ;;  %s6848_s27 = smov (!%p2792_p0, %s6844_s27), 63 }
  0x6e   : > { %s6850_s3 = smov (!%p2798_p4, %s6846_s3), 63  ;;  %s2797_s16 = sshll.u32 %s6848_s27, 4 }
  0x6f   : > { %s203_s4 = scalar_lea.hbm %s6746_s1, %s2797_s16  ;;  %s2803_s10 = sshll.u32 %s6850_s3, 4 }
  0x70   : > { %s3540_s7 = scalar_lea.hbm %s203_s4, 16  ;;  %p3543_p8 = scmp.lt.u32.totalorder %s203_s4, %s6746_s1 }
  0x71   : > { %p3541_p6 = scmp.ne.s32.totalorder %s203_s4, %s3540_s7  ;;  %p3544_p9 = scmp.lt.u32.totalorder %s5549_s14, %s3540_s7 }
  0x72   : > { %p3546_p12 = scmp.lt.u32.totalorder %s3540_s7, %s203_s4 }
  0x73   : > { %p3545_p10 = por %p3544_p9, %p3543_p8 }
  0x75   : > { %p3547_p1 = por %p3546_p12, %p3545_p10 }
  0x77   : > { %p3548_p3 = pnand %p3547_p1, %p3541_p6 }
  0x79   : > { %3551 = shalt.err (!%p3548_p3)  }
  0x7a   : > { %s3552_s3 = scalar_lea.vmem %s5536_s13, 16  ;;  %s5558_s30 = scalar_lea.vmem %s5536_s13, 1024 }
  0x7b   : > { %p3553_p5 = scmp.ne.s32.totalorder %s5536_s13, %s3552_s3  ;;  %p3557_p7 = scmp.lt.s32.totalorder %s5536_s13, %s5536_s13 }
  0x7c   : > { %p3558_p11 = scmp.lt.s32.totalorder %s5558_s30, %s3552_s3 }
  0x7e   : > { %p3559_p13 = por %p3558_p11, %p3557_p7 }
  0x80   : > { %p3560_p0 = pnand %p3559_p13, %p3553_p5 }
  0x82   : > { %3563 = shalt.err (!%p3560_p0)  }
  0x83   : > { %214 = dma.hbm_to_vmem [thread:$0]  %s203_s4, 16, %s5536_s13, [#allocation3] }
  0x84   : > { %s222_s8 = scalar_lea.hbm %s6746_s1, %s2803_s10 }
  0x85   : > { %s3564_s15 = scalar_lea.hbm %s222_s8, 16  ;;  %p3567_p4 = scmp.lt.u32.totalorder %s222_s8, %s6746_s1 }
  0x86   : > { %p3565_p2 = scmp.ne.s32.totalorder %s222_s8, %s3564_s15  ;;  %p3568_p6 = scmp.lt.u32.totalorder %s5549_s14, %s3564_s15 }
  0x87   : > { %p3570_p9 = scmp.lt.u32.totalorder %s3564_s15, %s222_s8 }
  0x88   : > { %p3569_p8 = por %p3568_p6, %p3567_p4 }
  0x8a   : > { %p3571_p10 = por %p3570_p9, %p3569_p8 }
  0x8c   : > { %p3572_p12 = pnand %p3571_p10, %p3565_p2 }
  0x8e   : > { %3575 = shalt.err (!%p3572_p12)  }
  0x8f   : > { %s3576_s20 = scalar_lea.vmem %s233_s24, 16  ;;  %p3581_p3 = scmp.lt.s32.totalorder %s233_s24, %s5536_s13 }
  0x90   : > { %p3577_p1 = scmp.ne.s32.totalorder %s233_s24, %s3576_s20  ;;  %p3582_p5 = scmp.lt.s32.totalorder %s5558_s30, %s3576_s20 }
  0x92   : > { %p3583_p7 = por %p3582_p5, %p3581_p3 }
  0x94   : > { %p3584_p11 = pnand %p3583_p7, %p3577_p1 }
  0x96   : > { %3587 = shalt.err (!%p3584_p11)  }
  0x97   : > { %235 = dma.hbm_to_vmem [thread:$0]  %s222_s8, 16, %s233_s24, [#allocation3 + $0x1] }
  0x98   : > { %s6792_s4 = sadd.s32 2, %s5497_s21  ;;  %s5296_s0 = smov [#allocation2 + $0x2]  }
  0x99   : > { %s237_s10 = sld [smem:[#allocation5 + %s6792_s4]]  ;;  %s253_s18 = sshll.u32 %s5296_s0, 4  ;;  %s5576_s18 = int_to_ptr.vmem [resolvable:$true] %s253_s18 }
  0x9a   : > { %s257_s3 = sadd.s32 3, %s5497_s21  ;;  %s278_s7 = sadd.s32 4, %s5497_s21 }
  0x9b   : > { %s5578_s28 = sld [smem:[#allocation5 + %s257_s3]]  ;;  %s5297_s15 = smov [#allocation2 + $0x3]  }
  0x9c   : > { %s274_s27 = sshll.u32 %s5297_s15, 4  ;;  %s5581_s24 = sld [smem:[#allocation5 + %s278_s7]]  ;;  %s5583_s27 = int_to_ptr.vmem [resolvable:$true] %s274_s27 }
  0x9d   : > { %s5298_s8 = smov [#allocation2 + $0x4]   ;;  %s299_s20 = sadd.s32 5, %s5497_s21 }
  0x9e   : > { %s5585_s16 = sshll.u32 %s5298_s8, 4  ;;  %s5612_s16 = int_to_ptr.vmem [resolvable:$true] %s5585_s16 }
  0x9f   : > { %p238_p13 = scmp.gt.s32.totalorder %s237_s10, 0  ;;  %p2804_p0 = scmp.lt.s32.totalorder %s237_s10, 63 }
  0xa1   : > { %s6852_s10 = smov (!%p238_p13, %s237_s10), 0  ;;  %p259_p2 = scmp.gt.s32.totalorder %s5578_s28, 0 }
  0xa2   : > { %p2810_p4 = scmp.lt.s32.totalorder %s5578_s28, 63  ;;  %s6854_s10 = smov (!%p2804_p0, %s6852_s10), 63 }
  0xa3   : > { %s260_s4 = scalar_select %p259_p2, %s5578_s28, 0 }
  0xa4   : > { %s2809_s0 = sshll.u32 %s6854_s10, 4  ;;  %p280_p6 = scmp.gt.s32.totalorder %s5581_s24, 0 }
  0xa5   : > { %s243_s15 = scalar_lea.hbm %s6746_s1, %s2809_s0 }
  0xa6   : > { %s3588_s5 = scalar_lea.hbm %s243_s15, 16  ;;  %p3591_p10 = scmp.lt.u32.totalorder %s243_s15, %s6746_s1 }
  0xa7   : > { %p3589_p9 = scmp.ne.s32.totalorder %s243_s15, %s3588_s5  ;;  %p3592_p12 = scmp.lt.u32.totalorder %s5549_s14, %s3588_s5 }
  0xa8   : > { %p3594_p3 = scmp.lt.u32.totalorder %s3588_s5, %s243_s15 }
  0xa9   : > { %p3593_p1 = por %p3592_p12, %p3591_p10 }
  0xab   : > { %p3595_p5 = por %p3594_p3, %p3593_p1 }
  0xad   : > { %p3596_p7 = pnand %p3595_p5, %p3589_p9 }
  0xaf   : > { %3599 = shalt.err (!%p3596_p7)  }
  0xb0   : > { %s3600_s10 = scalar_lea.vmem %s5576_s18, 16  ;;  %p3605_p13 = scmp.lt.s32.totalorder %s5576_s18, %s5536_s13 }
  0xb1   : > { %p3601_p11 = scmp.ne.s32.totalorder %s5576_s18, %s3600_s10  ;;  %p3606_p0 = scmp.lt.s32.totalorder %s5558_s30, %s3600_s10 }
  0xb3   : > { %p3607_p2 = por %p3606_p0, %p3605_p13 }
  0xb5   : > { %p3608_p8 = pnand %p3607_p2, %p3601_p11 }
  0xb7   : > { %3611 = shalt.err (!%p3608_p8)  }
  0xb8   : > { %256 = dma.hbm_to_vmem [thread:$0]  %s243_s15, 16, %s5576_s18, [#allocation3 + $0x2] }
  0xb9   : > { %s6856_s4 = smov (!%p2810_p4, %s260_s4), 63  ;;  %s5619_s3 = sld [smem:[#allocation5 + %s299_s20]] }
  0xba   : > { %s281_s5 = scalar_select %p280_p6, %s5581_s24, 0 }
  0xbb   : > { %s2815_s29 = sshll.u32 %s6856_s4, 4 }
  0xbc   : > { %s264_s0 = scalar_lea.hbm %s6746_s1, %s2815_s29 }
  0xbd   : > { %s3612_s7 = scalar_lea.hbm %s264_s0, 16  ;;  %p3615_p9 = scmp.lt.u32.totalorder %s264_s0, %s6746_s1 }
  0xbe   : > { %p3613_p8 = scmp.ne.s32.totalorder %s264_s0, %s3612_s7  ;;  %p3616_p10 = scmp.lt.u32.totalorder %s5549_s14, %s3612_s7 }
  0xbf   : > { %p3618_p12 = scmp.lt.u32.totalorder %s3612_s7, %s264_s0 }
  0xc0   : > { %p3617_p4 = por %p3616_p10, %p3615_p9 }
  0xc2   : > { %p3619_p6 = por %p3618_p12, %p3617_p4 }
  0xc4   : > { %p3620_p1 = pnand %p3619_p6, %p3613_p8 }
  0xc6   : > { %3623 = shalt.err (!%p3620_p1)  }
  0xc7   : > { %s3624_s18 = scalar_lea.vmem %s5583_s27, 16  ;;  %p3629_p5 = scmp.lt.s32.totalorder %s5583_s27, %s5536_s13 }
  0xc8   : > { %p3625_p3 = scmp.ne.s32.totalorder %s5583_s27, %s3624_s18  ;;  %p3630_p7 = scmp.lt.s32.totalorder %s5558_s30, %s3624_s18 }
  0xca   : > { %p3631_p11 = por %p3630_p7, %p3629_p5 }
  0xcc   : > { %p3632_p13 = pnand %p3631_p11, %p3625_p3 }
  0xce   : > { %3635 = shalt.err (!%p3632_p13)  }
  0xcf   : > { %277 = dma.hbm_to_vmem [thread:$0]  %s264_s0, 16, %s5583_s27, [#allocation3 + $0x3] }
  0xd0   : > { %p6793_p0 = scmp.lt.s32.totalorder %s5581_s24, 63  ;;  %s320_s6 = sadd.s32 6, %s5497_s21 }
  0xd1   : > { %s5299_s20 = smov [#allocation2 + $0x5]  }
  0xd2   : > { %s6858_s5 = smov (!%p6793_p0, %s281_s5), 63  ;;  %s316_s4 = sshll.u32 %s5299_s20, 4  ;;  %s5637_s4 = int_to_ptr.vmem [resolvable:$true] %s316_s4 }
  0xd3   : > { %s2821_s28 = sshll.u32 %s6858_s5, 4 }
  0xd4   : > { %s285_s12 = scalar_lea.hbm %s6746_s1, %s2821_s28 }
  0xd5   : > { %s3636_s8 = scalar_lea.hbm %s285_s12, 16  ;;  %p3639_p8 = scmp.lt.u32.totalorder %s285_s12, %s6746_s1 }
  0xd6   : > { %p3637_p2 = scmp.ne.s32.totalorder %s285_s12, %s3636_s8  ;;  %p3640_p9 = scmp.lt.u32.totalorder %s5549_s14, %s3636_s8 }
  0xd7   : > { %p3642_p4 = scmp.lt.u32.totalorder %s3636_s8, %s285_s12 }
  0xd8   : > { %p3641_p10 = por %p3640_p9, %p3639_p8 }
  0xda   : > { %p3643_p12 = por %p3642_p4, %p3641_p10 }
  0xdc   : > { %p3644_p6 = pnand %p3643_p12, %p3637_p2 }
  0xde   : > { %3647 = shalt.err (!%p3644_p6)  }
  0xdf   : > { %s3648_s27 = scalar_lea.vmem %s5612_s16, 16  ;;  %p3653_p3 = scmp.lt.s32.totalorder %s5612_s16, %s5536_s13 }
  0xe0   : > { %p3649_p1 = scmp.ne.s32.totalorder %s5612_s16, %s3648_s27  ;;  %p3654_p5 = scmp.lt.s32.totalorder %s5558_s30, %s3648_s27 }
  0xe2   : > { %p3655_p7 = por %p3654_p5, %p3653_p3 }
  0xe4   : > { %p3656_p11 = pnand %p3655_p7, %p3649_p1 }
  0xe6   : > { %3659 = shalt.err (!%p3656_p11)  }
  0xe7   : > { %298 = dma.hbm_to_vmem [thread:$0]  %s285_s12, 16, %s5612_s16, [#allocation3 + $0x4] }
  0xe8   : > { %p301_p13 = scmp.gt.s32.totalorder %s5619_s3, 0  ;;  %p2822_p0 = scmp.lt.s32.totalorder %s5619_s3, 63 }
  0xe9   : > { %s5651_s24 = sld [smem:[#allocation5 + %s320_s6]]  ;;  %s5300_s5 = smov [#allocation2 + $0x6]  }
  0xea   : > { %s6860_s3 = smov (!%p301_p13, %s5619_s3), 0  ;;  %s337_s0 = sshll.u32 %s5300_s5, 4  ;;  %s5655_s0 = int_to_ptr.vmem [resolvable:$true] %s337_s0 }
  0xeb   : > { %s341_s18 = sadd.s32 7, %s5497_s21  ;;  %s6862_s3 = smov (!%p2822_p0, %s6860_s3), 63 }
  0xec   : > { %s5657_s28 = sld [smem:[#allocation5 + %s341_s18]]  ;;  %s2827_s20 = sshll.u32 %s6862_s3, 4 }
  0xed   : > { %s306_s16 = scalar_lea.hbm %s6746_s1, %s2827_s20 }
  0xee   : > { %s3660_s12 = scalar_lea.hbm %s306_s16, 16  ;;  %p3663_p9 = scmp.lt.u32.totalorder %s306_s16, %s6746_s1 }
  0xef   : > { %p322_p2 = scmp.gt.s32.totalorder %s5651_s24, 0  ;;  %p3661_p8 = scmp.ne.s32.totalorder %s306_s16, %s3660_s12 }
  0xf0   : > { %p3664_p10 = scmp.lt.u32.totalorder %s5549_s14, %s3660_s12  ;;  %p3666_p12 = scmp.lt.u32.totalorder %s3660_s12, %s306_s16 }
  0xf2   : > { %p3665_p4 = por %p3664_p10, %p3663_p9 }
  0xf4   : > { %p3667_p6 = por %p3666_p12, %p3665_p4 }
  0xf6   : > { %p3668_p1 = pnand %p3667_p6, %p3661_p8 }
  0xf8   : > { %3671 = shalt.err (!%p3668_p1)  }
  0xf9   : > { %s3672_s3 = scalar_lea.vmem %s5637_s4, 16  ;;  %p3677_p5 = scmp.lt.s32.totalorder %s5637_s4, %s5536_s13 }
  0xfa   : > { %p3673_p3 = scmp.ne.s32.totalorder %s5637_s4, %s3672_s3  ;;  %p3678_p7 = scmp.lt.s32.totalorder %s5558_s30, %s3672_s3 }
  0xfc   : > { %p3679_p11 = por %p3678_p7, %p3677_p5 }
  0xfe   : > { %p3680_p13 = pnand %p3679_p11, %p3673_p3 }
 0x100   : > { %3683 = shalt.err (!%p3680_p13)  }
 0x101   : > { %319 = dma.hbm_to_vmem [thread:$0]  %s306_s16, 16, %s5637_s4, [#allocation3 + $0x5] }
 0x102   : > { %s323_s7 = scalar_select %p322_p2, %s5651_s24, 0 }
 0x103   : > { %p2828_p0 = scmp.lt.s32.totalorder %s5651_s24, 63  ;;  %s5301_s10 = smov [#allocation2 + $0x7]  }
 0x104   : > { %s358_s27 = sshll.u32 %s5301_s10, 4  ;;  %p343_p8 = scmp.gt.s32.totalorder %s5657_s28, 0  ;;  %s5680_s27 = int_to_ptr.vmem [resolvable:$true] %s358_s27 }
 0x105   : > { %p2834_p9 = scmp.lt.s32.totalorder %s5657_s28, 63  ;;  %s6864_s7 = smov (!%p2828_p0, %s323_s7), 63 }
 0x106   : > { %s344_s5 = scalar_select %p343_p8, %s5657_s28, 0 }
 0x107   : > { %s2833_s18 = sshll.u32 %s6864_s7, 4  ;;  %s362_s12 = sadd.s32 8, %s5497_s21 }
 0x108   : > { %s327_s29 = scalar_lea.hbm %s6746_s1, %s2833_s18 }
 0x109   : > { %s3684_s6 = scalar_lea.hbm %s327_s29, 16  ;;  %p3687_p2 = scmp.lt.u32.totalorder %s327_s29, %s6746_s1 }
 0x10a   : > { %p3685_p10 = scmp.ne.s32.totalorder %s327_s29, %s3684_s6  ;;  %p3688_p4 = scmp.lt.u32.totalorder %s5549_s14, %s3684_s6 }
 0x10b   : > { %p3690_p6 = scmp.lt.u32.totalorder %s3684_s6, %s327_s29 }
 0x10c   : > { %p3689_p12 = por %p3688_p4, %p3687_p2 }
 0x10e   : > { %p3691_p1 = por %p3690_p6, %p3689_p12 }
 0x110   : > { %p3692_p3 = pnand %p3691_p1, %p3685_p10 }
 0x112   : > { %3695 = shalt.err (!%p3692_p3)  }
 0x113   : > { %s3696_s24 = scalar_lea.vmem %s5655_s0, 16  ;;  %p3701_p7 = scmp.lt.s32.totalorder %s5655_s0, %s5536_s13 }
 0x114   : > { %p3697_p5 = scmp.ne.s32.totalorder %s5655_s0, %s3696_s24  ;;  %p3702_p11 = scmp.lt.s32.totalorder %s5558_s30, %s3696_s24 }
 0x116   : > { %p3703_p13 = por %p3702_p11, %p3701_p7 }
 0x118   : > { %p3704_p0 = pnand %p3703_p13, %p3697_p5 }
 0x11a   : > { %3707 = shalt.err (!%p3704_p0)  }
 0x11b   : > { %340 = dma.hbm_to_vmem [thread:$0]  %s327_s29, 16, %s5655_s0, [#allocation3 + $0x6] }
 0x11c   : > { %s6866_s5 = smov (!%p2834_p9, %s344_s5), 63  ;;  %s5698_s8 = sld [smem:[#allocation5 + %s362_s12]] }
 0x11d   : > { %s2839_s3 = sshll.u32 %s6866_s5, 4  ;;  %s5302_s7 = smov [#allocation2 + $0x8]  }
 0x11e   : > { %s379_s10 = sshll.u32 %s5302_s7, 4  ;;  %s348_s15 = scalar_lea.hbm %s6746_s1, %s2839_s3  ;;  %s5703_s10 = int_to_ptr.vmem [resolvable:$true] %s379_s10 }
 0x11f   : > { %s3708_s6 = scalar_lea.hbm %s348_s15, 16  ;;  %p3711_p10 = scmp.lt.u32.totalorder %s348_s15, %s6746_s1 }
 0x120   : > { %p3709_p8 = scmp.ne.s32.totalorder %s348_s15, %s3708_s6  ;;  %p3712_p2 = scmp.lt.u32.totalorder %s5549_s14, %s3708_s6 }
 0x121   : > { %p3714_p9 = scmp.lt.u32.totalorder %s3708_s6, %s348_s15 }
 0x122   : > { %p3713_p4 = por %p3712_p2, %p3711_p10 }
 0x124   : > { %p3715_p12 = por %p3714_p9, %p3713_p4 }
 0x126   : > { %p3716_p6 = pnand %p3715_p12, %p3709_p8 }
 0x128   : > { %3719 = shalt.err (!%p3716_p6)  }
 0x129   : > { %s3720_s0 = scalar_lea.vmem %s5680_s27, 16  ;;  %p3725_p3 = scmp.lt.s32.totalorder %s5680_s27, %s5536_s13 }
 0x12a   : > { %p3721_p1 = scmp.ne.s32.totalorder %s5680_s27, %s3720_s0  ;;  %p3726_p5 = scmp.lt.s32.totalorder %s5558_s30, %s3720_s0 }
 0x12c   : > { %p3727_p7 = por %p3726_p5, %p3725_p3 }
 0x12e   : > { %p3728_p11 = pnand %p3727_p7, %p3721_p1 }
 0x130   : > { %3731 = shalt.err (!%p3728_p11)  }
 0x131   : > { %361 = dma.hbm_to_vmem [thread:$0]  %s348_s15, 16, %s5680_s27, [#allocation3 + $0x7] }
 0x132   : > { %s383_s28 = sadd.s32 9, %s5497_s21  ;;  %s5303_s29 = smov [#allocation2 + $0x9]  }
 0x133   : > { %s5716_s5 = sld [smem:[#allocation5 + %s383_s28]]  ;;  %s400_s12 = sshll.u32 %s5303_s29, 4  ;;  %s5720_s12 = int_to_ptr.vmem [resolvable:$true] %s400_s12 }
 0x134   : > { %p364_p13 = scmp.gt.s32.totalorder %s5698_s8, 0  ;;  %p2840_p0 = scmp.lt.s32.totalorder %s5698_s8, 63 }
 0x135   : > { %s404_s24 = sadd.s32 10, %s5497_s21  ;;  %s5304_s7 = smov [#allocation2 + $0xa]  }
 0x136   : > { %s6868_s8 = smov (!%p364_p13, %s5698_s8), 0  ;;  %s5724_s3 = sld [smem:[#allocation5 + %s404_s24]] }
 0x137   : > { %s6870_s8 = smov (!%p2840_p0, %s6868_s8), 63  ;;  %s421_s18 = sshll.u32 %s5304_s7, 4  ;;  %s5731_s18 = int_to_ptr.vmem [resolvable:$true] %s421_s18 }
 0x138   : > { %s2845_s27 = sshll.u32 %s6870_s8, 4 }
 0x139   : > { %p385_p8 = scmp.gt.s32.totalorder %s5716_s5, 0  ;;  %p2846_p10 = scmp.lt.s32.totalorder %s5716_s5, 63 }
 0x13a   : > { %s369_s6 = scalar_lea.hbm %s6746_s1, %s2845_s27 }
 0x13b   : > { %s3732_s4 = scalar_lea.hbm %s369_s6, 16  ;;  %p3735_p4 = scmp.lt.u32.totalorder %s369_s6, %s6746_s1 }
 0x13c   : > { %p3733_p2 = scmp.ne.s32.totalorder %s369_s6, %s3732_s4  ;;  %p3736_p9 = scmp.lt.u32.totalorder %s5549_s14, %s3732_s4 }
 0x13d   : > { %p3738_p6 = scmp.lt.u32.totalorder %s3732_s4, %s369_s6 }
 0x13e   : > { %p3737_p12 = por %p3736_p9, %p3735_p4 }
 0x140   : > { %p3739_p1 = por %p3738_p6, %p3737_p12 }
 0x142   : > { %p3740_p3 = pnand %p3739_p1, %p3733_p2 }
 0x144   : > { %3743 = shalt.err (!%p3740_p3)  }
 0x145   : > { %s3744_s8 = scalar_lea.vmem %s5703_s10, 16  ;;  %p3749_p7 = scmp.lt.s32.totalorder %s5703_s10, %s5536_s13 }
 0x146   : > { %p3745_p5 = scmp.ne.s32.totalorder %s5703_s10, %s3744_s8  ;;  %p3750_p11 = scmp.lt.s32.totalorder %s5558_s30, %s3744_s8 }
 0x148   : > { %p3751_p13 = por %p3750_p11, %p3749_p7 }
 0x14a   : > { %p3752_p0 = pnand %p3751_p13, %p3745_p5 }
 0x14c   : > { %3755 = shalt.err (!%p3752_p0)  }
 0x14d   : > { %382 = dma.hbm_to_vmem [thread:$0]  %s369_s6, 16, %s5703_s10, [#allocation3 + $0x8] }
 0x14e   : > { %s386_s28 = scalar_select %p385_p8, %s5716_s5, 0 }
 0x14f   : > { %p406_p2 = scmp.gt.s32.totalorder %s5724_s3, 0  ;;  %p2852_p4 = scmp.lt.s32.totalorder %s5724_s3, 63 }
 0x150   : > { %s6872_s28 = smov (!%p2846_p10, %s386_s28), 63  ;;  %s425_s27 = sadd.s32 11, %s5497_s21 }
 0x151   : > { %s407_s29 = scalar_select %p406_p2, %s5724_s3, 0 }
 0x152   : > { %s2851_s24 = sshll.u32 %s6872_s28, 4  ;;  %s5755_s4 = sld [smem:[#allocation5 + %s425_s27]] }
 0x153   : > { %s390_s15 = scalar_lea.hbm %s6746_s1, %s2851_s24 }
 0x154   : > { %s3756_s16 = scalar_lea.hbm %s390_s15, 16  ;;  %p3759_p12 = scmp.lt.u32.totalorder %s390_s15, %s6746_s1 }
 0x155   : > { %p3757_p9 = scmp.ne.s32.totalorder %s390_s15, %s3756_s16  ;;  %p3760_p8 = scmp.lt.u32.totalorder %s5549_s14, %s3756_s16 }
 0x156   : > { %p3762_p1 = scmp.lt.u32.totalorder %s3756_s16, %s390_s15 }
 0x157   : > { %p3761_p6 = por %p3760_p8, %p3759_p12 }
 0x159   : > { %p3763_p3 = por %p3762_p1, %p3761_p6 }
 0x15b   : > { %p3764_p10 = pnand %p3763_p3, %p3757_p9 }
 0x15d   : > { %3767 = shalt.err (!%p3764_p10)  }
 0x15e   : > { %s3768_s10 = scalar_lea.vmem %s5720_s12, 16  ;;  %p3773_p7 = scmp.lt.s32.totalorder %s5720_s12, %s5536_s13 }
 0x15f   : > { %p3769_p5 = scmp.ne.s32.totalorder %s5720_s12, %s3768_s10  ;;  %p3774_p11 = scmp.lt.s32.totalorder %s5558_s30, %s3768_s10 }
 0x161   : > { %p3775_p13 = por %p3774_p11, %p3773_p7 }
 0x163   : > { %p3776_p0 = pnand %p3775_p13, %p3769_p5 }
 0x165   : > { %3779 = shalt.err (!%p3776_p0)  }
 0x166   : > { %403 = dma.hbm_to_vmem [thread:$0]  %s390_s15, 16, %s5720_s12, [#allocation3 + $0x9] }
 0x167   : > { %s6874_s29 = smov (!%p2852_p4, %s407_s29), 63  ;;  %s446_s5 = sadd.s32 12, %s5497_s21 }
 0x168   : > { %s2857_s6 = sshll.u32 %s6874_s29, 4  ;;  %s5305_s28 = smov [#allocation2 + $0xb]  }
 0x169   : > { %s442_s24 = sshll.u32 %s5305_s28, 4  ;;  %s411_s20 = scalar_lea.hbm %s6746_s1, %s2857_s6  ;;  %s5773_s24 = int_to_ptr.vmem [resolvable:$true] %s442_s24 }
 0x16a   : > { %s3780_s16 = scalar_lea.hbm %s411_s20, 16  ;;  %p3783_p9 = scmp.lt.u32.totalorder %s411_s20, %s6746_s1 }
 0x16b   : > { %p3781_p2 = scmp.ne.s32.totalorder %s411_s20, %s3780_s16  ;;  %p3784_p12 = scmp.lt.u32.totalorder %s5549_s14, %s3780_s16 }
 0x16c   : > { %p3786_p6 = scmp.lt.u32.totalorder %s3780_s16, %s411_s20 }
 0x16d   : > { %p3785_p8 = por %p3784_p12, %p3783_p9 }
 0x16f   : > { %p3787_p4 = por %p3786_p6, %p3785_p8 }
 0x171   : > { %p3788_p1 = pnand %p3787_p4, %p3781_p2 }
 0x173   : > { %3791 = shalt.err (!%p3788_p1)  }
 0x174   : > { %s3792_s12 = scalar_lea.vmem %s5731_s18, 16  ;;  %p3797_p10 = scmp.lt.s32.totalorder %s5731_s18, %s5536_s13 }
 0x175   : > { %p3793_p3 = scmp.ne.s32.totalorder %s5731_s18, %s3792_s12  ;;  %p3798_p5 = scmp.lt.s32.totalorder %s5558_s30, %s3792_s12 }
 0x177   : > { %p3799_p7 = por %p3798_p5, %p3797_p10 }
 0x179   : > { %p3800_p11 = pnand %p3799_p7, %p3793_p3 }
 0x17b   : > { %3803 = shalt.err (!%p3800_p11)  }
 0x17c   : > { %424 = dma.hbm_to_vmem [thread:$0]  %s411_s20, 16, %s5731_s18, [#allocation3 + $0xa] }
 0x17d   : > { %p427_p13 = scmp.gt.s32.totalorder %s5755_s4, 0  ;;  %p2858_p0 = scmp.lt.s32.totalorder %s5755_s4, 63 }
 0x17e   : > { %s5787_s3 = sld [smem:[#allocation5 + %s446_s5]]  ;;  %s5306_s29 = smov [#allocation2 + $0xc]  }
 0x17f   : > { %s6876_s4 = smov (!%p427_p13, %s5755_s4), 0  ;;  %s463_s15 = sshll.u32 %s5306_s29, 4  ;;  %s5791_s15 = int_to_ptr.vmem [resolvable:$true] %s463_s15 }
 0x180   : > { %s467_s10 = sadd.s32 13, %s5497_s21  ;;  %s6878_s4 = smov (!%p2858_p0, %s6876_s4), 63 }
 0x181   : > { %s5793_s6 = sld [smem:[#allocation5 + %s467_s10]]  ;;  %s2863_s28 = sshll.u32 %s6878_s4, 4 }
 0x182   : > { %s432_s18 = scalar_lea.hbm %s6746_s1, %s2863_s28 }
 0x183   : > { %s3804_s20 = scalar_lea.hbm %s432_s18, 16  ;;  %p3807_p12 = scmp.lt.u32.totalorder %s432_s18, %s6746_s1 }
 0x184   : > { %p448_p2 = scmp.gt.s32.totalorder %s5787_s3, 0  ;;  %p3805_p9 = scmp.ne.s32.totalorder %s432_s18, %s3804_s20 }
 0x185   : > { %p3808_p8 = scmp.lt.u32.totalorder %s5549_s14, %s3804_s20  ;;  %p3810_p4 = scmp.lt.u32.totalorder %s3804_s20, %s432_s18 }
 0x187   : > { %p3809_p6 = por %p3808_p8, %p3807_p12 }
 0x189   : > { %p3811_p1 = por %p3810_p4, %p3809_p6 }
 0x18b   : > { %p3812_p3 = pnand %p3811_p1, %p3805_p9 }
 0x18d   : > { %3815 = shalt.err (!%p3812_p3)  }
 0x18e   : > { %s3816_s4 = scalar_lea.vmem %s5773_s24, 16  ;;  %p3821_p5 = scmp.lt.s32.totalorder %s5773_s24, %s5536_s13 }
 0x18f   : > { %p3817_p10 = scmp.ne.s32.totalorder %s5773_s24, %s3816_s4  ;;  %p3822_p7 = scmp.lt.s32.totalorder %s5558_s30, %s3816_s4 }
 0x191   : > { %p3823_p11 = por %p3822_p7, %p3821_p5 }
 0x193   : > { %p3824_p13 = pnand %p3823_p11, %p3817_p10 }
 0x195   : > { %3827 = shalt.err (!%p3824_p13)  }
 0x196   : > { %445 = dma.hbm_to_vmem [thread:$0]  %s432_s18, 16, %s5773_s24, [#allocation3 + $0xb] }
 0x197   : > { %s449_s0 = scalar_select %p448_p2, %s5787_s3, 0 }
 0x198   : > { %p2864_p0 = scmp.lt.s32.totalorder %s5787_s3, 63  ;;  %s5307_s8 = smov [#allocation2 + $0xd]  }
 0x199   : > { %s484_s12 = sshll.u32 %s5307_s8, 4  ;;  %p469_p9 = scmp.gt.s32.totalorder %s5793_s6, 0  ;;  %s5816_s12 = int_to_ptr.vmem [resolvable:$true] %s484_s12 }
 0x19a   : > { %p2870_p12 = scmp.lt.s32.totalorder %s5793_s6, 63  ;;  %s6880_s0 = smov (!%p2864_p0, %s449_s0), 63 }
 0x19b   : > { %s470_s29 = scalar_select %p469_p9, %s5793_s6, 0 }
 0x19c   : > { %s2869_s10 = sshll.u32 %s6880_s0, 4  ;;  %s488_s20 = sadd.s32 14, %s5497_s21 }
 0x19d   : > { %s453_s7 = scalar_lea.hbm %s6746_s1, %s2869_s10 }
 0x19e   : > { %s3828_s5 = scalar_lea.hbm %s453_s7, 16  ;;  %p3831_p2 = scmp.lt.u32.totalorder %s453_s7, %s6746_s1 }
 0x19f   : > { %p3829_p8 = scmp.ne.s32.totalorder %s453_s7, %s3828_s5  ;;  %p3832_p6 = scmp.lt.u32.totalorder %s5549_s14, %s3828_s5 }
 0x1a0   : > { %p3834_p1 = scmp.lt.u32.totalorder %s3828_s5, %s453_s7 }
 0x1a1   : > { %p3833_p4 = por %p3832_p6, %p3831_p2 }
 0x1a3   : > { %p3835_p3 = por %p3834_p1, %p3833_p4 }
 0x1a5   : > { %p3836_p10 = pnand %p3835_p3, %p3829_p8 }
 0x1a7   : > { %3839 = shalt.err (!%p3836_p10)  }
 0x1a8   : > { %s3840_s3 = scalar_lea.vmem %s5791_s15, 16  ;;  %p3845_p7 = scmp.lt.s32.totalorder %s5791_s15, %s5536_s13 }
 0x1a9   : > { %p3841_p5 = scmp.ne.s32.totalorder %s5791_s15, %s3840_s3  ;;  %p3846_p11 = scmp.lt.s32.totalorder %s5558_s30, %s3840_s3 }
 0x1ab   : > { %p3847_p13 = por %p3846_p11, %p3845_p7 }
 0x1ad   : > { %p3848_p0 = pnand %p3847_p13, %p3841_p5 }
 0x1af   : > { %3851 = shalt.err (!%p3848_p0)  }
 0x1b0   : > { %466 = dma.hbm_to_vmem [thread:$0]  %s453_s7, 16, %s5791_s15, [#allocation3 + $0xc] }
 0x1b1   : > { %s6882_s29 = smov (!%p2870_p12, %s470_s29), 63  ;;  %s5834_s16 = sld [smem:[#allocation5 + %s488_s20]] }
 0x1b2   : > { %s2875_s4 = sshll.u32 %s6882_s29, 4  ;;  %s5308_s0 = smov [#allocation2 + $0xe]  }
 0x1b3   : > { %s505_s8 = sshll.u32 %s5308_s0, 4  ;;  %s474_s27 = scalar_lea.hbm %s6746_s1, %s2875_s4  ;;  %s5839_s8 = int_to_ptr.vmem [resolvable:$true] %s505_s8 }
 0x1b4   : > { %s3852_s5 = scalar_lea.hbm %s474_s27, 16  ;;  %p3855_p8 = scmp.lt.u32.totalorder %s474_s27, %s6746_s1 }
 0x1b5   : > { %p3853_p9 = scmp.ne.s32.totalorder %s474_s27, %s3852_s5  ;;  %p3856_p2 = scmp.lt.u32.totalorder %s5549_s14, %s3852_s5 }
 0x1b6   : > { %p3858_p12 = scmp.lt.u32.totalorder %s3852_s5, %s474_s27 }
 0x1b7   : > { %p3857_p6 = por %p3856_p2, %p3855_p8 }
 0x1b9   : > { %p3859_p4 = por %p3858_p12, %p3857_p6 }
 0x1bb   : > { %p3860_p1 = pnand %p3859_p4, %p3853_p9 }
 0x1bd   : > { %3863 = shalt.err (!%p3860_p1)  }
 0x1be   : > { %s3864_s15 = scalar_lea.vmem %s5816_s12, 16  ;;  %p3869_p10 = scmp.lt.s32.totalorder %s5816_s12, %s5536_s13 }
 0x1bf   : > { %p3865_p3 = scmp.ne.s32.totalorder %s5816_s12, %s3864_s15  ;;  %p3870_p5 = scmp.lt.s32.totalorder %s5558_s30, %s3864_s15 }
 0x1c1   : > { %p3871_p7 = por %p3870_p5, %p3869_p10 }
 0x1c3   : > { %p3872_p11 = pnand %p3871_p7, %p3865_p3 }
 0x1c5   : > { %3875 = shalt.err (!%p3872_p11)  }
 0x1c6   : > { %487 = dma.hbm_to_vmem [thread:$0]  %s474_s27, 16, %s5816_s12, [#allocation3 + $0xd] }
 0x1c7   : > { %s509_s6 = sadd.s32 15, %s5497_s21  ;;  %s5309_s7 = smov [#allocation2 + $0xf]  }
 0x1c8   : > { %s5852_s29 = sld [smem:[#allocation5 + %s509_s6]]  ;;  %s526_s20 = sshll.u32 %s5309_s7, 4  ;;  %s5856_s20 = int_to_ptr.vmem [resolvable:$true] %s526_s20 }
 0x1c9   : > { %p490_p13 = scmp.gt.s32.totalorder %s5834_s16, 0  ;;  %p2876_p0 = scmp.lt.s32.totalorder %s5834_s16, 63 }
 0x1ca   : > { %s530_s3 = sadd.s32 16, %s5497_s21  ;;  %s5310_s0 = smov [#allocation2 + $0x10]  }
 0x1cb   : > { %s6884_s16 = smov (!%p490_p13, %s5834_s16), 0  ;;  %s5860_s4 = sld [smem:[#allocation5 + %s530_s3]] }
 0x1cc   : > { %s6886_s16 = smov (!%p2876_p0, %s6884_s16), 63  ;;  %s547_s10 = sshll.u32 %s5310_s0, 4  ;;  %s5867_s10 = int_to_ptr.vmem [resolvable:$true] %s547_s10 }
 0x1cd   : > { %s2881_s12 = sshll.u32 %s6886_s16, 4 }
 0x1ce   : > { %p511_p9 = scmp.gt.s32.totalorder %s5852_s29, 0  ;;  %p2882_p8 = scmp.lt.s32.totalorder %s5852_s29, 63 }
 0x1cf   : > { %s495_s5 = scalar_lea.hbm %s6746_s1, %s2881_s12 }
 0x1d0   : > { %s3876_s24 = scalar_lea.hbm %s495_s5, 16  ;;  %p3879_p6 = scmp.lt.u32.totalorder %s495_s5, %s6746_s1 }
 0x1d1   : > { %p3877_p2 = scmp.ne.s32.totalorder %s495_s5, %s3876_s24  ;;  %p3880_p12 = scmp.lt.u32.totalorder %s5549_s14, %s3876_s24 }
 0x1d2   : > { %p3882_p1 = scmp.lt.u32.totalorder %s3876_s24, %s495_s5 }
 0x1d3   : > { %p3881_p4 = por %p3880_p12, %p3879_p6 }
 0x1d5   : > { %p3883_p3 = por %p3882_p1, %p3881_p4 }
 0x1d7   : > { %p3884_p10 = pnand %p3883_p3, %p3877_p2 }
 0x1d9   : > { %3887 = shalt.err (!%p3884_p10)  }
 0x1da   : > { %s3888_s16 = scalar_lea.vmem %s5839_s8, 16  ;;  %p3893_p7 = scmp.lt.s32.totalorder %s5839_s8, %s5536_s13 }
 0x1db   : > { %p3889_p5 = scmp.ne.s32.totalorder %s5839_s8, %s3888_s16  ;;  %p3894_p11 = scmp.lt.s32.totalorder %s5558_s30, %s3888_s16 }
 0x1dd   : > { %p3895_p13 = por %p3894_p11, %p3893_p7 }
 0x1df   : > { %p3896_p0 = pnand %p3895_p13, %p3889_p5 }
 0x1e1   : > { %3899 = shalt.err (!%p3896_p0)  }
 0x1e2   : > { %508 = dma.hbm_to_vmem [thread:$0]  %s495_s5, 16, %s5839_s8, [#allocation3 + $0xe] }
 0x1e3   : > { %s512_s6 = scalar_select %p511_p9, %s5852_s29, 0 }
 0x1e4   : > { %p532_p2 = scmp.gt.s32.totalorder %s5860_s4, 0  ;;  %p2888_p6 = scmp.lt.s32.totalorder %s5860_s4, 63 }
 0x1e5   : > { %s6888_s6 = smov (!%p2882_p8, %s512_s6), 63  ;;  %s551_s12 = sadd.s32 17, %s5497_s21 }
 0x1e6   : > { %s533_s7 = scalar_select %p532_p2, %s5860_s4, 0 }
 0x1e7   : > { %s2887_s3 = sshll.u32 %s6888_s6, 4  ;;  %s5891_s24 = sld [smem:[#allocation5 + %s551_s12]] }
 0x1e8   : > { %s516_s27 = scalar_lea.hbm %s6746_s1, %s2887_s3 }
 0x1e9   : > { %s3900_s18 = scalar_lea.hbm %s516_s27, 16  ;;  %p3903_p4 = scmp.lt.u32.totalorder %s516_s27, %s6746_s1 }
 0x1ea   : > { %p3901_p12 = scmp.ne.s32.totalorder %s516_s27, %s3900_s18  ;;  %p3904_p9 = scmp.lt.u32.totalorder %s5549_s14, %s3900_s18 }
 0x1eb   : > { %p3906_p3 = scmp.lt.u32.totalorder %s3900_s18, %s516_s27 }
 0x1ec   : > { %p3905_p1 = por %p3904_p9, %p3903_p4 }
 0x1ee   : > { %p3907_p10 = por %p3906_p3, %p3905_p1 }
 0x1f0   : > { %p3908_p8 = pnand %p3907_p10, %p3901_p12 }
 0x1f2   : > { %3911 = shalt.err (!%p3908_p8)  }
 0x1f3   : > { %s3912_s8 = scalar_lea.vmem %s5856_s20, 16  ;;  %p3917_p7 = scmp.lt.s32.totalorder %s5856_s20, %s5536_s13 }
 0x1f4   : > { %p3913_p5 = scmp.ne.s32.totalorder %s5856_s20, %s3912_s8  ;;  %p3918_p11 = scmp.lt.s32.totalorder %s5558_s30, %s3912_s8 }
 0x1f6   : > { %p3919_p13 = por %p3918_p11, %p3917_p7 }
 0x1f8   : > { %p3920_p0 = pnand %p3919_p13, %p3913_p5 }
 0x1fa   : > { %3923 = shalt.err (!%p3920_p0)  }
 0x1fb   : > { %529 = dma.hbm_to_vmem [thread:$0]  %s516_s27, 16, %s5856_s20, [#allocation3 + $0xf] }
 0x1fc   : > { %s6890_s7 = smov (!%p2888_p6, %s533_s7), 63  ;;  %s572_s29 = sadd.s32 18, %s5497_s21 }
 0x1fd   : > { %s2893_s5 = sshll.u32 %s6890_s7, 4  ;;  %s5311_s6 = smov [#allocation2 + $0x11]  }
 0x1fe   : > { %s568_s3 = sshll.u32 %s5311_s6, 4  ;;  %s537_s28 = scalar_lea.hbm %s6746_s1, %s2893_s5  ;;  %s5909_s3 = int_to_ptr.vmem [resolvable:$true] %s568_s3 }
 0x1ff   : > { %s3924_s18 = scalar_lea.hbm %s537_s28, 16  ;;  %p3927_p12 = scmp.lt.u32.totalorder %s537_s28, %s6746_s1 }
 0x200   : > { %p3925_p2 = scmp.ne.s32.totalorder %s537_s28, %s3924_s18  ;;  %p3928_p4 = scmp.lt.u32.totalorder %s5549_s14, %s3924_s18 }
 0x201   : > { %p3930_p1 = scmp.lt.u32.totalorder %s3924_s18, %s537_s28 }
 0x202   : > { %p3929_p9 = por %p3928_p4, %p3927_p12 }
 0x204   : > { %p3931_p6 = por %p3930_p1, %p3929_p9 }
 0x206   : > { %p3932_p3 = pnand %p3931_p6, %p3925_p2 }
 0x208   : > { %3935 = shalt.err (!%p3932_p3)  }
 0x209   : > { %s3936_s20 = scalar_lea.vmem %s5867_s10, 16  ;;  %p3941_p8 = scmp.lt.s32.totalorder %s5867_s10, %s5536_s13 }
 0x20a   : > { %p3937_p10 = scmp.ne.s32.totalorder %s5867_s10, %s3936_s20  ;;  %p3942_p5 = scmp.lt.s32.totalorder %s5558_s30, %s3936_s20 }
 0x20c   : > { %p3943_p7 = por %p3942_p5, %p3941_p8 }
 0x20e   : > { %p3944_p11 = pnand %p3943_p7, %p3937_p10 }
 0x210   : > { %3947 = shalt.err (!%p3944_p11)  }
 0x211   : > { %550 = dma.hbm_to_vmem [thread:$0]  %s537_s28, 16, %s5867_s10, [#allocation3 + $0x10] }
 0x212   : > { %p553_p13 = scmp.gt.s32.totalorder %s5891_s24, 0  ;;  %p2894_p0 = scmp.lt.s32.totalorder %s5891_s24, 63 }
 0x213   : > { %s5923_s4 = sld [smem:[#allocation5 + %s572_s29]]  ;;  %s5312_s7 = smov [#allocation2 + $0x12]  }
 0x214   : > { %s6892_s24 = smov (!%p553_p13, %s5891_s24), 0  ;;  %s589_s27 = sshll.u32 %s5312_s7, 4  ;;  %s5927_s27 = int_to_ptr.vmem [resolvable:$true] %s589_s27 }
 0x215   : > { %s593_s8 = sadd.s32 19, %s5497_s21  ;;  %s6894_s24 = smov (!%p2894_p0, %s6892_s24), 63 }
 0x216   : > { %s5929_s5 = sld [smem:[#allocation5 + %s593_s8]]  ;;  %s2899_s6 = sshll.u32 %s6894_s24, 4 }
 0x217   : > { %s558_s10 = scalar_lea.hbm %s6746_s1, %s2899_s6 }
 0x218   : > { %s3948_s28 = scalar_lea.hbm %s558_s10, 16  ;;  %p3951_p4 = scmp.lt.u32.totalorder %s558_s10, %s6746_s1 }
 0x219   : > { %p574_p2 = scmp.gt.s32.totalorder %s5923_s4, 0  ;;  %p3949_p12 = scmp.ne.s32.totalorder %s558_s10, %s3948_s28 }
 0x21a   : > { %p3952_p9 = scmp.lt.u32.totalorder %s5549_s14, %s3948_s28  ;;  %p3954_p6 = scmp.lt.u32.totalorder %s3948_s28, %s558_s10 }
 0x21c   : > { %p3953_p1 = por %p3952_p9, %p3951_p4 }
 0x21e   : > { %p3955_p3 = por %p3954_p6, %p3953_p1 }
 0x220   : > { %p3956_p10 = pnand %p3955_p3, %p3949_p12 }
 0x222   : > { %3959 = shalt.err (!%p3956_p10)  }
 0x223   : > { %s3960_s24 = scalar_lea.vmem %s5909_s3, 16  ;;  %p3965_p5 = scmp.lt.s32.totalorder %s5909_s3, %s5536_s13 }
 0x224   : > { %p3961_p8 = scmp.ne.s32.totalorder %s5909_s3, %s3960_s24  ;;  %p3966_p7 = scmp.lt.s32.totalorder %s5558_s30, %s3960_s24 }
 0x226   : > { %p3967_p11 = por %p3966_p7, %p3965_p5 }
 0x228   : > { %p3968_p13 = pnand %p3967_p11, %p3961_p8 }
 0x22a   : > { %3971 = shalt.err (!%p3968_p13)  }
 0x22b   : > { %571 = dma.hbm_to_vmem [thread:$0]  %s558_s10, 16, %s5909_s3, [#allocation3 + $0x11] }
 0x22c   : > { %s575_s15 = scalar_select %p574_p2, %s5923_s4, 0 }
 0x22d   : > { %p2900_p0 = scmp.lt.s32.totalorder %s5923_s4, 63  ;;  %s5313_s16 = smov [#allocation2 + $0x13]  }
 0x22e   : > { %s610_s20 = sshll.u32 %s5313_s16, 4  ;;  %p595_p12 = scmp.gt.s32.totalorder %s5929_s5, 0  ;;  %s5952_s20 = int_to_ptr.vmem [resolvable:$true] %s610_s20 }
 0x22f   : > { %p2906_p4 = scmp.lt.s32.totalorder %s5929_s5, 63  ;;  %s6896_s15 = smov (!%p2900_p0, %s575_s15), 63 }
 0x230   : > { %s596_s7 = scalar_select %p595_p12, %s5929_s5, 0 }
 0x231   : > { %s2905_s8 = sshll.u32 %s6896_s15, 4  ;;  %s614_s28 = sadd.s32 20, %s5497_s21 }
 0x232   : > { %s579_s0 = scalar_lea.hbm %s6746_s1, %s2905_s8 }
 0x233   : > { %s3972_s29 = scalar_lea.hbm %s579_s0, 16  ;;  %p3975_p2 = scmp.lt.u32.totalorder %s579_s0, %s6746_s1 }
 0x234   : > { %p3973_p9 = scmp.ne.s32.totalorder %s579_s0, %s3972_s29  ;;  %p3976_p1 = scmp.lt.u32.totalorder %s5549_s14, %s3972_s29 }
 0x235   : > { %p3978_p3 = scmp.lt.u32.totalorder %s3972_s29, %s579_s0 }
 0x236   : > { %p3977_p6 = por %p3976_p1, %p3975_p2 }
 0x238   : > { %p3979_p10 = por %p3978_p3, %p3977_p6 }
 0x23a   : > { %p3980_p8 = pnand %p3979_p10, %p3973_p9 }
 0x23c   : > { %3983 = shalt.err (!%p3980_p8)  }
 0x23d   : > { %s3984_s4 = scalar_lea.vmem %s5927_s27, 16  ;;  %p3989_p7 = scmp.lt.s32.totalorder %s5927_s27, %s5536_s13 }
 0x23e   : > { %p3985_p5 = scmp.ne.s32.totalorder %s5927_s27, %s3984_s4  ;;  %p3990_p11 = scmp.lt.s32.totalorder %s5558_s30, %s3984_s4 }
 0x240   : > { %p3991_p13 = por %p3990_p11, %p3989_p7 }
 0x242   : > { %p3992_p0 = pnand %p3991_p13, %p3985_p5 }
 0x244   : > { %3995 = shalt.err (!%p3992_p0)  }
 0x245   : > { %592 = dma.hbm_to_vmem [thread:$0]  %s579_s0, 16, %s5927_s27, [#allocation3 + $0x12] }
 0x246   : > { %s6898_s7 = smov (!%p2906_p4, %s596_s7), 63  ;;  %s5970_s18 = sld [smem:[#allocation5 + %s614_s28]] }
 0x247   : > { %s2911_s24 = sshll.u32 %s6898_s7, 4  ;;  %s5314_s15 = smov [#allocation2 + $0x14]  }
 0x248   : > { %s631_s16 = sshll.u32 %s5314_s15, 4  ;;  %s600_s12 = scalar_lea.hbm %s6746_s1, %s2911_s24  ;;  %s5975_s16 = int_to_ptr.vmem [resolvable:$true] %s631_s16 }
 0x249   : > { %s3996_s29 = scalar_lea.hbm %s600_s12, 16  ;;  %p3999_p9 = scmp.lt.u32.totalorder %s600_s12, %s6746_s1 }
 0x24a   : > { %p3997_p12 = scmp.ne.s32.totalorder %s600_s12, %s3996_s29  ;;  %p4000_p2 = scmp.lt.u32.totalorder %s5549_s14, %s3996_s29 }
 0x24b   : > { %p4002_p4 = scmp.lt.u32.totalorder %s3996_s29, %s600_s12 }
 0x24c   : > { %p4001_p1 = por %p4000_p2, %p3999_p9 }
 0x24e   : > { %p4003_p6 = por %p4002_p4, %p4001_p1 }
 0x250   : > { %p4004_p3 = pnand %p4003_p6, %p3997_p12 }
 0x252   : > { %4007 = shalt.err (!%p4004_p3)  }
 0x253   : > { %s4008_s27 = scalar_lea.vmem %s5952_s20, 16  ;;  %p4013_p8 = scmp.lt.s32.totalorder %s5952_s20, %s5536_s13 }
 0x254   : > { %p4009_p10 = scmp.ne.s32.totalorder %s5952_s20, %s4008_s27  ;;  %p4014_p5 = scmp.lt.s32.totalorder %s5558_s30, %s4008_s27 }
 0x256   : > { %p4015_p7 = por %p4014_p5, %p4013_p8 }
 0x258   : > { %p4016_p11 = pnand %p4015_p7, %p4009_p10 }
 0x25a   : > { %4019 = shalt.err (!%p4016_p11)  }
 0x25b   : > { %613 = dma.hbm_to_vmem [thread:$0]  %s600_s12, 16, %s5952_s20, [#allocation3 + $0x13] }
 0x25c   : > { %s635_s5 = sadd.s32 21, %s5497_s21  ;;  %s5315_s0 = smov [#allocation2 + $0x15]  }
 0x25d   : > { %s5988_s7 = sld [smem:[#allocation5 + %s635_s5]]  ;;  %s652_s28 = sshll.u32 %s5315_s0, 4  ;;  %s5992_s28 = int_to_ptr.vmem [resolvable:$true] %s652_s28 }
 0x25e   : > { %p616_p13 = scmp.gt.s32.totalorder %s5970_s18, 0  ;;  %p2912_p0 = scmp.lt.s32.totalorder %s5970_s18, 63 }
 0x25f   : > { %s656_s4 = sadd.s32 22, %s5497_s21  ;;  %s5316_s15 = smov [#allocation2 + $0x16]  }
 0x260   : > { %s6900_s18 = smov (!%p616_p13, %s5970_s18), 0  ;;  %s5996_s24 = sld [smem:[#allocation5 + %s656_s4]] }
 0x261   : > { %s6902_s18 = smov (!%p2912_p0, %s6900_s18), 63  ;;  %s673_s8 = sshll.u32 %s5316_s15, 4  ;;  %s6003_s8 = int_to_ptr.vmem [resolvable:$true] %s673_s8 }
 0x262   : > { %s2917_s20 = sshll.u32 %s6902_s18, 4 }
 0x263   : > { %p637_p12 = scmp.gt.s32.totalorder %s5988_s7, 0  ;;  %p2918_p9 = scmp.lt.s32.totalorder %s5988_s7, 63 }
 0x264   : > { %s621_s29 = scalar_lea.hbm %s6746_s1, %s2917_s20 }
 0x265   : > { %s4020_s3 = scalar_lea.hbm %s621_s29, 16  ;;  %p4023_p1 = scmp.lt.u32.totalorder %s621_s29, %s6746_s1 }
 0x266   : > { %p4021_p2 = scmp.ne.s32.totalorder %s621_s29, %s4020_s3  ;;  %p4024_p4 = scmp.lt.u32.totalorder %s5549_s14, %s4020_s3 }
 0x267   : > { %p4026_p3 = scmp.lt.u32.totalorder %s4020_s3, %s621_s29 }
 0x268   : > { %p4025_p6 = por %p4024_p4, %p4023_p1 }
 0x26a   : > { %p4027_p10 = por %p4026_p3, %p4025_p6 }
 0x26c   : > { %p4028_p8 = pnand %p4027_p10, %p4021_p2 }
 0x26e   : > { %4031 = shalt.err (!%p4028_p8)  }
 0x26f   : > { %s4032_s18 = scalar_lea.vmem %s5975_s16, 16  ;;  %p4037_p7 = scmp.lt.s32.totalorder %s5975_s16, %s5536_s13 }
 0x270   : > { %p4033_p5 = scmp.ne.s32.totalorder %s5975_s16, %s4032_s18  ;;  %p4038_p11 = scmp.lt.s32.totalorder %s5558_s30, %s4032_s18 }
 0x272   : > { %p4039_p13 = por %p4038_p11, %p4037_p7 }
 0x274   : > { %p4040_p0 = pnand %p4039_p13, %p4033_p5 }
 0x276   : > { %4043 = shalt.err (!%p4040_p0)  }
 0x277   : > { %634 = dma.hbm_to_vmem [thread:$0]  %s621_s29, 16, %s5975_s16, [#allocation3 + $0x14] }
 0x278   : > { %s638_s5 = scalar_select %p637_p12, %s5988_s7, 0 }
 0x279   : > { %p658_p2 = scmp.gt.s32.totalorder %s5996_s24, 0  ;;  %p2924_p1 = scmp.lt.s32.totalorder %s5996_s24, 63 }
 0x27a   : > { %s6904_s5 = smov (!%p2918_p9, %s638_s5), 63  ;;  %s677_s20 = sadd.s32 23, %s5497_s21 }
 0x27b   : > { %s659_s0 = scalar_select %p658_p2, %s5996_s24, 0 }
 0x27c   : > { %s2923_s4 = sshll.u32 %s6904_s5, 4  ;;  %s6027_s3 = sld [smem:[#allocation5 + %s677_s20]] }
 0x27d   : > { %s642_s12 = scalar_lea.hbm %s6746_s1, %s2923_s4 }
 0x27e   : > { %s4044_s10 = scalar_lea.hbm %s642_s12, 16  ;;  %p4047_p6 = scmp.lt.u32.totalorder %s642_s12, %s6746_s1 }
 0x27f   : > { %p4045_p4 = scmp.ne.s32.totalorder %s642_s12, %s4044_s10  ;;  %p4048_p12 = scmp.lt.u32.totalorder %s5549_s14, %s4044_s10 }
 0x280   : > { %p4050_p10 = scmp.lt.u32.totalorder %s4044_s10, %s642_s12 }
 0x281   : > { %p4049_p3 = por %p4048_p12, %p4047_p6 }
 0x283   : > { %p4051_p8 = por %p4050_p10, %p4049_p3 }
 0x285   : > { %p4052_p9 = pnand %p4051_p8, %p4045_p4 }
 0x287   : > { %4055 = shalt.err (!%p4052_p9)  }
 0x288   : > { %s4056_s16 = scalar_lea.vmem %s5992_s28, 16  ;;  %p4061_p7 = scmp.lt.s32.totalorder %s5992_s28, %s5536_s13 }
 0x289   : > { %p4057_p5 = scmp.ne.s32.totalorder %s5992_s28, %s4056_s16  ;;  %p4062_p11 = scmp.lt.s32.totalorder %s5558_s30, %s4056_s16 }
 0x28b   : > { %p4063_p13 = por %p4062_p11, %p4061_p7 }
 0x28d   : > { %p4064_p0 = pnand %p4063_p13, %p4057_p5 }
 0x28f   : > { %4067 = shalt.err (!%p4064_p0)  }
 0x290   : > { %655 = dma.hbm_to_vmem [thread:$0]  %s642_s12, 16, %s5992_s28, [#allocation3 + $0x15] }
 0x291   : > { %s6906_s0 = smov (!%p2924_p1, %s659_s0), 63  ;;  %s698_s7 = sadd.s32 24, %s5497_s21 }
 0x292   : > { %s2929_s29 = sshll.u32 %s6906_s0, 4  ;;  %s5317_s5 = smov [#allocation2 + $0x17]  }
 0x293   : > { %s694_s4 = sshll.u32 %s5317_s5, 4  ;;  %s663_s6 = scalar_lea.hbm %s6746_s1, %s2929_s29  ;;  %s6045_s4 = int_to_ptr.vmem [resolvable:$true] %s694_s4 }
 0x294   : > { %s4068_s10 = scalar_lea.hbm %s663_s6, 16  ;;  %p4071_p4 = scmp.lt.u32.totalorder %s663_s6, %s6746_s1 }
 0x295   : > { %p4069_p2 = scmp.ne.s32.totalorder %s663_s6, %s4068_s10  ;;  %p4072_p6 = scmp.lt.u32.totalorder %s5549_s14, %s4068_s10 }
 0x296   : > { %p4074_p3 = scmp.lt.u32.totalorder %s4068_s10, %s663_s6 }
 0x297   : > { %p4073_p12 = por %p4072_p6, %p4071_p4 }
 0x299   : > { %p4075_p1 = por %p4074_p3, %p4073_p12 }
 0x29b   : > { %p4076_p10 = pnand %p4075_p1, %p4069_p2 }
 0x29d   : > { %4079 = shalt.err (!%p4076_p10)  }
 0x29e   : > { %s4080_s28 = scalar_lea.vmem %s6003_s8, 16  ;;  %p4085_p9 = scmp.lt.s32.totalorder %s6003_s8, %s5536_s13 }
 0x29f   : > { %p4081_p8 = scmp.ne.s32.totalorder %s6003_s8, %s4080_s28  ;;  %p4086_p5 = scmp.lt.s32.totalorder %s5558_s30, %s4080_s28 }
 0x2a1   : > { %p4087_p7 = por %p4086_p5, %p4085_p9 }
 0x2a3   : > { %p4088_p11 = pnand %p4087_p7, %p4081_p8 }
 0x2a5   : > { %4091 = shalt.err (!%p4088_p11)  }
 0x2a6   : > { %676 = dma.hbm_to_vmem [thread:$0]  %s663_s6, 16, %s6003_s8, [#allocation3 + $0x16] }
 0x2a7   : > { %p679_p13 = scmp.gt.s32.totalorder %s6027_s3, 0  ;;  %p2930_p0 = scmp.lt.s32.totalorder %s6027_s3, 63 }
 0x2a8   : > { %s6059_s24 = sld [smem:[#allocation5 + %s698_s7]]  ;;  %s5318_s0 = smov [#allocation2 + $0x18]  }
 0x2a9   : > { %s6908_s3 = smov (!%p679_p13, %s6027_s3), 0  ;;  %s715_s12 = sshll.u32 %s5318_s0, 4  ;;  %s6063_s12 = int_to_ptr.vmem [resolvable:$true] %s715_s12 }
 0x2aa   : > { %s719_s16 = sadd.s32 25, %s5497_s21  ;;  %s6910_s3 = smov (!%p2930_p0, %s6908_s3), 63 }
 0x2ab   : > { %s6065_s29 = sld [smem:[#allocation5 + %s719_s16]]  ;;  %s2935_s5 = sshll.u32 %s6910_s3, 4 }
 0x2ac   : > { %s684_s8 = scalar_lea.hbm %s6746_s1, %s2935_s5 }
 0x2ad   : > { %s4092_s6 = scalar_lea.hbm %s684_s8, 16  ;;  %p4095_p6 = scmp.lt.u32.totalorder %s684_s8, %s6746_s1 }
 0x2ae   : > { %p700_p2 = scmp.gt.s32.totalorder %s6059_s24, 0  ;;  %p4093_p4 = scmp.ne.s32.totalorder %s684_s8, %s4092_s6 }
 0x2af   : > { %p4096_p12 = scmp.lt.u32.totalorder %s5549_s14, %s4092_s6  ;;  %p4098_p1 = scmp.lt.u32.totalorder %s4092_s6, %s684_s8 }
 0x2b1   : > { %p4097_p3 = por %p4096_p12, %p4095_p6 }
 0x2b3   : > { %p4099_p10 = por %p4098_p1, %p4097_p3 }
 0x2b5   : > { %p4100_p8 = pnand %p4099_p10, %p4093_p4 }
 0x2b7   : > { %4103 = shalt.err (!%p4100_p8)  }
 0x2b8   : > { %s4104_s3 = scalar_lea.vmem %s6045_s4, 16  ;;  %p4109_p5 = scmp.lt.s32.totalorder %s6045_s4, %s5536_s13 }
 0x2b9   : > { %p4105_p9 = scmp.ne.s32.totalorder %s6045_s4, %s4104_s3  ;;  %p4110_p7 = scmp.lt.s32.totalorder %s5558_s30, %s4104_s3 }
 0x2bb   : > { %p4111_p11 = por %p4110_p7, %p4109_p5 }
 0x2bd   : > { %p4112_p13 = pnand %p4111_p11, %p4105_p9 }
 0x2bf   : > { %4115 = shalt.err (!%p4112_p13)  }
 0x2c0   : > { %697 = dma.hbm_to_vmem [thread:$0]  %s684_s8, 16, %s6045_s4, [#allocation3 + $0x17] }
 0x2c1   : > { %s701_s27 = scalar_select %p700_p2, %s6059_s24, 0 }
 0x2c2   : > { %p2936_p0 = scmp.lt.s32.totalorder %s6059_s24, 63  ;;  %s5319_s18 = smov [#allocation2 + $0x19]  }
 0x2c3   : > { %s736_s28 = sshll.u32 %s5319_s18, 4  ;;  %p721_p4 = scmp.gt.s32.totalorder %s6065_s29, 0  ;;  %s6088_s28 = int_to_ptr.vmem [resolvable:$true] %s736_s28 }
 0x2c4   : > { %p2942_p6 = scmp.lt.s32.totalorder %s6065_s29, 63  ;;  %s6912_s27 = smov (!%p2936_p0, %s701_s27), 63 }
 0x2c5   : > { %s722_s0 = scalar_select %p721_p4, %s6065_s29, 0 }
 0x2c6   : > { %s2941_s16 = sshll.u32 %s6912_s27, 4  ;;  %s740_s6 = sadd.s32 26, %s5497_s21 }
 0x2c7   : > { %s705_s15 = scalar_lea.hbm %s6746_s1, %s2941_s16 }
 0x2c8   : > { %s4116_s7 = scalar_lea.hbm %s705_s15, 16  ;;  %p4119_p2 = scmp.lt.u32.totalorder %s705_s15, %s6746_s1 }
 0x2c9   : > { %p4117_p12 = scmp.ne.s32.totalorder %s705_s15, %s4116_s7  ;;  %p4120_p3 = scmp.lt.u32.totalorder %s5549_s14, %s4116_s7 }
 0x2ca   : > { %p4122_p10 = scmp.lt.u32.totalorder %s4116_s7, %s705_s15 }
 0x2cb   : > { %p4121_p1 = por %p4120_p3, %p4119_p2 }
 0x2cd   : > { %p4123_p8 = por %p4122_p10, %p4121_p1 }
 0x2cf   : > { %p4124_p9 = pnand %p4123_p8, %p4117_p12 }
 0x2d1   : > { %4127 = shalt.err (!%p4124_p9)  }
 0x2d2   : > { %s4128_s24 = scalar_lea.vmem %s6063_s12, 16  ;;  %p4133_p7 = scmp.lt.s32.totalorder %s6063_s12, %s5536_s13 }
 0x2d3   : > { %p4129_p5 = scmp.ne.s32.totalorder %s6063_s12, %s4128_s24  ;;  %p4134_p11 = scmp.lt.s32.totalorder %s5558_s30, %s4128_s24 }
 0x2d5   : > { %p4135_p13 = por %p4134_p11, %p4133_p7 }
 0x2d7   : > { %p4136_p0 = pnand %p4135_p13, %p4129_p5 }
 0x2d9   : > { %4139 = shalt.err (!%p4136_p0)  }
 0x2da   : > { %718 = dma.hbm_to_vmem [thread:$0]  %s705_s15, 16, %s6063_s12, [#allocation3 + $0x18] }
 0x2db   : > { %s6914_s0 = smov (!%p2942_p6, %s722_s0), 63  ;;  %s6106_s10 = sld [smem:[#allocation5 + %s740_s6]] }
 0x2dc   : > { %s2947_s3 = sshll.u32 %s6914_s0, 4  ;;  %s5320_s5 = smov [#allocation2 + $0x1a]  }
 0x2dd   : > { %s726_s16 = scalar_lea.hbm %s6746_s1, %s2947_s3  ;;  %s757_s20 = sshll.u32 %s5320_s5, 4  ;;  %s6122_s20 = int_to_ptr.vmem [resolvable:$true] %s757_s20 }
 0x2de   : > { %s4140_s7 = scalar_lea.hbm %s726_s16, 16  ;;  %p4143_p12 = scmp.lt.u32.totalorder %s726_s16, %s6746_s1 }
 0x2df   : > { %p4141_p4 = scmp.ne.s32.totalorder %s726_s16, %s4140_s7  ;;  %p4144_p2 = scmp.lt.u32.totalorder %s5549_s14, %s4140_s7 }
 0x2e0   : > { %p4146_p1 = scmp.lt.u32.totalorder %s4140_s7, %s726_s16 }
 0x2e1   : > { %p4145_p3 = por %p4144_p2, %p4143_p12 }
 0x2e3   : > { %p4147_p10 = por %p4146_p1, %p4145_p3 }
 0x2e5   : > { %p4148_p6 = pnand %p4147_p10, %p4141_p4 }
 0x2e7   : > { %4151 = shalt.err (!%p4148_p6)  }
 0x2e8   : > { %s4152_s12 = scalar_lea.vmem %s6088_s28, 16  ;;  %p4157_p9 = scmp.lt.s32.totalorder %s6088_s28, %s5536_s13 }
 0x2e9   : > { %p4153_p8 = scmp.ne.s32.totalorder %s6088_s28, %s4152_s12  ;;  %p4158_p5 = scmp.lt.s32.totalorder %s5558_s30, %s4152_s12 }
 0x2eb   : > { %p4159_p7 = por %p4158_p5, %p4157_p9 }
 0x2ed   : > { %p4160_p11 = pnand %p4159_p7, %p4153_p8 }
 0x2ef   : > { %4163 = shalt.err (!%p4160_p11)  }
 0x2f0   : > { %739 = dma.hbm_to_vmem [thread:$0]  %s726_s16, 16, %s6088_s28, [#allocation3 + $0x19] }
 0x2f1   : > { %s761_s29 = sadd.s32 27, %s5497_s21  ;;  %p742_p13 = scmp.gt.s32.totalorder %s6106_s10, 0 }
 0x2f2   : > { %s6124_s0 = sld [smem:[#allocation5 + %s761_s29]]  ;;  %p2948_p0 = scmp.lt.s32.totalorder %s6106_s10, 63 }
 0x2f3   : > { %s5321_s15 = smov [#allocation2 + $0x1b]   ;;  %s782_s24 = sadd.s32 28, %s5497_s21 }
 0x2f4   : > { %s778_s6 = sshll.u32 %s5321_s15, 4  ;;  %s6916_s10 = smov (!%p742_p13, %s6106_s10), 0  ;;  %s6133_s6 = int_to_ptr.vmem [resolvable:$true] %s778_s6 }
 0x2f5   : > { %s6130_s3 = sld [smem:[#allocation5 + %s782_s24]]  ;;  %s6918_s10 = smov (!%p2948_p0, %s6916_s10), 63 }
 0x2f6   : > { %s2953_s28 = sshll.u32 %s6918_s10, 4  ;;  %s5322_s5 = smov [#allocation2 + $0x1c]  }
 0x2f7   : > { %s747_s16 = scalar_lea.hbm %s6746_s1, %s2953_s28  ;;  %s6139_s7 = sshll.u32 %s5322_s5, 4  ;;  %s800_s7 = int_to_ptr.vmem [resolvable:$true] %s6139_s7 }
 0x2f8   : > { %p763_p4 = scmp.gt.s32.totalorder %s6124_s0, 0  ;;  %p2954_p12 = scmp.lt.s32.totalorder %s6124_s0, 63 }
 0x2f9   : > { %s4164_s4 = scalar_lea.hbm %s747_s16, 16  ;;  %p4167_p3 = scmp.lt.u32.totalorder %s747_s16, %s6746_s1 }
 0x2fa   : > { %p4165_p2 = scmp.ne.s32.totalorder %s747_s16, %s4164_s4  ;;  %p4168_p1 = scmp.lt.u32.totalorder %s5549_s14, %s4164_s4 }
 0x2fb   : > { %p4170_p6 = scmp.lt.u32.totalorder %s4164_s4, %s747_s16 }
 0x2fc   : > { %p4169_p10 = por %p4168_p1, %p4167_p3 }
 0x2fe   : > { %p4171_p8 = por %p4170_p6, %p4169_p10 }
 0x300   : > { %p4172_p9 = pnand %p4171_p8, %p4165_p2 }
 0x302   : > { %4175 = shalt.err (!%p4172_p9)  }
 0x303   : > { %s4176_s10 = scalar_lea.vmem %s6122_s20, 16  ;;  %p4181_p7 = scmp.lt.s32.totalorder %s6122_s20, %s5536_s13 }
 0x304   : > { %p4177_p5 = scmp.ne.s32.totalorder %s6122_s20, %s4176_s10  ;;  %p4182_p11 = scmp.lt.s32.totalorder %s5558_s30, %s4176_s10 }
 0x306   : > { %p4183_p13 = por %p4182_p11, %p4181_p7 }
 0x308   : > { %p4184_p0 = pnand %p4183_p13, %p4177_p5 }
 0x30a   : > { %4187 = shalt.err (!%p4184_p0)  }
 0x30b   : > { %760 = dma.hbm_to_vmem [thread:$0]  %s747_s16, 16, %s6122_s20, [#allocation3 + $0x1a] }
 0x30c   : > { %s764_s29 = scalar_select %p763_p4, %s6124_s0, 0 }
 0x30d   : > { %p784_p2 = scmp.gt.s32.totalorder %s6130_s3, 0  ;;  %p2960_p3 = scmp.lt.s32.totalorder %s6130_s3, 63 }
 0x30e   : > { %s6920_s29 = smov (!%p2954_p12, %s764_s29), 63  ;;  %s803_s28 = sadd.s32 29, %s5497_s21 }
 0x30f   : > { %s785_s15 = scalar_select %p784_p2, %s6130_s3, 0 }
 0x310   : > { %s2959_s24 = sshll.u32 %s6920_s29, 4  ;;  %s6163_s4 = sld [smem:[#allocation5 + %s803_s28]] }
 0x311   : > { %s768_s5 = scalar_lea.hbm %s6746_s1, %s2959_s24 }
 0x312   : > { %s4188_s8 = scalar_lea.hbm %s768_s5, 16  ;;  %p4191_p10 = scmp.lt.u32.totalorder %s768_s5, %s6746_s1 }
 0x313   : > { %p4189_p1 = scmp.ne.s32.totalorder %s768_s5, %s4188_s8  ;;  %p4192_p4 = scmp.lt.u32.totalorder %s5549_s14, %s4188_s8 }
 0x314   : > { %p4194_p8 = scmp.lt.u32.totalorder %s4188_s8, %s768_s5 }
 0x315   : > { %p4193_p6 = por %p4192_p4, %p4191_p10 }
 0x317   : > { %p4195_p9 = por %p4194_p8, %p4193_p6 }
 0x319   : > { %p4196_p12 = pnand %p4195_p9, %p4189_p1 }
 0x31b   : > { %4199 = shalt.err (!%p4196_p12)  }
 0x31c   : > { %s4200_s20 = scalar_lea.vmem %s6133_s6, 16  ;;  %p4205_p7 = scmp.lt.s32.totalorder %s6133_s6, %s5536_s13 }
 0x31d   : > { %p4201_p5 = scmp.ne.s32.totalorder %s6133_s6, %s4200_s20  ;;  %p4206_p11 = scmp.lt.s32.totalorder %s5558_s30, %s4200_s20 }
 0x31f   : > { %p4207_p13 = por %p4206_p11, %p4205_p7 }
 0x321   : > { %p4208_p0 = pnand %p4207_p13, %p4201_p5 }
 0x323   : > { %4211 = shalt.err (!%p4208_p0)  }
 0x324   : > { %781 = dma.hbm_to_vmem [thread:$0]  %s768_s5, 16, %s6133_s6, [#allocation3 + $0x1b] }
 0x325   : > { %s6922_s15 = smov (!%p2960_p3, %s785_s15), 63  ;;  %s824_s16 = sadd.s32 30, %s5497_s21 }
 0x326   : > { %s2965_s0 = sshll.u32 %s6922_s15, 4  ;;  %s5323_s27 = smov [#allocation2 + $0x1d]  }
 0x327   : > { %s789_s28 = scalar_lea.hbm %s6746_s1, %s2965_s0  ;;  %s820_s18 = sshll.u32 %s5323_s27, 4  ;;  %s821_s18 = int_to_ptr.vmem [resolvable:$true] %s820_s18 }
 0x328   : > { %s4212_s8 = scalar_lea.hbm %s789_s28, 16  ;;  %p4215_p1 = scmp.lt.u32.totalorder %s789_s28, %s6746_s1 }
 0x329   : > { %p4213_p2 = scmp.ne.s32.totalorder %s789_s28, %s4212_s8  ;;  %p4216_p10 = scmp.lt.u32.totalorder %s5549_s14, %s4212_s8 }
 0x32a   : > { %p4218_p6 = scmp.lt.u32.totalorder %s4212_s8, %s789_s28 }
 0x32b   : > { %p4217_p4 = por %p4216_p10, %p4215_p1 }
 0x32d   : > { %p4219_p8 = por %p4218_p6, %p4217_p4 }
 0x32f   : > { %p4220_p3 = pnand %p4219_p8, %p4213_p2 }
 0x331   : > { %4223 = shalt.err (!%p4220_p3)  }
 0x332   : > { %s4224_s6 = scalar_lea.vmem %s800_s7, 16  ;;  %p4229_p12 = scmp.lt.s32.totalorder %s800_s7, %s5536_s13 }
 0x333   : > { %p4225_p9 = scmp.ne.s32.totalorder %s800_s7, %s4224_s6  ;;  %p4230_p5 = scmp.lt.s32.totalorder %s5558_s30, %s4224_s6 }
 0x335   : > { %p4231_p7 = por %p4230_p5, %p4229_p12 }
 0x337   : > { %p4232_p11 = pnand %p4231_p7, %p4225_p9 }
 0x339   : > { %4235 = shalt.err (!%p4232_p11)  }
 0x33a   : > { %802 = dma.hbm_to_vmem [thread:$0]  %s789_s28, 16, %s800_s7, [#allocation3 + $0x1c] }
 0x33b   : > { %p805_p13 = scmp.gt.s32.totalorder %s6163_s4, 0  ;;  %p2966_p0 = scmp.lt.s32.totalorder %s6163_s4, 63 }
 0x33c   : > { %s6190_s3 = sld [smem:[#allocation5 + %s824_s16]]  ;;  %s5324_s15 = smov [#allocation2 + $0x1e]  }
 0x33d   : > { %s6924_s4 = smov (!%p805_p13, %s6163_s4), 0  ;;  %s841_s5 = sshll.u32 %s5324_s15, 4  ;;  %s6196_s5 = int_to_ptr.vmem [resolvable:$true] %s841_s5 }
 0x33e   : > { %s845_s20 = sadd.s32 31, %s5497_s21  ;;  %s6926_s4 = smov (!%p2966_p0, %s6924_s4), 63 }
 0x33f   : > { %s6194_s0 = sld [smem:[#allocation5 + %s845_s20]]  ;;  %s2971_s29 = sshll.u32 %s6926_s4, 4 }
 0x340   : > { %s810_s28 = scalar_lea.hbm %s6746_s1, %s2971_s29 }
 0x341   : > { %s4236_s27 = scalar_lea.hbm %s810_s28, 16  ;;  %p4239_p10 = scmp.lt.u32.totalorder %s810_s28, %s6746_s1 }
 0x342   : > { %p826_p2 = scmp.gt.s32.totalorder %s6190_s3, 0  ;;  %p4237_p1 = scmp.ne.s32.totalorder %s810_s28, %s4236_s27 }
 0x343   : > { %p4240_p4 = scmp.lt.u32.totalorder %s5549_s14, %s4236_s27  ;;  %p4242_p8 = scmp.lt.u32.totalorder %s4236_s27, %s810_s28 }
 0x345   : > { %p4241_p6 = por %p4240_p4, %p4239_p10 }
 0x347   : > { %p4243_p3 = por %p4242_p8, %p4241_p6 }
 0x349   : > { %p4244_p9 = pnand %p4243_p3, %p4237_p1 }
 0x34b   : > { %4247 = shalt.err (!%p4244_p9)  }
 0x34c   : > { %s4248_s4 = scalar_lea.vmem %s821_s18, 16  ;;  %p4253_p5 = scmp.lt.s32.totalorder %s821_s18, %s5536_s13 }
 0x34d   : > { %p4249_p12 = scmp.ne.s32.totalorder %s821_s18, %s4248_s4  ;;  %p4254_p7 = scmp.lt.s32.totalorder %s5558_s30, %s4248_s4 }
 0x34f   : > { %p4255_p11 = por %p4254_p7, %p4253_p5 }
 0x351   : > { %p4256_p13 = pnand %p4255_p11, %p4249_p12 }
 0x353   : > { %4259 = shalt.err (!%p4256_p13)  }
 0x354   : > { %823 = dma.hbm_to_vmem [thread:$0]  %s810_s28, 16, %s821_s18, [#allocation3 + $0x1d] }
 0x355   : > { %s827_s12 = scalar_select %p826_p2, %s6190_s3, 0 }
 0x356   : > { %p2972_p0 = scmp.lt.s32.totalorder %s6190_s3, 63  ;;  %p847_p1 = scmp.gt.s32.totalorder %s6194_s0, 0 }
 0x357   : > { %p2978_p10 = scmp.lt.s32.totalorder %s6194_s0, 63  ;;  %s5325_s18 = smov [#allocation2 + $0x1f]  }
 0x358   : > { %s6928_s12 = smov (!%p2972_p0, %s827_s12), 63  ;;  %s862_s7 = sshll.u32 %s5325_s18, 4  ;;  %s863_s7 = int_to_ptr.vmem [resolvable:$true] %s862_s7 }
 0x359   : > { %s848_s10 = scalar_select %p847_p1, %s6194_s0, 0 }
 0x35a   : > { %s2977_s6 = sshll.u32 %s6928_s12, 4 }
 0x35b   : > { %s831_s29 = scalar_lea.hbm %s6746_s1, %s2977_s6 }
 0x35c   : > { %s4260_s24 = scalar_lea.hbm %s831_s29, 16  ;;  %p4263_p6 = scmp.lt.u32.totalorder %s831_s29, %s6746_s1 }
 0x35d   : > { %p4261_p4 = scmp.ne.s32.totalorder %s831_s29, %s4260_s24  ;;  %p4264_p8 = scmp.lt.u32.totalorder %s5549_s14, %s4260_s24 }
 0x35e   : > { %p4266_p3 = scmp.lt.u32.totalorder %s4260_s24, %s831_s29 }
 0x35f   : > { %p4265_p2 = por %p4264_p8, %p4263_p6 }
 0x361   : > { %p4267_p9 = por %p4266_p3, %p4265_p2 }
 0x363   : > { %p4268_p12 = pnand %p4267_p9, %p4261_p4 }
 0x365   : > { %4271 = shalt.err (!%p4268_p12)  }
 0x366   : > { %s4272_s3 = scalar_lea.vmem %s6196_s5, 16  ;;  %p4277_p7 = scmp.lt.s32.totalorder %s6196_s5, %s5536_s13 }
 0x367   : > { %p4273_p5 = scmp.ne.s32.totalorder %s6196_s5, %s4272_s3  ;;  %p4278_p11 = scmp.lt.s32.totalorder %s5558_s30, %s4272_s3 }
 0x369   : > { %p4279_p13 = por %p4278_p11, %p4277_p7 }
 0x36b   : > { %p4280_p0 = pnand %p4279_p13, %p4273_p5 }
 0x36d   : > { %4283 = shalt.err (!%p4280_p0)  }
 0x36e   : > { %844 = dma.hbm_to_vmem [thread:$0]  %s831_s29, 16, %s6196_s5, [#allocation3 + $0x1e] }
 0x36f   : > { %s6930_s10 = smov (!%p2978_p10, %s848_s10), 63 }
 0x370   : > { %s2983_s16 = sshll.u32 %s6930_s10, 4 }
 0x371   : > { %s852_s12 = scalar_lea.hbm %s6746_s1, %s2983_s16 }
 0x372   : > { %s4284_s6 = scalar_lea.hbm %s852_s12, 16  ;;  %p4287_p4 = scmp.lt.u32.totalorder %s852_s12, %s6746_s1 }
 0x373   : > { %p4285_p1 = scmp.ne.s32.totalorder %s852_s12, %s4284_s6  ;;  %p4288_p6 = scmp.lt.u32.totalorder %s5549_s14, %s4284_s6 }
 0x374   : > { %p4290_p2 = scmp.lt.u32.totalorder %s4284_s6, %s852_s12 }
 0x375   : > { %p4289_p8 = por %p4288_p6, %p4287_p4 }
 0x377   : > { %p4291_p3 = por %p4290_p2, %p4289_p8 }
 0x379   : > { %p4292_p9 = pnand %p4291_p3, %p4285_p1 }
 0x37b   : > { %4295 = shalt.err (!%p4292_p9)  }
 0x37c   : > { %s4296_s5 = scalar_lea.vmem %s863_s7, 16  ;;  %p4301_p12 = scmp.lt.s32.totalorder %s863_s7, %s5536_s13 }
 0x37d   : > { %p4297_p10 = scmp.ne.s32.totalorder %s863_s7, %s4296_s5  ;;  %p4302_p5 = scmp.lt.s32.totalorder %s5558_s30, %s4296_s5 }
 0x37f   : > { %p4303_p7 = por %p4302_p5, %p4301_p12 }
 0x381   : > { %p4304_p11 = pnand %p4303_p7, %p4297_p10 }
 0x383   : > { %4307 = shalt.err (!%p4304_p11)  }
 0x384   : > { %865 = dma.hbm_to_vmem [thread:$0]  %s852_s12, 16, %s863_s7, [#allocation3 + $0x1f] }
 0x385   : > { %s6240_s0 = scalar_lea.vmem [#allocation9], %s5532_s17 }
 0x386   : > { %5134 = dma.done.wait [#allocation3], 16 }
 0x387   : > { %5135 = vsyncadd [#allocation3], 4294967280  ;;  %s3024_s10 = sshll.u32 %s6816_s22, 4  ;;  %s5326_s28 = smov [#allocation2 + $0x20]  }
 0x388   : > { %s954_s24 = scalar_lea.hbm %s6746_s1, %s3024_s10  ;;  %s964_s27 = sshll.u32 %s5326_s28, 4  ;;  %s965_s27 = int_to_ptr.vmem [resolvable:$true] %s964_s27 }
 0x389   : > { %s4308_s3 = scalar_lea.hbm %s954_s24, 16  ;;  %p4311_p0 = scmp.lt.u32.totalorder %s954_s24, %s6746_s1 }
 0x38a   : > { %p4309_p13 = scmp.ne.s32.totalorder %s954_s24, %s4308_s3  ;;  %p4312_p1 = scmp.lt.u32.totalorder %s5549_s14, %s4308_s3 }
 0x38b   : > { %p4314_p6 = scmp.lt.u32.totalorder %s4308_s3, %s954_s24 }
 0x38c   : > { %p4313_p4 = por %p4312_p1, %p4311_p0 }
 0x38e   : > { %p4315_p8 = por %p4314_p6, %p4313_p4 }
 0x390   : > { %p4316_p2 = pnand %p4315_p8, %p4309_p13 }
 0x392   : > { %4319 = shalt.err (!%p4316_p2)  }
 0x393   : > { %s4320_s22 = scalar_lea.vmem %s965_s27, 16  ;;  %p4325_p9 = scmp.lt.s32.totalorder %s965_s27, %s5536_s13 }
 0x394   : > { %p4321_p3 = scmp.ne.s32.totalorder %s965_s27, %s4320_s22  ;;  %p4326_p10 = scmp.lt.s32.totalorder %s5558_s30, %s4320_s22 }
 0x396   : > { %p4327_p12 = por %p4326_p10, %p4325_p9 }
 0x398   : > { %p4328_p5 = pnand %p4327_p12, %p4321_p3 }
 0x39a   : > { %4331 = shalt.err (!%p4328_p5)  }
 0x39b   : > { %967 = dma.hbm_to_vmem [thread:$0]  %s954_s24, 16, %s965_s27, [#allocation3] }
 0x39c   : > { %5136 = dma.done.wait [#allocation3 + $0x1], 16 }
 0x39d   : > { %5137 = vsyncadd [#allocation3 + $0x1], 4294967280  ;;  %s3025_s17 = sshll.u32 %s6818_s23, 4  ;;  %s5327_s6 = smov [#allocation2 + $0x21]  }
 0x39e   : > { %s974_s12 = scalar_lea.hbm %s6746_s1, %s3025_s17  ;;  %s984_s15 = sshll.u32 %s5327_s6, 4  ;;  %s985_s15 = int_to_ptr.vmem [resolvable:$true] %s984_s15 }
 0x39f   : > { %s4332_s20 = scalar_lea.hbm %s974_s12, 16  ;;  %p4335_p11 = scmp.lt.u32.totalorder %s974_s12, %s6746_s1 }
 0x3a0   : > { %p4333_p7 = scmp.ne.s32.totalorder %s974_s12, %s4332_s20  ;;  %p4336_p13 = scmp.lt.u32.totalorder %s5549_s14, %s4332_s20 }
 0x3a1   : > { %p4338_p1 = scmp.lt.u32.totalorder %s4332_s20, %s974_s12 }
 0x3a2   : > { %p4337_p0 = por %p4336_p13, %p4335_p11 }
 0x3a4   : > { %p4339_p4 = por %p4338_p1, %p4337_p0 }
 0x3a6   : > { %p4340_p6 = pnand %p4339_p4, %p4333_p7 }
 0x3a8   : > { %4343 = shalt.err (!%p4340_p6)  }
 0x3a9   : > { %s4344_s23 = scalar_lea.vmem %s985_s15, 16  ;;  %p4349_p2 = scmp.lt.s32.totalorder %s985_s15, %s5536_s13 }
 0x3aa   : > { %p4345_p8 = scmp.ne.s32.totalorder %s985_s15, %s4344_s23  ;;  %p4350_p3 = scmp.lt.s32.totalorder %s5558_s30, %s4344_s23 }
 0x3ac   : > { %p4351_p9 = por %p4350_p3, %p4349_p2 }
 0x3ae   : > { %p4352_p10 = pnand %p4351_p9, %p4345_p8 }
 0x3b0   : > { %4355 = shalt.err (!%p4352_p10)  }
 0x3b1   : > { %987 = dma.hbm_to_vmem [thread:$0]  %s974_s12, 16, %s985_s15, [#allocation3 + $0x1] }
 0x3b2   : > { %5138 = dma.done.wait [#allocation3 + $0x2], 16 }
 0x3b3   : > { %5139 = vsyncadd [#allocation3 + $0x2], 4294967280  ;;  %s3026_s29 = sshll.u32 %s6824_s25, 4  ;;  %s5328_s27 = smov [#allocation2 + $0x22]  }
 0x3b4   : > { %s994_s28 = scalar_lea.hbm %s6746_s1, %s3026_s29  ;;  %s1004_s3 = sshll.u32 %s5328_s27, 4  ;;  %s1005_s3 = int_to_ptr.vmem [resolvable:$true] %s1004_s3 }
 0x3b5   : > { %s4356_s16 = scalar_lea.hbm %s994_s28, 16  ;;  %p4359_p5 = scmp.lt.u32.totalorder %s994_s28, %s6746_s1 }
 0x3b6   : > { %p4357_p12 = scmp.ne.s32.totalorder %s994_s28, %s4356_s16  ;;  %p4360_p7 = scmp.lt.u32.totalorder %s5549_s14, %s4356_s16 }
 0x3b7   : > { %p4362_p13 = scmp.lt.u32.totalorder %s4356_s16, %s994_s28 }
 0x3b8   : > { %p4361_p11 = por %p4360_p7, %p4359_p5 }
 0x3ba   : > { %p4363_p0 = por %p4362_p13, %p4361_p11 }
 0x3bc   : > { %p4364_p1 = pnand %p4363_p0, %p4357_p12 }
 0x3be   : > { %4367 = shalt.err (!%p4364_p1)  }
 0x3bf   : > { %s4368_s25 = scalar_lea.vmem %s1005_s3, 16  ;;  %p4373_p6 = scmp.lt.s32.totalorder %s1005_s3, %s5536_s13 }
 0x3c0   : > { %p4369_p4 = scmp.ne.s32.totalorder %s1005_s3, %s4368_s25  ;;  %p4374_p8 = scmp.lt.s32.totalorder %s5558_s30, %s4368_s25 }
 0x3c2   : > { %p4375_p2 = por %p4374_p8, %p4373_p6 }
 0x3c4   : > { %p4376_p3 = pnand %p4375_p2, %p4369_p4 }
 0x3c6   : > { %4379 = shalt.err (!%p4376_p3)  }
 0x3c7   : > { %1007 = dma.hbm_to_vmem [thread:$0]  %s994_s28, 16, %s1005_s3, [#allocation3 + $0x2] }
 0x3c8   : > { %5140 = dma.done.wait [#allocation3 + $0x3], 16 }
 0x3c9   : > { %5141 = vsyncadd [#allocation3 + $0x3], 4294967280  ;;  %s3027_s17 = sshll.u32 %s6826_s26, 4  ;;  %s5329_s6 = smov [#allocation2 + $0x23]  }
 0x3ca   : > { %s1014_s12 = scalar_lea.hbm %s6746_s1, %s3027_s17  ;;  %s1024_s15 = sshll.u32 %s5329_s6, 4  ;;  %s1025_s15 = int_to_ptr.vmem [resolvable:$true] %s1024_s15 }
 0x3cb   : > { %s4380_s20 = scalar_lea.hbm %s1014_s12, 16  ;;  %p4383_p10 = scmp.lt.u32.totalorder %s1014_s12, %s6746_s1 }
 0x3cc   : > { %p4381_p9 = scmp.ne.s32.totalorder %s1014_s12, %s4380_s20  ;;  %p4384_p12 = scmp.lt.u32.totalorder %s5549_s14, %s4380_s20 }
 0x3cd   : > { %p4386_p7 = scmp.lt.u32.totalorder %s4380_s20, %s1014_s12 }
 0x3ce   : > { %p4385_p5 = por %p4384_p12, %p4383_p10 }
 0x3d0   : > { %p4387_p11 = por %p4386_p7, %p4385_p5 }
 0x3d2   : > { %p4388_p13 = pnand %p4387_p11, %p4381_p9 }
 0x3d4   : > { %4391 = shalt.err (!%p4388_p13)  }
 0x3d5   : > { %s4392_s26 = scalar_lea.vmem %s1025_s15, 16  ;;  %p4397_p1 = scmp.lt.s32.totalorder %s1025_s15, %s5536_s13 }
 0x3d6   : > { %p4393_p0 = scmp.ne.s32.totalorder %s1025_s15, %s4392_s26  ;;  %p4398_p4 = scmp.lt.s32.totalorder %s5558_s30, %s4392_s26 }
 0x3d8   : > { %p4399_p6 = por %p4398_p4, %p4397_p1 }
 0x3da   : > { %p4400_p8 = pnand %p4399_p6, %p4393_p0 }
 0x3dc   : > { %4403 = shalt.err (!%p4400_p8)  }
 0x3dd   : > { %1027 = dma.hbm_to_vmem [thread:$0]  %s1014_s12, 16, %s1025_s15, [#allocation3 + $0x3] }
 0x3de   : > { %5142 = dma.done.wait [#allocation3 + $0x4], 16 }
 0x3df   : > { %5143 = vsyncadd [#allocation3 + $0x4], 4294967280  ;;  %s3028_s23 = sshll.u32 %s6832_s9, 4  ;;  %s5330_s28 = smov [#allocation2 + $0x24]  }
 0x3e0   : > { %s1034_s24 = scalar_lea.hbm %s6746_s1, %s3028_s23  ;;  %s1044_s27 = sshll.u32 %s5330_s28, 4  ;;  %s1045_s27 = int_to_ptr.vmem [resolvable:$true] %s1044_s27 }
 0x3e1   : > { %s4404_s3 = scalar_lea.hbm %s1034_s24, 16  ;;  %p4407_p3 = scmp.lt.u32.totalorder %s1034_s24, %s6746_s1 }
 0x3e2   : > { %p4405_p2 = scmp.ne.s32.totalorder %s1034_s24, %s4404_s3  ;;  %p4408_p9 = scmp.lt.u32.totalorder %s5549_s14, %s4404_s3 }
 0x3e3   : > { %p4410_p12 = scmp.lt.u32.totalorder %s4404_s3, %s1034_s24 }
 0x3e4   : > { %p4409_p10 = por %p4408_p9, %p4407_p3 }
 0x3e6   : > { %p4411_p5 = por %p4410_p12, %p4409_p10 }
 0x3e8   : > { %p4412_p7 = pnand %p4411_p5, %p4405_p2 }
 0x3ea   : > { %4415 = shalt.err (!%p4412_p7)  }
 0x3eb   : > { %s4416_s9 = scalar_lea.vmem %s1045_s27, 16  ;;  %p4421_p13 = scmp.lt.s32.totalorder %s1045_s27, %s5536_s13 }
 0x3ec   : > { %p4417_p11 = scmp.ne.s32.totalorder %s1045_s27, %s4416_s9  ;;  %p4422_p0 = scmp.lt.s32.totalorder %s5558_s30, %s4416_s9 }
 0x3ee   : > { %p4423_p1 = por %p4422_p0, %p4421_p13 }
 0x3f0   : > { %p4424_p4 = pnand %p4423_p1, %p4417_p11 }
 0x3f2   : > { %4427 = shalt.err (!%p4424_p4)  }
 0x3f3   : > { %1047 = dma.hbm_to_vmem [thread:$0]  %s1034_s24, 16, %s1045_s27, [#allocation3 + $0x4] }
 0x3f4   : > { %5144 = dma.done.wait [#allocation3 + $0x5], 16 }
 0x3f5   : > { %5145 = vsyncadd [#allocation3 + $0x5], 4294967280  ;;  %s3029_s22 = sshll.u32 %s6834_s11, 4  ;;  %s5331_s4 = smov [#allocation2 + $0x25]  }
 0x3f6   : > { %s1054_s7 = scalar_lea.hbm %s6746_s1, %s3029_s22  ;;  %s1064_s12 = sshll.u32 %s5331_s4, 4  ;;  %s1065_s12 = int_to_ptr.vmem [resolvable:$true] %s1064_s12 }
 0x3f7   : > { %s4428_s6 = scalar_lea.hbm %s1054_s7, 16  ;;  %p4431_p8 = scmp.lt.u32.totalorder %s1054_s7, %s6746_s1 }
 0x3f8   : > { %p4429_p6 = scmp.ne.s32.totalorder %s1054_s7, %s4428_s6  ;;  %p4432_p2 = scmp.lt.u32.totalorder %s5549_s14, %s4428_s6 }
 0x3f9   : > { %p4434_p9 = scmp.lt.u32.totalorder %s4428_s6, %s1054_s7 }
 0x3fa   : > { %p4433_p3 = por %p4432_p2, %p4431_p8 }
 0x3fc   : > { %p4435_p10 = por %p4434_p9, %p4433_p3 }
 0x3fe   : > { %p4436_p12 = pnand %p4435_p10, %p4429_p6 }
 0x400   : > { %4439 = shalt.err (!%p4436_p12)  }
 0x401   : > { %s4440_s11 = scalar_lea.vmem %s1065_s12, 16  ;;  %p4445_p7 = scmp.lt.s32.totalorder %s1065_s12, %s5536_s13 }
 0x402   : > { %p4441_p5 = scmp.ne.s32.totalorder %s1065_s12, %s4440_s11  ;;  %p4446_p11 = scmp.lt.s32.totalorder %s5558_s30, %s4440_s11 }
 0x404   : > { %p4447_p13 = por %p4446_p11, %p4445_p7 }
 0x406   : > { %p4448_p0 = pnand %p4447_p13, %p4441_p5 }
 0x408   : > { %4451 = shalt.err (!%p4448_p0)  }
 0x409   : > { %1067 = dma.hbm_to_vmem [thread:$0]  %s1054_s7, 16, %s1065_s12, [#allocation3 + $0x5] }
 0x40a   : > { %5146 = dma.done.wait [#allocation3 + $0x6], 16 }
 0x40b   : > { %5147 = vsyncadd [#allocation3 + $0x6], 4294967280  ;;  %s3030_s5 = sshll.u32 %s6840_s2, 4  ;;  %s5332_s29 = smov [#allocation2 + $0x26]  }
 0x40c   : > { %s1074_s23 = scalar_lea.hbm %s6746_s1, %s3030_s5  ;;  %s1084_s18 = sshll.u32 %s5332_s29, 4  ;;  %s1085_s18 = int_to_ptr.vmem [resolvable:$true] %s1084_s18 }
 0x40d   : > { %s4452_s24 = scalar_lea.hbm %s1074_s23, 16  ;;  %p4455_p4 = scmp.lt.u32.totalorder %s1074_s23, %s6746_s1 }
 0x40e   : > { %p4453_p1 = scmp.ne.s32.totalorder %s1074_s23, %s4452_s24  ;;  %p4456_p6 = scmp.lt.u32.totalorder %s5549_s14, %s4452_s24 }
 0x40f   : > { %p4458_p2 = scmp.lt.u32.totalorder %s4452_s24, %s1074_s23 }
 0x410   : > { %p4457_p8 = por %p4456_p6, %p4455_p4 }
 0x412   : > { %p4459_p3 = por %p4458_p2, %p4457_p8 }
 0x414   : > { %p4460_p9 = pnand %p4459_p3, %p4453_p1 }
 0x416   : > { %4463 = shalt.err (!%p4460_p9)  }
 0x417   : > { %s4464_s2 = scalar_lea.vmem %s1085_s18, 16  ;;  %p4469_p12 = scmp.lt.s32.totalorder %s1085_s18, %s5536_s13 }
 0x418   : > { %p4465_p10 = scmp.ne.s32.totalorder %s1085_s18, %s4464_s2  ;;  %p4470_p5 = scmp.lt.s32.totalorder %s5558_s30, %s4464_s2 }
 0x41a   : > { %p4471_p7 = por %p4470_p5, %p4469_p12 }
 0x41c   : > { %p4472_p11 = pnand %p4471_p7, %p4465_p10 }
 0x41e   : > { %4475 = shalt.err (!%p4472_p11)  }
 0x41f   : > { %1087 = dma.hbm_to_vmem [thread:$0]  %s1074_s23, 16, %s1085_s18, [#allocation3 + $0x6] }
 0x420   : > { %5148 = dma.done.wait [#allocation3 + $0x7], 16 }
 0x421   : > { %5149 = vsyncadd [#allocation3 + $0x7], 4294967280  ;;  %s1161_s3 = sadd.s32 40, %s5497_s21  ;;  %s1168_s16 = sadd.s32 41, %s5497_s21 }
 0x422   : > { %s1162_s8 = sld [smem:[#allocation5 + %s1161_s3]]  ;;  %s1175_s22 = sadd.s32 42, %s5497_s21 }
 0x423   : > { %s1169_s9 = sld [smem:[#allocation5 + %s1168_s16]]  ;;  %s1182_s25 = sadd.s32 43, %s5497_s21 }
 0x424   : > { %s1176_s17 = sld [smem:[#allocation5 + %s1175_s22]]  ;;  %s1189_s4 = sadd.s32 44, %s5497_s21 }
 0x425   : > { %s1183_s7 = sld [smem:[#allocation5 + %s1182_s25]]  ;;  %s1196_s12 = sadd.s32 45, %s5497_s21 }
 0x426   : > { %s1190_s6 = sld [smem:[#allocation5 + %s1189_s4]]  ;;  %s1203_s20 = sadd.s32 46, %s5497_s21 }
 0x427   : > { %s1197_s15 = sld [smem:[#allocation5 + %s1196_s12]]  ;;  %s1210_s11 = sadd.s32 47, %s5497_s21 }
 0x428   : > { %p1163_p13 = scmp.gt.s32.totalorder %s1162_s8, 0  ;;  %p3034_p0 = scmp.lt.s32.totalorder %s1162_s8, 63 }
 0x429   : > { %p1170_p1 = scmp.gt.s32.totalorder %s1169_s9, 0  ;;  %p3039_p4 = scmp.lt.s32.totalorder %s1169_s9, 63 }
 0x42a   : > { %s6932_s8 = smov (!%p1163_p13, %s1162_s8), 0  ;;  %p1177_p6 = scmp.gt.s32.totalorder %s1176_s17, 0 }
 0x42b   : > { %s6934_s9 = smov (!%p1170_p1, %s1169_s9), 0  ;;  %s6936_s8 = smov (!%p3034_p0, %s6932_s8), 63 }
 0x42c   : > { %s6938_s9 = smov (!%p3039_p4, %s6934_s9), 63  ;;  %p3044_p8 = scmp.lt.s32.totalorder %s1176_s17, 63 }
 0x42d   : > { %p1184_p2 = scmp.gt.s32.totalorder %s1183_s7, 0  ;;  %p3049_p3 = scmp.lt.s32.totalorder %s1183_s7, 63 }
 0x42e   : > { %s6940_s17 = smov (!%p1177_p6, %s1176_s17), 0  ;;  %p1191_p9 = scmp.gt.s32.totalorder %s1190_s6, 0 }
 0x42f   : > { %s6942_s7 = smov (!%p1184_p2, %s1183_s7), 0  ;;  %s6944_s17 = smov (!%p3044_p8, %s6940_s17), 63 }
 0x430   : > { %s6946_s7 = smov (!%p3049_p3, %s6942_s7), 63  ;;  %p3054_p10 = scmp.lt.s32.totalorder %s1190_s6, 63 }
 0x431   : > { %p1198_p12 = scmp.gt.s32.totalorder %s1197_s15, 0  ;;  %p3059_p5 = scmp.lt.s32.totalorder %s1197_s15, 63 }
 0x432   : > { %s6948_s6 = smov (!%p1191_p9, %s1190_s6), 0  ;;  %s6332_s5 = sld [smem:[#allocation5 + %s1203_s20]] }
 0x433   : > { %s6950_s15 = smov (!%p1198_p12, %s1197_s15), 0  ;;  %s6952_s6 = smov (!%p3054_p10, %s6948_s6), 63 }
 0x434   : > { %s6954_s15 = smov (!%p3059_p5, %s6950_s15), 63  ;;  %s6334_s10 = sld [smem:[#allocation5 + %s1210_s11]] }
 0x435   : > { %s3031_s26 = sshll.u32 %s6842_s19, 4  ;;  %s5333_s24 = smov [#allocation2 + $0x27]  }
 0x436   : > { %s1094_s18 = scalar_lea.hbm %s6746_s1, %s3031_s26  ;;  %s1104_s28 = sshll.u32 %s5333_s24, 4  ;;  %s1105_s28 = int_to_ptr.vmem [resolvable:$true] %s1104_s28 }
 0x437   : > { %s4476_s27 = scalar_lea.hbm %s1094_s18, 16  ;;  %p4479_p11 = scmp.lt.u32.totalorder %s1094_s18, %s6746_s1 }
 0x438   : > { %p4477_p7 = scmp.ne.s32.totalorder %s1094_s18, %s4476_s27  ;;  %p4480_p13 = scmp.lt.u32.totalorder %s5549_s14, %s4476_s27 }
 0x439   : > { %p4482_p1 = scmp.lt.u32.totalorder %s4476_s27, %s1094_s18 }
 0x43a   : > { %p4481_p0 = por %p4480_p13, %p4479_p11 }
 0x43c   : > { %p4483_p4 = por %p4482_p1, %p4481_p0 }
 0x43e   : > { %p4484_p6 = pnand %p4483_p4, %p4477_p7 }
 0x440   : > { %4487 = shalt.err (!%p4484_p6)  }
 0x441   : > { %s4488_s19 = scalar_lea.vmem %s1105_s28, 16  ;;  %p4493_p2 = scmp.lt.s32.totalorder %s1105_s28, %s5536_s13 }
 0x442   : > { %p4489_p8 = scmp.ne.s32.totalorder %s1105_s28, %s4488_s19  ;;  %p4494_p3 = scmp.lt.s32.totalorder %s5558_s30, %s4488_s19 }
 0x444   : > { %p4495_p9 = por %p4494_p3, %p4493_p2 }
 0x446   : > { %p4496_p10 = pnand %p4495_p9, %p4489_p8 }
 0x448   : > { %4499 = shalt.err (!%p4496_p10)  }
 0x449   : > { %1107 = dma.hbm_to_vmem [thread:$0]  %s1094_s18, 16, %s1105_s28, [#allocation3 + $0x7]  ;;  %v1109_v2 = vld [vmem:[#allocation6] sm:$0xff] }
 0x44a   : > { %p1205_p12 = scmp.gt.s32.totalorder %s6332_s5, 0  ;;  %p3064_p5 = scmp.lt.s32.totalorder %s6332_s5, 63  ;;  %v1108_v3 = vld [vmem:[#allocation2] sm:$0xff] }
 0x44b   : > { %p1212_p7 = scmp.gt.s32.totalorder %s6334_s10, 0  ;;  %p3069_p11 = scmp.lt.s32.totalorder %s6334_s10, 63  ;;  %v1110_v4 = vadd.f32 %v1109_v2, %v1108_v3 }
 0x44c   : > { %s6956_s5 = smov (!%p1205_p12, %s6332_s5), 0 }
 0x44d   : > { %s6958_s10 = smov (!%p1212_p7, %s6334_s10), 0  ;;  %s6960_s5 = smov (!%p3064_p5, %s6956_s5), 63  ;;  %1111 = vadd.xlane.f32.xlu0 %v1110_v4 }
 0x44e   : > { %s6962_s10 = smov (!%p3069_p11, %s6958_s10), 63 }
 0x4da   : > { %v1112_v5 = vpop.xlane.xlu0 %1111 }
 0x4db   : > { %v1113_v6 = vmul.f32 0.0078125, %v1112_v5 }
 0x4dd   : > { %v1114_v7 = vsub.f32 %v1110_v4, %v1113_v6 }
 0x4df   : > { %v1115_v8 = vmul.f32 %v1114_v7, %v1114_v7 }
 0x4e1   : > { %1116 = vadd.xlane.f32.xlu0 %v1115_v8 }
 0x56e   : > { %v1117_v9 = vpop.xlane.xlu0 %1116 }
 0x56f   : > { %v1118_v10 = vmul.f32 0.0078125, %v1117_v9 }
 0x571   : > { %v1119_v11 = vadd.f32 1e-12, %v1118_v10 }
 0x573   : > { %3486 = vrsqrt.f32 %v1119_v11 }
 0x57d   : > { %v3487_v12 = vpop.eup %3486 }
 0x57e   : > { %v1121_v13 = vmul.f32 %v3487_v12, %v1114_v7 }
 0x580   : > { %v1128_v14 = vmul.f32 %v5509_v0, %v1121_v13 }
 0x582   : > { %v1135_v15 = vadd.f32 %v5514_v1, %v1128_v14 }
 0x584   : > { %1136 = vst [vmem:[%s6240_s0] sm:$0xff] %v1135_v15 }
 0x585   : > { %5150 = dma.done.wait [#allocation3 + $0x8], 16 }
 0x586   : > { %5151 = vsyncadd [#allocation3 + $0x8], 4294967280  ;;  %s3074_s16 = sshll.u32 %s6936_s8, 4  ;;  %s5334_s12 = smov [#allocation2 + $0x28]  }
 0x587   : > { %s1222_s4 = scalar_lea.hbm %s6746_s1, %s3074_s16  ;;  %s1232_s20 = sshll.u32 %s5334_s12, 4  ;;  %s1233_s20 = int_to_ptr.vmem [resolvable:$true] %s1232_s20 }
 0x588   : > { %s4500_s11 = scalar_lea.hbm %s1222_s4, 16  ;;  %p4503_p0 = scmp.lt.u32.totalorder %s1222_s4, %s6746_s1 }
 0x589   : > { %p4501_p13 = scmp.ne.s32.totalorder %s1222_s4, %s4500_s11  ;;  %p4504_p1 = scmp.lt.u32.totalorder %s5549_s14, %s4500_s11 }
 0x58a   : > { %p4506_p6 = scmp.lt.u32.totalorder %s4500_s11, %s1222_s4 }
 0x58b   : > { %p4505_p4 = por %p4504_p1, %p4503_p0 }
 0x58d   : > { %p4507_p8 = por %p4506_p6, %p4505_p4 }
 0x58f   : > { %p4508_p2 = pnand %p4507_p8, %p4501_p13 }
 0x591   : > { %4511 = shalt.err (!%p4508_p2)  }
 0x592   : > { %s4512_s8 = scalar_lea.vmem %s1233_s20, 16  ;;  %p4517_p9 = scmp.lt.s32.totalorder %s1233_s20, %s5536_s13 }
 0x593   : > { %p4513_p3 = scmp.ne.s32.totalorder %s1233_s20, %s4512_s8  ;;  %p4518_p10 = scmp.lt.s32.totalorder %s5558_s30, %s4512_s8 }
 0x595   : > { %p4519_p12 = por %p4518_p10, %p4517_p9 }
 0x597   : > { %p4520_p5 = pnand %p4519_p12, %p4513_p3 }
 0x599   : > { %4523 = shalt.err (!%p4520_p5)  }
 0x59a   : > { %1235 = dma.hbm_to_vmem [thread:$0]  %s1222_s4, 16, %s1233_s20, [#allocation3 + $0x8] }
 0x59b   : > { %5152 = dma.done.wait [#allocation3 + $0x9], 16 }
 0x59c   : > { %5153 = vsyncadd [#allocation3 + $0x9], 4294967280  ;;  %s3075_s29 = sshll.u32 %s6938_s9, 4  ;;  %s5335_s27 = smov [#allocation2 + $0x29]  }
 0x59d   : > { %s1242_s28 = scalar_lea.hbm %s6746_s1, %s3075_s29  ;;  %s1252_s2 = sshll.u32 %s5335_s27, 4  ;;  %s1253_s2 = int_to_ptr.vmem [resolvable:$true] %s1252_s2 }
 0x59e   : > { %s4524_s3 = scalar_lea.hbm %s1242_s28, 16  ;;  %p4527_p11 = scmp.lt.u32.totalorder %s1242_s28, %s6746_s1 }
 0x59f   : > { %p4525_p7 = scmp.ne.s32.totalorder %s1242_s28, %s4524_s3  ;;  %p4528_p13 = scmp.lt.u32.totalorder %s5549_s14, %s4524_s3 }
 0x5a0   : > { %p4530_p1 = scmp.lt.u32.totalorder %s4524_s3, %s1242_s28 }
 0x5a1   : > { %p4529_p0 = por %p4528_p13, %p4527_p11 }
 0x5a3   : > { %p4531_p4 = por %p4530_p1, %p4529_p0 }
 0x5a5   : > { %p4532_p6 = pnand %p4531_p4, %p4525_p7 }
 0x5a7   : > { %4535 = shalt.err (!%p4532_p6)  }
 0x5a8   : > { %s4536_s9 = scalar_lea.vmem %s1253_s2, 16  ;;  %p4541_p2 = scmp.lt.s32.totalorder %s1253_s2, %s5536_s13 }
 0x5a9   : > { %p4537_p8 = scmp.ne.s32.totalorder %s1253_s2, %s4536_s9  ;;  %p4542_p3 = scmp.lt.s32.totalorder %s5558_s30, %s4536_s9 }
 0x5ab   : > { %p4543_p9 = por %p4542_p3, %p4541_p2 }
 0x5ad   : > { %p4544_p10 = pnand %p4543_p9, %p4537_p8 }
 0x5af   : > { %4547 = shalt.err (!%p4544_p10)  }
 0x5b0   : > { %1255 = dma.hbm_to_vmem [thread:$0]  %s1242_s28, 16, %s1253_s2, [#allocation3 + $0x9] }
 0x5b1   : > { %5154 = dma.done.wait [#allocation3 + $0xa], 16 }
 0x5b2   : > { %5155 = vsyncadd [#allocation3 + $0xa], 4294967280  ;;  %s3076_s22 = sshll.u32 %s6944_s17, 4  ;;  %s5336_s20 = smov [#allocation2 + $0x2a]  }
 0x5b3   : > { %s1262_s12 = scalar_lea.hbm %s6746_s1, %s3076_s22  ;;  %s1272_s11 = sshll.u32 %s5336_s20, 4  ;;  %s1273_s11 = int_to_ptr.vmem [resolvable:$true] %s1272_s11 }
 0x5b4   : > { %s4548_s26 = scalar_lea.hbm %s1262_s12, 16  ;;  %p4551_p5 = scmp.lt.u32.totalorder %s1262_s12, %s6746_s1 }
 0x5b5   : > { %p4549_p12 = scmp.ne.s32.totalorder %s1262_s12, %s4548_s26  ;;  %p4552_p7 = scmp.lt.u32.totalorder %s5549_s14, %s4548_s26 }
 0x5b6   : > { %p4554_p13 = scmp.lt.u32.totalorder %s4548_s26, %s1262_s12 }
 0x5b7   : > { %p4553_p11 = por %p4552_p7, %p4551_p5 }
 0x5b9   : > { %p4555_p0 = por %p4554_p13, %p4553_p11 }
 0x5bb   : > { %p4556_p1 = pnand %p4555_p0, %p4549_p12 }
 0x5bd   : > { %4559 = shalt.err (!%p4556_p1)  }
 0x5be   : > { %s4560_s17 = scalar_lea.vmem %s1273_s11, 16  ;;  %p4565_p6 = scmp.lt.s32.totalorder %s1273_s11, %s5536_s13 }
 0x5bf   : > { %p4561_p4 = scmp.ne.s32.totalorder %s1273_s11, %s4560_s17  ;;  %p4566_p8 = scmp.lt.s32.totalorder %s5558_s30, %s4560_s17 }
 0x5c1   : > { %p4567_p2 = por %p4566_p8, %p4565_p6 }
 0x5c3   : > { %p4568_p3 = pnand %p4567_p2, %p4561_p4 }
 0x5c5   : > { %4571 = shalt.err (!%p4568_p3)  }
 0x5c6   : > { %1275 = dma.hbm_to_vmem [thread:$0]  %s1262_s12, 16, %s1273_s11, [#allocation3 + $0xa] }
 0x5c7   : > { %5156 = dma.done.wait [#allocation3 + $0xb], 16 }
 0x5c8   : > { %5157 = vsyncadd [#allocation3 + $0xb], 4294967280  ;;  %s3077_s29 = sshll.u32 %s6946_s7, 4  ;;  %s5337_s27 = smov [#allocation2 + $0x2b]  }
 0x5c9   : > { %s1282_s28 = scalar_lea.hbm %s6746_s1, %s3077_s29  ;;  %s1292_s2 = sshll.u32 %s5337_s27, 4  ;;  %s1293_s2 = int_to_ptr.vmem [resolvable:$true] %s1292_s2 }
 0x5ca   : > { %s4572_s3 = scalar_lea.hbm %s1282_s28, 16  ;;  %p4575_p10 = scmp.lt.u32.totalorder %s1282_s28, %s6746_s1 }
 0x5cb   : > { %p4573_p9 = scmp.ne.s32.totalorder %s1282_s28, %s4572_s3  ;;  %p4576_p12 = scmp.lt.u32.totalorder %s5549_s14, %s4572_s3 }
 0x5cc   : > { %p4578_p7 = scmp.lt.u32.totalorder %s4572_s3, %s1282_s28 }
 0x5cd   : > { %p4577_p5 = por %p4576_p12, %p4575_p10 }
 0x5cf   : > { %p4579_p11 = por %p4578_p7, %p4577_p5 }
 0x5d1   : > { %p4580_p13 = pnand %p4579_p11, %p4573_p9 }
 0x5d3   : > { %4583 = shalt.err (!%p4580_p13)  }
 0x5d4   : > { %s4584_s7 = scalar_lea.vmem %s1293_s2, 16  ;;  %p4589_p1 = scmp.lt.s32.totalorder %s1293_s2, %s5536_s13 }
 0x5d5   : > { %p4585_p0 = scmp.ne.s32.totalorder %s1293_s2, %s4584_s7  ;;  %p4590_p4 = scmp.lt.s32.totalorder %s5558_s30, %s4584_s7 }
 0x5d7   : > { %p4591_p6 = por %p4590_p4, %p4589_p1 }
 0x5d9   : > { %p4592_p8 = pnand %p4591_p6, %p4585_p0 }
 0x5db   : > { %4595 = shalt.err (!%p4592_p8)  }
 0x5dc   : > { %1295 = dma.hbm_to_vmem [thread:$0]  %s1282_s28, 16, %s1293_s2, [#allocation3 + $0xb] }
 0x5dd   : > { %5158 = dma.done.wait [#allocation3 + $0xc], 16 }
 0x5de   : > { %5159 = vsyncadd [#allocation3 + $0xc], 4294967280  ;;  %s3078_s9 = sshll.u32 %s6952_s6, 4  ;;  %s5338_s12 = smov [#allocation2 + $0x2c]  }
 0x5df   : > { %s1302_s4 = scalar_lea.hbm %s6746_s1, %s3078_s9  ;;  %s1312_s20 = sshll.u32 %s5338_s12, 4  ;;  %s1313_s20 = int_to_ptr.vmem [resolvable:$true] %s1312_s20 }
 0x5e0   : > { %s4596_s11 = scalar_lea.hbm %s1302_s4, 16  ;;  %p4599_p3 = scmp.lt.u32.totalorder %s1302_s4, %s6746_s1 }
 0x5e1   : > { %p4597_p2 = scmp.ne.s32.totalorder %s1302_s4, %s4596_s11  ;;  %p4600_p9 = scmp.lt.u32.totalorder %s5549_s14, %s4596_s11 }
 0x5e2   : > { %p4602_p12 = scmp.lt.u32.totalorder %s4596_s11, %s1302_s4 }
 0x5e3   : > { %p4601_p10 = por %p4600_p9, %p4599_p3 }
 0x5e5   : > { %p4603_p5 = por %p4602_p12, %p4601_p10 }
 0x5e7   : > { %p4604_p7 = pnand %p4603_p5, %p4597_p2 }
 0x5e9   : > { %4607 = shalt.err (!%p4604_p7)  }
 0x5ea   : > { %s4608_s6 = scalar_lea.vmem %s1313_s20, 16  ;;  %p4613_p13 = scmp.lt.s32.totalorder %s1313_s20, %s5536_s13 }
 0x5eb   : > { %p4609_p11 = scmp.ne.s32.totalorder %s1313_s20, %s4608_s6  ;;  %p4614_p0 = scmp.lt.s32.totalorder %s5558_s30, %s4608_s6 }
 0x5ed   : > { %p4615_p1 = por %p4614_p0, %p4613_p13 }
 0x5ef   : > { %p4616_p4 = pnand %p4615_p1, %p4609_p11 }
 0x5f1   : > { %4619 = shalt.err (!%p4616_p4)  }
 0x5f2   : > { %1315 = dma.hbm_to_vmem [thread:$0]  %s1302_s4, 16, %s1313_s20, [#allocation3 + $0xc] }
 0x5f3   : > { %5160 = dma.done.wait [#allocation3 + $0xd], 16 }
 0x5f4   : > { %5161 = vsyncadd [#allocation3 + $0xd], 4294967280  ;;  %s3079_s8 = sshll.u32 %s6954_s15, 4  ;;  %s5339_s24 = smov [#allocation2 + $0x2d]  }
 0x5f5   : > { %s1322_s18 = scalar_lea.hbm %s6746_s1, %s3079_s8  ;;  %s1332_s28 = sshll.u32 %s5339_s24, 4  ;;  %s1333_s28 = int_to_ptr.vmem [resolvable:$true] %s1332_s28 }
 0x5f6   : > { %s4620_s27 = scalar_lea.hbm %s1322_s18, 16  ;;  %p4623_p8 = scmp.lt.u32.totalorder %s1322_s18, %s6746_s1 }
 0x5f7   : > { %p4621_p6 = scmp.ne.s32.totalorder %s1322_s18, %s4620_s27  ;;  %p4624_p2 = scmp.lt.u32.totalorder %s5549_s14, %s4620_s27 }
 0x5f8   : > { %p4626_p9 = scmp.lt.u32.totalorder %s4620_s27, %s1322_s18 }
 0x5f9   : > { %p4625_p3 = por %p4624_p2, %p4623_p8 }
 0x5fb   : > { %p4627_p10 = por %p4626_p9, %p4625_p3 }
 0x5fd   : > { %p4628_p12 = pnand %p4627_p10, %p4621_p6 }
 0x5ff   : > { %4631 = shalt.err (!%p4628_p12)  }
 0x600   : > { %s4632_s15 = scalar_lea.vmem %s1333_s28, 16  ;;  %p4637_p7 = scmp.lt.s32.totalorder %s1333_s28, %s5536_s13 }
 0x601   : > { %p4633_p5 = scmp.ne.s32.totalorder %s1333_s28, %s4632_s15  ;;  %p4638_p11 = scmp.lt.s32.totalorder %s5558_s30, %s4632_s15 }
 0x603   : > { %p4639_p13 = por %p4638_p11, %p4637_p7 }
 0x605   : > { %p4640_p0 = pnand %p4639_p13, %p4633_p5 }
 0x607   : > { %4643 = shalt.err (!%p4640_p0)  }
 0x608   : > { %1335 = dma.hbm_to_vmem [thread:$0]  %s1322_s18, 16, %s1333_s28, [#allocation3 + $0xd] }
 0x609   : > { %5162 = dma.done.wait [#allocation3 + $0xe], 16 }
 0x60a   : > { %5163 = vsyncadd [#allocation3 + $0xe], 4294967280  ;;  %s3080_s19 = sshll.u32 %s6960_s5, 4  ;;  %s5340_s22 = smov [#allocation2 + $0x2e]  }
 0x60b   : > { %s1342_s9 = scalar_lea.hbm %s6746_s1, %s3080_s19  ;;  %s1352_s25 = sshll.u32 %s5340_s22, 4  ;;  %s1353_s25 = int_to_ptr.vmem [resolvable:$true] %s1352_s25 }
 0x60c   : > { %s4644_s4 = scalar_lea.hbm %s1342_s9, 16  ;;  %p4647_p4 = scmp.lt.u32.totalorder %s1342_s9, %s6746_s1 }
 0x60d   : > { %p4645_p1 = scmp.ne.s32.totalorder %s1342_s9, %s4644_s4  ;;  %p4648_p6 = scmp.lt.u32.totalorder %s5549_s14, %s4644_s4 }
 0x60e   : > { %p4650_p2 = scmp.lt.u32.totalorder %s4644_s4, %s1342_s9 }
 0x60f   : > { %p4649_p8 = por %p4648_p6, %p4647_p4 }
 0x611   : > { %p4651_p3 = por %p4650_p2, %p4649_p8 }
 0x613   : > { %p4652_p9 = pnand %p4651_p3, %p4645_p1 }
 0x615   : > { %4655 = shalt.err (!%p4652_p9)  }
 0x616   : > { %s4656_s5 = scalar_lea.vmem %s1353_s25, 16  ;;  %p4661_p12 = scmp.lt.s32.totalorder %s1353_s25, %s5536_s13 }
 0x617   : > { %p4657_p10 = scmp.ne.s32.totalorder %s1353_s25, %s4656_s5  ;;  %p4662_p5 = scmp.lt.s32.totalorder %s5558_s30, %s4656_s5 }
 0x619   : > { %p4663_p7 = por %p4662_p5, %p4661_p12 }
 0x61b   : > { %p4664_p11 = pnand %p4663_p7, %p4657_p10 }
 0x61d   : > { %4667 = shalt.err (!%p4664_p11)  }
 0x61e   : > { %1355 = dma.hbm_to_vmem [thread:$0]  %s1342_s9, 16, %s1353_s25, [#allocation3 + $0xe] }
 0x61f   : > { %5164 = dma.done.wait [#allocation3 + $0xf], 16 }
 0x620   : > { %5165 = vsyncadd [#allocation3 + $0xf], 4294967280  ;;  %s1420_s11 = sadd.s32 48, %s5497_s21  ;;  %s1427_s26 = sadd.s32 49, %s5497_s21 }
 0x621   : > { %s1421_s23 = sld [smem:[#allocation5 + %s1420_s11]]  ;;  %s1434_s8 = sadd.s32 50, %s5497_s21 }
 0x622   : > { %s1428_s6 = sld [smem:[#allocation5 + %s1427_s26]]  ;;  %s1441_s17 = sadd.s32 51, %s5497_s21 }
 0x623   : > { %s1435_s29 = sld [smem:[#allocation5 + %s1434_s8]]  ;;  %s1448_s24 = sadd.s32 52, %s5497_s21 }
 0x624   : > { %s1442_s18 = sld [smem:[#allocation5 + %s1441_s17]]  ;;  %s1455_s28 = sadd.s32 53, %s5497_s21 }
 0x625   : > { %s1449_s27 = sld [smem:[#allocation5 + %s1448_s24]]  ;;  %s1462_s3 = sadd.s32 54, %s5497_s21 }
 0x626   : > { %s1456_s2 = sld [smem:[#allocation5 + %s1455_s28]]  ;;  %s1469_s15 = sadd.s32 55, %s5497_s21 }
 0x627   : > { %p1422_p13 = scmp.gt.s32.totalorder %s1421_s23, 0  ;;  %p3083_p0 = scmp.lt.s32.totalorder %s1421_s23, 63 }
 0x628   : > { %p1429_p1 = scmp.gt.s32.totalorder %s1428_s6, 0  ;;  %p3088_p4 = scmp.lt.s32.totalorder %s1428_s6, 63 }
 0x629   : > { %s6964_s23 = smov (!%p1422_p13, %s1421_s23), 0  ;;  %p1436_p6 = scmp.gt.s32.totalorder %s1435_s29, 0 }
 0x62a   : > { %s6966_s6 = smov (!%p1429_p1, %s1428_s6), 0  ;;  %s6968_s23 = smov (!%p3083_p0, %s6964_s23), 63 }
 0x62b   : > { %s6970_s6 = smov (!%p3088_p4, %s6966_s6), 63  ;;  %p3093_p8 = scmp.lt.s32.totalorder %s1435_s29, 63 }
 0x62c   : > { %p1443_p2 = scmp.gt.s32.totalorder %s1442_s18, 0  ;;  %p3098_p3 = scmp.lt.s32.totalorder %s1442_s18, 63 }
 0x62d   : > { %s6972_s29 = smov (!%p1436_p6, %s1435_s29), 0  ;;  %p1450_p9 = scmp.gt.s32.totalorder %s1449_s27, 0 }
 0x62e   : > { %s6974_s18 = smov (!%p1443_p2, %s1442_s18), 0  ;;  %s6976_s29 = smov (!%p3093_p8, %s6972_s29), 63 }
 0x62f   : > { %s6978_s18 = smov (!%p3098_p3, %s6974_s18), 63  ;;  %p3103_p10 = scmp.lt.s32.totalorder %s1449_s27, 63 }
 0x630   : > { %p1457_p12 = scmp.gt.s32.totalorder %s1456_s2, 0  ;;  %p3108_p5 = scmp.lt.s32.totalorder %s1456_s2, 63 }
 0x631   : > { %s6980_s27 = smov (!%p1450_p9, %s1449_s27), 0  ;;  %s6449_s19 = sld [smem:[#allocation5 + %s1462_s3]] }
 0x632   : > { %s6982_s2 = smov (!%p1457_p12, %s1456_s2), 0  ;;  %s6984_s27 = smov (!%p3103_p10, %s6980_s27), 63 }
 0x633   : > { %s6986_s2 = smov (!%p3108_p5, %s6982_s2), 63  ;;  %s6451_s16 = sld [smem:[#allocation5 + %s1469_s15]] }
 0x634   : > { %s3081_s7 = sshll.u32 %s6962_s10, 4  ;;  %s5341_s4 = smov [#allocation2 + $0x2f]  }
 0x635   : > { %s1362_s25 = scalar_lea.hbm %s6746_s1, %s3081_s7  ;;  %s1372_s12 = sshll.u32 %s5341_s4, 4  ;;  %s1373_s12 = int_to_ptr.vmem [resolvable:$true] %s1372_s12 }
 0x636   : > { %s4668_s20 = scalar_lea.hbm %s1362_s25, 16  ;;  %p4671_p11 = scmp.lt.u32.totalorder %s1362_s25, %s6746_s1 }
 0x637   : > { %p4669_p7 = scmp.ne.s32.totalorder %s1362_s25, %s4668_s20  ;;  %p4672_p13 = scmp.lt.u32.totalorder %s5549_s14, %s4668_s20 }
 0x638   : > { %p4674_p1 = scmp.lt.u32.totalorder %s4668_s20, %s1362_s25 }
 0x639   : > { %p4673_p0 = por %p4672_p13, %p4671_p11 }
 0x63b   : > { %p4675_p4 = por %p4674_p1, %p4673_p0 }
 0x63d   : > { %p4676_p6 = pnand %p4675_p4, %p4669_p7 }
 0x63f   : > { %4679 = shalt.err (!%p4676_p6)  }
 0x640   : > { %s4680_s10 = scalar_lea.vmem %s1373_s12, 16  ;;  %p4685_p2 = scmp.lt.s32.totalorder %s1373_s12, %s5536_s13 }
 0x641   : > { %p4681_p8 = scmp.ne.s32.totalorder %s1373_s12, %s4680_s10  ;;  %p4686_p3 = scmp.lt.s32.totalorder %s5558_s30, %s4680_s10 }
 0x643   : > { %p4687_p9 = por %p4686_p3, %p4685_p2 }
 0x645   : > { %p4688_p10 = pnand %p4687_p9, %p4681_p8 }
 0x647   : > { %4691 = shalt.err (!%p4688_p10)  }
 0x648   : > { %1375 = dma.hbm_to_vmem [thread:$0]  %s1362_s25, 16, %s1373_s12, [#allocation3 + $0xf]  ;;  %v1379_v16 = vld [vmem:[#allocation6 + $0x8] sm:$0xff] }
 0x649   : > { %p1464_p12 = scmp.gt.s32.totalorder %s6449_s19, 0  ;;  %p3113_p5 = scmp.lt.s32.totalorder %s6449_s19, 63  ;;  %v1377_v17 = vld [vmem:[#allocation2 + $0x8] sm:$0xff] }
 0x64a   : > { %p1471_p7 = scmp.gt.s32.totalorder %s6451_s16, 0  ;;  %p3118_p11 = scmp.lt.s32.totalorder %s6451_s16, 63  ;;  %v1380_v18 = vadd.f32 %v1379_v16, %v1377_v17 }
 0x64b   : > { %s6988_s19 = smov (!%p1464_p12, %s6449_s19), 0 }
 0x64c   : > { %s6990_s16 = smov (!%p1471_p7, %s6451_s16), 0  ;;  %s6992_s19 = smov (!%p3113_p5, %s6988_s19), 63  ;;  %1381 = vadd.xlane.f32.xlu0 %v1380_v18 }
 0x64d   : > { %s6994_s16 = smov (!%p3118_p11, %s6990_s16), 63 }
 0x6d9   : > { %v1382_v19 = vpop.xlane.xlu0 %1381 }
 0x6da   : > { %v1383_v20 = vmul.f32 0.0078125, %v1382_v19 }
 0x6dc   : > { %v1384_v21 = vsub.f32 %v1380_v18, %v1383_v20 }
 0x6de   : > { %v1385_v22 = vmul.f32 %v1384_v21, %v1384_v21 }
 0x6e0   : > { %1386 = vadd.xlane.f32.xlu0 %v1385_v22 }
 0x76d   : > { %v1387_v23 = vpop.xlane.xlu0 %1386 }
 0x76e   : > { %v1388_v24 = vmul.f32 0.0078125, %v1387_v23 }
 0x770   : > { %v1389_v25 = vadd.f32 1e-12, %v1388_v24 }
 0x772   : > { %3488 = vrsqrt.f32 %v1389_v25 }
 0x77c   : > { %v3489_v26 = vpop.eup %3488 }
 0x77d   : > { %v1391_v27 = vmul.f32 %v3489_v26, %v1384_v21 }
 0x77f   : > { %v1392_v28 = vmul.f32 %v5509_v0, %v1391_v27 }
 0x781   : > { %v1393_v29 = vadd.f32 %v5514_v1, %v1392_v28 }
 0x783   : > { %3082 = vst [vmem:[%s6240_s0 + $0x8] sm:$0xff] %v1393_v29 }
 0x784   : > { %5166 = dma.done.wait [#allocation3 + $0x10], 16 }
 0x785   : > { %5167 = vsyncadd [#allocation3 + $0x10], 4294967280  ;;  %s3123_s26 = sshll.u32 %s6968_s23, 4  ;;  %s5342_s28 = smov [#allocation2 + $0x30]  }
 0x786   : > { %s1481_s24 = scalar_lea.hbm %s6746_s1, %s3123_s26  ;;  %s1491_s3 = sshll.u32 %s5342_s28, 4  ;;  %s1492_s3 = int_to_ptr.vmem [resolvable:$true] %s1491_s3 }
 0x787   : > { %s4692_s15 = scalar_lea.hbm %s1481_s24, 16  ;;  %p4695_p0 = scmp.lt.u32.totalorder %s1481_s24, %s6746_s1 }
 0x788   : > { %p4693_p13 = scmp.ne.s32.totalorder %s1481_s24, %s4692_s15  ;;  %p4696_p1 = scmp.lt.u32.totalorder %s5549_s14, %s4692_s15 }
 0x789   : > { %p4698_p6 = scmp.lt.u32.totalorder %s4692_s15, %s1481_s24 }
 0x78a   : > { %p4697_p4 = por %p4696_p1, %p4695_p0 }
 0x78c   : > { %p4699_p8 = por %p4698_p6, %p4697_p4 }
 0x78e   : > { %p4700_p2 = pnand %p4699_p8, %p4693_p13 }
 0x790   : > { %4703 = shalt.err (!%p4700_p2)  }
 0x791   : > { %s4704_s23 = scalar_lea.vmem %s1492_s3, 16  ;;  %p4709_p9 = scmp.lt.s32.totalorder %s1492_s3, %s5536_s13 }
 0x792   : > { %p4705_p3 = scmp.ne.s32.totalorder %s1492_s3, %s4704_s23  ;;  %p4710_p10 = scmp.lt.s32.totalorder %s5558_s30, %s4704_s23 }
 0x794   : > { %p4711_p12 = por %p4710_p10, %p4709_p9 }
 0x796   : > { %p4712_p5 = pnand %p4711_p12, %p4705_p3 }
 0x798   : > { %4715 = shalt.err (!%p4712_p5)  }
 0x799   : > { %1494 = dma.hbm_to_vmem [thread:$0]  %s1481_s24, 16, %s1492_s3, [#allocation3 + $0x10] }
 0x79a   : > { %5168 = dma.done.wait [#allocation3 + $0x11], 16 }
 0x79b   : > { %5169 = vsyncadd [#allocation3 + $0x11], 4294967280  ;;  %s3124_s22 = sshll.u32 %s6970_s6, 4  ;;  %s5343_s20 = smov [#allocation2 + $0x31]  }
 0x79c   : > { %s1501_s12 = scalar_lea.hbm %s6746_s1, %s3124_s22  ;;  %s1511_s5 = sshll.u32 %s5343_s20, 4  ;;  %s1512_s5 = int_to_ptr.vmem [resolvable:$true] %s1511_s5 }
 0x79d   : > { %s4716_s11 = scalar_lea.hbm %s1501_s12, 16  ;;  %p4719_p11 = scmp.lt.u32.totalorder %s1501_s12, %s6746_s1 }
 0x79e   : > { %p4717_p7 = scmp.ne.s32.totalorder %s1501_s12, %s4716_s11  ;;  %p4720_p13 = scmp.lt.u32.totalorder %s5549_s14, %s4716_s11 }
 0x79f   : > { %p4722_p1 = scmp.lt.u32.totalorder %s4716_s11, %s1501_s12 }
 0x7a0   : > { %p4721_p0 = por %p4720_p13, %p4719_p11 }
 0x7a2   : > { %p4723_p4 = por %p4722_p1, %p4721_p0 }
 0x7a4   : > { %p4724_p6 = pnand %p4723_p4, %p4717_p7 }
 0x7a6   : > { %4727 = shalt.err (!%p4724_p6)  }
 0x7a7   : > { %s4728_s6 = scalar_lea.vmem %s1512_s5, 16  ;;  %p4733_p2 = scmp.lt.s32.totalorder %s1512_s5, %s5536_s13 }
 0x7a8   : > { %p4729_p8 = scmp.ne.s32.totalorder %s1512_s5, %s4728_s6  ;;  %p4734_p3 = scmp.lt.s32.totalorder %s5558_s30, %s4728_s6 }
 0x7aa   : > { %p4735_p9 = por %p4734_p3, %p4733_p2 }
 0x7ac   : > { %p4736_p10 = pnand %p4735_p9, %p4729_p8 }
 0x7ae   : > { %4739 = shalt.err (!%p4736_p10)  }
 0x7af   : > { %1514 = dma.hbm_to_vmem [thread:$0]  %s1501_s12, 16, %s1512_s5, [#allocation3 + $0x11] }
 0x7b0   : > { %5170 = dma.done.wait [#allocation3 + $0x12], 16 }
 0x7b1   : > { %5171 = vsyncadd [#allocation3 + $0x12], 4294967280  ;;  %s3125_s8 = sshll.u32 %s6976_s29, 4  ;;  %s5344_s3 = smov [#allocation2 + $0x32]  }
 0x7b2   : > { %s1521_s28 = scalar_lea.hbm %s6746_s1, %s3125_s8  ;;  %s1531_s15 = sshll.u32 %s5344_s3, 4  ;;  %s1532_s15 = int_to_ptr.vmem [resolvable:$true] %s1531_s15 }
 0x7b3   : > { %s4740_s7 = scalar_lea.hbm %s1521_s28, 16  ;;  %p4743_p5 = scmp.lt.u32.totalorder %s1521_s28, %s6746_s1 }
 0x7b4   : > { %p4741_p12 = scmp.ne.s32.totalorder %s1521_s28, %s4740_s7  ;;  %p4744_p7 = scmp.lt.u32.totalorder %s5549_s14, %s4740_s7 }
 0x7b5   : > { %p4746_p13 = scmp.lt.u32.totalorder %s4740_s7, %s1521_s28 }
 0x7b6   : > { %p4745_p11 = por %p4744_p7, %p4743_p5 }
 0x7b8   : > { %p4747_p0 = por %p4746_p13, %p4745_p11 }
 0x7ba   : > { %p4748_p1 = pnand %p4747_p0, %p4741_p12 }
 0x7bc   : > { %4751 = shalt.err (!%p4748_p1)  }
 0x7bd   : > { %s4752_s29 = scalar_lea.vmem %s1532_s15, 16  ;;  %p4757_p6 = scmp.lt.s32.totalorder %s1532_s15, %s5536_s13 }
 0x7be   : > { %p4753_p4 = scmp.ne.s32.totalorder %s1532_s15, %s4752_s29  ;;  %p4758_p8 = scmp.lt.s32.totalorder %s5558_s30, %s4752_s29 }
 0x7c0   : > { %p4759_p2 = por %p4758_p8, %p4757_p6 }
 0x7c2   : > { %p4760_p3 = pnand %p4759_p2, %p4753_p4 }
 0x7c4   : > { %4763 = shalt.err (!%p4760_p3)  }
 0x7c5   : > { %1534 = dma.hbm_to_vmem [thread:$0]  %s1521_s28, 16, %s1532_s15, [#allocation3 + $0x12] }
 0x7c6   : > { %5172 = dma.done.wait [#allocation3 + $0x13], 16 }
 0x7c7   : > { %5173 = vsyncadd [#allocation3 + $0x13], 4294967280  ;;  %s3126_s22 = sshll.u32 %s6978_s18, 4  ;;  %s5345_s20 = smov [#allocation2 + $0x33]  }
 0x7c8   : > { %s1541_s12 = scalar_lea.hbm %s6746_s1, %s3126_s22  ;;  %s1551_s5 = sshll.u32 %s5345_s20, 4  ;;  %s1552_s5 = int_to_ptr.vmem [resolvable:$true] %s1551_s5 }
 0x7c9   : > { %s4764_s11 = scalar_lea.hbm %s1541_s12, 16  ;;  %p4767_p10 = scmp.lt.u32.totalorder %s1541_s12, %s6746_s1 }
 0x7ca   : > { %p4765_p9 = scmp.ne.s32.totalorder %s1541_s12, %s4764_s11  ;;  %p4768_p12 = scmp.lt.u32.totalorder %s5549_s14, %s4764_s11 }
 0x7cb   : > { %p4770_p7 = scmp.lt.u32.totalorder %s4764_s11, %s1541_s12 }
 0x7cc   : > { %p4769_p5 = por %p4768_p12, %p4767_p10 }
 0x7ce   : > { %p4771_p11 = por %p4770_p7, %p4769_p5 }
 0x7d0   : > { %p4772_p13 = pnand %p4771_p11, %p4765_p9 }
 0x7d2   : > { %4775 = shalt.err (!%p4772_p13)  }
 0x7d3   : > { %s4776_s18 = scalar_lea.vmem %s1552_s5, 16  ;;  %p4781_p1 = scmp.lt.s32.totalorder %s1552_s5, %s5536_s13 }
 0x7d4   : > { %p4777_p0 = scmp.ne.s32.totalorder %s1552_s5, %s4776_s18  ;;  %p4782_p4 = scmp.lt.s32.totalorder %s5558_s30, %s4776_s18 }
 0x7d6   : > { %p4783_p6 = por %p4782_p4, %p4781_p1 }
 0x7d8   : > { %p4784_p8 = pnand %p4783_p6, %p4777_p0 }
 0x7da   : > { %4787 = shalt.err (!%p4784_p8)  }
 0x7db   : > { %1554 = dma.hbm_to_vmem [thread:$0]  %s1541_s12, 16, %s1552_s5, [#allocation3 + $0x13] }
 0x7dc   : > { %5174 = dma.done.wait [#allocation3 + $0x14], 16 }
 0x7dd   : > { %5175 = vsyncadd [#allocation3 + $0x14], 4294967280  ;;  %s3127_s6 = sshll.u32 %s6984_s27, 4  ;;  %s5346_s28 = smov [#allocation2 + $0x34]  }
 0x7de   : > { %s1561_s24 = scalar_lea.hbm %s6746_s1, %s3127_s6  ;;  %s1571_s3 = sshll.u32 %s5346_s28, 4  ;;  %s1572_s3 = int_to_ptr.vmem [resolvable:$true] %s1571_s3 }
 0x7df   : > { %s4788_s15 = scalar_lea.hbm %s1561_s24, 16  ;;  %p4791_p3 = scmp.lt.u32.totalorder %s1561_s24, %s6746_s1 }
 0x7e0   : > { %p4789_p2 = scmp.ne.s32.totalorder %s1561_s24, %s4788_s15  ;;  %p4792_p9 = scmp.lt.u32.totalorder %s5549_s14, %s4788_s15 }
 0x7e1   : > { %p4794_p12 = scmp.lt.u32.totalorder %s4788_s15, %s1561_s24 }
 0x7e2   : > { %p4793_p10 = por %p4792_p9, %p4791_p3 }
 0x7e4   : > { %p4795_p5 = por %p4794_p12, %p4793_p10 }
 0x7e6   : > { %p4796_p7 = pnand %p4795_p5, %p4789_p2 }
 0x7e8   : > { %4799 = shalt.err (!%p4796_p7)  }
 0x7e9   : > { %s4800_s27 = scalar_lea.vmem %s1572_s3, 16  ;;  %p4805_p13 = scmp.lt.s32.totalorder %s1572_s3, %s5536_s13 }
 0x7ea   : > { %p4801_p11 = scmp.ne.s32.totalorder %s1572_s3, %s4800_s27  ;;  %p4806_p0 = scmp.lt.s32.totalorder %s5558_s30, %s4800_s27 }
 0x7ec   : > { %p4807_p1 = por %p4806_p0, %p4805_p13 }
 0x7ee   : > { %p4808_p4 = pnand %p4807_p1, %p4801_p11 }
 0x7f0   : > { %4811 = shalt.err (!%p4808_p4)  }
 0x7f1   : > { %1574 = dma.hbm_to_vmem [thread:$0]  %s1561_s24, 16, %s1572_s3, [#allocation3 + $0x14] }
 0x7f2   : > { %5176 = dma.done.wait [#allocation3 + $0x15], 16 }
 0x7f3   : > { %5177 = vsyncadd [#allocation3 + $0x15], 4294967280  ;;  %s3128_s23 = sshll.u32 %s6986_s2, 4  ;;  %s5347_s4 = smov [#allocation2 + $0x35]  }
 0x7f4   : > { %s1581_s25 = scalar_lea.hbm %s6746_s1, %s3128_s23  ;;  %s1591_s12 = sshll.u32 %s5347_s4, 4  ;;  %s1592_s12 = int_to_ptr.vmem [resolvable:$true] %s1591_s12 }
 0x7f5   : > { %s4812_s20 = scalar_lea.hbm %s1581_s25, 16  ;;  %p4815_p8 = scmp.lt.u32.totalorder %s1581_s25, %s6746_s1 }
 0x7f6   : > { %p4813_p6 = scmp.ne.s32.totalorder %s1581_s25, %s4812_s20  ;;  %p4816_p2 = scmp.lt.u32.totalorder %s5549_s14, %s4812_s20 }
 0x7f7   : > { %p4818_p9 = scmp.lt.u32.totalorder %s4812_s20, %s1581_s25 }
 0x7f8   : > { %p4817_p3 = por %p4816_p2, %p4815_p8 }
 0x7fa   : > { %p4819_p10 = por %p4818_p9, %p4817_p3 }
 0x7fc   : > { %p4820_p12 = pnand %p4819_p10, %p4813_p6 }
 0x7fe   : > { %4823 = shalt.err (!%p4820_p12)  }
 0x7ff   : > { %s4824_s2 = scalar_lea.vmem %s1592_s12, 16  ;;  %p4829_p7 = scmp.lt.s32.totalorder %s1592_s12, %s5536_s13 }
 0x800   : > { %p4825_p5 = scmp.ne.s32.totalorder %s1592_s12, %s4824_s2  ;;  %p4830_p11 = scmp.lt.s32.totalorder %s5558_s30, %s4824_s2 }
 0x802   : > { %p4831_p13 = por %p4830_p11, %p4829_p7 }
 0x804   : > { %p4832_p0 = pnand %p4831_p13, %p4825_p5 }
 0x806   : > { %4835 = shalt.err (!%p4832_p0)  }
 0x807   : > { %1594 = dma.hbm_to_vmem [thread:$0]  %s1581_s25, 16, %s1592_s12, [#allocation3 + $0x15] }
 0x808   : > { %5178 = dma.done.wait [#allocation3 + $0x16], 16 }
 0x809   : > { %5179 = vsyncadd [#allocation3 + $0x16], 4294967280  ;;  %s3129_s10 = sshll.u32 %s6992_s19, 4  ;;  %s5348_s8 = smov [#allocation2 + $0x36]  }
 0x80a   : > { %s1601_s6 = scalar_lea.hbm %s6746_s1, %s3129_s10  ;;  %s1611_s17 = sshll.u32 %s5348_s8, 4  ;;  %s1612_s17 = int_to_ptr.vmem [resolvable:$true] %s1611_s17 }
 0x80b   : > { %s4836_s24 = scalar_lea.hbm %s1601_s6, 16  ;;  %p4839_p4 = scmp.lt.u32.totalorder %s1601_s6, %s6746_s1 }
 0x80c   : > { %p4837_p1 = scmp.ne.s32.totalorder %s1601_s6, %s4836_s24  ;;  %p4840_p6 = scmp.lt.u32.totalorder %s5549_s14, %s4836_s24 }
 0x80d   : > { %p4842_p2 = scmp.lt.u32.totalorder %s4836_s24, %s1601_s6 }
 0x80e   : > { %p4841_p8 = por %p4840_p6, %p4839_p4 }
 0x810   : > { %p4843_p3 = por %p4842_p2, %p4841_p8 }
 0x812   : > { %p4844_p9 = pnand %p4843_p3, %p4837_p1 }
 0x814   : > { %4847 = shalt.err (!%p4844_p9)  }
 0x815   : > { %s4848_s19 = scalar_lea.vmem %s1612_s17, 16  ;;  %p4853_p12 = scmp.lt.s32.totalorder %s1612_s17, %s5536_s13 }
 0x816   : > { %p4849_p10 = scmp.ne.s32.totalorder %s1612_s17, %s4848_s19  ;;  %p4854_p5 = scmp.lt.s32.totalorder %s5558_s30, %s4848_s19 }
 0x818   : > { %p4855_p7 = por %p4854_p5, %p4853_p12 }
 0x81a   : > { %p4856_p11 = pnand %p4855_p7, %p4849_p10 }
 0x81c   : > { %4859 = shalt.err (!%p4856_p11)  }
 0x81d   : > { %1614 = dma.hbm_to_vmem [thread:$0]  %s1601_s6, 16, %s1612_s17, [#allocation3 + $0x16] }
 0x81e   : > { %5180 = dma.done.wait [#allocation3 + $0x17], 16 }
 0x81f   : > { %5181 = vsyncadd [#allocation3 + $0x17], 4294967280  ;;  %s1679_s15 = sadd.s32 56, %s5497_s21  ;;  %s1686_s7 = sadd.s32 57, %s5497_s21 }
 0x820   : > { %s1680_s9 = sld [smem:[#allocation5 + %s1679_s15]]  ;;  %s1693_s23 = sadd.s32 58, %s5497_s21 }
 0x821   : > { %s1687_s27 = sld [smem:[#allocation5 + %s1686_s7]]  ;;  %s1700_s29 = sadd.s32 59, %s5497_s21 }
 0x822   : > { %s1694_s22 = sld [smem:[#allocation5 + %s1693_s23]]  ;;  %s1707_s4 = sadd.s32 60, %s5497_s21 }
 0x823   : > { %s1701_s25 = sld [smem:[#allocation5 + %s1700_s29]]  ;;  %s1714_s12 = sadd.s32 61, %s5497_s21 }
 0x824   : > { %s1708_s20 = sld [smem:[#allocation5 + %s1707_s4]]  ;;  %s1721_s11 = sadd.s32 62, %s5497_s21 }
 0x825   : > { %s1715_s5 = sld [smem:[#allocation5 + %s1714_s12]]  ;;  %s1728_s2 = sadd.s32 63, %s5497_s21 }
 0x826   : > { %p1681_p13 = scmp.gt.s32.totalorder %s1680_s9, 0  ;;  %p3132_p0 = scmp.lt.s32.totalorder %s1680_s9, 63 }
 0x827   : > { %p1688_p1 = scmp.gt.s32.totalorder %s1687_s27, 0  ;;  %p3137_p4 = scmp.lt.s32.totalorder %s1687_s27, 63 }
 0x828   : > { %s6996_s9 = smov (!%p1681_p13, %s1680_s9), 0  ;;  %p1695_p6 = scmp.gt.s32.totalorder %s1694_s22, 0 }
 0x829   : > { %s6998_s27 = smov (!%p1688_p1, %s1687_s27), 0  ;;  %s7000_s9 = smov (!%p3132_p0, %s6996_s9), 63 }
 0x82a   : > { %s7002_s27 = smov (!%p3137_p4, %s6998_s27), 63  ;;  %p3142_p8 = scmp.lt.s32.totalorder %s1694_s22, 63 }
 0x82b   : > { %p1702_p2 = scmp.gt.s32.totalorder %s1701_s25, 0  ;;  %p3147_p3 = scmp.lt.s32.totalorder %s1701_s25, 63 }
 0x82c   : > { %s7004_s22 = smov (!%p1695_p6, %s1694_s22), 0  ;;  %p1709_p9 = scmp.gt.s32.totalorder %s1708_s20, 0 }
 0x82d   : > { %s7006_s25 = smov (!%p1702_p2, %s1701_s25), 0  ;;  %s7008_s22 = smov (!%p3142_p8, %s7004_s22), 63 }
 0x82e   : > { %s7010_s25 = smov (!%p3147_p3, %s7006_s25), 63  ;;  %p3152_p10 = scmp.lt.s32.totalorder %s1708_s20, 63 }
 0x82f   : > { %p1716_p12 = scmp.gt.s32.totalorder %s1715_s5, 0  ;;  %p3157_p5 = scmp.lt.s32.totalorder %s1715_s5, 63 }
 0x830   : > { %s7012_s20 = smov (!%p1709_p9, %s1708_s20), 0  ;;  %s6566_s21 = sld [smem:[#allocation5 + %s1721_s11]] }
 0x831   : > { %s7014_s5 = smov (!%p1716_p12, %s1715_s5), 0  ;;  %s7016_s20 = smov (!%p3152_p10, %s7012_s20), 63 }
 0x832   : > { %s7018_s5 = smov (!%p3157_p5, %s7014_s5), 63  ;;  %s6568_s10 = sld [smem:[#allocation5 + %s1728_s2]] }
 0x833   : > { %s3130_s26 = sshll.u32 %s6994_s16, 4  ;;  %s5349_s17 = smov [#allocation2 + $0x37]  }
 0x834   : > { %s1621_s8 = scalar_lea.hbm %s6746_s1, %s3130_s26  ;;  %s1631_s24 = sshll.u32 %s5349_s17, 4  ;;  %s1632_s24 = int_to_ptr.vmem [resolvable:$true] %s1631_s24 }
 0x835   : > { %s4860_s28 = scalar_lea.hbm %s1621_s8, 16  ;;  %p4863_p11 = scmp.lt.u32.totalorder %s1621_s8, %s6746_s1 }
 0x836   : > { %p4861_p7 = scmp.ne.s32.totalorder %s1621_s8, %s4860_s28  ;;  %p4864_p13 = scmp.lt.u32.totalorder %s5549_s14, %s4860_s28 }
 0x837   : > { %p4866_p1 = scmp.lt.u32.totalorder %s4860_s28, %s1621_s8 }
 0x838   : > { %p4865_p0 = por %p4864_p13, %p4863_p11 }
 0x83a   : > { %p4867_p4 = por %p4866_p1, %p4865_p0 }
 0x83c   : > { %p4868_p6 = pnand %p4867_p4, %p4861_p7 }
 0x83e   : > { %4871 = shalt.err (!%p4868_p6)  }
 0x83f   : > { %s4872_s16 = scalar_lea.vmem %s1632_s24, 16  ;;  %p4877_p2 = scmp.lt.s32.totalorder %s1632_s24, %s5536_s13 }
 0x840   : > { %p4873_p8 = scmp.ne.s32.totalorder %s1632_s24, %s4872_s16  ;;  %p4878_p3 = scmp.lt.s32.totalorder %s5558_s30, %s4872_s16 }
 0x842   : > { %p4879_p9 = por %p4878_p3, %p4877_p2 }
 0x844   : > { %p4880_p10 = pnand %p4879_p9, %p4873_p8 }
 0x846   : > { %4883 = shalt.err (!%p4880_p10)  }
 0x847   : > { %1634 = dma.hbm_to_vmem [thread:$0]  %s1621_s8, 16, %s1632_s24, [#allocation3 + $0x17]  ;;  %v1638_v30 = vld [vmem:[#allocation6 + $0x10] sm:$0xff] }
 0x848   : > { %p1723_p12 = scmp.gt.s32.totalorder %s6566_s21, 0  ;;  %p3162_p5 = scmp.lt.s32.totalorder %s6566_s21, 63  ;;  %v1636_v31 = vld [vmem:[#allocation2 + $0x10] sm:$0xff] }
 0x849   : > { %p1730_p7 = scmp.gt.s32.totalorder %s6568_s10, 0  ;;  %p3167_p11 = scmp.lt.s32.totalorder %s6568_s10, 63  ;;  %v1639_v32 = vadd.f32 %v1638_v30, %v1636_v31 }
 0x84a   : > { %s7020_s21 = smov (!%p1723_p12, %s6566_s21), 0 }
 0x84b   : > { %s7022_s10 = smov (!%p1730_p7, %s6568_s10), 0  ;;  %s7024_s21 = smov (!%p3162_p5, %s7020_s21), 63  ;;  %1640 = vadd.xlane.f32.xlu0 %v1639_v32 }
 0x84c   : > { %s7026_s10 = smov (!%p3167_p11, %s7022_s10), 63 }
 0x8d8   : > { %v1641_v33 = vpop.xlane.xlu0 %1640 }
 0x8d9   : > { %v1642_v34 = vmul.f32 0.0078125, %v1641_v33 }
 0x8db   : > { %v1643_v35 = vsub.f32 %v1639_v32, %v1642_v34 }
 0x8dd   : > { %v1644_v36 = vmul.f32 %v1643_v35, %v1643_v35 }
 0x8df   : > { %1645 = vadd.xlane.f32.xlu0 %v1644_v36 }
 0x96c   : > { %v1646_v37 = vpop.xlane.xlu0 %1645 }
 0x96d   : > { %v1647_v38 = vmul.f32 0.0078125, %v1646_v37 }
 0x96f   : > { %v1648_v39 = vadd.f32 1e-12, %v1647_v38 }
 0x971   : > { %3490 = vrsqrt.f32 %v1648_v39 }
 0x97b   : > { %v3491_v40 = vpop.eup %3490 }
 0x97c   : > { %v1650_v41 = vmul.f32 %v3491_v40, %v1643_v35 }
 0x97e   : > { %v1651_v42 = vmul.f32 %v5509_v0, %v1650_v41 }
 0x980   : > { %v1652_v43 = vadd.f32 %v5514_v1, %v1651_v42 }
 0x982   : > { %3131 = vst [vmem:[%s6240_s0 + $0x10] sm:$0xff] %v1652_v43 }
 0x983   : > { %5182 = dma.done.wait [#allocation3 + $0x18], 16 }
 0x984   : > { %5183 = vsyncadd [#allocation3 + $0x18], 4294967280  ;;  %s3172_s15 = sshll.u32 %s7000_s9, 4  ;;  %s5350_s4 = smov [#allocation2 + $0x38]  }
 0x985   : > { %s1740_s29 = scalar_lea.hbm %s6746_s1, %s3172_s15  ;;  %s1750_s12 = sshll.u32 %s5350_s4, 4  ;;  %s1751_s12 = int_to_ptr.vmem [resolvable:$true] %s1750_s12 }
 0x986   : > { %s4884_s11 = scalar_lea.hbm %s1740_s29, 16  ;;  %p4887_p0 = scmp.lt.u32.totalorder %s1740_s29, %s6746_s1 }
 0x987   : > { %p4885_p13 = scmp.ne.s32.totalorder %s1740_s29, %s4884_s11  ;;  %p4888_p1 = scmp.lt.u32.totalorder %s5549_s14, %s4884_s11 }
 0x988   : > { %p4890_p6 = scmp.lt.u32.totalorder %s4884_s11, %s1740_s29 }
 0x989   : > { %p4889_p4 = por %p4888_p1, %p4887_p0 }
 0x98b   : > { %p4891_p8 = por %p4890_p6, %p4889_p4 }
 0x98d   : > { %p4892_p2 = pnand %p4891_p8, %p4885_p13 }
 0x98f   : > { %4895 = shalt.err (!%p4892_p2)  }
 0x990   : > { %s4896_s9 = scalar_lea.vmem %s1751_s12, 16  ;;  %p4901_p9 = scmp.lt.s32.totalorder %s1751_s12, %s5536_s13 }
 0x991   : > { %p4897_p3 = scmp.ne.s32.totalorder %s1751_s12, %s4896_s9  ;;  %p4902_p10 = scmp.lt.s32.totalorder %s5558_s30, %s4896_s9 }
 0x993   : > { %p4903_p12 = por %p4902_p10, %p4901_p9 }
 0x995   : > { %p4904_p5 = pnand %p4903_p12, %p4897_p3 }
 0x997   : > { %4907 = shalt.err (!%p4904_p5)  }
 0x998   : > { %1753 = dma.hbm_to_vmem [thread:$0]  %s1740_s29, 16, %s1751_s12, [#allocation3 + $0x18] }
 0x999   : > { %5184 = dma.done.wait [#allocation3 + $0x19], 16 }
 0x99a   : > { %5185 = vsyncadd [#allocation3 + $0x19], 4294967280  ;;  %s3173_s18 = sshll.u32 %s7002_s27, 4  ;;  %s5351_s24 = smov [#allocation2 + $0x39]  }
 0x99b   : > { %s1760_s17 = scalar_lea.hbm %s6746_s1, %s3173_s18  ;;  %s1770_s28 = sshll.u32 %s5351_s24, 4  ;;  %s1771_s28 = int_to_ptr.vmem [resolvable:$true] %s1770_s28 }
 0x99c   : > { %s4908_s3 = scalar_lea.hbm %s1760_s17, 16  ;;  %p4911_p11 = scmp.lt.u32.totalorder %s1760_s17, %s6746_s1 }
 0x99d   : > { %p4909_p7 = scmp.ne.s32.totalorder %s1760_s17, %s4908_s3  ;;  %p4912_p13 = scmp.lt.u32.totalorder %s5549_s14, %s4908_s3 }
 0x99e   : > { %p4914_p1 = scmp.lt.u32.totalorder %s4908_s3, %s1760_s17 }
 0x99f   : > { %p4913_p0 = por %p4912_p13, %p4911_p11 }
 0x9a1   : > { %p4915_p4 = por %p4914_p1, %p4913_p0 }
 0x9a3   : > { %p4916_p6 = pnand %p4915_p4, %p4909_p7 }
 0x9a5   : > { %4919 = shalt.err (!%p4916_p6)  }
 0x9a6   : > { %s4920_s27 = scalar_lea.vmem %s1771_s28, 16  ;;  %p4925_p2 = scmp.lt.s32.totalorder %s1771_s28, %s5536_s13 }
 0x9a7   : > { %p4921_p8 = scmp.ne.s32.totalorder %s1771_s28, %s4920_s27  ;;  %p4926_p3 = scmp.lt.s32.totalorder %s5558_s30, %s4920_s27 }
 0x9a9   : > { %p4927_p9 = por %p4926_p3, %p4925_p2 }
 0x9ab   : > { %p4928_p10 = pnand %p4927_p9, %p4921_p8 }
 0x9ad   : > { %4931 = shalt.err (!%p4928_p10)  }
 0x9ae   : > { %1773 = dma.hbm_to_vmem [thread:$0]  %s1760_s17, 16, %s1771_s28, [#allocation3 + $0x19] }
 0x9af   : > { %5186 = dma.done.wait [#allocation3 + $0x1a], 16 }
 0x9b0   : > { %5187 = vsyncadd [#allocation3 + $0x1a], 4294967280  ;;  %s3174_s15 = sshll.u32 %s7008_s22, 4  ;;  %s5352_s4 = smov [#allocation2 + $0x3a]  }
 0x9b1   : > { %s1780_s29 = scalar_lea.hbm %s6746_s1, %s3174_s15  ;;  %s1790_s12 = sshll.u32 %s5352_s4, 4  ;;  %s1791_s12 = int_to_ptr.vmem [resolvable:$true] %s1790_s12 }
 0x9b2   : > { %s4932_s11 = scalar_lea.hbm %s1780_s29, 16  ;;  %p4935_p5 = scmp.lt.u32.totalorder %s1780_s29, %s6746_s1 }
 0x9b3   : > { %p4933_p12 = scmp.ne.s32.totalorder %s1780_s29, %s4932_s11  ;;  %p4936_p7 = scmp.lt.u32.totalorder %s5549_s14, %s4932_s11 }
 0x9b4   : > { %p4938_p13 = scmp.lt.u32.totalorder %s4932_s11, %s1780_s29 }
 0x9b5   : > { %p4937_p11 = por %p4936_p7, %p4935_p5 }
 0x9b7   : > { %p4939_p0 = por %p4938_p13, %p4937_p11 }
 0x9b9   : > { %p4940_p1 = pnand %p4939_p0, %p4933_p12 }
 0x9bb   : > { %4943 = shalt.err (!%p4940_p1)  }
 0x9bc   : > { %s4944_s22 = scalar_lea.vmem %s1791_s12, 16  ;;  %p4949_p6 = scmp.lt.s32.totalorder %s1791_s12, %s5536_s13 }
 0x9bd   : > { %p4945_p4 = scmp.ne.s32.totalorder %s1791_s12, %s4944_s22  ;;  %p4950_p8 = scmp.lt.s32.totalorder %s5558_s30, %s4944_s22 }
 0x9bf   : > { %p4951_p2 = por %p4950_p8, %p4949_p6 }
 0x9c1   : > { %p4952_p3 = pnand %p4951_p2, %p4945_p4 }
 0x9c3   : > { %4955 = shalt.err (!%p4952_p3)  }
 0x9c4   : > { %1793 = dma.hbm_to_vmem [thread:$0]  %s1780_s29, 16, %s1791_s12, [#allocation3 + $0x1a] }
 0x9c5   : > { %5188 = dma.done.wait [#allocation3 + $0x1b], 16 }
 0x9c6   : > { %5189 = vsyncadd [#allocation3 + $0x1b], 4294967280  ;;  %s3175_s9 = sshll.u32 %s7010_s25, 4  ;;  %s5353_s17 = smov [#allocation2 + $0x3b]  }
 0x9c7   : > { %s1800_s8 = scalar_lea.hbm %s6746_s1, %s3175_s9  ;;  %s1810_s24 = sshll.u32 %s5353_s17, 4  ;;  %s1811_s24 = int_to_ptr.vmem [resolvable:$true] %s1810_s24 }
 0x9c8   : > { %s4956_s28 = scalar_lea.hbm %s1800_s8, 16  ;;  %p4959_p10 = scmp.lt.u32.totalorder %s1800_s8, %s6746_s1 }
 0x9c9   : > { %p4957_p9 = scmp.ne.s32.totalorder %s1800_s8, %s4956_s28  ;;  %p4960_p12 = scmp.lt.u32.totalorder %s5549_s14, %s4956_s28 }
 0x9ca   : > { %p4962_p7 = scmp.lt.u32.totalorder %s4956_s28, %s1800_s8 }
 0x9cb   : > { %p4961_p5 = por %p4960_p12, %p4959_p10 }
 0x9cd   : > { %p4963_p11 = por %p4962_p7, %p4961_p5 }
 0x9cf   : > { %p4964_p13 = pnand %p4963_p11, %p4957_p9 }
 0x9d1   : > { %4967 = shalt.err (!%p4964_p13)  }
 0x9d2   : > { %s4968_s25 = scalar_lea.vmem %s1811_s24, 16  ;;  %p4973_p1 = scmp.lt.s32.totalorder %s1811_s24, %s5536_s13 }
 0x9d3   : > { %p4969_p0 = scmp.ne.s32.totalorder %s1811_s24, %s4968_s25  ;;  %p4974_p4 = scmp.lt.s32.totalorder %s5558_s30, %s4968_s25 }
 0x9d5   : > { %p4975_p6 = por %p4974_p4, %p4973_p1 }
 0x9d7   : > { %p4976_p8 = pnand %p4975_p6, %p4969_p0 }
 0x9d9   : > { %4979 = shalt.err (!%p4976_p8)  }
 0x9da   : > { %1813 = dma.hbm_to_vmem [thread:$0]  %s1800_s8, 16, %s1811_s24, [#allocation3 + $0x1b] }
 0x9db   : > { %5190 = dma.done.wait [#allocation3 + $0x1c], 16 }
 0x9dc   : > { %5191 = vsyncadd [#allocation3 + $0x1c], 4294967280  ;;  %s3176_s16 = sshll.u32 %s7016_s20, 4  ;;  %s5354_s23 = smov [#allocation2 + $0x3c]  }
 0x9dd   : > { %s1820_s7 = scalar_lea.hbm %s6746_s1, %s3176_s16  ;;  %s1830_s29 = sshll.u32 %s5354_s23, 4  ;;  %s1831_s29 = int_to_ptr.vmem [resolvable:$true] %s1830_s29 }
 0x9de   : > { %s4980_s4 = scalar_lea.hbm %s1820_s7, 16  ;;  %p4983_p3 = scmp.lt.u32.totalorder %s1820_s7, %s6746_s1 }
 0x9df   : > { %p4981_p2 = scmp.ne.s32.totalorder %s1820_s7, %s4980_s4  ;;  %p4984_p9 = scmp.lt.u32.totalorder %s5549_s14, %s4980_s4 }
 0x9e0   : > { %p4986_p12 = scmp.lt.u32.totalorder %s4980_s4, %s1820_s7 }
 0x9e1   : > { %p4985_p10 = por %p4984_p9, %p4983_p3 }
 0x9e3   : > { %p4987_p5 = por %p4986_p12, %p4985_p10 }
 0x9e5   : > { %p4988_p7 = pnand %p4987_p5, %p4981_p2 }
 0x9e7   : > { %4991 = shalt.err (!%p4988_p7)  }
 0x9e8   : > { %s4992_s20 = scalar_lea.vmem %s1831_s29, 16  ;;  %p4997_p13 = scmp.lt.s32.totalorder %s1831_s29, %s5536_s13 }
 0x9e9   : > { %p4993_p11 = scmp.ne.s32.totalorder %s1831_s29, %s4992_s20  ;;  %p4998_p0 = scmp.lt.s32.totalorder %s5558_s30, %s4992_s20 }
 0x9eb   : > { %p4999_p1 = por %p4998_p0, %p4997_p13 }
 0x9ed   : > { %p5000_p4 = pnand %p4999_p1, %p4993_p11 }
 0x9ef   : > { %5003 = shalt.err (!%p5000_p4)  }
 0x9f0   : > { %1833 = dma.hbm_to_vmem [thread:$0]  %s1820_s7, 16, %s1831_s29, [#allocation3 + $0x1c] }
 0x9f1   : > { %5192 = dma.done.wait [#allocation3 + $0x1d], 16 }
 0x9f2   : > { %5193 = vsyncadd [#allocation3 + $0x1d], 4294967280  ;;  %s3177_s2 = sshll.u32 %s7018_s5, 4  ;;  %s5355_s18 = smov [#allocation2 + $0x3d]  }
 0x9f3   : > { %s1840_s9 = scalar_lea.hbm %s6746_s1, %s3177_s2  ;;  %s1850_s6 = sshll.u32 %s5355_s18, 4  ;;  %s1851_s6 = int_to_ptr.vmem [resolvable:$true] %s1850_s6 }
 0x9f4   : > { %s5004_s8 = scalar_lea.hbm %s1840_s9, 16  ;;  %p5007_p8 = scmp.lt.u32.totalorder %s1840_s9, %s6746_s1 }
 0x9f5   : > { %p5005_p6 = scmp.ne.s32.totalorder %s1840_s9, %s5004_s8  ;;  %p5008_p2 = scmp.lt.u32.totalorder %s5549_s14, %s5004_s8 }
 0x9f6   : > { %p5010_p9 = scmp.lt.u32.totalorder %s5004_s8, %s1840_s9 }
 0x9f7   : > { %p5009_p3 = por %p5008_p2, %p5007_p8 }
 0x9f9   : > { %p5011_p10 = por %p5010_p9, %p5009_p3 }
 0x9fb   : > { %p5012_p12 = pnand %p5011_p10, %p5005_p6 }
 0x9fd   : > { %5015 = shalt.err (!%p5012_p12)  }
 0x9fe   : > { %s5016_s5 = scalar_lea.vmem %s1851_s6, 16  ;;  %p5021_p7 = scmp.lt.s32.totalorder %s1851_s6, %s5536_s13 }
 0x9ff   : > { %p5017_p5 = scmp.ne.s32.totalorder %s1851_s6, %s5016_s5  ;;  %p5022_p11 = scmp.lt.s32.totalorder %s5558_s30, %s5016_s5 }
 0xa01   : > { %p5023_p13 = por %p5022_p11, %p5021_p7 }
 0xa03   : > { %p5024_p0 = pnand %p5023_p13, %p5017_p5 }
 0xa05   : > { %5027 = shalt.err (!%p5024_p0)  }
 0xa06   : > { %1853 = dma.hbm_to_vmem [thread:$0]  %s1840_s9, 16, %s1851_s6, [#allocation3 + $0x1d] }
 0xa07   : > { %5194 = dma.done.wait [#allocation3 + $0x1e], 16 }
 0xa08   : > { %5195 = vsyncadd [#allocation3 + $0x1e], 4294967280  ;;  %s3178_s28 = sshll.u32 %s7024_s21, 4  ;;  %s5356_s16 = smov [#allocation2 + $0x3e]  }
 0xa09   : > { %s1860_s25 = scalar_lea.hbm %s6746_s1, %s3178_s28  ;;  %s1870_s27 = sshll.u32 %s5356_s16, 4  ;;  %s1871_s27 = int_to_ptr.vmem [resolvable:$true] %s1870_s27 }
 0xa0a   : > { %s5028_s15 = scalar_lea.hbm %s1860_s25, 16  ;;  %p5031_p4 = scmp.lt.u32.totalorder %s1860_s25, %s6746_s1 }
 0xa0b   : > { %p5029_p1 = scmp.ne.s32.totalorder %s1860_s25, %s5028_s15  ;;  %p5032_p6 = scmp.lt.u32.totalorder %s5549_s14, %s5028_s15 }
 0xa0c   : > { %p5034_p2 = scmp.lt.u32.totalorder %s5028_s15, %s1860_s25 }
 0xa0d   : > { %p5033_p8 = por %p5032_p6, %p5031_p4 }
 0xa0f   : > { %p5035_p3 = por %p5034_p2, %p5033_p8 }
 0xa11   : > { %p5036_p9 = pnand %p5035_p3, %p5029_p1 }
 0xa13   : > { %5039 = shalt.err (!%p5036_p9)  }
 0xa14   : > { %s5040_s21 = scalar_lea.vmem %s1871_s27, 16  ;;  %p5045_p12 = scmp.lt.s32.totalorder %s1871_s27, %s5536_s13 }
 0xa15   : > { %p5041_p10 = scmp.ne.s32.totalorder %s1871_s27, %s5040_s21  ;;  %p5046_p5 = scmp.lt.s32.totalorder %s5558_s30, %s5040_s21 }
 0xa17   : > { %p5047_p7 = por %p5046_p5, %p5045_p12 }
 0xa19   : > { %p5048_p11 = pnand %p5047_p7, %p5041_p10 }
 0xa1b   : > { %5051 = shalt.err (!%p5048_p11)  }
 0xa1c   : > { %1873 = dma.hbm_to_vmem [thread:$0]  %s1860_s25, 16, %s1871_s27, [#allocation3 + $0x1e] }
 0xa1d   : > { %5196 = dma.done.wait [#allocation3 + $0x1f], 16 }
 0xa1e   : > { %5197 = vsyncadd [#allocation3 + $0x1f], 4294967280  ;;  %s3179_s29 = sshll.u32 %s7026_s10, 4  ;;  %s5357_s20 = smov [#allocation2 + $0x3f]  }
 0xa1f   : > { %s1880_s11 = scalar_lea.hbm %s6746_s1, %s3179_s29  ;;  %s1890_s2 = sshll.u32 %s5357_s20, 4  ;;  %s1891_s2 = int_to_ptr.vmem [resolvable:$true] %s1890_s2 }
 0xa20   : > { %s5052_s26 = scalar_lea.hbm %s1880_s11, 16  ;;  %p5055_p0 = scmp.lt.u32.totalorder %s1880_s11, %s6746_s1 }
 0xa21   : > { %p5053_p13 = scmp.ne.s32.totalorder %s1880_s11, %s5052_s26  ;;  %p5056_p1 = scmp.lt.u32.totalorder %s5549_s14, %s5052_s26 }
 0xa22   : > { %p5058_p6 = scmp.lt.u32.totalorder %s5052_s26, %s1880_s11 }
 0xa23   : > { %p5057_p4 = por %p5056_p1, %p5055_p0 }
 0xa25   : > { %p5059_p8 = por %p5058_p6, %p5057_p4 }
 0xa27   : > { %p5060_p2 = pnand %p5059_p8, %p5053_p13 }
 0xa29   : > { %5063 = shalt.err (!%p5060_p2)  }
 0xa2a   : > { %s5064_s10 = scalar_lea.vmem %s1891_s2, 16  ;;  %p5069_p9 = scmp.lt.s32.totalorder %s1891_s2, %s5536_s13 }
 0xa2b   : > { %p5065_p3 = scmp.ne.s32.totalorder %s1891_s2, %s5064_s10  ;;  %p5070_p10 = scmp.lt.s32.totalorder %s5558_s30, %s5064_s10 }
 0xa2d   : > { %p5071_p12 = por %p5070_p10, %p5069_p9 }
 0xa2f   : > { %p5072_p5 = pnand %p5071_p12, %p5065_p3 }
 0xa31   : > { %5075 = shalt.err (!%p5072_p5)  }
 0xa32   : > { %1893 = dma.hbm_to_vmem [thread:$0]  %s1880_s11, 16, %s1891_s2, [#allocation3 + $0x1f]  ;;  %v1897_v44 = vld [vmem:[#allocation6 + $0x18] sm:$0xff] }
 0xa33   : > { %v1895_v45 = vld [vmem:[#allocation2 + $0x18] sm:$0xff] }
 0xa34   : > { %v1898_v46 = vadd.f32 %v1897_v44, %v1895_v45 }
 0xa36   : > { %1899 = vadd.xlane.f32.xlu0 %v1898_v46 }
 0xac3   : > { %v1900_v47 = vpop.xlane.xlu0 %1899 }
 0xac4   : > { %v1901_v48 = vmul.f32 0.0078125, %v1900_v47 }
 0xac6   : > { %v1902_v49 = vsub.f32 %v1898_v46, %v1901_v48 }
 0xac8   : > { %v1903_v50 = vmul.f32 %v1902_v49, %v1902_v49 }
 0xaca   : > { %1904 = vadd.xlane.f32.xlu0 %v1903_v50 }
 0xb57   : > { %v1905_v51 = vpop.xlane.xlu0 %1904 }
 0xb58   : > { %v1906_v52 = vmul.f32 0.0078125, %v1905_v51 }
 0xb5a   : > { %v1907_v53 = vadd.f32 1e-12, %v1906_v52 }
 0xb5c   : > { %3492 = vrsqrt.f32 %v1907_v53 }
 0xb66   : > { %v3493_v54 = vpop.eup %3492 }
 0xb67   : > { %v1909_v55 = vmul.f32 %v3493_v54, %v1902_v49 }
 0xb69   : > { %v1910_v56 = vmul.f32 %v5509_v0, %v1909_v55 }
 0xb6b   : > { %v1911_v57 = vadd.f32 %v5514_v1, %v1910_v56 }
 0xb6d   : > { %3180 = vst [vmem:[%s6240_s0 + $0x18] sm:$0xff] %v1911_v57 }
 0xb6e   : > { %5198 = dma.done.wait [#allocation3], 16 }
 0xb6f   : > { %5199 = vsyncadd [#allocation3], 4294967280 }
 0xb70   : > { %5200 = dma.done.wait [#allocation3 + $0x1], 16 }
 0xb71   : > { %5201 = vsyncadd [#allocation3 + $0x1], 4294967280 }
 0xb72   : > { %5202 = dma.done.wait [#allocation3 + $0x2], 16 }
 0xb73   : > { %5203 = vsyncadd [#allocation3 + $0x2], 4294967280 }
 0xb74   : > { %5204 = dma.done.wait [#allocation3 + $0x3], 16 }
 0xb75   : > { %5205 = vsyncadd [#allocation3 + $0x3], 4294967280 }
 0xb76   : > { %5206 = dma.done.wait [#allocation3 + $0x4], 16 }
 0xb77   : > { %5207 = vsyncadd [#allocation3 + $0x4], 4294967280 }
 0xb78   : > { %5208 = dma.done.wait [#allocation3 + $0x5], 16 }
 0xb79   : > { %5209 = vsyncadd [#allocation3 + $0x5], 4294967280 }
 0xb7a   : > { %5210 = dma.done.wait [#allocation3 + $0x6], 16 }
 0xb7b   : > { %5211 = vsyncadd [#allocation3 + $0x6], 4294967280 }
 0xb7c   : > { %5212 = dma.done.wait [#allocation3 + $0x7], 16 }
 0xb7d   : > { %5213 = vsyncadd [#allocation3 + $0x7], 4294967280  ;;  %v1970_v58 = vld [vmem:[#allocation2 + $0x20] sm:$0xff] }
 0xb7e   : > { %v1972_v59 = vld [vmem:[#allocation6 + $0x20] sm:$0xff] }
 0xb7f   : > { %v1973_v60 = vadd.f32 %v1972_v59, %v1970_v58 }
 0xb81   : > { %1974 = vadd.xlane.f32.xlu0 %v1973_v60 }
 0xc0e   : > { %v1975_v61 = vpop.xlane.xlu0 %1974 }
 0xc0f   : > { %v1976_v62 = vmul.f32 0.0078125, %v1975_v61 }
 0xc11   : > { %v1977_v63 = vsub.f32 %v1973_v60, %v1976_v62 }
 0xc13   : > { %v1978_v2 = vmul.f32 %v1977_v63, %v1977_v63 }
 0xc15   : > { %1979 = vadd.xlane.f32.xlu0 %v1978_v2 }
 0xca2   : > { %v1980_v3 = vpop.xlane.xlu0 %1979 }
 0xca3   : > { %v1981_v4 = vmul.f32 0.0078125, %v1980_v3 }
 0xca5   : > { %v1982_v5 = vadd.f32 1e-12, %v1981_v4 }
 0xca7   : > { %3494 = vrsqrt.f32 %v1982_v5 }
 0xcb1   : > { %v3495_v6 = vpop.eup %3494 }
 0xcb2   : > { %v1984_v7 = vmul.f32 %v3495_v6, %v1977_v63 }
 0xcb4   : > { %v1985_v8 = vmul.f32 %v5509_v0, %v1984_v7 }
 0xcb6   : > { %v1986_v9 = vadd.f32 %v5514_v1, %v1985_v8 }
 0xcb8   : > { %3181 = vst [vmem:[%s6240_s0 + $0x20] sm:$0xff] %v1986_v9 }
 0xcb9   : > { %5214 = dma.done.wait [#allocation3 + $0x8], 16 }
 0xcba   : > { %5215 = vsyncadd [#allocation3 + $0x8], 4294967280 }
 0xcbb   : > { %5216 = dma.done.wait [#allocation3 + $0x9], 16 }
 0xcbc   : > { %5217 = vsyncadd [#allocation3 + $0x9], 4294967280 }
 0xcbd   : > { %5218 = dma.done.wait [#allocation3 + $0xa], 16 }
 0xcbe   : > { %5219 = vsyncadd [#allocation3 + $0xa], 4294967280 }
 0xcbf   : > { %5220 = dma.done.wait [#allocation3 + $0xb], 16 }
 0xcc0   : > { %5221 = vsyncadd [#allocation3 + $0xb], 4294967280 }
 0xcc1   : > { %5222 = dma.done.wait [#allocation3 + $0xc], 16 }
 0xcc2   : > { %5223 = vsyncadd [#allocation3 + $0xc], 4294967280 }
 0xcc3   : > { %5224 = dma.done.wait [#allocation3 + $0xd], 16 }
 0xcc4   : > { %5225 = vsyncadd [#allocation3 + $0xd], 4294967280 }
 0xcc5   : > { %5226 = dma.done.wait [#allocation3 + $0xe], 16 }
 0xcc6   : > { %5227 = vsyncadd [#allocation3 + $0xe], 4294967280 }
 0xcc7   : > { %5228 = dma.done.wait [#allocation3 + $0xf], 16 }
 0xcc8   : > { %5229 = vsyncadd [#allocation3 + $0xf], 4294967280  ;;  %v2045_v10 = vld [vmem:[#allocation2 + $0x28] sm:$0xff] }
 0xcc9   : > { %v2047_v11 = vld [vmem:[#allocation6 + $0x28] sm:$0xff] }
 0xcca   : > { %v2048_v12 = vadd.f32 %v2047_v11, %v2045_v10 }
 0xccc   : > { %2049 = vadd.xlane.f32.xlu0 %v2048_v12 }
 0xd59   : > { %v2050_v13 = vpop.xlane.xlu0 %2049 }
 0xd5a   : > { %v2051_v14 = vmul.f32 0.0078125, %v2050_v13 }
 0xd5c   : > { %v2052_v15 = vsub.f32 %v2048_v12, %v2051_v14 }
 0xd5e   : > { %v2053_v16 = vmul.f32 %v2052_v15, %v2052_v15 }
 0xd60   : > { %2054 = vadd.xlane.f32.xlu0 %v2053_v16 }
 0xded   : > { %v2055_v17 = vpop.xlane.xlu0 %2054 }
 0xdee   : > { %v2056_v18 = vmul.f32 0.0078125, %v2055_v17 }
 0xdf0   : > { %v2057_v19 = vadd.f32 1e-12, %v2056_v18 }
 0xdf2   : > { %3496 = vrsqrt.f32 %v2057_v19 }
 0xdfc   : > { %v3497_v20 = vpop.eup %3496 }
 0xdfd   : > { %v2059_v21 = vmul.f32 %v3497_v20, %v2052_v15 }
 0xdff   : > { %v2060_v22 = vmul.f32 %v5509_v0, %v2059_v21 }
 0xe01   : > { %v2061_v23 = vadd.f32 %v5514_v1, %v2060_v22 }
 0xe03   : > { %3182 = vst [vmem:[%s6240_s0 + $0x28] sm:$0xff] %v2061_v23 }
 0xe04   : > { %5230 = dma.done.wait [#allocation3 + $0x10], 16 }
 0xe05   : > { %5231 = vsyncadd [#allocation3 + $0x10], 4294967280 }
 0xe06   : > { %5232 = dma.done.wait [#allocation3 + $0x11], 16 }
 0xe07   : > { %5233 = vsyncadd [#allocation3 + $0x11], 4294967280 }
 0xe08   : > { %5234 = dma.done.wait [#allocation3 + $0x12], 16 }
 0xe09   : > { %5235 = vsyncadd [#allocation3 + $0x12], 4294967280 }
 0xe0a   : > { %5236 = dma.done.wait [#allocation3 + $0x13], 16 }
 0xe0b   : > { %5237 = vsyncadd [#allocation3 + $0x13], 4294967280 }
 0xe0c   : > { %5238 = dma.done.wait [#allocation3 + $0x14], 16 }
 0xe0d   : > { %5239 = vsyncadd [#allocation3 + $0x14], 4294967280 }
 0xe0e   : > { %5240 = dma.done.wait [#allocation3 + $0x15], 16 }
 0xe0f   : > { %5241 = vsyncadd [#allocation3 + $0x15], 4294967280 }
 0xe10   : > { %5242 = dma.done.wait [#allocation3 + $0x16], 16 }
 0xe11   : > { %5243 = vsyncadd [#allocation3 + $0x16], 4294967280 }
 0xe12   : > { %5244 = dma.done.wait [#allocation3 + $0x17], 16 }
 0xe13   : > { %5245 = vsyncadd [#allocation3 + $0x17], 4294967280  ;;  %v2120_v24 = vld [vmem:[#allocation2 + $0x30] sm:$0xff] }
 0xe14   : > { %v2122_v25 = vld [vmem:[#allocation6 + $0x30] sm:$0xff] }
 0xe15   : > { %v2123_v26 = vadd.f32 %v2122_v25, %v2120_v24 }
 0xe17   : > { %2124 = vadd.xlane.f32.xlu0 %v2123_v26 }
 0xea4   : > { %v2125_v27 = vpop.xlane.xlu0 %2124 }
 0xea5   : > { %v2126_v28 = vmul.f32 0.0078125, %v2125_v27 }
 0xea7   : > { %v2127_v29 = vsub.f32 %v2123_v26, %v2126_v28 }
 0xea9   : > { %v2128_v30 = vmul.f32 %v2127_v29, %v2127_v29 }
 0xeab   : > { %2129 = vadd.xlane.f32.xlu0 %v2128_v30 }
 0xf38   : > { %v2130_v31 = vpop.xlane.xlu0 %2129 }
 0xf39   : > { %v2131_v32 = vmul.f32 0.0078125, %v2130_v31 }
 0xf3b   : > { %v2132_v33 = vadd.f32 1e-12, %v2131_v32 }
 0xf3d   : > { %3498 = vrsqrt.f32 %v2132_v33 }
 0xf47   : > { %v3499_v34 = vpop.eup %3498 }
 0xf48   : > { %v2134_v35 = vmul.f32 %v3499_v34, %v2127_v29 }
 0xf4a   : > { %v2135_v36 = vmul.f32 %v5509_v0, %v2134_v35 }
 0xf4c   : > { %v2136_v37 = vadd.f32 %v5514_v1, %v2135_v36 }
 0xf4e   : > { %3183 = vst [vmem:[%s6240_s0 + $0x30] sm:$0xff] %v2136_v37 }
 0xf4f   : > { %5246 = dma.done.wait [#allocation3 + $0x18], 16 }
 0xf50   : > { %5247 = vsyncadd [#allocation3 + $0x18], 4294967280 }
 0xf51   : > { %5248 = dma.done.wait [#allocation3 + $0x19], 16 }
 0xf52   : > { %5249 = vsyncadd [#allocation3 + $0x19], 4294967280 }
 0xf53   : > { %5250 = dma.done.wait [#allocation3 + $0x1a], 16 }
 0xf54   : > { %5251 = vsyncadd [#allocation3 + $0x1a], 4294967280 }
 0xf55   : > { %5252 = dma.done.wait [#allocation3 + $0x1b], 16 }
 0xf56   : > { %5253 = vsyncadd [#allocation3 + $0x1b], 4294967280 }
 0xf57   : > { %5254 = dma.done.wait [#allocation3 + $0x1c], 16 }
 0xf58   : > { %5255 = vsyncadd [#allocation3 + $0x1c], 4294967280 }
 0xf59   : > { %5256 = dma.done.wait [#allocation3 + $0x1d], 16 }
 0xf5a   : > { %5257 = vsyncadd [#allocation3 + $0x1d], 4294967280 }
 0xf5b   : > { %5258 = dma.done.wait [#allocation3 + $0x1e], 16 }
 0xf5c   : > { %5259 = vsyncadd [#allocation3 + $0x1e], 4294967280 }
 0xf5d   : > { %5260 = dma.done.wait [#allocation3 + $0x1f], 16 }
 0xf5e   : > { %5261 = vsyncadd [#allocation3 + $0x1f], 4294967280  ;;  %s6794_s14 = sld [smem:[#allocation210_spill]]  ;;  %v2195_v38 = vld [vmem:[#allocation2 + $0x38] sm:$0xff]  ;;  %s6795_s13 = sld [smem:[#allocation208_spill]] }
 0xf5f   : > { %v2197_v39 = vld [vmem:[#allocation6 + $0x38] sm:$0xff]  ;;  %s6796_s30 = sld [smem:[#allocation214_spill]]  ;;  %s2230_s6 = sshll.u32 %s6240_s0, 4  ;;  %s6693_s6 = int_to_ptr.vmem [resolvable:$true] %s2230_s6 }
 0xf60   : > { %v2198_v40 = vadd.f32 %v2197_v39, %v2195_v38  ;;  %s6797_s24 = sld [smem:[#allocation220_spill]]  ;;  %s5076_s19 = scalar_lea.vmem %s6693_s6, 1024 }
 0xf61   : > { %p5077_p7 = scmp.ne.s32.totalorder %s6693_s6, %s5076_s19  ;;  %s5358_s25 = smov [#allocation9]  }
 0xf62   : > { %2199 = vadd.xlane.f32.xlu0 %v2198_v40  ;;  %s5080_s16 = sshll.u32 %s5358_s25, 4  ;;  %s5081_s16 = int_to_ptr.vmem [resolvable:$false] %s5080_s16 }
 0xf63   : > { %s5082_s27 = scalar_lea.vmem %s5081_s16, 2048  ;;  %p5083_p1 = scmp.lt.s32.totalorder %s6693_s6, %s5081_s16 }
 0xf64   : > { %s3350_s18 = sshll.u32 %s6794_s14, 10  ;;  %s6798_s28 = sand.u32 1, %s6795_s13  }
 0xf65   : > { %s6699_s3 = scalar_lea.sflag [#allocation8], %s6798_s28  ;;  %p6799_p11 = scmp.ne.s32.totalorder %s6796_s30, 0 }
 0xf66   : > { %s6691_s5 = scalar_lea.hbm %s6797_s24, %s3350_s18  ;;  %p5084_p4 = scmp.lt.s32.totalorder %s5082_s27, %s5076_s19 }
 0xf67   : > { %p5078_p13 = pnand %p5077_p7, %p6799_p11 }
 0xf68   : > { %p5085_p6 = por %p5084_p4, %p5083_p1 }
 0xf69   : > { %p5079_p0 = pneg %p5078_p13 }
 0xf6b   : > { %p5086_p8 = pnand %p5085_p6, %p5079_p0 }
 0xfef   : > { %v2200_v41 = vpop.xlane.xlu0 %2199 }
 0xff0   : > { %v2201_v42 = vmul.f32 0.0078125, %v2200_v41 }
 0xff2   : > { %v2202_v43 = vsub.f32 %v2198_v40, %v2201_v42 }
 0xff4   : > { %v2203_v44 = vmul.f32 %v2202_v43, %v2202_v43 }
 0xff6   : > { %2204 = vadd.xlane.f32.xlu0 %v2203_v44 }
0x1083   : > { %v2205_v45 = vpop.xlane.xlu0 %2204 }
0x1084   : > { %v2206_v46 = vmul.f32 0.0078125, %v2205_v45 }
0x1086   : > { %v2207_v47 = vadd.f32 1e-12, %v2206_v46 }
0x1088   : > { %3500 = vrsqrt.f32 %v2207_v47 }
0x1092   : > { %v3501_v48 = vpop.eup %3500 }
0x1093   : > { %v2209_v49 = vmul.f32 %v3501_v48, %v2202_v43 }
0x1095   : > { %v2210_v50 = vmul.f32 %v5509_v0, %v2209_v49 }
0x1097   : > { %v2211_v51 = vadd.f32 %v5514_v1, %v2210_v50 }
0x1099   : > { %3184 = vst [vmem:[%s6240_s0 + $0x38] sm:$0xff] %v2211_v51 }
0x109a   : > { %5089 = shalt.err (!%p5086_p8)
}
0x109b   : > { %s5090_s0 = scalar_lea.hbm %s6691_s5, 1024  ;;  %s5094_s23 = scalar_lea.hbm %s6797_s24, 2048 }
0x109c   : > { %p5091_p2 = scmp.ne.s32.totalorder %s6691_s5, %s5090_s0  ;;  %p5095_p10 = scmp.lt.u32.totalorder %s6691_s5, %s6797_s24 }
0x109d   : > { %p5096_p12 = scmp.lt.u32.totalorder %s5094_s23, %s5090_s0  ;;  %p5098_p7 = scmp.lt.u32.totalorder %s5090_s0, %s6691_s5 }
0x109e   : > { %p5092_p3 = pnand %p5091_p2, %p6799_p11 }
0x109f   : > { %p5097_p5 = por %p5096_p12, %p5095_p10 }
0x10a0   : > { %p5093_p9 = pneg %p5092_p3 }
0x10a1   : > { %p5099_p13 = por %p5098_p7, %p5097_p5 }
0x10a3   : > { %p5100_p0 = pnand %p5099_p13, %p5093_p9 }
0x10a5   : > { %5103 = shalt.err (!%p5100_p0)
}
0x10a6   : > { %s5359_s4 = smov 128   ;;  %s5360_s12 = smov 8  }
0x10a7   : > { %3355 = dma.vmem_to_hbm [thread:$0]  (%p6799_p11), %s6693_s6, 1024, %s6691_s5, %s6699_s3, %s5359_s4, %s5359_s4, %s5360_s12  }
0x10a8 PF: > { %s6800_s11 = sld [smem:[#allocation212_spill]]  ;;  %s6801_s20 = sld [smem:[#allocation207_spill]] }
0x10a9   : > { %s6802_s2 = sld [smem:[#allocation215_spill]] }
0x10ae   : > { %p3367_p1 = scmp.ge.s32.totalorder %s6800_s11, 2  ;;  %s2245_s26 = sand.u32 1, %s6801_s20  }
0x10af   : > { %p6803_p4 = scmp.ne.s32.totalorder %s6802_s2, 0  ;;  %s2246_s22 = scalar_lea.sflag [#allocation8], %s2245_s26 }
0x10b1   : > { %p3362_p6 = pnand %p3367_p1, %p6803_p4 }
0x10b3   : > { %5263 = dma.done.wait (!%p3362_p6), %s2246_s22, 1024  }
0x10b4   : > { %5265 = vsyncadd (!%p3362_p6), %s2246_s22, 4294966272  ;;  %s23_s8 = sadd.s32 1, %s6800_s11   ;;  %s6804_s28 = sld [smem:[#allocation208_spill]] }
0x10b5   : > { %p20_p8 = scmp.ge.s32.totalorder %s23_s8, 4   ;;  %s6805_s29 = sld [smem:[#allocation209_spill]] }
0x10b6   : > { %s6806_s30 = sld [smem:[#allocation216_spill]]  ;;  %s6807_s6 = sld [smem:[#allocation211_spill]] }
0x10b7   : > { %s6808_s7 = sld [smem:[#allocation213_spill]]  ;;  %22 = sbr.rel (!%p20_p8) target bundleno = 18 (0x12), region = 632 }
0x10be   :  { %2251 = vsyncpa [#allocation7], 1 }
0x10bf   :  { %2253 = vsyncpa [#allocation7 + $0x1], 1 }
0x10c0   :  { %2254 = vsyncpa [#allocation8], 1 }
0x10c1   :  { %2256 = vsyncpa [#allocation8 + $0x1], 1 }
0x10c2   :  { %2257 = vsyncmov [#allocation3] }
0x10c5   :  { %s2258_s9 = vpop.sfrf %2257 }
0x10c6   :  { %p3190_p11 = scmp.ne.s32.totalorder %s2258_s9, 0 }
0x10c8   :  { %2262 = shalt.err (%p3190_p11)  }
0x10c9   :  { %2264 = vsyncmov [#allocation3 + $0x1] }
0x10cc   :  { %s2265_s10 = vpop.sfrf %2264 }
0x10cd   :  { %p3191_p2 = scmp.ne.s32.totalorder %s2265_s10, 0 }
0x10cf   :  { %2269 = shalt.err (%p3191_p2)  }
0x10d0   :  { %2271 = vsyncmov [#allocation3 + $0x2] }
0x10d3   :  { %s2272_s14 = vpop.sfrf %2271 }
0x10d4   :  { %p3192_p3 = scmp.ne.s32.totalorder %s2272_s14, 0 }
0x10d6   :  { %2276 = shalt.err (%p3192_p3)  }
0x10d7   :  { %2278 = vsyncmov [#allocation3 + $0x3] }
0x10da   :  { %s2279_s13 = vpop.sfrf %2278 }
0x10db   :  { %p3193_p9 = scmp.ne.s32.totalorder %s2279_s13, 0 }
0x10dd   :  { %2283 = shalt.err (%p3193_p9)  }
0x10de   :  { %2285 = vsyncmov [#allocation3 + $0x4] }
0x10e1   :  { %s2286_s1 = vpop.sfrf %2285 }
0x10e2   :  { %p3194_p10 = scmp.ne.s32.totalorder %s2286_s1, 0 }
0x10e4   :  { %2290 = shalt.err (%p3194_p10)  }
0x10e5   :  { %2292 = vsyncmov [#allocation3 + $0x5] }
0x10e8   :  { %s2293_s30 = vpop.sfrf %2292 }
0x10e9   :  { %p3195_p12 = scmp.ne.s32.totalorder %s2293_s30, 0 }
0x10eb   :  { %2297 = shalt.err (%p3195_p12)  }
0x10ec   :  { %2299 = vsyncmov [#allocation3 + $0x6] }
0x10ef   :  { %s2300_s18 = vpop.sfrf %2299 }
0x10f0   :  { %p3196_p5 = scmp.ne.s32.totalorder %s2300_s18, 0 }
0x10f2   :  { %2304 = shalt.err (%p3196_p5)  }
0x10f3   :  { %2306 = vsyncmov [#allocation3 + $0x7] }
0x10f6   :  { %s2307_s6 = vpop.sfrf %2306 }
0x10f7   :  { %p3197_p7 = scmp.ne.s32.totalorder %s2307_s6, 0 }
0x10f9   :  { %2311 = shalt.err (%p3197_p7)  }
0x10fa   :  { %2313 = vsyncmov [#allocation3 + $0x8] }
0x10fd   :  { %s2314_s8 = vpop.sfrf %2313 }
0x10fe   :  { %p3198_p13 = scmp.ne.s32.totalorder %s2314_s8, 0 }
0x1100   :  { %2318 = shalt.err (%p3198_p13)  }
0x1101   :  { %2320 = vsyncmov [#allocation3 + $0x9] }
0x1104   :  { %s2321_s17 = vpop.sfrf %2320 }
0x1105   :  { %p3199_p0 = scmp.ne.s32.totalorder %s2321_s17, 0 }
0x1107   :  { %2325 = shalt.err (%p3199_p0)  }
0x1108   :  { %2327 = vsyncmov [#allocation3 + $0xa] }
0x110b   :  { %s2328_s24 = vpop.sfrf %2327 }
0x110c   :  { %p3200_p1 = scmp.ne.s32.totalorder %s2328_s24, 0 }
0x110e   :  { %2332 = shalt.err (%p3200_p1)  }
0x110f   :  { %2334 = vsyncmov [#allocation3 + $0xb] }
0x1112   :  { %s2335_s5 = vpop.sfrf %2334 }
0x1113   :  { %p3201_p4 = scmp.ne.s32.totalorder %s2335_s5, 0 }
0x1115   :  { %2339 = shalt.err (%p3201_p4)  }
0x1116   :  { %2341 = vsyncmov [#allocation3 + $0xc] }
0x1119   :  { %s2342_s28 = vpop.sfrf %2341 }
0x111a   :  { %p3202_p6 = scmp.ne.s32.totalorder %s2342_s28, 0 }
0x111c   :  { %2346 = shalt.err (%p3202_p6)  }
0x111d   :  { %2348 = vsyncmov [#allocation3 + $0xd] }
0x1120   :  { %s2349_s3 = vpop.sfrf %2348 }
0x1121   :  { %p3203_p8 = scmp.ne.s32.totalorder %s2349_s3, 0 }
0x1123   :  { %2353 = shalt.err (%p3203_p8)  }
0x1124   :  { %2355 = vsyncmov [#allocation3 + $0xe] }
0x1127   :  { %s2356_s19 = vpop.sfrf %2355 }
0x1128   :  { %p3204_p11 = scmp.ne.s32.totalorder %s2356_s19, 0 }
0x112a   :  { %2360 = shalt.err (%p3204_p11)  }
0x112b   :  { %2362 = vsyncmov [#allocation3 + $0xf] }
0x112e   :  { %s2363_s25 = vpop.sfrf %2362 }
0x112f   :  { %p3205_p2 = scmp.ne.s32.totalorder %s2363_s25, 0 }
0x1131   :  { %2367 = shalt.err (%p3205_p2)  }
0x1132   :  { %2369 = vsyncmov [#allocation3 + $0x10] }
0x1135   :  { %s2370_s16 = vpop.sfrf %2369 }
0x1136   :  { %p3206_p3 = scmp.ne.s32.totalorder %s2370_s16, 0 }
0x1138   :  { %2374 = shalt.err (%p3206_p3)  }
0x1139   :  { %2376 = vsyncmov [#allocation3 + $0x11] }
0x113c   :  { %s2377_s27 = vpop.sfrf %2376 }
0x113d   :  { %p3207_p9 = scmp.ne.s32.totalorder %s2377_s27, 0 }
0x113f   :  { %2381 = shalt.err (%p3207_p9)  }
0x1140   :  { %2383 = vsyncmov [#allocation3 + $0x12] }
0x1143   :  { %s2384_s0 = vpop.sfrf %2383 }
0x1144   :  { %p3208_p10 = scmp.ne.s32.totalorder %s2384_s0, 0 }
0x1146   :  { %2388 = shalt.err (%p3208_p10)  }
0x1147   :  { %2390 = vsyncmov [#allocation3 + $0x13] }
0x114a   :  { %s2391_s15 = vpop.sfrf %2390 }
0x114b   :  { %p3209_p12 = scmp.ne.s32.totalorder %s2391_s15, 0 }
0x114d   :  { %2395 = shalt.err (%p3209_p12)  }
0x114e   :  { %2397 = vsyncmov [#allocation3 + $0x14] }
0x1151   :  { %s2398_s7 = vpop.sfrf %2397 }
0x1152   :  { %p3210_p5 = scmp.ne.s32.totalorder %s2398_s7, 0 }
0x1154   :  { %2402 = shalt.err (%p3210_p5)  }
0x1155   :  { %2404 = vsyncmov [#allocation3 + $0x15] }
0x1158   :  { %s2405_s23 = vpop.sfrf %2404 }
0x1159   :  { %p3211_p7 = scmp.ne.s32.totalorder %s2405_s23, 0 }
0x115b   :  { %2409 = shalt.err (%p3211_p7)  }
0x115c   :  { %2411 = vsyncmov [#allocation3 + $0x16] }
0x115f   :  { %s2412_s21 = vpop.sfrf %2411 }
0x1160   :  { %p3212_p13 = scmp.ne.s32.totalorder %s2412_s21, 0 }
0x1162   :  { %2416 = shalt.err (%p3212_p13)  }
0x1163   :  { %2418 = vsyncmov [#allocation3 + $0x17] }
0x1166   :  { %s2419_s29 = vpop.sfrf %2418 }
0x1167   :  { %p3213_p0 = scmp.ne.s32.totalorder %s2419_s29, 0 }
0x1169   :  { %2423 = shalt.err (%p3213_p0)  }
0x116a   :  { %2425 = vsyncmov [#allocation3 + $0x18] }
0x116d   :  { %s2426_s4 = vpop.sfrf %2425 }
0x116e   :  { %p3214_p1 = scmp.ne.s32.totalorder %s2426_s4, 0 }
0x1170   :  { %2430 = shalt.err (%p3214_p1)  }
0x1171   :  { %2432 = vsyncmov [#allocation3 + $0x19] }
0x1174   :  { %s2433_s12 = vpop.sfrf %2432 }
0x1175   :  { %p3215_p4 = scmp.ne.s32.totalorder %s2433_s12, 0 }
0x1177   :  { %2437 = shalt.err (%p3215_p4)  }
0x1178   :  { %2439 = vsyncmov [#allocation3 + $0x1a] }
0x117b   :  { %s2440_s11 = vpop.sfrf %2439 }
0x117c   :  { %p3216_p6 = scmp.ne.s32.totalorder %s2440_s11, 0 }
0x117e   :  { %2444 = shalt.err (%p3216_p6)  }
0x117f   :  { %2446 = vsyncmov [#allocation3 + $0x1b] }
0x1182   :  { %s2447_s20 = vpop.sfrf %2446 }
0x1183   :  { %p3217_p8 = scmp.ne.s32.totalorder %s2447_s20, 0 }
0x1185   :  { %2451 = shalt.err (%p3217_p8)  }
0x1186   :  { %2453 = vsyncmov [#allocation3 + $0x1c] }
0x1189   :  { %s2454_s2 = vpop.sfrf %2453 }
0x118a   :  { %p3218_p11 = scmp.ne.s32.totalorder %s2454_s2, 0 }
0x118c   :  { %2458 = shalt.err (%p3218_p11)  }
0x118d   :  { %2460 = vsyncmov [#allocation3 + $0x1d] }
0x1190   :  { %s2461_s26 = vpop.sfrf %2460 }
0x1191   :  { %p3219_p2 = scmp.ne.s32.totalorder %s2461_s26, 0 }
0x1193   :  { %2465 = shalt.err (%p3219_p2)  }
0x1194   :  { %2467 = vsyncmov [#allocation3 + $0x1e] }
0x1197   :  { %s2468_s22 = vpop.sfrf %2467 }
0x1198   :  { %p3220_p3 = scmp.ne.s32.totalorder %s2468_s22, 0 }
0x119a   :  { %2472 = shalt.err (%p3220_p3)  }
0x119b   :  { %2474 = vsyncmov [#allocation3 + $0x1f] }
0x119e   :  { %s2475_s9 = vpop.sfrf %2474 }
0x119f   :  { %p3221_p9 = scmp.ne.s32.totalorder %s2475_s9, 0 }
0x11a1   :  { %2479 = shalt.err (%p3221_p9)  }

</bundles_post_ra>
